<compile_context>
chip_gen: v5e
topology: v5e:2x2
jax: 0.10.0
libtpu: 0.0.40
codegen_flags: <defaults>
</compile_context>

<pallas_src>
import jax
import jax.numpy as jnp
from jax import lax
from jax.experimental import pallas as pl
from jax.experimental.pallas import tpu as pltpu

# ----------------------------------------------------------------------------
# Deterministic stand-ins for module-level globals used in RHI_Test.py
# (num_neuron, num_S1, I_max, Simulation_time, param_*, TrickID, ...).
# ----------------------------------------------------------------------------
NUM_NEURON = 256          # num_neuron
NUM_S1 = 256              # num_S1 (== num_neuron in the forward pass)
I_MAX = 10.0              # I_max
SIMULATION_TIME = 50      # Simulation_time
PARAM_THRESHOLD = 30.0    # param_threshold
PARAM_A = 0.02            # param_a
PARAM_B = 0.2             # param_b
PARAM_C = -65.0           # param_c
PARAM_D = 8.0             # param_d
PARAM_MEM = -70.0         # param_mem (initial membrane potential)
PARAM_U = PARAM_B * PARAM_MEM  # param_u (initial recovery variable)
PARAM_DT = 0.5            # param_dt
# TODO(synk): TrickID == 1 path uses a data-dependent Python-list lookup
# (spike_num_list[int(...)]); not implemented as a Pallas kernel.
# TODO(synk): IzhNodeMU source is not in the snippet; standard BrainCog-style
# Izhikevich dynamics (Euler update, strict '>' threshold, reset-to-c,
# u += d on spike) are used — verify dt placement of the input current and the
# threshold comparison against the real IzhNodeMU before relying on exact rates.

SUBLANE = 8      # f32 sublane count per vreg
MAX_B_TILE = 32  # cap so the fully unrolled 50-step loop doesn't spill vregs


def s1net_kernel(c_ref, inp_ref, w_ref, fr_ref, frn_ref, inpn_ref):
    """One batch tile: c (Bt,1), input (Bt,N), weights (R,N), FR (R,Bt,N)."""
    R = fr_ref.shape[0]

    fr = fr_ref[...]          # (R, Bt, N)
    w = w_ref[...]            # (R, N)

    # FR_W = sum_i FR[i] * connection[i].weight  -- explicit VALU add chain
    # over the (tiny, static) population axis; avoids an XLU sublane reduce.
    fr_w = fr[0] * w[0:1, :]
    for r in range(1, R):
        fr_w = fr_w + fr[r] * w[r:r + 1, :]

    # sf = relu(tanh(FR_W))   (tanh goes to the EUP slot)
    sf = jnp.maximum(jnp.tanh(fr_w), 0.0)

    # input_n = relu(-C * (input - sf) + input) == relu(input + C*(sf - input))
    c = c_ref[...]                              # (Bt, 1), per-sample scalar C
    inp = inp_ref[...]                          # (Bt, N)
    input_n = jnp.maximum(inp + c * (sf - inp), 0.0)
    inpn_ref[...] = input_n

    # input = input_n * I_max ; input_r = round(input)
    input_r = jnp.round(input_n * I_MAX)

    # Izhikevich (IzhNodeMU) simulation for Simulation_time steps after
    # n_reset().  Constant-folded form of
    #   mem += dt*(0.04*mem^2 + 5*mem + 140 - u) + input_r
    #   u   += dt*a*(b*mem - u)
    # i.e. mem = mem*(k1*mem + (1+k2)) - dt*u + bias,  bias = input_r + dt*140
    #      u   = u*(1 - dt*a) + (dt*a*b)*mem
    k1 = PARAM_DT * 0.04
    one_p_k2 = 1.0 + PARAM_DT * 5.0
    neg_dt = -PARAM_DT
    u_decay = 1.0 - PARAM_DT * PARAM_A
    u_gain = PARAM_DT * PARAM_A * PARAM_B
    bias = input_r + PARAM_DT * 140.0           # hoisted out of the loop

    mem0 = jnp.full_like(input_r, PARAM_MEM)
    u0 = jnp.full_like(input_r, PARAM_U)
    spike0 = jnp.zeros_like(input_r)

    def step(_, carry):
        mem, u, spike = carry
        mem = mem * (k1 * mem + one_p_k2) + (neg_dt * u + bias)
        u = u * u_decay + u_gain * mem
        fired = mem > PARAM_THRESHOLD
        spike = spike + fired.astype(jnp.float32)
        mem = jnp.where(fired, PARAM_C, mem)
        u = jnp.where(fired, u + PARAM_D, u)
        return mem, u, spike

    _, _, spike = lax.fori_loop(0, SIMULATION_TIME, step, (mem0, u0, spike0),
                                unroll=True)

    # FR_n = Spike / Simulation_time
    frn_ref[...] = spike * (1.0 / float(SIMULATION_TIME))


def _num_tensorcores():
    """2 on v7x-class chips (megacore), 1 on v5e/v6e.  Best-effort detection."""
    try:
        kind = jax.devices()[0].device_kind.lower()
    except Exception:  # pragma: no cover
        return 1
    return 2 if "v7" in kind else 1


def _choose_tile(B):
    """Batch tile: one invocation when small, <=32 rows per tile, >=2 parallel
    grid points on 2-TC chips so both TensorCores get work."""
    b8 = -(-B // SUBLANE) * SUBLANE            # round batch up to sublane multiple
    if b8 <= MAX_B_TILE:
        tile = b8
        if _num_tensorcores() > 1 and b8 % (2 * SUBLANE) == 0 and b8 >= 2 * SUBLANE:
            tile = b8 // 2                      # 2 parallel points for megacore
        # TODO(synk): on v7x, if plain "parallel" doesn't shard across TCs,
        # switch dimension_semantics to pltpu.CORE_PARALLEL.
        return tile
    return MAX_B_TILE


def _pad_axis(x, axis, target):
    pad = target - x.shape[axis]
    if pad == 0:
        return x
    widths = [(0, 0)] * x.ndim
    widths[axis] = (0, pad)
    return jnp.pad(x, widths)


def s1net_forward_batched(inp, fr, weights, C):
    """B independent S1Net.forward(input, FR, C) calls fused into one kernel.

    inp:     (B, N) float32
    fr:      (R, B, N) float32 -- population-major (produce FR in this layout
                                  upstream; avoids a wrapper-side transpose)
    weights: (R, N) float32    -- stacked self.connection[i].weight (shared)
    C:       scalar or (B,) float32
    Returns (FR_n (B, N), input_n (B, N)).
    """
    inp = jnp.asarray(inp, jnp.float32)
    fr = jnp.asarray(fr, jnp.float32)
    weights = jnp.asarray(weights, jnp.float32)
    B, N = inp.shape
    R = weights.shape[0]
    assert fr.shape == (R, B, N)
    assert N % 128 == 0

    c = jnp.asarray(C, jnp.float32)
    if c.ndim == 0:
        c = jnp.full((B,), c, jnp.float32)
    c = c.reshape(B, 1)

    tile = _choose_tile(B)
    b_pad = -(-B // tile) * tile
    inp_p = _pad_axis(inp, 0, b_pad)
    fr_p = _pad_axis(fr, 1, b_pad)
    c_p = _pad_axis(c, 0, b_pad)

    frn, inpn = pl.pallas_call(
        s1net_kernel,
        out_shape=(
            jax.ShapeDtypeStruct((b_pad, N), jnp.float32),
            jax.ShapeDtypeStruct((b_pad, N), jnp.float32),
        ),
        grid=(b_pad // tile,),
        in_specs=[
            pl.BlockSpec((tile, 1), lambda b: (b, 0)),       # C (per-sample scalar)
            pl.BlockSpec((tile, N), lambda b: (b, 0)),       # input
            pl.BlockSpec((R, N), lambda b: (0, 0)),          # weights (shared)
            pl.BlockSpec((R, tile, N), lambda b: (0, b, 0)), # FR (population-major)
        ],
        out_specs=(
            pl.BlockSpec((tile, N), lambda b: (b, 0)),
            pl.BlockSpec((tile, N), lambda b: (b, 0)),
        ),
        compiler_params=pltpu.CompilerParams(
            dimension_semantics=("parallel",)),
    )(c_p, inp_p, weights, fr_p)
    return frn[:B], inpn[:B]


def s1net_forward(inp, fr, weights, C):
    """Module-faithful single-sample forward; routes through the batched kernel.

    inp:     (N,) float32           -- `input`
    fr:      (N,) or (R, N) float32 -- `FR`
    weights: (R, N) float32         -- stacked self.connection[i].weight
    C:       scalar float32
    Returns (FR_n (N,), input_n (N,)).
    """
    inp = jnp.asarray(inp, jnp.float32)
    fr = jnp.asarray(fr, jnp.float32)
    weights = jnp.asarray(weights, jnp.float32)
    if fr.ndim == 1:                       # len(FR.shape) == 1 branch
        fr = fr[None, :]
        weights = weights[:1]
    N = inp.shape[0]
    frn, inpn = s1net_forward_batched(
        inp.reshape(1, N), fr[:, None, :], weights,
        jnp.asarray(C, jnp.float32).reshape(1))
    return frn[0], inpn[0]


def s1net_reference(inp, fr, weights, C):
    """Pure-JAX reference with the original PyTorch op ordering (no folding)."""
    fr_w = jnp.einsum("rbn,rn->bn", fr, weights)
    sf = jnp.tanh(fr_w)
    sf = jnp.where(sf < 0, 0.0, sf)
    c = jnp.reshape(C, (-1, 1))
    input_n = -c * (inp - sf) + inp
    input_n = jnp.where(input_n < 0, 0.0, input_n)
    input_r = jnp.round(input_n * I_MAX)
    mem = jnp.full_like(input_r, PARAM_MEM)
    u = jnp.full_like(input_r, PARAM_U)
    spike = jnp.zeros_like(input_r)

    def step(_, carry):
        mem, u, spike = carry
        mem = mem + PARAM_DT * (mem * (0.04 * mem + 5.0) + 140.0 - u) + input_r
        u = u + PARAM_DT * PARAM_A * (PARAM_B * mem - u)
        fired = mem > PARAM_THRESHOLD
        spike = spike + fired.astype(jnp.float32)
        mem = jnp.where(fired, PARAM_C, mem)
        u = jnp.where(fired, u + PARAM_D, u)
        return mem, u, spike

    _, _, spike = lax.fori_loop(0, SIMULATION_TIME, step, (mem, u, spike))
    return spike / SIMULATION_TIME, input_n


if __name__ == "__main__":
    key = jax.random.PRNGKey(0)
    k_fr, k_w, k_in, k_c = jax.random.split(key, 4)

    B, R = 16, 2  # 16 independent forwards, 2 connection populations
    fr = jax.random.uniform(k_fr, (R, B, NUM_NEURON), jnp.float32)           # FR (pop-major)
    weights = jax.random.normal(k_w, (R, NUM_NEURON), jnp.float32) * 0.5     # conn. weights
    inp = jax.random.uniform(k_in, (B, NUM_NEURON), jnp.float32)             # input
    C = jax.random.uniform(k_c, (B,), jnp.float32)                           # per-call C

    # Batched kernel (primary path): single grid step at B=16 on 1-TC chips.
    fr_n, input_n = jax.jit(s1net_forward_batched)(inp, fr, weights, C)
    jax.block_until_ready((fr_n, input_n))
    assert fr_n.shape == (B, NUM_S1) and input_n.shape == (B, NUM_NEURON)
    assert bool(jnp.all(jnp.isfinite(fr_n))) and bool(jnp.all(jnp.isfinite(input_n)))

    # Pure-JAX reference.  input_n: tight tolerance (only the EUP tanh
    # approximation differs).  FR_n: mean-abs check, because a near-.5 round()
    # boundary can legitimately flip a single neuron's integer drive between
    # the two tanh approximations, making a strict elementwise check flaky.
    fr_n_ref, input_n_ref = jax.jit(s1net_reference)(inp, fr, weights, C)
    assert bool(jnp.allclose(input_n, input_n_ref, atol=1e-3))
    assert float(jnp.mean(jnp.abs(fr_n - fr_n_ref))) < 5e-3

    # Single-sample (module-faithful) path; must agree with row 0 of the batch.
    fr1_n, inp1_n = jax.jit(s1net_forward)(inp[0], fr[:, 0, :], weights, C[0])
    jax.block_until_ready((fr1_n, inp1_n))
    assert fr1_n.shape == (NUM_S1,) and inp1_n.shape == (NUM_NEURON,)
    assert bool(jnp.allclose(fr1_n, fr_n[0], atol=1e-5))
    assert bool(jnp.allclose(inp1_n, input_n[0], atol=1e-5))

    print("KERNEL_OK")
</pallas_src>

<mosaic_0001>
module attributes {stable_mosaic.version = 11 : i64} {
  func.func @s1net_kernel(%arg0: i32, %arg1: memref<16x1xf32, #tpu.memory_space<vmem>>, %arg2: memref<16x256xf32, #tpu.memory_space<vmem>>, %arg3: memref<2x256xf32, #tpu.memory_space<vmem>>, %arg4: memref<2x16x256xf32, #tpu.memory_space<vmem>>, %arg5: memref<16x256xf32, #tpu.memory_space<vmem>>, %arg6: memref<16x256xf32, #tpu.memory_space<vmem>>) attributes {dimension_semantics = [#tpu.dimension_semantics<parallel>], iteration_bounds = array<i64: 1>, scalar_prefetch = 0 : i64, scratch_operands = 0 : i64, tpu.core_type = #tpu.core_type<tc>, window_params = [{transform_indices = @transform_0, window_bounds = array<i64: 16, 1>}, {transform_indices = @transform_1, window_bounds = array<i64: 16, 256>}, {pipeline_mode = #tpu.pipeline_mode<synchronous>, transform_indices = @transform_2, window_bounds = array<i64: 2, 256>}, {transform_indices = @transform_3, window_bounds = array<i64: 2, 16, 256>}, {transform_indices = @transform_4, window_bounds = array<i64: 16, 256>}, {transform_indices = @transform_5, window_bounds = array<i64: 16, 256>}]} {
    %c0 = arith.constant 0 : index
    %c0_0 = arith.constant 0 : index
    %c0_1 = arith.constant 0 : index
    %0 = vector.load %arg4[%c0, %c0_0, %c0_1] : memref<2x16x256xf32, #tpu.memory_space<vmem>>, vector<2x16x256xf32>
    %c0_2 = arith.constant 0 : index
    %c0_3 = arith.constant 0 : index
    %1 = vector.load %arg3[%c0_2, %c0_3] : memref<2x256xf32, #tpu.memory_space<vmem>>, vector<2x256xf32>
    %2 = vector.extract_strided_slice %0 {offsets = [0, 0, 0], sizes = [1, 16, 256], strides = [1, 1, 1]} : vector<2x16x256xf32> to vector<1x16x256xf32>
    %3 = vector.shape_cast %2 : vector<1x16x256xf32> to vector<16x256xf32>
    %4 = vector.extract_strided_slice %1 {offsets = [0, 0], sizes = [1, 256], strides = [1, 1]} : vector<2x256xf32> to vector<1x256xf32>
    %5 = vector.broadcast %4 : vector<1x256xf32> to vector<16x256xf32>
    %6 = arith.mulf %3, %5 : vector<16x256xf32>
    %7 = vector.extract_strided_slice %0 {offsets = [1, 0, 0], sizes = [1, 16, 256], strides = [1, 1, 1]} : vector<2x16x256xf32> to vector<1x16x256xf32>
    %8 = vector.shape_cast %7 : vector<1x16x256xf32> to vector<16x256xf32>
    %9 = vector.extract_strided_slice %1 {offsets = [1, 0], sizes = [1, 256], strides = [1, 1]} : vector<2x256xf32> to vector<1x256xf32>
    %10 = vector.broadcast %9 : vector<1x256xf32> to vector<16x256xf32>
    %11 = arith.mulf %8, %10 : vector<16x256xf32>
    %12 = arith.addf %6, %11 : vector<16x256xf32>
    %13 = math.tanh %12 : vector<16x256xf32>
    %cst = arith.constant 0.000000e+00 : f32
    %14 = vector.broadcast %cst : f32 to vector<16x256xf32>
    %15 = arith.maximumf %13, %14 : vector<16x256xf32>
    %c0_4 = arith.constant 0 : index
    %c0_5 = arith.constant 0 : index
    %16 = vector.load %arg1[%c0_4, %c0_5] : memref<16x1xf32, #tpu.memory_space<vmem>>, vector<16x1xf32>
    %c0_6 = arith.constant 0 : index
    %c0_7 = arith.constant 0 : index
    %17 = vector.load %arg2[%c0_6, %c0_7] : memref<16x256xf32, #tpu.memory_space<vmem>>, vector<16x256xf32>
    %18 = arith.subf %15, %17 : vector<16x256xf32>
    %19 = vector.broadcast %16 : vector<16x1xf32> to vector<16x256xf32>
    %20 = arith.mulf %19, %18 : vector<16x256xf32>
    %21 = arith.addf %17, %20 : vector<16x256xf32>
    %cst_8 = arith.constant 0.000000e+00 : f32
    %22 = vector.broadcast %cst_8 : f32 to vector<16x256xf32>
    %23 = arith.maximumf %21, %22 : vector<16x256xf32>
    %c0_9 = arith.constant 0 : index
    %c0_10 = arith.constant 0 : index
    %24 = vector.load %arg6[%c0_9, %c0_10] : memref<16x256xf32, #tpu.memory_space<vmem>>, vector<16x256xf32>
    tpu.vector_store %arg6[%c0_9, %c0_10], %23 {strides = array<i32>} : memref<16x256xf32, #tpu.memory_space<vmem>>, vector<16x256xf32>,
    %cst_11 = arith.constant 1.000000e+01 : f32
    %25 = vector.broadcast %cst_11 : f32 to vector<16x256xf32>
    %26 = arith.mulf %23, %25 : vector<16x256xf32>
    %27 = math.roundeven %26 : vector<16x256xf32>
    %cst_12 = arith.constant 7.000000e+01 : f32
    %28 = vector.broadcast %cst_12 : f32 to vector<16x256xf32>
    %29 = arith.addf %27, %28 : vector<16x256xf32>
    %cst_13 = arith.constant -7.000000e+01 : f32
    %30 = vector.broadcast %cst_13 : f32 to vector<16x256xf32>
    %cst_14 = arith.constant -1.400000e+01 : f32
    %31 = vector.broadcast %cst_14 : f32 to vector<16x256xf32>
    %cst_15 = arith.constant 0.000000e+00 : f32
    %32 = vector.broadcast %cst_15 : f32 to vector<16x256xf32>
    %c0_i32 = arith.constant 0 : i32
    %cst_16 = arith.constant 2.000000e-02 : f32
    %33 = vector.broadcast %cst_16 : f32 to vector<16x256xf32>
    %34 = arith.mulf %33, %30 : vector<16x256xf32>
    %cst_17 = arith.constant 3.500000e+00 : f32
    %35 = vector.broadcast %cst_17 : f32 to vector<16x256xf32>
    %36 = arith.addf %34, %35 : vector<16x256xf32>
    %37 = arith.mulf %30, %36 : vector<16x256xf32>
    %cst_18 = arith.constant -5.000000e-01 : f32
    %38 = vector.broadcast %cst_18 : f32 to vector<16x256xf32>
    %39 = arith.mulf %38, %31 : vector<16x256xf32>
    %40 = arith.addf %39, %29 : vector<16x256xf32>
    %41 = arith.addf %37, %40 : vector<16x256xf32>
    %cst_19 = arith.constant 9.900000e-01 : f32
    %42 = vector.broadcast %cst_19 : f32 to vector<16x256xf32>
    %43 = arith.mulf %31, %42 : vector<16x256xf32>
    %cst_20 = arith.constant 2.000000e-03 : f32
    %44 = vector.broadcast %cst_20 : f32 to vector<16x256xf32>
    %45 = arith.mulf %44, %41 : vector<16x256xf32>
    %46 = arith.addf %43, %45 : vector<16x256xf32>
    %cst_21 = arith.constant 3.000000e+01 : f32
    %47 = vector.broadcast %cst_21 : f32 to vector<16x256xf32>
    %48 = arith.cmpf ogt, %41, %47 : vector<16x256xf32>
    %49 = arith.extui %48 : vector<16x256xi1> to vector<16x256xi32>
    %50 = arith.sitofp %49 : vector<16x256xi32> to vector<16x256xf32>
    %51 = arith.addf %32, %50 : vector<16x256xf32>
    %cst_22 = arith.constant -6.500000e+01 : f32
    %52 = vector.broadcast %cst_22 : f32 to vector<16x256xf32>
    %53 = arith.select %48, %52, %41 : vector<16x256xi1>, vector<16x256xf32>
    %cst_23 = arith.constant 8.000000e+00 : f32
    %54 = vector.broadcast %cst_23 : f32 to vector<16x256xf32>
    %55 = arith.addf %46, %54 : vector<16x256xf32>
    %56 = arith.select %48, %55, %46 : vector<16x256xi1>, vector<16x256xf32>
    %c1_i32 = arith.constant 1 : i32
    %cst_24 = arith.constant 2.000000e-02 : f32
    %57 = vector.broadcast %cst_24 : f32 to vector<16x256xf32>
    %58 = arith.mulf %57, %53 : vector<16x256xf32>
    %cst_25 = arith.constant 3.500000e+00 : f32
    %59 = vector.broadcast %cst_25 : f32 to vector<16x256xf32>
    %60 = arith.addf %58, %59 : vector<16x256xf32>
    %61 = arith.mulf %53, %60 : vector<16x256xf32>
    %cst_26 = arith.constant -5.000000e-01 : f32
    %62 = vector.broadcast %cst_26 : f32 to vector<16x256xf32>
    %63 = arith.mulf %62, %56 : vector<16x256xf32>
    %64 = arith.addf %63, %29 : vector<16x256xf32>
    %65 = arith.addf %61, %64 : vector<16x256xf32>
    %cst_27 = arith.constant 9.900000e-01 : f32
    %66 = vector.broadcast %cst_27 : f32 to vector<16x256xf32>
    %67 = arith.mulf %56, %66 : vector<16x256xf32>
    %cst_28 = arith.constant 2.000000e-03 : f32
    %68 = vector.broadcast %cst_28 : f32 to vector<16x256xf32>
    %69 = arith.mulf %68, %65 : vector<16x256xf32>
    %70 = arith.addf %67, %69 : vector<16x256xf32>
    %cst_29 = arith.constant 3.000000e+01 : f32
    %71 = vector.broadcast %cst_29 : f32 to vector<16x256xf32>
    %72 = arith.cmpf ogt, %65, %71 : vector<16x256xf32>
    %73 = arith.extui %72 : vector<16x256xi1> to vector<16x256xi32>
    %74 = arith.sitofp %73 : vector<16x256xi32> to vector<16x256xf32>
    %75 = arith.addf %51, %74 : vector<16x256xf32>
    %cst_30 = arith.constant -6.500000e+01 : f32
    %76 = vector.broadcast %cst_30 : f32 to vector<16x256xf32>
    %77 = arith.select %72, %76, %65 : vector<16x256xi1>, vector<16x256xf32>
    %cst_31 = arith.constant 8.000000e+00 : f32
    %78 = vector.broadcast %cst_31 : f32 to vector<16x256xf32>
    %79 = arith.addf %70, %78 : vector<16x256xf32>
    %80 = arith.select %72, %79, %70 : vector<16x256xi1>, vector<16x256xf32>
    %c2_i32 = arith.constant 2 : i32
    %cst_32 = arith.constant 2.000000e-02 : f32
    %81 = vector.broadcast %cst_32 : f32 to vector<16x256xf32>
    %82 = arith.mulf %81, %77 : vector<16x256xf32>
    %cst_33 = arith.constant 3.500000e+00 : f32
    %83 = vector.broadcast %cst_33 : f32 to vector<16x256xf32>
    %84 = arith.addf %82, %83 : vector<16x256xf32>
    %85 = arith.mulf %77, %84 : vector<16x256xf32>
    %cst_34 = arith.constant -5.000000e-01 : f32
    %86 = vector.broadcast %cst_34 : f32 to vector<16x256xf32>
    %87 = arith.mulf %86, %80 : vector<16x256xf32>
    %88 = arith.addf %87, %29 : vector<16x256xf32>
    %89 = arith.addf %85, %88 : vector<16x256xf32>
    %cst_35 = arith.constant 9.900000e-01 : f32
    %90 = vector.broadcast %cst_35 : f32 to vector<16x256xf32>
    %91 = arith.mulf %80, %90 : vector<16x256xf32>
    %cst_36 = arith.constant 2.000000e-03 : f32
    %92 = vector.broadcast %cst_36 : f32 to vector<16x256xf32>
    %93 = arith.mulf %92, %89 : vector<16x256xf32>
    %94 = arith.addf %91, %93 : vector<16x256xf32>
    %cst_37 = arith.constant 3.000000e+01 : f32
    %95 = vector.broadcast %cst_37 : f32 to vector<16x256xf32>
    %96 = arith.cmpf ogt, %89, %95 : vector<16x256xf32>
    %97 = arith.extui %96 : vector<16x256xi1> to vector<16x256xi32>
    %98 = arith.sitofp %97 : vector<16x256xi32> to vector<16x256xf32>
    %99 = arith.addf %75, %98 : vector<16x256xf32>
    %cst_38 = arith.constant -6.500000e+01 : f32
    %100 = vector.broadcast %cst_38 : f32 to vector<16x256xf32>
    %101 = arith.select %96, %100, %89 : vector<16x256xi1>, vector<16x256xf32>
    %cst_39 = arith.constant 8.000000e+00 : f32
    %102 = vector.broadcast %cst_39 : f32 to vector<16x256xf32>
    %103 = arith.addf %94, %102 : vector<16x256xf32>
    %104 = arith.select %96, %103, %94 : vector<16x256xi1>, vector<16x256xf32>
    %c3_i32 = arith.constant 3 : i32
    %cst_40 = arith.constant 2.000000e-02 : f32
    %105 = vector.broadcast %cst_40 : f32 to vector<16x256xf32>
    %106 = arith.mulf %105, %101 : vector<16x256xf32>
    %cst_41 = arith.constant 3.500000e+00 : f32
    %107 = vector.broadcast %cst_41 : f32 to vector<16x256xf32>
    %108 = arith.addf %106, %107 : vector<16x256xf32>
    %109 = arith.mulf %101, %108 : vector<16x256xf32>
    %cst_42 = arith.constant -5.000000e-01 : f32
    %110 = vector.broadcast %cst_42 : f32 to vector<16x256xf32>
    %111 = arith.mulf %110, %104 : vector<16x256xf32>
    %112 = arith.addf %111, %29 : vector<16x256xf32>
    %113 = arith.addf %109, %112 : vector<16x256xf32>
    %cst_43 = arith.constant 9.900000e-01 : f32
    %114 = vector.broadcast %cst_43 : f32 to vector<16x256xf32>
    %115 = arith.mulf %104, %114 : vector<16x256xf32>
    %cst_44 = arith.constant 2.000000e-03 : f32
    %116 = vector.broadcast %cst_44 : f32 to vector<16x256xf32>
    %117 = arith.mulf %116, %113 : vector<16x256xf32>
    %118 = arith.addf %115, %117 : vector<16x256xf32>
    %cst_45 = arith.constant 3.000000e+01 : f32
    %119 = vector.broadcast %cst_45 : f32 to vector<16x256xf32>
    %120 = arith.cmpf ogt, %113, %119 : vector<16x256xf32>
    %121 = arith.extui %120 : vector<16x256xi1> to vector<16x256xi32>
    %122 = arith.sitofp %121 : vector<16x256xi32> to vector<16x256xf32>
    %123 = arith.addf %99, %122 : vector<16x256xf32>
    %cst_46 = arith.constant -6.500000e+01 : f32
    %124 = vector.broadcast %cst_46 : f32 to vector<16x256xf32>
    %125 = arith.select %120, %124, %113 : vector<16x256xi1>, vector<16x256xf32>
    %cst_47 = arith.constant 8.000000e+00 : f32
    %126 = vector.broadcast %cst_47 : f32 to vector<16x256xf32>
    %127 = arith.addf %118, %126 : vector<16x256xf32>
    %128 = arith.select %120, %127, %118 : vector<16x256xi1>, vector<16x256xf32>
    %c4_i32 = arith.constant 4 : i32
    %cst_48 = arith.constant 2.000000e-02 : f32
    %129 = vector.broadcast %cst_48 : f32 to vector<16x256xf32>
    %130 = arith.mulf %129, %125 : vector<16x256xf32>
    %cst_49 = arith.constant 3.500000e+00 : f32
    %131 = vector.broadcast %cst_49 : f32 to vector<16x256xf32>
    %132 = arith.addf %130, %131 : vector<16x256xf32>
    %133 = arith.mulf %125, %132 : vector<16x256xf32>
    %cst_50 = arith.constant -5.000000e-01 : f32
    %134 = vector.broadcast %cst_50 : f32 to vector<16x256xf32>
    %135 = arith.mulf %134, %128 : vector<16x256xf32>
    %136 = arith.addf %135, %29 : vector<16x256xf32>
    %137 = arith.addf %133, %136 : vector<16x256xf32>
    %cst_51 = arith.constant 9.900000e-01 : f32
    %138 = vector.broadcast %cst_51 : f32 to vector<16x256xf32>
    %139 = arith.mulf %128, %138 : vector<16x256xf32>
    %cst_52 = arith.constant 2.000000e-03 : f32
    %140 = vector.broadcast %cst_52 : f32 to vector<16x256xf32>
    %141 = arith.mulf %140, %137 : vector<16x256xf32>
    %142 = arith.addf %139, %141 : vector<16x256xf32>
    %cst_53 = arith.constant 3.000000e+01 : f32
    %143 = vector.broadcast %cst_53 : f32 to vector<16x256xf32>
    %144 = arith.cmpf ogt, %137, %143 : vector<16x256xf32>
    %145 = arith.extui %144 : vector<16x256xi1> to vector<16x256xi32>
    %146 = arith.sitofp %145 : vector<16x256xi32> to vector<16x256xf32>
    %147 = arith.addf %123, %146 : vector<16x256xf32>
    %cst_54 = arith.constant -6.500000e+01 : f32
    %148 = vector.broadcast %cst_54 : f32 to vector<16x256xf32>
    %149 = arith.select %144, %148, %137 : vector<16x256xi1>, vector<16x256xf32>
    %cst_55 = arith.constant 8.000000e+00 : f32
    %150 = vector.broadcast %cst_55 : f32 to vector<16x256xf32>
    %151 = arith.addf %142, %150 : vector<16x256xf32>
    %152 = arith.select %144, %151, %142 : vector<16x256xi1>, vector<16x256xf32>
    %c5_i32 = arith.constant 5 : i32
    %cst_56 = arith.constant 2.000000e-02 : f32
    %153 = vector.broadcast %cst_56 : f32 to vector<16x256xf32>
    %154 = arith.mulf %153, %149 : vector<16x256xf32>
    %cst_57 = arith.constant 3.500000e+00 : f32
    %155 = vector.broadcast %cst_57 : f32 to vector<16x256xf32>
    %156 = arith.addf %154, %155 : vector<16x256xf32>
    %157 = arith.mulf %149, %156 : vector<16x256xf32>
    %cst_58 = arith.constant -5.000000e-01 : f32
    %158 = vector.broadcast %cst_58 : f32 to vector<16x256xf32>
    %159 = arith.mulf %158, %152 : vector<16x256xf32>
    %160 = arith.addf %159, %29 : vector<16x256xf32>
    %161 = arith.addf %157, %160 : vector<16x256xf32>
    %cst_59 = arith.constant 9.900000e-01 : f32
    %162 = vector.broadcast %cst_59 : f32 to vector<16x256xf32>
    %163 = arith.mulf %152, %162 : vector<16x256xf32>
    %cst_60 = arith.constant 2.000000e-03 : f32
    %164 = vector.broadcast %cst_60 : f32 to vector<16x256xf32>
    %165 = arith.mulf %164, %161 : vector<16x256xf32>
    %166 = arith.addf %163, %165 : vector<16x256xf32>
    %cst_61 = arith.constant 3.000000e+01 : f32
    %167 = vector.broadcast %cst_61 : f32 to vector<16x256xf32>
    %168 = arith.cmpf ogt, %161, %167 : vector<16x256xf32>
    %169 = arith.extui %168 : vector<16x256xi1> to vector<16x256xi32>
    %170 = arith.sitofp %169 : vector<16x256xi32> to vector<16x256xf32>
    %171 = arith.addf %147, %170 : vector<16x256xf32>
    %cst_62 = arith.constant -6.500000e+01 : f32
    %172 = vector.broadcast %cst_62 : f32 to vector<16x256xf32>
    %173 = arith.select %168, %172, %161 : vector<16x256xi1>, vector<16x256xf32>
    %cst_63 = arith.constant 8.000000e+00 : f32
    %174 = vector.broadcast %cst_63 : f32 to vector<16x256xf32>
    %175 = arith.addf %166, %174 : vector<16x256xf32>
    %176 = arith.select %168, %175, %166 : vector<16x256xi1>, vector<16x256xf32>
    %c6_i32 = arith.constant 6 : i32
    %cst_64 = arith.constant 2.000000e-02 : f32
    %177 = vector.broadcast %cst_64 : f32 to vector<16x256xf32>
    %178 = arith.mulf %177, %173 : vector<16x256xf32>
    %cst_65 = arith.constant 3.500000e+00 : f32
    %179 = vector.broadcast %cst_65 : f32 to vector<16x256xf32>
    %180 = arith.addf %178, %179 : vector<16x256xf32>
    %181 = arith.mulf %173, %180 : vector<16x256xf32>
    %cst_66 = arith.constant -5.000000e-01 : f32
    %182 = vector.broadcast %cst_66 : f32 to vector<16x256xf32>
    %183 = arith.mulf %182, %176 : vector<16x256xf32>
    %184 = arith.addf %183, %29 : vector<16x256xf32>
    %185 = arith.addf %181, %184 : vector<16x256xf32>
    %cst_67 = arith.constant 9.900000e-01 : f32
    %186 = vector.broadcast %cst_67 : f32 to vector<16x256xf32>
    %187 = arith.mulf %176, %186 : vector<16x256xf32>
    %cst_68 = arith.constant 2.000000e-03 : f32
    %188 = vector.broadcast %cst_68 : f32 to vector<16x256xf32>
    %189 = arith.mulf %188, %185 : vector<16x256xf32>
    %190 = arith.addf %187, %189 : vector<16x256xf32>
    %cst_69 = arith.constant 3.000000e+01 : f32
    %191 = vector.broadcast %cst_69 : f32 to vector<16x256xf32>
    %192 = arith.cmpf ogt, %185, %191 : vector<16x256xf32>
    %193 = arith.extui %192 : vector<16x256xi1> to vector<16x256xi32>
    %194 = arith.sitofp %193 : vector<16x256xi32> to vector<16x256xf32>
    %195 = arith.addf %171, %194 : vector<16x256xf32>
    %cst_70 = arith.constant -6.500000e+01 : f32
    %196 = vector.broadcast %cst_70 : f32 to vector<16x256xf32>
    %197 = arith.select %192, %196, %185 : vector<16x256xi1>, vector<16x256xf32>
    %cst_71 = arith.constant 8.000000e+00 : f32
    %198 = vector.broadcast %cst_71 : f32 to vector<16x256xf32>
    %199 = arith.addf %190, %198 : vector<16x256xf32>
    %200 = arith.select %192, %199, %190 : vector<16x256xi1>, vector<16x256xf32>
    %c7_i32 = arith.constant 7 : i32
    %cst_72 = arith.constant 2.000000e-02 : f32
    %201 = vector.broadcast %cst_72 : f32 to vector<16x256xf32>
    %202 = arith.mulf %201, %197 : vector<16x256xf32>
    %cst_73 = arith.constant 3.500000e+00 : f32
    %203 = vector.broadcast %cst_73 : f32 to vector<16x256xf32>
    %204 = arith.addf %202, %203 : vector<16x256xf32>
    %205 = arith.mulf %197, %204 : vector<16x256xf32>
    %cst_74 = arith.constant -5.000000e-01 : f32
    %206 = vector.broadcast %cst_74 : f32 to vector<16x256xf32>
    %207 = arith.mulf %206, %200 : vector<16x256xf32>
    %208 = arith.addf %207, %29 : vector<16x256xf32>
    %209 = arith.addf %205, %208 : vector<16x256xf32>
    %cst_75 = arith.constant 9.900000e-01 : f32
    %210 = vector.broadcast %cst_75 : f32 to vector<16x256xf32>
    %211 = arith.mulf %200, %210 : vector<16x256xf32>
    %cst_76 = arith.constant 2.000000e-03 : f32
    %212 = vector.broadcast %cst_76 : f32 to vector<16x256xf32>
    %213 = arith.mulf %212, %209 : vector<16x256xf32>
    %214 = arith.addf %211, %213 : vector<16x256xf32>
    %cst_77 = arith.constant 3.000000e+01 : f32
    %215 = vector.broadcast %cst_77 : f32 to vector<16x256xf32>
    %216 = arith.cmpf ogt, %209, %215 : vector<16x256xf32>
    %217 = arith.extui %216 : vector<16x256xi1> to vector<16x256xi32>
    %218 = arith.sitofp %217 : vector<16x256xi32> to vector<16x256xf32>
    %219 = arith.addf %195, %218 : vector<16x256xf32>
    %cst_78 = arith.constant -6.500000e+01 : f32
    %220 = vector.broadcast %cst_78 : f32 to vector<16x256xf32>
    %221 = arith.select %216, %220, %209 : vector<16x256xi1>, vector<16x256xf32>
    %cst_79 = arith.constant 8.000000e+00 : f32
    %222 = vector.broadcast %cst_79 : f32 to vector<16x256xf32>
    %223 = arith.addf %214, %222 : vector<16x256xf32>
    %224 = arith.select %216, %223, %214 : vector<16x256xi1>, vector<16x256xf32>
    %c8_i32 = arith.constant 8 : i32
    %cst_80 = arith.constant 2.000000e-02 : f32
    %225 = vector.broadcast %cst_80 : f32 to vector<16x256xf32>
    %226 = arith.mulf %225, %221 : vector<16x256xf32>
    %cst_81 = arith.constant 3.500000e+00 : f32
    %227 = vector.broadcast %cst_81 : f32 to vector<16x256xf32>
    %228 = arith.addf %226, %227 : vector<16x256xf32>
    %229 = arith.mulf %221, %228 : vector<16x256xf32>
    %cst_82 = arith.constant -5.000000e-01 : f32
    %230 = vector.broadcast %cst_82 : f32 to vector<16x256xf32>
    %231 = arith.mulf %230, %224 : vector<16x256xf32>
    %232 = arith.addf %231, %29 : vector<16x256xf32>
    %233 = arith.addf %229, %232 : vector<16x256xf32>
    %cst_83 = arith.constant 9.900000e-01 : f32
    %234 = vector.broadcast %cst_83 : f32 to vector<16x256xf32>
    %235 = arith.mulf %224, %234 : vector<16x256xf32>
    %cst_84 = arith.constant 2.000000e-03 : f32
    %236 = vector.broadcast %cst_84 : f32 to vector<16x256xf32>
    %237 = arith.mulf %236, %233 : vector<16x256xf32>
    %238 = arith.addf %235, %237 : vector<16x256xf32>
    %cst_85 = arith.constant 3.000000e+01 : f32
    %239 = vector.broadcast %cst_85 : f32 to vector<16x256xf32>
    %240 = arith.cmpf ogt, %233, %239 : vector<16x256xf32>
    %241 = arith.extui %240 : vector<16x256xi1> to vector<16x256xi32>
    %242 = arith.sitofp %241 : vector<16x256xi32> to vector<16x256xf32>
    %243 = arith.addf %219, %242 : vector<16x256xf32>
    %cst_86 = arith.constant -6.500000e+01 : f32
    %244 = vector.broadcast %cst_86 : f32 to vector<16x256xf32>
    %245 = arith.select %240, %244, %233 : vector<16x256xi1>, vector<16x256xf32>
    %cst_87 = arith.constant 8.000000e+00 : f32
    %246 = vector.broadcast %cst_87 : f32 to vector<16x256xf32>
    %247 = arith.addf %238, %246 : vector<16x256xf32>
    %248 = arith.select %240, %247, %238 : vector<16x256xi1>, vector<16x256xf32>
    %c9_i32 = arith.constant 9 : i32
    %cst_88 = arith.constant 2.000000e-02 : f32
    %249 = vector.broadcast %cst_88 : f32 to vector<16x256xf32>
    %250 = arith.mulf %249, %245 : vector<16x256xf32>
    %cst_89 = arith.constant 3.500000e+00 : f32
    %251 = vector.broadcast %cst_89 : f32 to vector<16x256xf32>
    %252 = arith.addf %250, %251 : vector<16x256xf32>
    %253 = arith.mulf %245, %252 : vector<16x256xf32>
    %cst_90 = arith.constant -5.000000e-01 : f32
    %254 = vector.broadcast %cst_90 : f32 to vector<16x256xf32>
    %255 = arith.mulf %254, %248 : vector<16x256xf32>
    %256 = arith.addf %255, %29 : vector<16x256xf32>
    %257 = arith.addf %253, %256 : vector<16x256xf32>
    %cst_91 = arith.constant 9.900000e-01 : f32
    %258 = vector.broadcast %cst_91 : f32 to vector<16x256xf32>
    %259 = arith.mulf %248, %258 : vector<16x256xf32>
    %cst_92 = arith.constant 2.000000e-03 : f32
    %260 = vector.broadcast %cst_92 : f32 to vector<16x256xf32>
    %261 = arith.mulf %260, %257 : vector<16x256xf32>
    %262 = arith.addf %259, %261 : vector<16x256xf32>
    %cst_93 = arith.constant 3.000000e+01 : f32
    %263 = vector.broadcast %cst_93 : f32 to vector<16x256xf32>
    %264 = arith.cmpf ogt, %257, %263 : vector<16x256xf32>
    %265 = arith.extui %264 : vector<16x256xi1> to vector<16x256xi32>
    %266 = arith.sitofp %265 : vector<16x256xi32> to vector<16x256xf32>
    %267 = arith.addf %243, %266 : vector<16x256xf32>
    %cst_94 = arith.constant -6.500000e+01 : f32
    %268 = vector.broadcast %cst_94 : f32 to vector<16x256xf32>
    %269 = arith.select %264, %268, %257 : vector<16x256xi1>, vector<16x256xf32>
    %cst_95 = arith.constant 8.000000e+00 : f32
    %270 = vector.broadcast %cst_95 : f32 to vector<16x256xf32>
    %271 = arith.addf %262, %270 : vector<16x256xf32>
    %272 = arith.select %264, %271, %262 : vector<16x256xi1>, vector<16x256xf32>
    %c10_i32 = arith.constant 10 : i32
    %cst_96 = arith.constant 2.000000e-02 : f32
    %273 = vector.broadcast %cst_96 : f32 to vector<16x256xf32>
    %274 = arith.mulf %273, %269 : vector<16x256xf32>
    %cst_97 = arith.constant 3.500000e+00 : f32
    %275 = vector.broadcast %cst_97 : f32 to vector<16x256xf32>
    %276 = arith.addf %274, %275 : vector<16x256xf32>
    %277 = arith.mulf %269, %276 : vector<16x256xf32>
    %cst_98 = arith.constant -5.000000e-01 : f32
    %278 = vector.broadcast %cst_98 : f32 to vector<16x256xf32>
    %279 = arith.mulf %278, %272 : vector<16x256xf32>
    %280 = arith.addf %279, %29 : vector<16x256xf32>
    %281 = arith.addf %277, %280 : vector<16x256xf32>
    %cst_99 = arith.constant 9.900000e-01 : f32
    %282 = vector.broadcast %cst_99 : f32 to vector<16x256xf32>
    %283 = arith.mulf %272, %282 : vector<16x256xf32>
    %cst_100 = arith.constant 2.000000e-03 : f32
    %284 = vector.broadcast %cst_100 : f32 to vector<16x256xf32>
    %285 = arith.mulf %284, %281 : vector<16x256xf32>
    %286 = arith.addf %283, %285 : vector<16x256xf32>
    %cst_101 = arith.constant 3.000000e+01 : f32
    %287 = vector.broadcast %cst_101 : f32 to vector<16x256xf32>
    %288 = arith.cmpf ogt, %281, %287 : vector<16x256xf32>
    %289 = arith.extui %288 : vector<16x256xi1> to vector<16x256xi32>
    %290 = arith.sitofp %289 : vector<16x256xi32> to vector<16x256xf32>
    %291 = arith.addf %267, %290 : vector<16x256xf32>
    %cst_102 = arith.constant -6.500000e+01 : f32
    %292 = vector.broadcast %cst_102 : f32 to vector<16x256xf32>
    %293 = arith.select %288, %292, %281 : vector<16x256xi1>, vector<16x256xf32>
    %cst_103 = arith.constant 8.000000e+00 : f32
    %294 = vector.broadcast %cst_103 : f32 to vector<16x256xf32>
    %295 = arith.addf %286, %294 : vector<16x256xf32>
    %296 = arith.select %288, %295, %286 : vector<16x256xi1>, vector<16x256xf32>
    %c11_i32 = arith.constant 11 : i32
    %cst_104 = arith.constant 2.000000e-02 : f32
    %297 = vector.broadcast %cst_104 : f32 to vector<16x256xf32>
    %298 = arith.mulf %297, %293 : vector<16x256xf32>
    %cst_105 = arith.constant 3.500000e+00 : f32
    %299 = vector.broadcast %cst_105 : f32 to vector<16x256xf32>
    %300 = arith.addf %298, %299 : vector<16x256xf32>
    %301 = arith.mulf %293, %300 : vector<16x256xf32>
    %cst_106 = arith.constant -5.000000e-01 : f32
    %302 = vector.broadcast %cst_106 : f32 to vector<16x256xf32>
    %303 = arith.mulf %302, %296 : vector<16x256xf32>
    %304 = arith.addf %303, %29 : vector<16x256xf32>
    %305 = arith.addf %301, %304 : vector<16x256xf32>
    %cst_107 = arith.constant 9.900000e-01 : f32
    %306 = vector.broadcast %cst_107 : f32 to vector<16x256xf32>
    %307 = arith.mulf %296, %306 : vector<16x256xf32>
    %cst_108 = arith.constant 2.000000e-03 : f32
    %308 = vector.broadcast %cst_108 : f32 to vector<16x256xf32>
    %309 = arith.mulf %308, %305 : vector<16x256xf32>
    %310 = arith.addf %307, %309 : vector<16x256xf32>
    %cst_109 = arith.constant 3.000000e+01 : f32
    %311 = vector.broadcast %cst_109 : f32 to vector<16x256xf32>
    %312 = arith.cmpf ogt, %305, %311 : vector<16x256xf32>
    %313 = arith.extui %312 : vector<16x256xi1> to vector<16x256xi32>
    %314 = arith.sitofp %313 : vector<16x256xi32> to vector<16x256xf32>
    %315 = arith.addf %291, %314 : vector<16x256xf32>
    %cst_110 = arith.constant -6.500000e+01 : f32
    %316 = vector.broadcast %cst_110 : f32 to vector<16x256xf32>
    %317 = arith.select %312, %316, %305 : vector<16x256xi1>, vector<16x256xf32>
    %cst_111 = arith.constant 8.000000e+00 : f32
    %318 = vector.broadcast %cst_111 : f32 to vector<16x256xf32>
    %319 = arith.addf %310, %318 : vector<16x256xf32>
    %320 = arith.select %312, %319, %310 : vector<16x256xi1>, vector<16x256xf32>
    %c12_i32 = arith.constant 12 : i32
    %cst_112 = arith.constant 2.000000e-02 : f32
    %321 = vector.broadcast %cst_112 : f32 to vector<16x256xf32>
    %322 = arith.mulf %321, %317 : vector<16x256xf32>
    %cst_113 = arith.constant 3.500000e+00 : f32
    %323 = vector.broadcast %cst_113 : f32 to vector<16x256xf32>
    %324 = arith.addf %322, %323 : vector<16x256xf32>
    %325 = arith.mulf %317, %324 : vector<16x256xf32>
    %cst_114 = arith.constant -5.000000e-01 : f32
    %326 = vector.broadcast %cst_114 : f32 to vector<16x256xf32>
    %327 = arith.mulf %326, %320 : vector<16x256xf32>
    %328 = arith.addf %327, %29 : vector<16x256xf32>
    %329 = arith.addf %325, %328 : vector<16x256xf32>
    %cst_115 = arith.constant 9.900000e-01 : f32
    %330 = vector.broadcast %cst_115 : f32 to vector<16x256xf32>
    %331 = arith.mulf %320, %330 : vector<16x256xf32>
    %cst_116 = arith.constant 2.000000e-03 : f32
    %332 = vector.broadcast %cst_116 : f32 to vector<16x256xf32>
    %333 = arith.mulf %332, %329 : vector<16x256xf32>
    %334 = arith.addf %331, %333 : vector<16x256xf32>
    %cst_117 = arith.constant 3.000000e+01 : f32
    %335 = vector.broadcast %cst_117 : f32 to vector<16x256xf32>
    %336 = arith.cmpf ogt, %329, %335 : vector<16x256xf32>
    %337 = arith.extui %336 : vector<16x256xi1> to vector<16x256xi32>
    %338 = arith.sitofp %337 : vector<16x256xi32> to vector<16x256xf32>
    %339 = arith.addf %315, %338 : vector<16x256xf32>
    %cst_118 = arith.constant -6.500000e+01 : f32
    %340 = vector.broadcast %cst_118 : f32 to vector<16x256xf32>
    %341 = arith.select %336, %340, %329 : vector<16x256xi1>, vector<16x256xf32>
    %cst_119 = arith.constant 8.000000e+00 : f32
    %342 = vector.broadcast %cst_119 : f32 to vector<16x256xf32>
    %343 = arith.addf %334, %342 : vector<16x256xf32>
    %344 = arith.select %336, %343, %334 : vector<16x256xi1>, vector<16x256xf32>
    %c13_i32 = arith.constant 13 : i32
    %cst_120 = arith.constant 2.000000e-02 : f32
    %345 = vector.broadcast %cst_120 : f32 to vector<16x256xf32>
    %346 = arith.mulf %345, %341 : vector<16x256xf32>
    %cst_121 = arith.constant 3.500000e+00 : f32
    %347 = vector.broadcast %cst_121 : f32 to vector<16x256xf32>
    %348 = arith.addf %346, %347 : vector<16x256xf32>
    %349 = arith.mulf %341, %348 : vector<16x256xf32>
    %cst_122 = arith.constant -5.000000e-01 : f32
    %350 = vector.broadcast %cst_122 : f32 to vector<16x256xf32>
    %351 = arith.mulf %350, %344 : vector<16x256xf32>
    %352 = arith.addf %351, %29 : vector<16x256xf32>
    %353 = arith.addf %349, %352 : vector<16x256xf32>
    %cst_123 = arith.constant 9.900000e-01 : f32
    %354 = vector.broadcast %cst_123 : f32 to vector<16x256xf32>
    %355 = arith.mulf %344, %354 : vector<16x256xf32>
    %cst_124 = arith.constant 2.000000e-03 : f32
    %356 = vector.broadcast %cst_124 : f32 to vector<16x256xf32>
    %357 = arith.mulf %356, %353 : vector<16x256xf32>
    %358 = arith.addf %355, %357 : vector<16x256xf32>
    %cst_125 = arith.constant 3.000000e+01 : f32
    %359 = vector.broadcast %cst_125 : f32 to vector<16x256xf32>
    %360 = arith.cmpf ogt, %353, %359 : vector<16x256xf32>
    %361 = arith.extui %360 : vector<16x256xi1> to vector<16x256xi32>
    %362 = arith.sitofp %361 : vector<16x256xi32> to vector<16x256xf32>
    %363 = arith.addf %339, %362 : vector<16x256xf32>
    %cst_126 = arith.constant -6.500000e+01 : f32
    %364 = vector.broadcast %cst_126 : f32 to vector<16x256xf32>
    %365 = arith.select %360, %364, %353 : vector<16x256xi1>, vector<16x256xf32>
    %cst_127 = arith.constant 8.000000e+00 : f32
    %366 = vector.broadcast %cst_127 : f32 to vector<16x256xf32>
    %367 = arith.addf %358, %366 : vector<16x256xf32>
    %368 = arith.select %360, %367, %358 : vector<16x256xi1>, vector<16x256xf32>
    %c14_i32 = arith.constant 14 : i32
    %cst_128 = arith.constant 2.000000e-02 : f32
    %369 = vector.broadcast %cst_128 : f32 to vector<16x256xf32>
    %370 = arith.mulf %369, %365 : vector<16x256xf32>
    %cst_129 = arith.constant 3.500000e+00 : f32
    %371 = vector.broadcast %cst_129 : f32 to vector<16x256xf32>
    %372 = arith.addf %370, %371 : vector<16x256xf32>
    %373 = arith.mulf %365, %372 : vector<16x256xf32>
    %cst_130 = arith.constant -5.000000e-01 : f32
    %374 = vector.broadcast %cst_130 : f32 to vector<16x256xf32>
    %375 = arith.mulf %374, %368 : vector<16x256xf32>
    %376 = arith.addf %375, %29 : vector<16x256xf32>
    %377 = arith.addf %373, %376 : vector<16x256xf32>
    %cst_131 = arith.constant 9.900000e-01 : f32
    %378 = vector.broadcast %cst_131 : f32 to vector<16x256xf32>
    %379 = arith.mulf %368, %378 : vector<16x256xf32>
    %cst_132 = arith.constant 2.000000e-03 : f32
    %380 = vector.broadcast %cst_132 : f32 to vector<16x256xf32>
    %381 = arith.mulf %380, %377 : vector<16x256xf32>
    %382 = arith.addf %379, %381 : vector<16x256xf32>
    %cst_133 = arith.constant 3.000000e+01 : f32
    %383 = vector.broadcast %cst_133 : f32 to vector<16x256xf32>
    %384 = arith.cmpf ogt, %377, %383 : vector<16x256xf32>
    %385 = arith.extui %384 : vector<16x256xi1> to vector<16x256xi32>
    %386 = arith.sitofp %385 : vector<16x256xi32> to vector<16x256xf32>
    %387 = arith.addf %363, %386 : vector<16x256xf32>
    %cst_134 = arith.constant -6.500000e+01 : f32
    %388 = vector.broadcast %cst_134 : f32 to vector<16x256xf32>
    %389 = arith.select %384, %388, %377 : vector<16x256xi1>, vector<16x256xf32>
    %cst_135 = arith.constant 8.000000e+00 : f32
    %390 = vector.broadcast %cst_135 : f32 to vector<16x256xf32>
    %391 = arith.addf %382, %390 : vector<16x256xf32>
    %392 = arith.select %384, %391, %382 : vector<16x256xi1>, vector<16x256xf32>
    %c15_i32 = arith.constant 15 : i32
    %cst_136 = arith.constant 2.000000e-02 : f32
    %393 = vector.broadcast %cst_136 : f32 to vector<16x256xf32>
    %394 = arith.mulf %393, %389 : vector<16x256xf32>
    %cst_137 = arith.constant 3.500000e+00 : f32
    %395 = vector.broadcast %cst_137 : f32 to vector<16x256xf32>
    %396 = arith.addf %394, %395 : vector<16x256xf32>
    %397 = arith.mulf %389, %396 : vector<16x256xf32>
    %cst_138 = arith.constant -5.000000e-01 : f32
    %398 = vector.broadcast %cst_138 : f32 to vector<16x256xf32>
    %399 = arith.mulf %398, %392 : vector<16x256xf32>
    %400 = arith.addf %399, %29 : vector<16x256xf32>
    %401 = arith.addf %397, %400 : vector<16x256xf32>
    %cst_139 = arith.constant 9.900000e-01 : f32
    %402 = vector.broadcast %cst_139 : f32 to vector<16x256xf32>
    %403 = arith.mulf %392, %402 : vector<16x256xf32>
    %cst_140 = arith.constant 2.000000e-03 : f32
    %404 = vector.broadcast %cst_140 : f32 to vector<16x256xf32>
    %405 = arith.mulf %404, %401 : vector<16x256xf32>
    %406 = arith.addf %403, %405 : vector<16x256xf32>
    %cst_141 = arith.constant 3.000000e+01 : f32
    %407 = vector.broadcast %cst_141 : f32 to vector<16x256xf32>
    %408 = arith.cmpf ogt, %401, %407 : vector<16x256xf32>
    %409 = arith.extui %408 : vector<16x256xi1> to vector<16x256xi32>
    %410 = arith.sitofp %409 : vector<16x256xi32> to vector<16x256xf32>
    %411 = arith.addf %387, %410 : vector<16x256xf32>
    %cst_142 = arith.constant -6.500000e+01 : f32
    %412 = vector.broadcast %cst_142 : f32 to vector<16x256xf32>
    %413 = arith.select %408, %412, %401 : vector<16x256xi1>, vector<16x256xf32>
    %cst_143 = arith.constant 8.000000e+00 : f32
    %414 = vector.broadcast %cst_143 : f32 to vector<16x256xf32>
    %415 = arith.addf %406, %414 : vector<16x256xf32>
    %416 = arith.select %408, %415, %406 : vector<16x256xi1>, vector<16x256xf32>
    %c16_i32 = arith.constant 16 : i32
    %cst_144 = arith.constant 2.000000e-02 : f32
    %417 = vector.broadcast %cst_144 : f32 to vector<16x256xf32>
    %418 = arith.mulf %417, %413 : vector<16x256xf32>
    %cst_145 = arith.constant 3.500000e+00 : f32
    %419 = vector.broadcast %cst_145 : f32 to vector<16x256xf32>
    %420 = arith.addf %418, %419 : vector<16x256xf32>
    %421 = arith.mulf %413, %420 : vector<16x256xf32>
    %cst_146 = arith.constant -5.000000e-01 : f32
    %422 = vector.broadcast %cst_146 : f32 to vector<16x256xf32>
    %423 = arith.mulf %422, %416 : vector<16x256xf32>
    %424 = arith.addf %423, %29 : vector<16x256xf32>
    %425 = arith.addf %421, %424 : vector<16x256xf32>
    %cst_147 = arith.constant 9.900000e-01 : f32
    %426 = vector.broadcast %cst_147 : f32 to vector<16x256xf32>
    %427 = arith.mulf %416, %426 : vector<16x256xf32>
    %cst_148 = arith.constant 2.000000e-03 : f32
    %428 = vector.broadcast %cst_148 : f32 to vector<16x256xf32>
    %429 = arith.mulf %428, %425 : vector<16x256xf32>
    %430 = arith.addf %427, %429 : vector<16x256xf32>
    %cst_149 = arith.constant 3.000000e+01 : f32
    %431 = vector.broadcast %cst_149 : f32 to vector<16x256xf32>
    %432 = arith.cmpf ogt, %425, %431 : vector<16x256xf32>
    %433 = arith.extui %432 : vector<16x256xi1> to vector<16x256xi32>
    %434 = arith.sitofp %433 : vector<16x256xi32> to vector<16x256xf32>
    %435 = arith.addf %411, %434 : vector<16x256xf32>
    %cst_150 = arith.constant -6.500000e+01 : f32
    %436 = vector.broadcast %cst_150 : f32 to vector<16x256xf32>
    %437 = arith.select %432, %436, %425 : vector<16x256xi1>, vector<16x256xf32>
    %cst_151 = arith.constant 8.000000e+00 : f32
    %438 = vector.broadcast %cst_151 : f32 to vector<16x256xf32>
    %439 = arith.addf %430, %438 : vector<16x256xf32>
    %440 = arith.select %432, %439, %430 : vector<16x256xi1>, vector<16x256xf32>
    %c17_i32 = arith.constant 17 : i32
    %cst_152 = arith.constant 2.000000e-02 : f32
    %441 = vector.broadcast %cst_152 : f32 to vector<16x256xf32>
    %442 = arith.mulf %441, %437 : vector<16x256xf32>
    %cst_153 = arith.constant 3.500000e+00 : f32
    %443 = vector.broadcast %cst_153 : f32 to vector<16x256xf32>
    %444 = arith.addf %442, %443 : vector<16x256xf32>
    %445 = arith.mulf %437, %444 : vector<16x256xf32>
    %cst_154 = arith.constant -5.000000e-01 : f32
    %446 = vector.broadcast %cst_154 : f32 to vector<16x256xf32>
    %447 = arith.mulf %446, %440 : vector<16x256xf32>
    %448 = arith.addf %447, %29 : vector<16x256xf32>
    %449 = arith.addf %445, %448 : vector<16x256xf32>
    %cst_155 = arith.constant 9.900000e-01 : f32
    %450 = vector.broadcast %cst_155 : f32 to vector<16x256xf32>
    %451 = arith.mulf %440, %450 : vector<16x256xf32>
    %cst_156 = arith.constant 2.000000e-03 : f32
    %452 = vector.broadcast %cst_156 : f32 to vector<16x256xf32>
    %453 = arith.mulf %452, %449 : vector<16x256xf32>
    %454 = arith.addf %451, %453 : vector<16x256xf32>
    %cst_157 = arith.constant 3.000000e+01 : f32
    %455 = vector.broadcast %cst_157 : f32 to vector<16x256xf32>
    %456 = arith.cmpf ogt, %449, %455 : vector<16x256xf32>
    %457 = arith.extui %456 : vector<16x256xi1> to vector<16x256xi32>
    %458 = arith.sitofp %457 : vector<16x256xi32> to vector<16x256xf32>
    %459 = arith.addf %435, %458 : vector<16x256xf32>
    %cst_158 = arith.constant -6.500000e+01 : f32
    %460 = vector.broadcast %cst_158 : f32 to vector<16x256xf32>
    %461 = arith.select %456, %460, %449 : vector<16x256xi1>, vector<16x256xf32>
    %cst_159 = arith.constant 8.000000e+00 : f32
    %462 = vector.broadcast %cst_159 : f32 to vector<16x256xf32>
    %463 = arith.addf %454, %462 : vector<16x256xf32>
    %464 = arith.select %456, %463, %454 : vector<16x256xi1>, vector<16x256xf32>
    %c18_i32 = arith.constant 18 : i32
    %cst_160 = arith.constant 2.000000e-02 : f32
    %465 = vector.broadcast %cst_160 : f32 to vector<16x256xf32>
    %466 = arith.mulf %465, %461 : vector<16x256xf32>
    %cst_161 = arith.constant 3.500000e+00 : f32
    %467 = vector.broadcast %cst_161 : f32 to vector<16x256xf32>
    %468 = arith.addf %466, %467 : vector<16x256xf32>
    %469 = arith.mulf %461, %468 : vector<16x256xf32>
    %cst_162 = arith.constant -5.000000e-01 : f32
    %470 = vector.broadcast %cst_162 : f32 to vector<16x256xf32>
    %471 = arith.mulf %470, %464 : vector<16x256xf32>
    %472 = arith.addf %471, %29 : vector<16x256xf32>
    %473 = arith.addf %469, %472 : vector<16x256xf32>
    %cst_163 = arith.constant 9.900000e-01 : f32
    %474 = vector.broadcast %cst_163 : f32 to vector<16x256xf32>
    %475 = arith.mulf %464, %474 : vector<16x256xf32>
    %cst_164 = arith.constant 2.000000e-03 : f32
    %476 = vector.broadcast %cst_164 : f32 to vector<16x256xf32>
    %477 = arith.mulf %476, %473 : vector<16x256xf32>
    %478 = arith.addf %475, %477 : vector<16x256xf32>
    %cst_165 = arith.constant 3.000000e+01 : f32
    %479 = vector.broadcast %cst_165 : f32 to vector<16x256xf32>
    %480 = arith.cmpf ogt, %473, %479 : vector<16x256xf32>
    %481 = arith.extui %480 : vector<16x256xi1> to vector<16x256xi32>
    %482 = arith.sitofp %481 : vector<16x256xi32> to vector<16x256xf32>
    %483 = arith.addf %459, %482 : vector<16x256xf32>
    %cst_166 = arith.constant -6.500000e+01 : f32
    %484 = vector.broadcast %cst_166 : f32 to vector<16x256xf32>
    %485 = arith.select %480, %484, %473 : vector<16x256xi1>, vector<16x256xf32>
    %cst_167 = arith.constant 8.000000e+00 : f32
    %486 = vector.broadcast %cst_167 : f32 to vector<16x256xf32>
    %487 = arith.addf %478, %486 : vector<16x256xf32>
    %488 = arith.select %480, %487, %478 : vector<16x256xi1>, vector<16x256xf32>
    %c19_i32 = arith.constant 19 : i32
    %cst_168 = arith.constant 2.000000e-02 : f32
    %489 = vector.broadcast %cst_168 : f32 to vector<16x256xf32>
    %490 = arith.mulf %489, %485 : vector<16x256xf32>
    %cst_169 = arith.constant 3.500000e+00 : f32
    %491 = vector.broadcast %cst_169 : f32 to vector<16x256xf32>
    %492 = arith.addf %490, %491 : vector<16x256xf32>
    %493 = arith.mulf %485, %492 : vector<16x256xf32>
    %cst_170 = arith.constant -5.000000e-01 : f32
    %494 = vector.broadcast %cst_170 : f32 to vector<16x256xf32>
    %495 = arith.mulf %494, %488 : vector<16x256xf32>
    %496 = arith.addf %495, %29 : vector<16x256xf32>
    %497 = arith.addf %493, %496 : vector<16x256xf32>
    %cst_171 = arith.constant 9.900000e-01 : f32
    %498 = vector.broadcast %cst_171 : f32 to vector<16x256xf32>
    %499 = arith.mulf %488, %498 : vector<16x256xf32>
    %cst_172 = arith.constant 2.000000e-03 : f32
    %500 = vector.broadcast %cst_172 : f32 to vector<16x256xf32>
    %501 = arith.mulf %500, %497 : vector<16x256xf32>
    %502 = arith.addf %499, %501 : vector<16x256xf32>
    %cst_173 = arith.constant 3.000000e+01 : f32
    %503 = vector.broadcast %cst_173 : f32 to vector<16x256xf32>
    %504 = arith.cmpf ogt, %497, %503 : vector<16x256xf32>
    %505 = arith.extui %504 : vector<16x256xi1> to vector<16x256xi32>
    %506 = arith.sitofp %505 : vector<16x256xi32> to vector<16x256xf32>
    %507 = arith.addf %483, %506 : vector<16x256xf32>
    %cst_174 = arith.constant -6.500000e+01 : f32
    %508 = vector.broadcast %cst_174 : f32 to vector<16x256xf32>
    %509 = arith.select %504, %508, %497 : vector<16x256xi1>, vector<16x256xf32>
    %cst_175 = arith.constant 8.000000e+00 : f32
    %510 = vector.broadcast %cst_175 : f32 to vector<16x256xf32>
    %511 = arith.addf %502, %510 : vector<16x256xf32>
    %512 = arith.select %504, %511, %502 : vector<16x256xi1>, vector<16x256xf32>
    %c20_i32 = arith.constant 20 : i32
    %cst_176 = arith.constant 2.000000e-02 : f32
    %513 = vector.broadcast %cst_176 : f32 to vector<16x256xf32>
    %514 = arith.mulf %513, %509 : vector<16x256xf32>
    %cst_177 = arith.constant 3.500000e+00 : f32
    %515 = vector.broadcast %cst_177 : f32 to vector<16x256xf32>
    %516 = arith.addf %514, %515 : vector<16x256xf32>
    %517 = arith.mulf %509, %516 : vector<16x256xf32>
    %cst_178 = arith.constant -5.000000e-01 : f32
    %518 = vector.broadcast %cst_178 : f32 to vector<16x256xf32>
    %519 = arith.mulf %518, %512 : vector<16x256xf32>
    %520 = arith.addf %519, %29 : vector<16x256xf32>
    %521 = arith.addf %517, %520 : vector<16x256xf32>
    %cst_179 = arith.constant 9.900000e-01 : f32
    %522 = vector.broadcast %cst_179 : f32 to vector<16x256xf32>
    %523 = arith.mulf %512, %522 : vector<16x256xf32>
    %cst_180 = arith.constant 2.000000e-03 : f32
    %524 = vector.broadcast %cst_180 : f32 to vector<16x256xf32>
    %525 = arith.mulf %524, %521 : vector<16x256xf32>
    %526 = arith.addf %523, %525 : vector<16x256xf32>
    %cst_181 = arith.constant 3.000000e+01 : f32
    %527 = vector.broadcast %cst_181 : f32 to vector<16x256xf32>
    %528 = arith.cmpf ogt, %521, %527 : vector<16x256xf32>
    %529 = arith.extui %528 : vector<16x256xi1> to vector<16x256xi32>
    %530 = arith.sitofp %529 : vector<16x256xi32> to vector<16x256xf32>
    %531 = arith.addf %507, %530 : vector<16x256xf32>
    %cst_182 = arith.constant -6.500000e+01 : f32
    %532 = vector.broadcast %cst_182 : f32 to vector<16x256xf32>
    %533 = arith.select %528, %532, %521 : vector<16x256xi1>, vector<16x256xf32>
    %cst_183 = arith.constant 8.000000e+00 : f32
    %534 = vector.broadcast %cst_183 : f32 to vector<16x256xf32>
    %535 = arith.addf %526, %534 : vector<16x256xf32>
    %536 = arith.select %528, %535, %526 : vector<16x256xi1>, vector<16x256xf32>
    %c21_i32 = arith.constant 21 : i32
    %cst_184 = arith.constant 2.000000e-02 : f32
    %537 = vector.broadcast %cst_184 : f32 to vector<16x256xf32>
    %538 = arith.mulf %537, %533 : vector<16x256xf32>
    %cst_185 = arith.constant 3.500000e+00 : f32
    %539 = vector.broadcast %cst_185 : f32 to vector<16x256xf32>
    %540 = arith.addf %538, %539 : vector<16x256xf32>
    %541 = arith.mulf %533, %540 : vector<16x256xf32>
    %cst_186 = arith.constant -5.000000e-01 : f32
    %542 = vector.broadcast %cst_186 : f32 to vector<16x256xf32>
    %543 = arith.mulf %542, %536 : vector<16x256xf32>
    %544 = arith.addf %543, %29 : vector<16x256xf32>
    %545 = arith.addf %541, %544 : vector<16x256xf32>
    %cst_187 = arith.constant 9.900000e-01 : f32
    %546 = vector.broadcast %cst_187 : f32 to vector<16x256xf32>
    %547 = arith.mulf %536, %546 : vector<16x256xf32>
    %cst_188 = arith.constant 2.000000e-03 : f32
    %548 = vector.broadcast %cst_188 : f32 to vector<16x256xf32>
    %549 = arith.mulf %548, %545 : vector<16x256xf32>
    %550 = arith.addf %547, %549 : vector<16x256xf32>
    %cst_189 = arith.constant 3.000000e+01 : f32
    %551 = vector.broadcast %cst_189 : f32 to vector<16x256xf32>
    %552 = arith.cmpf ogt, %545, %551 : vector<16x256xf32>
    %553 = arith.extui %552 : vector<16x256xi1> to vector<16x256xi32>
    %554 = arith.sitofp %553 : vector<16x256xi32> to vector<16x256xf32>
    %555 = arith.addf %531, %554 : vector<16x256xf32>
    %cst_190 = arith.constant -6.500000e+01 : f32
    %556 = vector.broadcast %cst_190 : f32 to vector<16x256xf32>
    %557 = arith.select %552, %556, %545 : vector<16x256xi1>, vector<16x256xf32>
    %cst_191 = arith.constant 8.000000e+00 : f32
    %558 = vector.broadcast %cst_191 : f32 to vector<16x256xf32>
    %559 = arith.addf %550, %558 : vector<16x256xf32>
    %560 = arith.select %552, %559, %550 : vector<16x256xi1>, vector<16x256xf32>
    %c22_i32 = arith.constant 22 : i32
    %cst_192 = arith.constant 2.000000e-02 : f32
    %561 = vector.broadcast %cst_192 : f32 to vector<16x256xf32>
    %562 = arith.mulf %561, %557 : vector<16x256xf32>
    %cst_193 = arith.constant 3.500000e+00 : f32
    %563 = vector.broadcast %cst_193 : f32 to vector<16x256xf32>
    %564 = arith.addf %562, %563 : vector<16x256xf32>
    %565 = arith.mulf %557, %564 : vector<16x256xf32>
    %cst_194 = arith.constant -5.000000e-01 : f32
    %566 = vector.broadcast %cst_194 : f32 to vector<16x256xf32>
    %567 = arith.mulf %566, %560 : vector<16x256xf32>
    %568 = arith.addf %567, %29 : vector<16x256xf32>
    %569 = arith.addf %565, %568 : vector<16x256xf32>
    %cst_195 = arith.constant 9.900000e-01 : f32
    %570 = vector.broadcast %cst_195 : f32 to vector<16x256xf32>
    %571 = arith.mulf %560, %570 : vector<16x256xf32>
    %cst_196 = arith.constant 2.000000e-03 : f32
    %572 = vector.broadcast %cst_196 : f32 to vector<16x256xf32>
    %573 = arith.mulf %572, %569 : vector<16x256xf32>
    %574 = arith.addf %571, %573 : vector<16x256xf32>
    %cst_197 = arith.constant 3.000000e+01 : f32
    %575 = vector.broadcast %cst_197 : f32 to vector<16x256xf32>
    %576 = arith.cmpf ogt, %569, %575 : vector<16x256xf32>
    %577 = arith.extui %576 : vector<16x256xi1> to vector<16x256xi32>
    %578 = arith.sitofp %577 : vector<16x256xi32> to vector<16x256xf32>
    %579 = arith.addf %555, %578 : vector<16x256xf32>
    %cst_198 = arith.constant -6.500000e+01 : f32
    %580 = vector.broadcast %cst_198 : f32 to vector<16x256xf32>
    %581 = arith.select %576, %580, %569 : vector<16x256xi1>, vector<16x256xf32>
    %cst_199 = arith.constant 8.000000e+00 : f32
    %582 = vector.broadcast %cst_199 : f32 to vector<16x256xf32>
    %583 = arith.addf %574, %582 : vector<16x256xf32>
    %584 = arith.select %576, %583, %574 : vector<16x256xi1>, vector<16x256xf32>
    %c23_i32 = arith.constant 23 : i32
    %cst_200 = arith.constant 2.000000e-02 : f32
    %585 = vector.broadcast %cst_200 : f32 to vector<16x256xf32>
    %586 = arith.mulf %585, %581 : vector<16x256xf32>
    %cst_201 = arith.constant 3.500000e+00 : f32
    %587 = vector.broadcast %cst_201 : f32 to vector<16x256xf32>
    %588 = arith.addf %586, %587 : vector<16x256xf32>
    %589 = arith.mulf %581, %588 : vector<16x256xf32>
    %cst_202 = arith.constant -5.000000e-01 : f32
    %590 = vector.broadcast %cst_202 : f32 to vector<16x256xf32>
    %591 = arith.mulf %590, %584 : vector<16x256xf32>
    %592 = arith.addf %591, %29 : vector<16x256xf32>
    %593 = arith.addf %589, %592 : vector<16x256xf32>
    %cst_203 = arith.constant 9.900000e-01 : f32
    %594 = vector.broadcast %cst_203 : f32 to vector<16x256xf32>
    %595 = arith.mulf %584, %594 : vector<16x256xf32>
    %cst_204 = arith.constant 2.000000e-03 : f32
    %596 = vector.broadcast %cst_204 : f32 to vector<16x256xf32>
    %597 = arith.mulf %596, %593 : vector<16x256xf32>
    %598 = arith.addf %595, %597 : vector<16x256xf32>
    %cst_205 = arith.constant 3.000000e+01 : f32
    %599 = vector.broadcast %cst_205 : f32 to vector<16x256xf32>
    %600 = arith.cmpf ogt, %593, %599 : vector<16x256xf32>
    %601 = arith.extui %600 : vector<16x256xi1> to vector<16x256xi32>
    %602 = arith.sitofp %601 : vector<16x256xi32> to vector<16x256xf32>
    %603 = arith.addf %579, %602 : vector<16x256xf32>
    %cst_206 = arith.constant -6.500000e+01 : f32
    %604 = vector.broadcast %cst_206 : f32 to vector<16x256xf32>
    %605 = arith.select %600, %604, %593 : vector<16x256xi1>, vector<16x256xf32>
    %cst_207 = arith.constant 8.000000e+00 : f32
    %606 = vector.broadcast %cst_207 : f32 to vector<16x256xf32>
    %607 = arith.addf %598, %606 : vector<16x256xf32>
    %608 = arith.select %600, %607, %598 : vector<16x256xi1>, vector<16x256xf32>
    %c24_i32 = arith.constant 24 : i32
    %cst_208 = arith.constant 2.000000e-02 : f32
    %609 = vector.broadcast %cst_208 : f32 to vector<16x256xf32>
    %610 = arith.mulf %609, %605 : vector<16x256xf32>
    %cst_209 = arith.constant 3.500000e+00 : f32
    %611 = vector.broadcast %cst_209 : f32 to vector<16x256xf32>
    %612 = arith.addf %610, %611 : vector<16x256xf32>
    %613 = arith.mulf %605, %612 : vector<16x256xf32>
    %cst_210 = arith.constant -5.000000e-01 : f32
    %614 = vector.broadcast %cst_210 : f32 to vector<16x256xf32>
    %615 = arith.mulf %614, %608 : vector<16x256xf32>
    %616 = arith.addf %615, %29 : vector<16x256xf32>
    %617 = arith.addf %613, %616 : vector<16x256xf32>
    %cst_211 = arith.constant 9.900000e-01 : f32
    %618 = vector.broadcast %cst_211 : f32 to vector<16x256xf32>
    %619 = arith.mulf %608, %618 : vector<16x256xf32>
    %cst_212 = arith.constant 2.000000e-03 : f32
    %620 = vector.broadcast %cst_212 : f32 to vector<16x256xf32>
    %621 = arith.mulf %620, %617 : vector<16x256xf32>
    %622 = arith.addf %619, %621 : vector<16x256xf32>
    %cst_213 = arith.constant 3.000000e+01 : f32
    %623 = vector.broadcast %cst_213 : f32 to vector<16x256xf32>
    %624 = arith.cmpf ogt, %617, %623 : vector<16x256xf32>
    %625 = arith.extui %624 : vector<16x256xi1> to vector<16x256xi32>
    %626 = arith.sitofp %625 : vector<16x256xi32> to vector<16x256xf32>
    %627 = arith.addf %603, %626 : vector<16x256xf32>
    %cst_214 = arith.constant -6.500000e+01 : f32
    %628 = vector.broadcast %cst_214 : f32 to vector<16x256xf32>
    %629 = arith.select %624, %628, %617 : vector<16x256xi1>, vector<16x256xf32>
    %cst_215 = arith.constant 8.000000e+00 : f32
    %630 = vector.broadcast %cst_215 : f32 to vector<16x256xf32>
    %631 = arith.addf %622, %630 : vector<16x256xf32>
    %632 = arith.select %624, %631, %622 : vector<16x256xi1>, vector<16x256xf32>
    %c25_i32 = arith.constant 25 : i32
    %cst_216 = arith.constant 2.000000e-02 : f32
    %633 = vector.broadcast %cst_216 : f32 to vector<16x256xf32>
    %634 = arith.mulf %633, %629 : vector<16x256xf32>
    %cst_217 = arith.constant 3.500000e+00 : f32
    %635 = vector.broadcast %cst_217 : f32 to vector<16x256xf32>
    %636 = arith.addf %634, %635 : vector<16x256xf32>
    %637 = arith.mulf %629, %636 : vector<16x256xf32>
    %cst_218 = arith.constant -5.000000e-01 : f32
    %638 = vector.broadcast %cst_218 : f32 to vector<16x256xf32>
    %639 = arith.mulf %638, %632 : vector<16x256xf32>
    %640 = arith.addf %639, %29 : vector<16x256xf32>
    %641 = arith.addf %637, %640 : vector<16x256xf32>
    %cst_219 = arith.constant 9.900000e-01 : f32
    %642 = vector.broadcast %cst_219 : f32 to vector<16x256xf32>
    %643 = arith.mulf %632, %642 : vector<16x256xf32>
    %cst_220 = arith.constant 2.000000e-03 : f32
    %644 = vector.broadcast %cst_220 : f32 to vector<16x256xf32>
    %645 = arith.mulf %644, %641 : vector<16x256xf32>
    %646 = arith.addf %643, %645 : vector<16x256xf32>
    %cst_221 = arith.constant 3.000000e+01 : f32
    %647 = vector.broadcast %cst_221 : f32 to vector<16x256xf32>
    %648 = arith.cmpf ogt, %641, %647 : vector<16x256xf32>
    %649 = arith.extui %648 : vector<16x256xi1> to vector<16x256xi32>
    %650 = arith.sitofp %649 : vector<16x256xi32> to vector<16x256xf32>
    %651 = arith.addf %627, %650 : vector<16x256xf32>
    %cst_222 = arith.constant -6.500000e+01 : f32
    %652 = vector.broadcast %cst_222 : f32 to vector<16x256xf32>
    %653 = arith.select %648, %652, %641 : vector<16x256xi1>, vector<16x256xf32>
    %cst_223 = arith.constant 8.000000e+00 : f32
    %654 = vector.broadcast %cst_223 : f32 to vector<16x256xf32>
    %655 = arith.addf %646, %654 : vector<16x256xf32>
    %656 = arith.select %648, %655, %646 : vector<16x256xi1>, vector<16x256xf32>
    %c26_i32 = arith.constant 26 : i32
    %cst_224 = arith.constant 2.000000e-02 : f32
    %657 = vector.broadcast %cst_224 : f32 to vector<16x256xf32>
    %658 = arith.mulf %657, %653 : vector<16x256xf32>
    %cst_225 = arith.constant 3.500000e+00 : f32
    %659 = vector.broadcast %cst_225 : f32 to vector<16x256xf32>
    %660 = arith.addf %658, %659 : vector<16x256xf32>
    %661 = arith.mulf %653, %660 : vector<16x256xf32>
    %cst_226 = arith.constant -5.000000e-01 : f32
    %662 = vector.broadcast %cst_226 : f32 to vector<16x256xf32>
    %663 = arith.mulf %662, %656 : vector<16x256xf32>
    %664 = arith.addf %663, %29 : vector<16x256xf32>
    %665 = arith.addf %661, %664 : vector<16x256xf32>
    %cst_227 = arith.constant 9.900000e-01 : f32
    %666 = vector.broadcast %cst_227 : f32 to vector<16x256xf32>
    %667 = arith.mulf %656, %666 : vector<16x256xf32>
    %cst_228 = arith.constant 2.000000e-03 : f32
    %668 = vector.broadcast %cst_228 : f32 to vector<16x256xf32>
    %669 = arith.mulf %668, %665 : vector<16x256xf32>
    %670 = arith.addf %667, %669 : vector<16x256xf32>
    %cst_229 = arith.constant 3.000000e+01 : f32
    %671 = vector.broadcast %cst_229 : f32 to vector<16x256xf32>
    %672 = arith.cmpf ogt, %665, %671 : vector<16x256xf32>
    %673 = arith.extui %672 : vector<16x256xi1> to vector<16x256xi32>
    %674 = arith.sitofp %673 : vector<16x256xi32> to vector<16x256xf32>
    %675 = arith.addf %651, %674 : vector<16x256xf32>
    %cst_230 = arith.constant -6.500000e+01 : f32
    %676 = vector.broadcast %cst_230 : f32 to vector<16x256xf32>
    %677 = arith.select %672, %676, %665 : vector<16x256xi1>, vector<16x256xf32>
    %cst_231 = arith.constant 8.000000e+00 : f32
    %678 = vector.broadcast %cst_231 : f32 to vector<16x256xf32>
    %679 = arith.addf %670, %678 : vector<16x256xf32>
    %680 = arith.select %672, %679, %670 : vector<16x256xi1>, vector<16x256xf32>
    %c27_i32 = arith.constant 27 : i32
    %cst_232 = arith.constant 2.000000e-02 : f32
    %681 = vector.broadcast %cst_232 : f32 to vector<16x256xf32>
    %682 = arith.mulf %681, %677 : vector<16x256xf32>
    %cst_233 = arith.constant 3.500000e+00 : f32
    %683 = vector.broadcast %cst_233 : f32 to vector<16x256xf32>
    %684 = arith.addf %682, %683 : vector<16x256xf32>
    %685 = arith.mulf %677, %684 : vector<16x256xf32>
    %cst_234 = arith.constant -5.000000e-01 : f32
    %686 = vector.broadcast %cst_234 : f32 to vector<16x256xf32>
    %687 = arith.mulf %686, %680 : vector<16x256xf32>
    %688 = arith.addf %687, %29 : vector<16x256xf32>
    %689 = arith.addf %685, %688 : vector<16x256xf32>
    %cst_235 = arith.constant 9.900000e-01 : f32
    %690 = vector.broadcast %cst_235 : f32 to vector<16x256xf32>
    %691 = arith.mulf %680, %690 : vector<16x256xf32>
    %cst_236 = arith.constant 2.000000e-03 : f32
    %692 = vector.broadcast %cst_236 : f32 to vector<16x256xf32>
    %693 = arith.mulf %692, %689 : vector<16x256xf32>
    %694 = arith.addf %691, %693 : vector<16x256xf32>
    %cst_237 = arith.constant 3.000000e+01 : f32
    %695 = vector.broadcast %cst_237 : f32 to vector<16x256xf32>
    %696 = arith.cmpf ogt, %689, %695 : vector<16x256xf32>
    %697 = arith.extui %696 : vector<16x256xi1> to vector<16x256xi32>
    %698 = arith.sitofp %697 : vector<16x256xi32> to vector<16x256xf32>
    %699 = arith.addf %675, %698 : vector<16x256xf32>
    %cst_238 = arith.constant -6.500000e+01 : f32
    %700 = vector.broadcast %cst_238 : f32 to vector<16x256xf32>
    %701 = arith.select %696, %700, %689 : vector<16x256xi1>, vector<16x256xf32>
    %cst_239 = arith.constant 8.000000e+00 : f32
    %702 = vector.broadcast %cst_239 : f32 to vector<16x256xf32>
    %703 = arith.addf %694, %702 : vector<16x256xf32>
    %704 = arith.select %696, %703, %694 : vector<16x256xi1>, vector<16x256xf32>
    %c28_i32 = arith.constant 28 : i32
    %cst_240 = arith.constant 2.000000e-02 : f32
    %705 = vector.broadcast %cst_240 : f32 to vector<16x256xf32>
    %706 = arith.mulf %705, %701 : vector<16x256xf32>
    %cst_241 = arith.constant 3.500000e+00 : f32
    %707 = vector.broadcast %cst_241 : f32 to vector<16x256xf32>
    %708 = arith.addf %706, %707 : vector<16x256xf32>
    %709 = arith.mulf %701, %708 : vector<16x256xf32>
    %cst_242 = arith.constant -5.000000e-01 : f32
    %710 = vector.broadcast %cst_242 : f32 to vector<16x256xf32>
    %711 = arith.mulf %710, %704 : vector<16x256xf32>
    %712 = arith.addf %711, %29 : vector<16x256xf32>
    %713 = arith.addf %709, %712 : vector<16x256xf32>
    %cst_243 = arith.constant 9.900000e-01 : f32
    %714 = vector.broadcast %cst_243 : f32 to vector<16x256xf32>
    %715 = arith.mulf %704, %714 : vector<16x256xf32>
    %cst_244 = arith.constant 2.000000e-03 : f32
    %716 = vector.broadcast %cst_244 : f32 to vector<16x256xf32>
    %717 = arith.mulf %716, %713 : vector<16x256xf32>
    %718 = arith.addf %715, %717 : vector<16x256xf32>
    %cst_245 = arith.constant 3.000000e+01 : f32
    %719 = vector.broadcast %cst_245 : f32 to vector<16x256xf32>
    %720 = arith.cmpf ogt, %713, %719 : vector<16x256xf32>
    %721 = arith.extui %720 : vector<16x256xi1> to vector<16x256xi32>
    %722 = arith.sitofp %721 : vector<16x256xi32> to vector<16x256xf32>
    %723 = arith.addf %699, %722 : vector<16x256xf32>
    %cst_246 = arith.constant -6.500000e+01 : f32
    %724 = vector.broadcast %cst_246 : f32 to vector<16x256xf32>
    %725 = arith.select %720, %724, %713 : vector<16x256xi1>, vector<16x256xf32>
    %cst_247 = arith.constant 8.000000e+00 : f32
    %726 = vector.broadcast %cst_247 : f32 to vector<16x256xf32>
    %727 = arith.addf %718, %726 : vector<16x256xf32>
    %728 = arith.select %720, %727, %718 : vector<16x256xi1>, vector<16x256xf32>
    %c29_i32 = arith.constant 29 : i32
    %cst_248 = arith.constant 2.000000e-02 : f32
    %729 = vector.broadcast %cst_248 : f32 to vector<16x256xf32>
    %730 = arith.mulf %729, %725 : vector<16x256xf32>
    %cst_249 = arith.constant 3.500000e+00 : f32
    %731 = vector.broadcast %cst_249 : f32 to vector<16x256xf32>
    %732 = arith.addf %730, %731 : vector<16x256xf32>
    %733 = arith.mulf %725, %732 : vector<16x256xf32>
    %cst_250 = arith.constant -5.000000e-01 : f32
    %734 = vector.broadcast %cst_250 : f32 to vector<16x256xf32>
    %735 = arith.mulf %734, %728 : vector<16x256xf32>
    %736 = arith.addf %735, %29 : vector<16x256xf32>
    %737 = arith.addf %733, %736 : vector<16x256xf32>
    %cst_251 = arith.constant 9.900000e-01 : f32
    %738 = vector.broadcast %cst_251 : f32 to vector<16x256xf32>
    %739 = arith.mulf %728, %738 : vector<16x256xf32>
    %cst_252 = arith.constant 2.000000e-03 : f32
    %740 = vector.broadcast %cst_252 : f32 to vector<16x256xf32>
    %741 = arith.mulf %740, %737 : vector<16x256xf32>
    %742 = arith.addf %739, %741 : vector<16x256xf32>
    %cst_253 = arith.constant 3.000000e+01 : f32
    %743 = vector.broadcast %cst_253 : f32 to vector<16x256xf32>
    %744 = arith.cmpf ogt, %737, %743 : vector<16x256xf32>
    %745 = arith.extui %744 : vector<16x256xi1> to vector<16x256xi32>
    %746 = arith.sitofp %745 : vector<16x256xi32> to vector<16x256xf32>
    %747 = arith.addf %723, %746 : vector<16x256xf32>
    %cst_254 = arith.constant -6.500000e+01 : f32
    %748 = vector.broadcast %cst_254 : f32 to vector<16x256xf32>
    %749 = arith.select %744, %748, %737 : vector<16x256xi1>, vector<16x256xf32>
    %cst_255 = arith.constant 8.000000e+00 : f32
    %750 = vector.broadcast %cst_255 : f32 to vector<16x256xf32>
    %751 = arith.addf %742, %750 : vector<16x256xf32>
    %752 = arith.select %744, %751, %742 : vector<16x256xi1>, vector<16x256xf32>
    %c30_i32 = arith.constant 30 : i32
    %cst_256 = arith.constant 2.000000e-02 : f32
    %753 = vector.broadcast %cst_256 : f32 to vector<16x256xf32>
    %754 = arith.mulf %753, %749 : vector<16x256xf32>
    %cst_257 = arith.constant 3.500000e+00 : f32
    %755 = vector.broadcast %cst_257 : f32 to vector<16x256xf32>
    %756 = arith.addf %754, %755 : vector<16x256xf32>
    %757 = arith.mulf %749, %756 : vector<16x256xf32>
    %cst_258 = arith.constant -5.000000e-01 : f32
    %758 = vector.broadcast %cst_258 : f32 to vector<16x256xf32>
    %759 = arith.mulf %758, %752 : vector<16x256xf32>
    %760 = arith.addf %759, %29 : vector<16x256xf32>
    %761 = arith.addf %757, %760 : vector<16x256xf32>
    %cst_259 = arith.constant 9.900000e-01 : f32
    %762 = vector.broadcast %cst_259 : f32 to vector<16x256xf32>
    %763 = arith.mulf %752, %762 : vector<16x256xf32>
    %cst_260 = arith.constant 2.000000e-03 : f32
    %764 = vector.broadcast %cst_260 : f32 to vector<16x256xf32>
    %765 = arith.mulf %764, %761 : vector<16x256xf32>
    %766 = arith.addf %763, %765 : vector<16x256xf32>
    %cst_261 = arith.constant 3.000000e+01 : f32
    %767 = vector.broadcast %cst_261 : f32 to vector<16x256xf32>
    %768 = arith.cmpf ogt, %761, %767 : vector<16x256xf32>
    %769 = arith.extui %768 : vector<16x256xi1> to vector<16x256xi32>
    %770 = arith.sitofp %769 : vector<16x256xi32> to vector<16x256xf32>
    %771 = arith.addf %747, %770 : vector<16x256xf32>
    %cst_262 = arith.constant -6.500000e+01 : f32
    %772 = vector.broadcast %cst_262 : f32 to vector<16x256xf32>
    %773 = arith.select %768, %772, %761 : vector<16x256xi1>, vector<16x256xf32>
    %cst_263 = arith.constant 8.000000e+00 : f32
    %774 = vector.broadcast %cst_263 : f32 to vector<16x256xf32>
    %775 = arith.addf %766, %774 : vector<16x256xf32>
    %776 = arith.select %768, %775, %766 : vector<16x256xi1>, vector<16x256xf32>
    %c31_i32 = arith.constant 31 : i32
    %cst_264 = arith.constant 2.000000e-02 : f32
    %777 = vector.broadcast %cst_264 : f32 to vector<16x256xf32>
    %778 = arith.mulf %777, %773 : vector<16x256xf32>
    %cst_265 = arith.constant 3.500000e+00 : f32
    %779 = vector.broadcast %cst_265 : f32 to vector<16x256xf32>
    %780 = arith.addf %778, %779 : vector<16x256xf32>
    %781 = arith.mulf %773, %780 : vector<16x256xf32>
    %cst_266 = arith.constant -5.000000e-01 : f32
    %782 = vector.broadcast %cst_266 : f32 to vector<16x256xf32>
    %783 = arith.mulf %782, %776 : vector<16x256xf32>
    %784 = arith.addf %783, %29 : vector<16x256xf32>
    %785 = arith.addf %781, %784 : vector<16x256xf32>
    %cst_267 = arith.constant 9.900000e-01 : f32
    %786 = vector.broadcast %cst_267 : f32 to vector<16x256xf32>
    %787 = arith.mulf %776, %786 : vector<16x256xf32>
    %cst_268 = arith.constant 2.000000e-03 : f32
    %788 = vector.broadcast %cst_268 : f32 to vector<16x256xf32>
    %789 = arith.mulf %788, %785 : vector<16x256xf32>
    %790 = arith.addf %787, %789 : vector<16x256xf32>
    %cst_269 = arith.constant 3.000000e+01 : f32
    %791 = vector.broadcast %cst_269 : f32 to vector<16x256xf32>
    %792 = arith.cmpf ogt, %785, %791 : vector<16x256xf32>
    %793 = arith.extui %792 : vector<16x256xi1> to vector<16x256xi32>
    %794 = arith.sitofp %793 : vector<16x256xi32> to vector<16x256xf32>
    %795 = arith.addf %771, %794 : vector<16x256xf32>
    %cst_270 = arith.constant -6.500000e+01 : f32
    %796 = vector.broadcast %cst_270 : f32 to vector<16x256xf32>
    %797 = arith.select %792, %796, %785 : vector<16x256xi1>, vector<16x256xf32>
    %cst_271 = arith.constant 8.000000e+00 : f32
    %798 = vector.broadcast %cst_271 : f32 to vector<16x256xf32>
    %799 = arith.addf %790, %798 : vector<16x256xf32>
    %800 = arith.select %792, %799, %790 : vector<16x256xi1>, vector<16x256xf32>
    %c32_i32 = arith.constant 32 : i32
    %cst_272 = arith.constant 2.000000e-02 : f32
    %801 = vector.broadcast %cst_272 : f32 to vector<16x256xf32>
    %802 = arith.mulf %801, %797 : vector<16x256xf32>
    %cst_273 = arith.constant 3.500000e+00 : f32
    %803 = vector.broadcast %cst_273 : f32 to vector<16x256xf32>
    %804 = arith.addf %802, %803 : vector<16x256xf32>
    %805 = arith.mulf %797, %804 : vector<16x256xf32>
    %cst_274 = arith.constant -5.000000e-01 : f32
    %806 = vector.broadcast %cst_274 : f32 to vector<16x256xf32>
    %807 = arith.mulf %806, %800 : vector<16x256xf32>
    %808 = arith.addf %807, %29 : vector<16x256xf32>
    %809 = arith.addf %805, %808 : vector<16x256xf32>
    %cst_275 = arith.constant 9.900000e-01 : f32
    %810 = vector.broadcast %cst_275 : f32 to vector<16x256xf32>
    %811 = arith.mulf %800, %810 : vector<16x256xf32>
    %cst_276 = arith.constant 2.000000e-03 : f32
    %812 = vector.broadcast %cst_276 : f32 to vector<16x256xf32>
    %813 = arith.mulf %812, %809 : vector<16x256xf32>
    %814 = arith.addf %811, %813 : vector<16x256xf32>
    %cst_277 = arith.constant 3.000000e+01 : f32
    %815 = vector.broadcast %cst_277 : f32 to vector<16x256xf32>
    %816 = arith.cmpf ogt, %809, %815 : vector<16x256xf32>
    %817 = arith.extui %816 : vector<16x256xi1> to vector<16x256xi32>
    %818 = arith.sitofp %817 : vector<16x256xi32> to vector<16x256xf32>
    %819 = arith.addf %795, %818 : vector<16x256xf32>
    %cst_278 = arith.constant -6.500000e+01 : f32
    %820 = vector.broadcast %cst_278 : f32 to vector<16x256xf32>
    %821 = arith.select %816, %820, %809 : vector<16x256xi1>, vector<16x256xf32>
    %cst_279 = arith.constant 8.000000e+00 : f32
    %822 = vector.broadcast %cst_279 : f32 to vector<16x256xf32>
    %823 = arith.addf %814, %822 : vector<16x256xf32>
    %824 = arith.select %816, %823, %814 : vector<16x256xi1>, vector<16x256xf32>
    %c33_i32 = arith.constant 33 : i32
    %cst_280 = arith.constant 2.000000e-02 : f32
    %825 = vector.broadcast %cst_280 : f32 to vector<16x256xf32>
    %826 = arith.mulf %825, %821 : vector<16x256xf32>
    %cst_281 = arith.constant 3.500000e+00 : f32
    %827 = vector.broadcast %cst_281 : f32 to vector<16x256xf32>
    %828 = arith.addf %826, %827 : vector<16x256xf32>
    %829 = arith.mulf %821, %828 : vector<16x256xf32>
    %cst_282 = arith.constant -5.000000e-01 : f32
    %830 = vector.broadcast %cst_282 : f32 to vector<16x256xf32>
    %831 = arith.mulf %830, %824 : vector<16x256xf32>
    %832 = arith.addf %831, %29 : vector<16x256xf32>
    %833 = arith.addf %829, %832 : vector<16x256xf32>
    %cst_283 = arith.constant 9.900000e-01 : f32
    %834 = vector.broadcast %cst_283 : f32 to vector<16x256xf32>
    %835 = arith.mulf %824, %834 : vector<16x256xf32>
    %cst_284 = arith.constant 2.000000e-03 : f32
    %836 = vector.broadcast %cst_284 : f32 to vector<16x256xf32>
    %837 = arith.mulf %836, %833 : vector<16x256xf32>
    %838 = arith.addf %835, %837 : vector<16x256xf32>
    %cst_285 = arith.constant 3.000000e+01 : f32
    %839 = vector.broadcast %cst_285 : f32 to vector<16x256xf32>
    %840 = arith.cmpf ogt, %833, %839 : vector<16x256xf32>
    %841 = arith.extui %840 : vector<16x256xi1> to vector<16x256xi32>
    %842 = arith.sitofp %841 : vector<16x256xi32> to vector<16x256xf32>
    %843 = arith.addf %819, %842 : vector<16x256xf32>
    %cst_286 = arith.constant -6.500000e+01 : f32
    %844 = vector.broadcast %cst_286 : f32 to vector<16x256xf32>
    %845 = arith.select %840, %844, %833 : vector<16x256xi1>, vector<16x256xf32>
    %cst_287 = arith.constant 8.000000e+00 : f32
    %846 = vector.broadcast %cst_287 : f32 to vector<16x256xf32>
    %847 = arith.addf %838, %846 : vector<16x256xf32>
    %848 = arith.select %840, %847, %838 : vector<16x256xi1>, vector<16x256xf32>
    %c34_i32 = arith.constant 34 : i32
    %cst_288 = arith.constant 2.000000e-02 : f32
    %849 = vector.broadcast %cst_288 : f32 to vector<16x256xf32>
    %850 = arith.mulf %849, %845 : vector<16x256xf32>
    %cst_289 = arith.constant 3.500000e+00 : f32
    %851 = vector.broadcast %cst_289 : f32 to vector<16x256xf32>
    %852 = arith.addf %850, %851 : vector<16x256xf32>
    %853 = arith.mulf %845, %852 : vector<16x256xf32>
    %cst_290 = arith.constant -5.000000e-01 : f32
    %854 = vector.broadcast %cst_290 : f32 to vector<16x256xf32>
    %855 = arith.mulf %854, %848 : vector<16x256xf32>
    %856 = arith.addf %855, %29 : vector<16x256xf32>
    %857 = arith.addf %853, %856 : vector<16x256xf32>
    %cst_291 = arith.constant 9.900000e-01 : f32
    %858 = vector.broadcast %cst_291 : f32 to vector<16x256xf32>
    %859 = arith.mulf %848, %858 : vector<16x256xf32>
    %cst_292 = arith.constant 2.000000e-03 : f32
    %860 = vector.broadcast %cst_292 : f32 to vector<16x256xf32>
    %861 = arith.mulf %860, %857 : vector<16x256xf32>
    %862 = arith.addf %859, %861 : vector<16x256xf32>
    %cst_293 = arith.constant 3.000000e+01 : f32
    %863 = vector.broadcast %cst_293 : f32 to vector<16x256xf32>
    %864 = arith.cmpf ogt, %857, %863 : vector<16x256xf32>
    %865 = arith.extui %864 : vector<16x256xi1> to vector<16x256xi32>
    %866 = arith.sitofp %865 : vector<16x256xi32> to vector<16x256xf32>
    %867 = arith.addf %843, %866 : vector<16x256xf32>
    %cst_294 = arith.constant -6.500000e+01 : f32
    %868 = vector.broadcast %cst_294 : f32 to vector<16x256xf32>
    %869 = arith.select %864, %868, %857 : vector<16x256xi1>, vector<16x256xf32>
    %cst_295 = arith.constant 8.000000e+00 : f32
    %870 = vector.broadcast %cst_295 : f32 to vector<16x256xf32>
    %871 = arith.addf %862, %870 : vector<16x256xf32>
    %872 = arith.select %864, %871, %862 : vector<16x256xi1>, vector<16x256xf32>
    %c35_i32 = arith.constant 35 : i32
    %cst_296 = arith.constant 2.000000e-02 : f32
    %873 = vector.broadcast %cst_296 : f32 to vector<16x256xf32>
    %874 = arith.mulf %873, %869 : vector<16x256xf32>
    %cst_297 = arith.constant 3.500000e+00 : f32
    %875 = vector.broadcast %cst_297 : f32 to vector<16x256xf32>
    %876 = arith.addf %874, %875 : vector<16x256xf32>
    %877 = arith.mulf %869, %876 : vector<16x256xf32>
    %cst_298 = arith.constant -5.000000e-01 : f32
    %878 = vector.broadcast %cst_298 : f32 to vector<16x256xf32>
    %879 = arith.mulf %878, %872 : vector<16x256xf32>
    %880 = arith.addf %879, %29 : vector<16x256xf32>
    %881 = arith.addf %877, %880 : vector<16x256xf32>
    %cst_299 = arith.constant 9.900000e-01 : f32
    %882 = vector.broadcast %cst_299 : f32 to vector<16x256xf32>
    %883 = arith.mulf %872, %882 : vector<16x256xf32>
    %cst_300 = arith.constant 2.000000e-03 : f32
    %884 = vector.broadcast %cst_300 : f32 to vector<16x256xf32>
    %885 = arith.mulf %884, %881 : vector<16x256xf32>
    %886 = arith.addf %883, %885 : vector<16x256xf32>
    %cst_301 = arith.constant 3.000000e+01 : f32
    %887 = vector.broadcast %cst_301 : f32 to vector<16x256xf32>
    %888 = arith.cmpf ogt, %881, %887 : vector<16x256xf32>
    %889 = arith.extui %888 : vector<16x256xi1> to vector<16x256xi32>
    %890 = arith.sitofp %889 : vector<16x256xi32> to vector<16x256xf32>
    %891 = arith.addf %867, %890 : vector<16x256xf32>
    %cst_302 = arith.constant -6.500000e+01 : f32
    %892 = vector.broadcast %cst_302 : f32 to vector<16x256xf32>
    %893 = arith.select %888, %892, %881 : vector<16x256xi1>, vector<16x256xf32>
    %cst_303 = arith.constant 8.000000e+00 : f32
    %894 = vector.broadcast %cst_303 : f32 to vector<16x256xf32>
    %895 = arith.addf %886, %894 : vector<16x256xf32>
    %896 = arith.select %888, %895, %886 : vector<16x256xi1>, vector<16x256xf32>
    %c36_i32 = arith.constant 36 : i32
    %cst_304 = arith.constant 2.000000e-02 : f32
    %897 = vector.broadcast %cst_304 : f32 to vector<16x256xf32>
    %898 = arith.mulf %897, %893 : vector<16x256xf32>
    %cst_305 = arith.constant 3.500000e+00 : f32
    %899 = vector.broadcast %cst_305 : f32 to vector<16x256xf32>
    %900 = arith.addf %898, %899 : vector<16x256xf32>
    %901 = arith.mulf %893, %900 : vector<16x256xf32>
    %cst_306 = arith.constant -5.000000e-01 : f32
    %902 = vector.broadcast %cst_306 : f32 to vector<16x256xf32>
    %903 = arith.mulf %902, %896 : vector<16x256xf32>
    %904 = arith.addf %903, %29 : vector<16x256xf32>
    %905 = arith.addf %901, %904 : vector<16x256xf32>
    %cst_307 = arith.constant 9.900000e-01 : f32
    %906 = vector.broadcast %cst_307 : f32 to vector<16x256xf32>
    %907 = arith.mulf %896, %906 : vector<16x256xf32>
    %cst_308 = arith.constant 2.000000e-03 : f32
    %908 = vector.broadcast %cst_308 : f32 to vector<16x256xf32>
    %909 = arith.mulf %908, %905 : vector<16x256xf32>
    %910 = arith.addf %907, %909 : vector<16x256xf32>
    %cst_309 = arith.constant 3.000000e+01 : f32
    %911 = vector.broadcast %cst_309 : f32 to vector<16x256xf32>
    %912 = arith.cmpf ogt, %905, %911 : vector<16x256xf32>
    %913 = arith.extui %912 : vector<16x256xi1> to vector<16x256xi32>
    %914 = arith.sitofp %913 : vector<16x256xi32> to vector<16x256xf32>
    %915 = arith.addf %891, %914 : vector<16x256xf32>
    %cst_310 = arith.constant -6.500000e+01 : f32
    %916 = vector.broadcast %cst_310 : f32 to vector<16x256xf32>
    %917 = arith.select %912, %916, %905 : vector<16x256xi1>, vector<16x256xf32>
    %cst_311 = arith.constant 8.000000e+00 : f32
    %918 = vector.broadcast %cst_311 : f32 to vector<16x256xf32>
    %919 = arith.addf %910, %918 : vector<16x256xf32>
    %920 = arith.select %912, %919, %910 : vector<16x256xi1>, vector<16x256xf32>
    %c37_i32 = arith.constant 37 : i32
    %cst_312 = arith.constant 2.000000e-02 : f32
    %921 = vector.broadcast %cst_312 : f32 to vector<16x256xf32>
    %922 = arith.mulf %921, %917 : vector<16x256xf32>
    %cst_313 = arith.constant 3.500000e+00 : f32
    %923 = vector.broadcast %cst_313 : f32 to vector<16x256xf32>
    %924 = arith.addf %922, %923 : vector<16x256xf32>
    %925 = arith.mulf %917, %924 : vector<16x256xf32>
    %cst_314 = arith.constant -5.000000e-01 : f32
    %926 = vector.broadcast %cst_314 : f32 to vector<16x256xf32>
    %927 = arith.mulf %926, %920 : vector<16x256xf32>
    %928 = arith.addf %927, %29 : vector<16x256xf32>
    %929 = arith.addf %925, %928 : vector<16x256xf32>
    %cst_315 = arith.constant 9.900000e-01 : f32
    %930 = vector.broadcast %cst_315 : f32 to vector<16x256xf32>
    %931 = arith.mulf %920, %930 : vector<16x256xf32>
    %cst_316 = arith.constant 2.000000e-03 : f32
    %932 = vector.broadcast %cst_316 : f32 to vector<16x256xf32>
    %933 = arith.mulf %932, %929 : vector<16x256xf32>
    %934 = arith.addf %931, %933 : vector<16x256xf32>
    %cst_317 = arith.constant 3.000000e+01 : f32
    %935 = vector.broadcast %cst_317 : f32 to vector<16x256xf32>
    %936 = arith.cmpf ogt, %929, %935 : vector<16x256xf32>
    %937 = arith.extui %936 : vector<16x256xi1> to vector<16x256xi32>
    %938 = arith.sitofp %937 : vector<16x256xi32> to vector<16x256xf32>
    %939 = arith.addf %915, %938 : vector<16x256xf32>
    %cst_318 = arith.constant -6.500000e+01 : f32
    %940 = vector.broadcast %cst_318 : f32 to vector<16x256xf32>
    %941 = arith.select %936, %940, %929 : vector<16x256xi1>, vector<16x256xf32>
    %cst_319 = arith.constant 8.000000e+00 : f32
    %942 = vector.broadcast %cst_319 : f32 to vector<16x256xf32>
    %943 = arith.addf %934, %942 : vector<16x256xf32>
    %944 = arith.select %936, %943, %934 : vector<16x256xi1>, vector<16x256xf32>
    %c38_i32 = arith.constant 38 : i32
    %cst_320 = arith.constant 2.000000e-02 : f32
    %945 = vector.broadcast %cst_320 : f32 to vector<16x256xf32>
    %946 = arith.mulf %945, %941 : vector<16x256xf32>
    %cst_321 = arith.constant 3.500000e+00 : f32
    %947 = vector.broadcast %cst_321 : f32 to vector<16x256xf32>
    %948 = arith.addf %946, %947 : vector<16x256xf32>
    %949 = arith.mulf %941, %948 : vector<16x256xf32>
    %cst_322 = arith.constant -5.000000e-01 : f32
    %950 = vector.broadcast %cst_322 : f32 to vector<16x256xf32>
    %951 = arith.mulf %950, %944 : vector<16x256xf32>
    %952 = arith.addf %951, %29 : vector<16x256xf32>
    %953 = arith.addf %949, %952 : vector<16x256xf32>
    %cst_323 = arith.constant 9.900000e-01 : f32
    %954 = vector.broadcast %cst_323 : f32 to vector<16x256xf32>
    %955 = arith.mulf %944, %954 : vector<16x256xf32>
    %cst_324 = arith.constant 2.000000e-03 : f32
    %956 = vector.broadcast %cst_324 : f32 to vector<16x256xf32>
    %957 = arith.mulf %956, %953 : vector<16x256xf32>
    %958 = arith.addf %955, %957 : vector<16x256xf32>
    %cst_325 = arith.constant 3.000000e+01 : f32
    %959 = vector.broadcast %cst_325 : f32 to vector<16x256xf32>
    %960 = arith.cmpf ogt, %953, %959 : vector<16x256xf32>
    %961 = arith.extui %960 : vector<16x256xi1> to vector<16x256xi32>
    %962 = arith.sitofp %961 : vector<16x256xi32> to vector<16x256xf32>
    %963 = arith.addf %939, %962 : vector<16x256xf32>
    %cst_326 = arith.constant -6.500000e+01 : f32
    %964 = vector.broadcast %cst_326 : f32 to vector<16x256xf32>
    %965 = arith.select %960, %964, %953 : vector<16x256xi1>, vector<16x256xf32>
    %cst_327 = arith.constant 8.000000e+00 : f32
    %966 = vector.broadcast %cst_327 : f32 to vector<16x256xf32>
    %967 = arith.addf %958, %966 : vector<16x256xf32>
    %968 = arith.select %960, %967, %958 : vector<16x256xi1>, vector<16x256xf32>
    %c39_i32 = arith.constant 39 : i32
    %cst_328 = arith.constant 2.000000e-02 : f32
    %969 = vector.broadcast %cst_328 : f32 to vector<16x256xf32>
    %970 = arith.mulf %969, %965 : vector<16x256xf32>
    %cst_329 = arith.constant 3.500000e+00 : f32
    %971 = vector.broadcast %cst_329 : f32 to vector<16x256xf32>
    %972 = arith.addf %970, %971 : vector<16x256xf32>
    %973 = arith.mulf %965, %972 : vector<16x256xf32>
    %cst_330 = arith.constant -5.000000e-01 : f32
    %974 = vector.broadcast %cst_330 : f32 to vector<16x256xf32>
    %975 = arith.mulf %974, %968 : vector<16x256xf32>
    %976 = arith.addf %975, %29 : vector<16x256xf32>
    %977 = arith.addf %973, %976 : vector<16x256xf32>
    %cst_331 = arith.constant 9.900000e-01 : f32
    %978 = vector.broadcast %cst_331 : f32 to vector<16x256xf32>
    %979 = arith.mulf %968, %978 : vector<16x256xf32>
    %cst_332 = arith.constant 2.000000e-03 : f32
    %980 = vector.broadcast %cst_332 : f32 to vector<16x256xf32>
    %981 = arith.mulf %980, %977 : vector<16x256xf32>
    %982 = arith.addf %979, %981 : vector<16x256xf32>
    %cst_333 = arith.constant 3.000000e+01 : f32
    %983 = vector.broadcast %cst_333 : f32 to vector<16x256xf32>
    %984 = arith.cmpf ogt, %977, %983 : vector<16x256xf32>
    %985 = arith.extui %984 : vector<16x256xi1> to vector<16x256xi32>
    %986 = arith.sitofp %985 : vector<16x256xi32> to vector<16x256xf32>
    %987 = arith.addf %963, %986 : vector<16x256xf32>
    %cst_334 = arith.constant -6.500000e+01 : f32
    %988 = vector.broadcast %cst_334 : f32 to vector<16x256xf32>
    %989 = arith.select %984, %988, %977 : vector<16x256xi1>, vector<16x256xf32>
    %cst_335 = arith.constant 8.000000e+00 : f32
    %990 = vector.broadcast %cst_335 : f32 to vector<16x256xf32>
    %991 = arith.addf %982, %990 : vector<16x256xf32>
    %992 = arith.select %984, %991, %982 : vector<16x256xi1>, vector<16x256xf32>
    %c40_i32 = arith.constant 40 : i32
    %cst_336 = arith.constant 2.000000e-02 : f32
    %993 = vector.broadcast %cst_336 : f32 to vector<16x256xf32>
    %994 = arith.mulf %993, %989 : vector<16x256xf32>
    %cst_337 = arith.constant 3.500000e+00 : f32
    %995 = vector.broadcast %cst_337 : f32 to vector<16x256xf32>
    %996 = arith.addf %994, %995 : vector<16x256xf32>
    %997 = arith.mulf %989, %996 : vector<16x256xf32>
    %cst_338 = arith.constant -5.000000e-01 : f32
    %998 = vector.broadcast %cst_338 : f32 to vector<16x256xf32>
    %999 = arith.mulf %998, %992 : vector<16x256xf32>
    %1000 = arith.addf %999, %29 : vector<16x256xf32>
    %1001 = arith.addf %997, %1000 : vector<16x256xf32>
    %cst_339 = arith.constant 9.900000e-01 : f32
    %1002 = vector.broadcast %cst_339 : f32 to vector<16x256xf32>
    %1003 = arith.mulf %992, %1002 : vector<16x256xf32>
    %cst_340 = arith.constant 2.000000e-03 : f32
    %1004 = vector.broadcast %cst_340 : f32 to vector<16x256xf32>
    %1005 = arith.mulf %1004, %1001 : vector<16x256xf32>
    %1006 = arith.addf %1003, %1005 : vector<16x256xf32>
    %cst_341 = arith.constant 3.000000e+01 : f32
    %1007 = vector.broadcast %cst_341 : f32 to vector<16x256xf32>
    %1008 = arith.cmpf ogt, %1001, %1007 : vector<16x256xf32>
    %1009 = arith.extui %1008 : vector<16x256xi1> to vector<16x256xi32>
    %1010 = arith.sitofp %1009 : vector<16x256xi32> to vector<16x256xf32>
    %1011 = arith.addf %987, %1010 : vector<16x256xf32>
    %cst_342 = arith.constant -6.500000e+01 : f32
    %1012 = vector.broadcast %cst_342 : f32 to vector<16x256xf32>
    %1013 = arith.select %1008, %1012, %1001 : vector<16x256xi1>, vector<16x256xf32>
    %cst_343 = arith.constant 8.000000e+00 : f32
    %1014 = vector.broadcast %cst_343 : f32 to vector<16x256xf32>
    %1015 = arith.addf %1006, %1014 : vector<16x256xf32>
    %1016 = arith.select %1008, %1015, %1006 : vector<16x256xi1>, vector<16x256xf32>
    %c41_i32 = arith.constant 41 : i32
    %cst_344 = arith.constant 2.000000e-02 : f32
    %1017 = vector.broadcast %cst_344 : f32 to vector<16x256xf32>
    %1018 = arith.mulf %1017, %1013 : vector<16x256xf32>
    %cst_345 = arith.constant 3.500000e+00 : f32
    %1019 = vector.broadcast %cst_345 : f32 to vector<16x256xf32>
    %1020 = arith.addf %1018, %1019 : vector<16x256xf32>
    %1021 = arith.mulf %1013, %1020 : vector<16x256xf32>
    %cst_346 = arith.constant -5.000000e-01 : f32
    %1022 = vector.broadcast %cst_346 : f32 to vector<16x256xf32>
    %1023 = arith.mulf %1022, %1016 : vector<16x256xf32>
    %1024 = arith.addf %1023, %29 : vector<16x256xf32>
    %1025 = arith.addf %1021, %1024 : vector<16x256xf32>
    %cst_347 = arith.constant 9.900000e-01 : f32
    %1026 = vector.broadcast %cst_347 : f32 to vector<16x256xf32>
    %1027 = arith.mulf %1016, %1026 : vector<16x256xf32>
    %cst_348 = arith.constant 2.000000e-03 : f32
    %1028 = vector.broadcast %cst_348 : f32 to vector<16x256xf32>
    %1029 = arith.mulf %1028, %1025 : vector<16x256xf32>
    %1030 = arith.addf %1027, %1029 : vector<16x256xf32>
    %cst_349 = arith.constant 3.000000e+01 : f32
    %1031 = vector.broadcast %cst_349 : f32 to vector<16x256xf32>
    %1032 = arith.cmpf ogt, %1025, %1031 : vector<16x256xf32>
    %1033 = arith.extui %1032 : vector<16x256xi1> to vector<16x256xi32>
    %1034 = arith.sitofp %1033 : vector<16x256xi32> to vector<16x256xf32>
    %1035 = arith.addf %1011, %1034 : vector<16x256xf32>
    %cst_350 = arith.constant -6.500000e+01 : f32
    %1036 = vector.broadcast %cst_350 : f32 to vector<16x256xf32>
    %1037 = arith.select %1032, %1036, %1025 : vector<16x256xi1>, vector<16x256xf32>
    %cst_351 = arith.constant 8.000000e+00 : f32
    %1038 = vector.broadcast %cst_351 : f32 to vector<16x256xf32>
    %1039 = arith.addf %1030, %1038 : vector<16x256xf32>
    %1040 = arith.select %1032, %1039, %1030 : vector<16x256xi1>, vector<16x256xf32>
    %c42_i32 = arith.constant 42 : i32
    %cst_352 = arith.constant 2.000000e-02 : f32
    %1041 = vector.broadcast %cst_352 : f32 to vector<16x256xf32>
    %1042 = arith.mulf %1041, %1037 : vector<16x256xf32>
    %cst_353 = arith.constant 3.500000e+00 : f32
    %1043 = vector.broadcast %cst_353 : f32 to vector<16x256xf32>
    %1044 = arith.addf %1042, %1043 : vector<16x256xf32>
    %1045 = arith.mulf %1037, %1044 : vector<16x256xf32>
    %cst_354 = arith.constant -5.000000e-01 : f32
    %1046 = vector.broadcast %cst_354 : f32 to vector<16x256xf32>
    %1047 = arith.mulf %1046, %1040 : vector<16x256xf32>
    %1048 = arith.addf %1047, %29 : vector<16x256xf32>
    %1049 = arith.addf %1045, %1048 : vector<16x256xf32>
    %cst_355 = arith.constant 9.900000e-01 : f32
    %1050 = vector.broadcast %cst_355 : f32 to vector<16x256xf32>
    %1051 = arith.mulf %1040, %1050 : vector<16x256xf32>
    %cst_356 = arith.constant 2.000000e-03 : f32
    %1052 = vector.broadcast %cst_356 : f32 to vector<16x256xf32>
    %1053 = arith.mulf %1052, %1049 : vector<16x256xf32>
    %1054 = arith.addf %1051, %1053 : vector<16x256xf32>
    %cst_357 = arith.constant 3.000000e+01 : f32
    %1055 = vector.broadcast %cst_357 : f32 to vector<16x256xf32>
    %1056 = arith.cmpf ogt, %1049, %1055 : vector<16x256xf32>
    %1057 = arith.extui %1056 : vector<16x256xi1> to vector<16x256xi32>
    %1058 = arith.sitofp %1057 : vector<16x256xi32> to vector<16x256xf32>
    %1059 = arith.addf %1035, %1058 : vector<16x256xf32>
    %cst_358 = arith.constant -6.500000e+01 : f32
    %1060 = vector.broadcast %cst_358 : f32 to vector<16x256xf32>
    %1061 = arith.select %1056, %1060, %1049 : vector<16x256xi1>, vector<16x256xf32>
    %cst_359 = arith.constant 8.000000e+00 : f32
    %1062 = vector.broadcast %cst_359 : f32 to vector<16x256xf32>
    %1063 = arith.addf %1054, %1062 : vector<16x256xf32>
    %1064 = arith.select %1056, %1063, %1054 : vector<16x256xi1>, vector<16x256xf32>
    %c43_i32 = arith.constant 43 : i32
    %cst_360 = arith.constant 2.000000e-02 : f32
    %1065 = vector.broadcast %cst_360 : f32 to vector<16x256xf32>
    %1066 = arith.mulf %1065, %1061 : vector<16x256xf32>
    %cst_361 = arith.constant 3.500000e+00 : f32
    %1067 = vector.broadcast %cst_361 : f32 to vector<16x256xf32>
    %1068 = arith.addf %1066, %1067 : vector<16x256xf32>
    %1069 = arith.mulf %1061, %1068 : vector<16x256xf32>
    %cst_362 = arith.constant -5.000000e-01 : f32
    %1070 = vector.broadcast %cst_362 : f32 to vector<16x256xf32>
    %1071 = arith.mulf %1070, %1064 : vector<16x256xf32>
    %1072 = arith.addf %1071, %29 : vector<16x256xf32>
    %1073 = arith.addf %1069, %1072 : vector<16x256xf32>
    %cst_363 = arith.constant 9.900000e-01 : f32
    %1074 = vector.broadcast %cst_363 : f32 to vector<16x256xf32>
    %1075 = arith.mulf %1064, %1074 : vector<16x256xf32>
    %cst_364 = arith.constant 2.000000e-03 : f32
    %1076 = vector.broadcast %cst_364 : f32 to vector<16x256xf32>
    %1077 = arith.mulf %1076, %1073 : vector<16x256xf32>
    %1078 = arith.addf %1075, %1077 : vector<16x256xf32>
    %cst_365 = arith.constant 3.000000e+01 : f32
    %1079 = vector.broadcast %cst_365 : f32 to vector<16x256xf32>
    %1080 = arith.cmpf ogt, %1073, %1079 : vector<16x256xf32>
    %1081 = arith.extui %1080 : vector<16x256xi1> to vector<16x256xi32>
    %1082 = arith.sitofp %1081 : vector<16x256xi32> to vector<16x256xf32>
    %1083 = arith.addf %1059, %1082 : vector<16x256xf32>
    %cst_366 = arith.constant -6.500000e+01 : f32
    %1084 = vector.broadcast %cst_366 : f32 to vector<16x256xf32>
    %1085 = arith.select %1080, %1084, %1073 : vector<16x256xi1>, vector<16x256xf32>
    %cst_367 = arith.constant 8.000000e+00 : f32
    %1086 = vector.broadcast %cst_367 : f32 to vector<16x256xf32>
    %1087 = arith.addf %1078, %1086 : vector<16x256xf32>
    %1088 = arith.select %1080, %1087, %1078 : vector<16x256xi1>, vector<16x256xf32>
    %c44_i32 = arith.constant 44 : i32
    %cst_368 = arith.constant 2.000000e-02 : f32
    %1089 = vector.broadcast %cst_368 : f32 to vector<16x256xf32>
    %1090 = arith.mulf %1089, %1085 : vector<16x256xf32>
    %cst_369 = arith.constant 3.500000e+00 : f32
    %1091 = vector.broadcast %cst_369 : f32 to vector<16x256xf32>
    %1092 = arith.addf %1090, %1091 : vector<16x256xf32>
    %1093 = arith.mulf %1085, %1092 : vector<16x256xf32>
    %cst_370 = arith.constant -5.000000e-01 : f32
    %1094 = vector.broadcast %cst_370 : f32 to vector<16x256xf32>
    %1095 = arith.mulf %1094, %1088 : vector<16x256xf32>
    %1096 = arith.addf %1095, %29 : vector<16x256xf32>
    %1097 = arith.addf %1093, %1096 : vector<16x256xf32>
    %cst_371 = arith.constant 9.900000e-01 : f32
    %1098 = vector.broadcast %cst_371 : f32 to vector<16x256xf32>
    %1099 = arith.mulf %1088, %1098 : vector<16x256xf32>
    %cst_372 = arith.constant 2.000000e-03 : f32
    %1100 = vector.broadcast %cst_372 : f32 to vector<16x256xf32>
    %1101 = arith.mulf %1100, %1097 : vector<16x256xf32>
    %1102 = arith.addf %1099, %1101 : vector<16x256xf32>
    %cst_373 = arith.constant 3.000000e+01 : f32
    %1103 = vector.broadcast %cst_373 : f32 to vector<16x256xf32>
    %1104 = arith.cmpf ogt, %1097, %1103 : vector<16x256xf32>
    %1105 = arith.extui %1104 : vector<16x256xi1> to vector<16x256xi32>
    %1106 = arith.sitofp %1105 : vector<16x256xi32> to vector<16x256xf32>
    %1107 = arith.addf %1083, %1106 : vector<16x256xf32>
    %cst_374 = arith.constant -6.500000e+01 : f32
    %1108 = vector.broadcast %cst_374 : f32 to vector<16x256xf32>
    %1109 = arith.select %1104, %1108, %1097 : vector<16x256xi1>, vector<16x256xf32>
    %cst_375 = arith.constant 8.000000e+00 : f32
    %1110 = vector.broadcast %cst_375 : f32 to vector<16x256xf32>
    %1111 = arith.addf %1102, %1110 : vector<16x256xf32>
    %1112 = arith.select %1104, %1111, %1102 : vector<16x256xi1>, vector<16x256xf32>
    %c45_i32 = arith.constant 45 : i32
    %cst_376 = arith.constant 2.000000e-02 : f32
    %1113 = vector.broadcast %cst_376 : f32 to vector<16x256xf32>
    %1114 = arith.mulf %1113, %1109 : vector<16x256xf32>
    %cst_377 = arith.constant 3.500000e+00 : f32
    %1115 = vector.broadcast %cst_377 : f32 to vector<16x256xf32>
    %1116 = arith.addf %1114, %1115 : vector<16x256xf32>
    %1117 = arith.mulf %1109, %1116 : vector<16x256xf32>
    %cst_378 = arith.constant -5.000000e-01 : f32
    %1118 = vector.broadcast %cst_378 : f32 to vector<16x256xf32>
    %1119 = arith.mulf %1118, %1112 : vector<16x256xf32>
    %1120 = arith.addf %1119, %29 : vector<16x256xf32>
    %1121 = arith.addf %1117, %1120 : vector<16x256xf32>
    %cst_379 = arith.constant 9.900000e-01 : f32
    %1122 = vector.broadcast %cst_379 : f32 to vector<16x256xf32>
    %1123 = arith.mulf %1112, %1122 : vector<16x256xf32>
    %cst_380 = arith.constant 2.000000e-03 : f32
    %1124 = vector.broadcast %cst_380 : f32 to vector<16x256xf32>
    %1125 = arith.mulf %1124, %1121 : vector<16x256xf32>
    %1126 = arith.addf %1123, %1125 : vector<16x256xf32>
    %cst_381 = arith.constant 3.000000e+01 : f32
    %1127 = vector.broadcast %cst_381 : f32 to vector<16x256xf32>
    %1128 = arith.cmpf ogt, %1121, %1127 : vector<16x256xf32>
    %1129 = arith.extui %1128 : vector<16x256xi1> to vector<16x256xi32>
    %1130 = arith.sitofp %1129 : vector<16x256xi32> to vector<16x256xf32>
    %1131 = arith.addf %1107, %1130 : vector<16x256xf32>
    %cst_382 = arith.constant -6.500000e+01 : f32
    %1132 = vector.broadcast %cst_382 : f32 to vector<16x256xf32>
    %1133 = arith.select %1128, %1132, %1121 : vector<16x256xi1>, vector<16x256xf32>
    %cst_383 = arith.constant 8.000000e+00 : f32
    %1134 = vector.broadcast %cst_383 : f32 to vector<16x256xf32>
    %1135 = arith.addf %1126, %1134 : vector<16x256xf32>
    %1136 = arith.select %1128, %1135, %1126 : vector<16x256xi1>, vector<16x256xf32>
    %c46_i32 = arith.constant 46 : i32
    %cst_384 = arith.constant 2.000000e-02 : f32
    %1137 = vector.broadcast %cst_384 : f32 to vector<16x256xf32>
    %1138 = arith.mulf %1137, %1133 : vector<16x256xf32>
    %cst_385 = arith.constant 3.500000e+00 : f32
    %1139 = vector.broadcast %cst_385 : f32 to vector<16x256xf32>
    %1140 = arith.addf %1138, %1139 : vector<16x256xf32>
    %1141 = arith.mulf %1133, %1140 : vector<16x256xf32>
    %cst_386 = arith.constant -5.000000e-01 : f32
    %1142 = vector.broadcast %cst_386 : f32 to vector<16x256xf32>
    %1143 = arith.mulf %1142, %1136 : vector<16x256xf32>
    %1144 = arith.addf %1143, %29 : vector<16x256xf32>
    %1145 = arith.addf %1141, %1144 : vector<16x256xf32>
    %cst_387 = arith.constant 9.900000e-01 : f32
    %1146 = vector.broadcast %cst_387 : f32 to vector<16x256xf32>
    %1147 = arith.mulf %1136, %1146 : vector<16x256xf32>
    %cst_388 = arith.constant 2.000000e-03 : f32
    %1148 = vector.broadcast %cst_388 : f32 to vector<16x256xf32>
    %1149 = arith.mulf %1148, %1145 : vector<16x256xf32>
    %1150 = arith.addf %1147, %1149 : vector<16x256xf32>
    %cst_389 = arith.constant 3.000000e+01 : f32
    %1151 = vector.broadcast %cst_389 : f32 to vector<16x256xf32>
    %1152 = arith.cmpf ogt, %1145, %1151 : vector<16x256xf32>
    %1153 = arith.extui %1152 : vector<16x256xi1> to vector<16x256xi32>
    %1154 = arith.sitofp %1153 : vector<16x256xi32> to vector<16x256xf32>
    %1155 = arith.addf %1131, %1154 : vector<16x256xf32>
    %cst_390 = arith.constant -6.500000e+01 : f32
    %1156 = vector.broadcast %cst_390 : f32 to vector<16x256xf32>
    %1157 = arith.select %1152, %1156, %1145 : vector<16x256xi1>, vector<16x256xf32>
    %cst_391 = arith.constant 8.000000e+00 : f32
    %1158 = vector.broadcast %cst_391 : f32 to vector<16x256xf32>
    %1159 = arith.addf %1150, %1158 : vector<16x256xf32>
    %1160 = arith.select %1152, %1159, %1150 : vector<16x256xi1>, vector<16x256xf32>
    %c47_i32 = arith.constant 47 : i32
    %cst_392 = arith.constant 2.000000e-02 : f32
    %1161 = vector.broadcast %cst_392 : f32 to vector<16x256xf32>
    %1162 = arith.mulf %1161, %1157 : vector<16x256xf32>
    %cst_393 = arith.constant 3.500000e+00 : f32
    %1163 = vector.broadcast %cst_393 : f32 to vector<16x256xf32>
    %1164 = arith.addf %1162, %1163 : vector<16x256xf32>
    %1165 = arith.mulf %1157, %1164 : vector<16x256xf32>
    %cst_394 = arith.constant -5.000000e-01 : f32
    %1166 = vector.broadcast %cst_394 : f32 to vector<16x256xf32>
    %1167 = arith.mulf %1166, %1160 : vector<16x256xf32>
    %1168 = arith.addf %1167, %29 : vector<16x256xf32>
    %1169 = arith.addf %1165, %1168 : vector<16x256xf32>
    %cst_395 = arith.constant 9.900000e-01 : f32
    %1170 = vector.broadcast %cst_395 : f32 to vector<16x256xf32>
    %1171 = arith.mulf %1160, %1170 : vector<16x256xf32>
    %cst_396 = arith.constant 2.000000e-03 : f32
    %1172 = vector.broadcast %cst_396 : f32 to vector<16x256xf32>
    %1173 = arith.mulf %1172, %1169 : vector<16x256xf32>
    %1174 = arith.addf %1171, %1173 : vector<16x256xf32>
    %cst_397 = arith.constant 3.000000e+01 : f32
    %1175 = vector.broadcast %cst_397 : f32 to vector<16x256xf32>
    %1176 = arith.cmpf ogt, %1169, %1175 : vector<16x256xf32>
    %1177 = arith.extui %1176 : vector<16x256xi1> to vector<16x256xi32>
    %1178 = arith.sitofp %1177 : vector<16x256xi32> to vector<16x256xf32>
    %1179 = arith.addf %1155, %1178 : vector<16x256xf32>
    %cst_398 = arith.constant -6.500000e+01 : f32
    %1180 = vector.broadcast %cst_398 : f32 to vector<16x256xf32>
    %1181 = arith.select %1176, %1180, %1169 : vector<16x256xi1>, vector<16x256xf32>
    %cst_399 = arith.constant 8.000000e+00 : f32
    %1182 = vector.broadcast %cst_399 : f32 to vector<16x256xf32>
    %1183 = arith.addf %1174, %1182 : vector<16x256xf32>
    %1184 = arith.select %1176, %1183, %1174 : vector<16x256xi1>, vector<16x256xf32>
    %c48_i32 = arith.constant 48 : i32
    %cst_400 = arith.constant 2.000000e-02 : f32
    %1185 = vector.broadcast %cst_400 : f32 to vector<16x256xf32>
    %1186 = arith.mulf %1185, %1181 : vector<16x256xf32>
    %cst_401 = arith.constant 3.500000e+00 : f32
    %1187 = vector.broadcast %cst_401 : f32 to vector<16x256xf32>
    %1188 = arith.addf %1186, %1187 : vector<16x256xf32>
    %1189 = arith.mulf %1181, %1188 : vector<16x256xf32>
    %cst_402 = arith.constant -5.000000e-01 : f32
    %1190 = vector.broadcast %cst_402 : f32 to vector<16x256xf32>
    %1191 = arith.mulf %1190, %1184 : vector<16x256xf32>
    %1192 = arith.addf %1191, %29 : vector<16x256xf32>
    %1193 = arith.addf %1189, %1192 : vector<16x256xf32>
    %cst_403 = arith.constant 9.900000e-01 : f32
    %1194 = vector.broadcast %cst_403 : f32 to vector<16x256xf32>
    %1195 = arith.mulf %1184, %1194 : vector<16x256xf32>
    %cst_404 = arith.constant 2.000000e-03 : f32
    %1196 = vector.broadcast %cst_404 : f32 to vector<16x256xf32>
    %1197 = arith.mulf %1196, %1193 : vector<16x256xf32>
    %1198 = arith.addf %1195, %1197 : vector<16x256xf32>
    %cst_405 = arith.constant 3.000000e+01 : f32
    %1199 = vector.broadcast %cst_405 : f32 to vector<16x256xf32>
    %1200 = arith.cmpf ogt, %1193, %1199 : vector<16x256xf32>
    %1201 = arith.extui %1200 : vector<16x256xi1> to vector<16x256xi32>
    %1202 = arith.sitofp %1201 : vector<16x256xi32> to vector<16x256xf32>
    %1203 = arith.addf %1179, %1202 : vector<16x256xf32>
    %cst_406 = arith.constant -6.500000e+01 : f32
    %1204 = vector.broadcast %cst_406 : f32 to vector<16x256xf32>
    %1205 = arith.select %1200, %1204, %1193 : vector<16x256xi1>, vector<16x256xf32>
    %cst_407 = arith.constant 8.000000e+00 : f32
    %1206 = vector.broadcast %cst_407 : f32 to vector<16x256xf32>
    %1207 = arith.addf %1198, %1206 : vector<16x256xf32>
    %1208 = arith.select %1200, %1207, %1198 : vector<16x256xi1>, vector<16x256xf32>
    %c49_i32 = arith.constant 49 : i32
    %cst_408 = arith.constant 2.000000e-02 : f32
    %1209 = vector.broadcast %cst_408 : f32 to vector<16x256xf32>
    %1210 = arith.mulf %1209, %1205 : vector<16x256xf32>
    %cst_409 = arith.constant 3.500000e+00 : f32
    %1211 = vector.broadcast %cst_409 : f32 to vector<16x256xf32>
    %1212 = arith.addf %1210, %1211 : vector<16x256xf32>
    %1213 = arith.mulf %1205, %1212 : vector<16x256xf32>
    %cst_410 = arith.constant -5.000000e-01 : f32
    %1214 = vector.broadcast %cst_410 : f32 to vector<16x256xf32>
    %1215 = arith.mulf %1214, %1208 : vector<16x256xf32>
    %1216 = arith.addf %1215, %29 : vector<16x256xf32>
    %1217 = arith.addf %1213, %1216 : vector<16x256xf32>
    %cst_411 = arith.constant 9.900000e-01 : f32
    %1218 = vector.broadcast %cst_411 : f32 to vector<16x256xf32>
    %1219 = arith.mulf %1208, %1218 : vector<16x256xf32>
    %cst_412 = arith.constant 2.000000e-03 : f32
    %1220 = vector.broadcast %cst_412 : f32 to vector<16x256xf32>
    %1221 = arith.mulf %1220, %1217 : vector<16x256xf32>
    %1222 = arith.addf %1219, %1221 : vector<16x256xf32>
    %cst_413 = arith.constant 3.000000e+01 : f32
    %1223 = vector.broadcast %cst_413 : f32 to vector<16x256xf32>
    %1224 = arith.cmpf ogt, %1217, %1223 : vector<16x256xf32>
    %1225 = arith.extui %1224 : vector<16x256xi1> to vector<16x256xi32>
    %1226 = arith.sitofp %1225 : vector<16x256xi32> to vector<16x256xf32>
    %1227 = arith.addf %1203, %1226 : vector<16x256xf32>
    %cst_414 = arith.constant -6.500000e+01 : f32
    %1228 = vector.broadcast %cst_414 : f32 to vector<16x256xf32>
    %1229 = arith.select %1224, %1228, %1217 : vector<16x256xi1>, vector<16x256xf32>
    %cst_415 = arith.constant 8.000000e+00 : f32
    %1230 = vector.broadcast %cst_415 : f32 to vector<16x256xf32>
    %1231 = arith.addf %1222, %1230 : vector<16x256xf32>
    %1232 = arith.select %1224, %1231, %1222 : vector<16x256xi1>, vector<16x256xf32>
    %cst_416 = arith.constant 2.000000e-02 : f32
    %1233 = vector.broadcast %cst_416 : f32 to vector<16x256xf32>
    %1234 = arith.mulf %1227, %1233 : vector<16x256xf32>
    %c0_417 = arith.constant 0 : index
    %c0_418 = arith.constant 0 : index
    %1235 = vector.load %arg5[%c0_417, %c0_418] : memref<16x256xf32, #tpu.memory_space<vmem>>, vector<16x256xf32>
    tpu.vector_store %arg5[%c0_417, %c0_418], %1234 {strides = array<i32>} : memref<16x256xf32, #tpu.memory_space<vmem>>, vector<16x256xf32>,
    return
  }
  func.func @transform_0(%arg0: i32) -> (i32, i32) {
    %c0_i32 = arith.constant 0 : i32
    %c0_i32_0 = arith.constant 0 : i32
    return %arg0, %c0_i32 : i32, i32
  }
  func.func @transform_1(%arg0: i32) -> (i32, i32) {
    %c0_i32 = arith.constant 0 : i32
    %c0_i32_0 = arith.constant 0 : i32
    return %arg0, %c0_i32 : i32, i32
  }
  func.func @transform_2(%arg0: i32) -> (i32, i32) {
    %c0_i32 = arith.constant 0 : i32
    %c0_i32_0 = arith.constant 0 : i32
    %c0_i32_1 = arith.constant 0 : i32
    return %c0_i32, %c0_i32_0 : i32, i32
  }
  func.func @transform_3(%arg0: i32) -> (i32, i32, i32) {
    %c0_i32 = arith.constant 0 : i32
    %c0_i32_0 = arith.constant 0 : i32
    %c0_i32_1 = arith.constant 0 : i32
    return %c0_i32, %arg0, %c0_i32_0 : i32, i32, i32
  }
  func.func @transform_4(%arg0: i32) -> (i32, i32) {
    %c0_i32 = arith.constant 0 : i32
    %c0_i32_0 = arith.constant 0 : i32
    return %arg0, %c0_i32 : i32, i32
  }
  func.func @transform_5(%arg0: i32) -> (i32, i32) {
    %c0_i32 = arith.constant 0 : i32
    %c0_i32_0 = arith.constant 0 : i32
    return %arg0, %c0_i32 : i32, i32
  }
}

</mosaic_0001>

<bundles_post_ra>
// kernel: s1net_forward_batched.1
= control target key start
LH: loop header
LB: loop body
LE: loop exit
PB: predicated region body
PF: predicated region fallthrough
CT: control target
= control target key end

     0   :  { %11 = vsyncpa [#allocation3], 0  ;;  %s4947_s0 = inlined_call_operand.vmem [shape: f32[16,1], index: 0, kind: input, shape index: {}]   ;;  %s4948_s1 = inlined_call_operand.hbm [shape: f32[16,256], index: 1, kind: input, shape index: {}]   ;;  %s4949_s2 = inlined_call_operand.vmem [shape: f32[2,256], index: 2, kind: input, shape index: {}]   ;;  %s4950_s3 = inlined_call_operand.hbm [shape: f32[2,16,256], index: 3, kind: input, shape index: {}]   ;;  %s4951_s4 = inlined_call_operand.hbm [shape: f32[16,256], index: 4, kind: output, shape index: {0}]   ;;  %s4952_s5 = inlined_call_operand.hbm [shape: f32[16,256], index: 5, kind: output, shape index: {1}]  }
   0x1   :  { %12 = vsyncpa [#allocation6], 0 }
   0x2   :  { %13 = vsyncpa [#allocation4], 0 }
   0x3   :  { %14 = vsyncpa [#allocation9], 0  ;;  %s21_s20 = sshll.u32 %s4948_s1, 4  ;;  %s3698_s21 = smov [#allocation2]   ;;  %s22_s20 = int_to_ptr.hbm [resolvable:$true] %s21_s20 }
   0x4   :  { %s23_s22 = sshll.u32 %s3698_s21, 4  ;;  %s36_s25 = sshll.u32 %s4950_s3, 4  ;;  %s24_s22 = int_to_ptr.vmem [resolvable:$true] %s23_s22  ;;  %s37_s25 = int_to_ptr.hbm [resolvable:$true] %s36_s25 }
   0x5   :  { %s3699_s26 = smov 256   ;;  %s3700_s27 = smov 16  }
   0x6   :  { %29 = dma.hbm_to_vmem [thread:$0]  %s22_s20, 512, %s24_s22, [#allocation3], %s3699_s26, %s3699_s26, %s3700_s27  }
   0x7   :  { %s3701_s28 = smov [#allocation5]  }
   0x8   :  { %s38_s29 = sshll.u32 %s3701_s28, 4  ;;  %s39_s29 = int_to_ptr.vmem [resolvable:$true] %s38_s29 }
   0x9   :  { %44 = dma.hbm_to_vmem [thread:$0]  %s37_s25, 1024, %s39_s29, [#allocation6], %s3699_s26, %s3699_s26, %s3700_s27  }
   0xa   :  { %3690 = dma.done.wait [#allocation3], 512  }
   0xb   :  { %3691 = vsyncadd [#allocation3], 4294966784 }
   0xc   :  { %3692 = dma.done.wait [#allocation6], 1024  }
   0xd   :  { %3693 = vsyncadd [#allocation6], 4294966272  ;;  %v3702_v0 = vmov 0   ;;  %v95_v1 = vld [vmem:[%s4947_s0] sm:$0xff]  ;;  %v96_v2 = vld [vmem:[%s4947_s0 + $0x8] sm:$0xff]  ;;  %s3704_s0 = smov [#allocation8]  }
   0xe   :  { %3585 = vset.pattern.permute.xlu0 %v3702_v0  ;;  %v61_v3 = vld [vmem:[%s4949_s2] sm:$0xf]  ;;  %v54_v14 = vld [vmem:[#allocation5 + $0x8] sm:$0xff]  ;;  %v55_v21 = vld [vmem:[#allocation5 + $0x10] sm:$0xff]  ;;  %s3324_s2 = sshll.u32 %s3704_s0, 4  ;;  %s3326_s11 = sshll.u32 %s4952_s5, 4  ;;  %s3325_s2 = int_to_ptr.vmem [resolvable:$true] %s3324_s2  ;;  %s3327_s11 = int_to_ptr.hbm [resolvable:$true] %s3326_s11 }
   0xf   :  { %107 = vperm.xlu0 %3585, %v95_v1   ;;  %v63_v4 = vperm.slane %v61_v3, 0  ;;  %v73_v5 = vperm.slane %v61_v3, 1  ;;  %v64_v6 = vperm.slane %v61_v3, 2  ;;  %v74_v7 = vperm.slane %v61_v3, 3  ;;  %v53_v10 = vld [vmem:[#allocation5] sm:$0xff]  ;;  %v58_v15 = vld [vmem:[#allocation5 + $0x28] sm:$0xff] }
  0x10   :  { %v57_v11 = vld [vmem:[#allocation5 + $0x20] sm:$0xff]  ;;  %v59_v22 = vld [vmem:[#allocation5 + $0x30] sm:$0xff]  ;;  %v56_v24 = vld [vmem:[#allocation5 + $0x18] sm:$0xff]  ;;  %s3705_s5 = smov [#allocation7]   ;;  %s3313_s15 = sshll.u32 %s4951_s4, 4  ;;  %s3314_s15 = int_to_ptr.hbm [resolvable:$true] %s3313_s15 }
  0x11   :  { %v67_v8 = vperm.slane %v63_v4, 0  ;;  %v77_v9 = vperm.slane %v73_v5, 1  ;;  %v68_v12 = vperm.slane %v64_v6, 0  ;;  %v78_v13 = vperm.slane %v74_v7, 1  ;;  %v60_v25 = vld [vmem:[#allocation5 + $0x38] sm:$0xff]  ;;  %v97_v36 = vld [vmem:[#allocation2] sm:$0xff] }
  0x12   :  { %v98_v37 = vld [vmem:[#allocation2 + $0x8] sm:$0xff]  ;;  %v99_v47 = vld [vmem:[#allocation2 + $0x10] sm:$0xff]  ;;  %v100_v48 = vld [vmem:[#allocation2 + $0x18] sm:$0xff]  ;;  %s3311_s12 = sshll.u32 %s3705_s5, 4  ;;  %s3312_s12 = int_to_ptr.vmem [resolvable:$true] %s3311_s12 }
  0x13   :  { %v69_v16 = vmul.f32 %v67_v8, %v53_v10  ;;  %v79_v17 = vmul.f32 %v77_v9, %v57_v11  ;;  %v70_v18 = vmul.f32 %v68_v12, %v54_v14  ;;  %v80_v19 = vmul.f32 %v78_v13, %v58_v15 }
  0x14   :  { %v71_v26 = vmul.f32 %v67_v8, %v55_v21  ;;  %v81_v27 = vmul.f32 %v77_v9, %v59_v22  ;;  %v72_v28 = vmul.f32 %v68_v12, %v56_v24  ;;  %v82_v29 = vmul.f32 %v78_v13, %v60_v25 }
  0x15   :  { %v83_v20 = vadd.f32 %v79_v17, %v69_v16  ;;  %v84_v23 = vadd.f32 %v80_v19, %v70_v18 }
  0x16   :  { %v85_v30 = vadd.f32 %v81_v27, %v71_v26  ;;  %v86_v31 = vadd.f32 %v82_v29, %v72_v28 }
  0x17   :  { %112 = vperm.xlu0 %3585, %v96_v2   ;;  %3586 = vtanh.f32 %v83_v20 }
  0x18   :  { %3588 = vtanh.f32 %v84_v23 }
  0x19   :  { %3590 = vtanh.f32 %v85_v30 }
  0x1a   :  { %3592 = vtanh.f32 %v86_v31 }
  0x1d   :  { %v3587_v32 = vpop.eup %3586 }
  0x1e   :  { %v3589_v33 = vpop.eup %3588  ;;  %v91_v34 = vmax.f32 %v3587_v32, 0.0 }
  0x1f   :  { %v92_v35 = vmax.f32 %v3589_v33, 0.0  ;;  %v3591_v38 = vpop.eup %3590 }
  0x20   :  { %v101_v39 = vsub.f32 %v91_v34, %v97_v36  ;;  %v3593_v41 = vpop.eup %3592  ;;  %v93_v43 = vmax.f32 %v3591_v38, 0.0 }
  0x21   :  { %v102_v40 = vsub.f32 %v92_v35, %v98_v37  ;;  %v94_v44 = vmax.f32 %v3593_v41, 0.0 }
  0x22   :  { %v103_v51 = vsub.f32 %v93_v43, %v99_v47 }
  0x23   :  { %v104_v52 = vsub.f32 %v94_v44, %v100_v48 }
  0x81   :  { %v108_v42 = vpop.permute.xlu0 %107 }
  0x82   :  { %v115_v45 = vmul.f32 %v108_v42, %v101_v39  ;;  %v116_v46 = vmul.f32 %v108_v42, %v102_v40 }
  0x84   :  { %v119_v49 = vadd.f32 %v115_v45, %v97_v36  ;;  %v120_v50 = vadd.f32 %v116_v46, %v98_v37 }
  0x86   :  { %v123_v53 = vmax.f32 %v119_v49, 0.0  ;;  %v124_v54 = vmax.f32 %v120_v50, 0.0 }
  0x88   :  { %127 = vst [vmem:[#allocation8] sm:$0xff] %v123_v53  ;;  %v131_v55 = vmul.f32 10.0, %v123_v53  ;;  %v132_v56 = vmul.f32 10.0, %v124_v54 }
  0x89   :  { %v113_v57 = vpop.permute.xlu0 %112  ;;  %128 = vst [vmem:[#allocation8 + $0x8] sm:$0xff] %v124_v54 }
  0x8a   :  { %v117_v58 = vmul.f32 %v113_v57, %v103_v51  ;;  %v118_v59 = vmul.f32 %v113_v57, %v104_v52  ;;  %v3547_v60 = vcvt.f32.s32 %v131_v55  ;;  %v3555_v61 = vcvt.f32.s32 %v132_v56 }
  0x8b   :  { %v3545_v1 = vand.u32 2147483647, %v131_v55  ;;  %v3550_v2 = vand.u32 2147483648, %v131_v55  ;;  %v3553_v7 = vand.u32 2147483647, %v132_v56  ;;  %v3558_v9 = vand.u32 2147483648, %v132_v56 }
  0x8c   :  { %v121_v62 = vadd.f32 %v117_v58, %v99_v47  ;;  %v122_v63 = vadd.f32 %v118_v59, %v100_v48  ;;  %v3548_v0 = vcvt.s32.f32 %v3547_v60  ;;  %v3556_v3 = vcvt.s32.f32 %v3555_v61 }
  0x8d   :  { %vm3546_vm0 = vcmp.lt.f32.partialorder %v3545_v1, 8388608.0  ;;  %vm3554_vm1 = vcmp.lt.f32.partialorder %v3553_v7, 8388608.0  ;;  %v3703_v52 = vmov 0.0  }
  0x8e   :  { %v125_v4 = vmax.f32 %v121_v62, 0.0  ;;  %v126_v5 = vmax.f32 %v122_v63, 0.0  ;;  %v3549_v6 = vand.u32 2147483647, %v3548_v0  ;;  %v3557_v8 = vand.u32 2147483647, %v3556_v3 }
  0x90   :  { %129 = vst [vmem:[#allocation8 + $0x10] sm:$0xff] %v125_v4  ;;  %v133_v10 = vmul.f32 10.0, %v125_v4  ;;  %v134_v11 = vmul.f32 10.0, %v126_v5  ;;  %v3551_v12 = vor.u32 %v3550_v2, %v3549_v6  ;;  %v3559_v13 = vor.u32 %v3558_v9, %v3557_v8 }
  0x91   :  { %130 = vst [vmem:[#allocation8 + $0x18] sm:$0xff] %v126_v5 }
  0x92   :  { %v3552_v14 = vsel %vm3546_vm0, %v3551_v12, %v131_v55  ;;  %v3563_v15 = vcvt.f32.s32 %v133_v10  ;;  %v3560_v16 = vsel %vm3554_vm1, %v3559_v13, %v132_v56  ;;  %v3571_v17 = vcvt.f32.s32 %v134_v11  ;;  %3332 = dma.vmem_to_hbm [thread:$0]  %s3325_s2, 512, %s3327_s11, [#allocation9], %s3699_s26, %s3699_s26, %s3700_s27  }
  0x93   :  { %v3757_v19 = vadd.f32 70.0, %v3552_v14  ;;  %v3759_v20 = vadd.f32 70.0, %v3560_v16  ;;  %v3561_v21 = vand.u32 2147483647, %v133_v10  ;;  %v3569_v22 = vand.u32 2147483647, %v134_v11 }
  0x94   :  { %v3564_v18 = vcvt.s32.f32 %v3563_v15  ;;  %v3572_v23 = vcvt.s32.f32 %v3571_v17  ;;  %v3566_v25 = vand.u32 2147483648, %v133_v10  ;;  %v3574_v29 = vand.u32 2147483648, %v134_v11 }
  0x95   :  { %v143_v26 = vadd.f32 7.0, %v3757_v19  ;;  %v144_v27 = vadd.f32 7.0, %v3759_v20  ;;  %vm3562_vm2 = vcmp.lt.f32.partialorder %v3561_v21, 8388608.0  ;;  %vm3570_vm3 = vcmp.lt.f32.partialorder %v3569_v22, 8388608.0 }
  0x96   :  { %v3565_v24 = vand.u32 2147483647, %v3564_v18  ;;  %v3573_v28 = vand.u32 2147483647, %v3572_v23 }
  0x97   :  { %v147_v31 = vadd.f32 -147.0, %v143_v26  ;;  %v148_v32 = vadd.f32 -147.0, %v144_v27 }
  0x98   :  { %v3567_v30 = vor.u32 %v3566_v25, %v3565_v24  ;;  %v3575_v33 = vor.u32 %v3574_v29, %v3573_v28 }
  0x99   :  { %v151_v35 = vmul.f32 0.002, %v147_v31  ;;  %v152_v36 = vmul.f32 0.002, %v148_v32  ;;  %vm159_vm4 = vcmp.gt.f32.partialorder %v147_v31, 30.0  ;;  %vm160_vm5 = vcmp.gt.f32.partialorder %v148_v32, 30.0 }
  0x9a   :  { %v3568_v34 = vsel %vm3562_vm2, %v3567_v30, %v133_v10  ;;  %v3576_v37 = vsel %vm3570_vm3, %v3575_v33, %v134_v11  ;;  %v175_v43 = vsel %vm159_vm4, -65.0, %v147_v31  ;;  %v176_v44 = vsel %vm160_vm5, -65.0, %v148_v32 }
  0x9b   :  { %v3763_v38 = vadd.f32 70.0, %v3568_v34  ;;  %v3765_v39 = vadd.f32 70.0, %v3576_v37  ;;  %v155_v40 = vadd.f32 -13.860001, %v151_v35  ;;  %v156_v41 = vadd.f32 -13.860001, %v152_v36 }
  0x9c   :  { %v187_v48 = vmul.f32 0.02, %v175_v43  ;;  %v188_v50 = vmul.f32 0.02, %v176_v44  ;;  %v3345_v53 = vsel %vm159_vm4, 1.0, %v3703_v52  ;;  %v3346_v63 = vsel %vm160_vm5, 1.0, %v3703_v52 }
  0x9d   :  { %v145_v42 = vadd.f32 7.0, %v3763_v38  ;;  %v146_v45 = vadd.f32 7.0, %v3765_v39  ;;  %v179_v46 = vadd.f32 8.0, %v155_v40  ;;  %v180_v47 = vadd.f32 8.0, %v156_v41 }
  0x9e   :  { %v191_v55 = vadd.f32 3.5, %v187_v48  ;;  %v192_v61 = vadd.f32 3.5, %v188_v50 }
  0x9f   :  { %v149_v49 = vadd.f32 -147.0, %v145_v42  ;;  %v150_v51 = vadd.f32 -147.0, %v146_v45  ;;  %v183_v54 = vsel %vm159_vm4, %v179_v46, %v155_v40  ;;  %v184_v57 = vsel %vm160_vm5, %v180_v47, %v156_v41 }
  0xa0   :  { %v199_v58 = vmul.f32 -0.5, %v183_v54  ;;  %v195_v5 = vmul.f32 %v191_v55, %v175_v43  ;;  %v200_v8 = vmul.f32 -0.5, %v184_v57  ;;  %v196_v13 = vmul.f32 %v192_v61, %v176_v44 }
  0xa1   :  { %v153_v56 = vmul.f32 0.002, %v149_v49  ;;  %vm161_vm6 = vcmp.gt.f32.partialorder %v149_v49, 30.0  ;;  %v154_v59 = vmul.f32 0.002, %v150_v51  ;;  %vm162_vm7 = vcmp.gt.f32.partialorder %v150_v51, 30.0 }
  0xa2   :  { %v177_v60 = vsel %vm161_vm6, -65.0, %v149_v49  ;;  %v178_v0 = vsel %vm162_vm7, -65.0, %v150_v51  ;;  %v3347_v3 = vsel %vm161_vm6, 1.0, %v3703_v52  ;;  %v203_v9 = vadd.f32 %v199_v58, %v3757_v19 }
  0xa3   :  { %v157_v62 = vadd.f32 -13.860001, %v153_v56  ;;  %v189_v1 = vmul.f32 0.02, %v177_v60  ;;  %v158_v2 = vadd.f32 -13.860001, %v154_v59  ;;  %v204_v15 = vadd.f32 %v200_v8, %v3759_v20 }
  0xa4   :  { %v190_v4 = vmul.f32 0.02, %v178_v0  ;;  %v3348_v10 = vsel %vm162_vm7, 1.0, %v3703_v52  ;;  %v207_v16 = vadd.f32 %v203_v9, %v195_v5  ;;  %v211_v17 = vmul.f32 0.99, %v183_v54 }
  0xa5   :  { %v181_v6 = vadd.f32 8.0, %v157_v62  ;;  %v193_v7 = vadd.f32 3.5, %v189_v1  ;;  %v182_v11 = vadd.f32 8.0, %v158_v2  ;;  %v212_v23 = vmul.f32 0.99, %v184_v57 }
  0xa6   :  { %v194_v12 = vadd.f32 3.5, %v190_v4  ;;  %v208_v26 = vadd.f32 %v204_v15, %v196_v13  ;;  %v215_v27 = vmul.f32 0.002, %v207_v16  ;;  %vm223_vm8 = vcmp.gt.f32.partialorder %v207_v16, 30.0 }
  0xa7   :  { %v185_v14 = vsel %vm161_vm6, %v181_v6, %v157_v62  ;;  %v186_v18 = vsel %vm162_vm7, %v182_v11, %v158_v2  ;;  %v197_v21 = vmul.f32 %v193_v7, %v177_v60  ;;  %v3349_v35 = vsel %vm223_vm8, 1.0, %v3703_v52 }
  0xa8   :  { %v201_v22 = vmul.f32 -0.5, %v185_v14  ;;  %v198_v24 = vmul.f32 %v194_v12, %v178_v0  ;;  %v202_v25 = vmul.f32 -0.5, %v186_v18  ;;  %v213_v29 = vmul.f32 0.99, %v185_v14 }
  0xa9   :  { %v214_v30 = vmul.f32 0.99, %v186_v18  ;;  %v216_v32 = vmul.f32 0.002, %v208_v26  ;;  %v219_v33 = vadd.f32 %v215_v27, %v211_v17  ;;  %vm224_vm9 = vcmp.gt.f32.partialorder %v208_v26, 30.0 }
  0xaa   :  { %v205_v28 = vadd.f32 %v201_v22, %v3763_v38  ;;  %v206_v31 = vadd.f32 %v202_v25, %v3765_v39  ;;  %v3350_v36 = vsel %vm224_vm9, 1.0, %v3703_v52  ;;  %v239_v37 = vsel %vm223_vm8, -65.0, %v207_v16 }
  0xab   :  { %v220_v41 = vadd.f32 %v216_v32, %v212_v23  ;;  %v3794_v42 = vadd.f32 %v3349_v35, %v3345_v53  ;;  %v3796_v43 = vadd.f32 %v3350_v36, %v3346_v63  ;;  %v240_v45 = vsel %vm224_vm9, -65.0, %v208_v26 }
  0xac   :  { %v209_v34 = vadd.f32 %v205_v28, %v197_v21  ;;  %v210_v40 = vadd.f32 %v206_v31, %v198_v24  ;;  %v243_v46 = vadd.f32 8.0, %v219_v33  ;;  %v251_v60 = vmul.f32 0.02, %v239_v37 }
  0xad   :  { %v244_v57 = vadd.f32 8.0, %v220_v41  ;;  %v252_v61 = vmul.f32 0.02, %v240_v45 }
  0xae   :  { %v217_v44 = vmul.f32 0.002, %v209_v34  ;;  %vm225_vm10 = vcmp.gt.f32.partialorder %v209_v34, 30.0  ;;  %v218_v47 = vmul.f32 0.002, %v210_v40  ;;  %vm226_vm11 = vcmp.gt.f32.partialorder %v210_v40, 30.0 }
  0xaf   :  { %v3351_v48 = vsel %vm225_vm10, 1.0, %v3703_v52  ;;  %v241_v49 = vsel %vm225_vm10, -65.0, %v209_v34  ;;  %v3352_v51 = vsel %vm226_vm11, 1.0, %v3703_v52  ;;  %v242_v54 = vsel %vm226_vm11, -65.0, %v210_v40 }
  0xb0   :  { %v221_v50 = vadd.f32 %v217_v44, %v213_v29  ;;  %v237_v53 = vadd.f32 %v3351_v48, %v3347_v3  ;;  %v222_v55 = vadd.f32 %v218_v47, %v214_v30  ;;  %v238_v56 = vadd.f32 %v3352_v51, %v3348_v10 }
  0xb1   :  { %v247_v58 = vsel %vm223_vm8, %v243_v46, %v219_v33  ;;  %v248_v0 = vsel %vm224_vm9, %v244_v57, %v220_v41  ;;  %v253_v1 = vmul.f32 0.02, %v241_v49  ;;  %v254_v2 = vmul.f32 0.02, %v242_v54 }
  0xb2   :  { %v245_v59 = vadd.f32 8.0, %v221_v50  ;;  %v263_v62 = vmul.f32 -0.5, %v247_v58  ;;  %v246_v63 = vadd.f32 8.0, %v222_v55  ;;  %v255_v5 = vadd.f32 3.5, %v251_v60 }
  0xb3   :  { %v256_v3 = vadd.f32 3.5, %v252_v61  ;;  %v264_v6 = vmul.f32 -0.5, %v248_v0  ;;  %v257_v8 = vadd.f32 3.5, %v253_v1  ;;  %v258_v9 = vadd.f32 3.5, %v254_v2 }
  0xb4   :  { %v249_v4 = vsel %vm225_vm10, %v245_v59, %v221_v50  ;;  %v250_v7 = vsel %vm226_vm11, %v246_v63, %v222_v55  ;;  %v259_v11 = vmul.f32 %v255_v5, %v239_v37  ;;  %v267_v13 = vadd.f32 %v263_v62, %v3757_v19 }
  0xb5   :  { %v265_v10 = vmul.f32 -0.5, %v249_v4  ;;  %v266_v12 = vmul.f32 -0.5, %v250_v7  ;;  %v260_v14 = vmul.f32 %v256_v3, %v240_v45  ;;  %v261_v15 = vmul.f32 %v257_v8, %v241_v49 }
  0xb6   :  { %v268_v16 = vadd.f32 %v264_v6, %v3759_v20  ;;  %v262_v18 = vmul.f32 %v258_v9, %v242_v54  ;;  %v271_v22 = vadd.f32 %v267_v13, %v259_v11  ;;  %v275_v23 = vmul.f32 0.99, %v247_v58 }
  0xb7   :  { %v269_v17 = vadd.f32 %v265_v10, %v3763_v38  ;;  %v270_v21 = vadd.f32 %v266_v12, %v3765_v39  ;;  %v276_v26 = vmul.f32 0.99, %v248_v0  ;;  %v277_v27 = vmul.f32 0.99, %v249_v4 }
  0xb8   :  { %v272_v24 = vadd.f32 %v268_v16, %v260_v14  ;;  %v278_v29 = vmul.f32 0.99, %v250_v7  ;;  %v279_v30 = vmul.f32 0.002, %v271_v22  ;;  %vm287_vm12 = vcmp.gt.f32.partialorder %v271_v22, 30.0 }
  0xb9   :  { %v273_v25 = vadd.f32 %v269_v17, %v261_v15  ;;  %v274_v28 = vadd.f32 %v270_v21, %v262_v18  ;;  %v3353_v35 = vsel %vm287_vm12, 1.0, %v3703_v52  ;;  %v303_v50 = vsel %vm287_vm12, -65.0, %v271_v22 }
  0xba   :  { %v280_v31 = vmul.f32 0.002, %v272_v24  ;;  %vm288_vm13 = vcmp.gt.f32.partialorder %v272_v24, 30.0  ;;  %v283_v34 = vadd.f32 %v279_v30, %v275_v23  ;;  %v299_v46 = vadd.f32 %v3353_v35, %v3794_v42 }
  0xbb   :  { %v281_v32 = vmul.f32 0.002, %v273_v25  ;;  %vm289_vm14 = vcmp.gt.f32.partialorder %v273_v25, 30.0  ;;  %v282_v33 = vmul.f32 0.002, %v274_v28  ;;  %vm290_vm15 = vcmp.gt.f32.partialorder %v274_v28, 30.0 }
  0xbc   :  { %v284_v36 = vadd.f32 %v280_v31, %v276_v26  ;;  %v3354_v40 = vsel %vm288_vm13, 1.0, %v3703_v52  ;;  %v3355_v41 = vsel %vm289_vm14, 1.0, %v3703_v52  ;;  %v3356_v45 = vsel %vm290_vm15, 1.0, %v3703_v52 }
  0xbd   :  { %v285_v37 = vadd.f32 %v281_v32, %v277_v27  ;;  %v286_v44 = vadd.f32 %v282_v33, %v278_v29  ;;  %v300_v47 = vadd.f32 %v3354_v40, %v3796_v43  ;;  %v301_v48 = vadd.f32 %v3355_v41, %v237_v53 }
  0xbe   :  { %v302_v49 = vadd.f32 %v3356_v45, %v238_v56  ;;  %v304_v51 = vsel %vm288_vm13, -65.0, %v272_v24  ;;  %v305_v54 = vsel %vm289_vm14, -65.0, %v273_v25  ;;  %v306_v55 = vsel %vm290_vm15, -65.0, %v274_v28 }
  0xbf   :  { %v307_v57 = vadd.f32 8.0, %v283_v34  ;;  %v308_v58 = vadd.f32 8.0, %v284_v36  ;;  %v309_v59 = vadd.f32 8.0, %v285_v37  ;;  %v310_v60 = vadd.f32 8.0, %v286_v44 }
  0xc0   :  { %v315_v61 = vmul.f32 0.02, %v303_v50  ;;  %v316_v62 = vmul.f32 0.02, %v304_v51  ;;  %v317_v53 = vmul.f32 0.02, %v305_v54 }
  0xc1   :  { %v311_v42 = vsel %vm287_vm12, %v307_v57, %v283_v34  ;;  %v312_v43 = vsel %vm288_vm13, %v308_v58, %v284_v36  ;;  %v318_v56 = vmul.f32 0.02, %v306_v55  ;;  %v313_v63 = vsel %vm289_vm14, %v309_v59, %v285_v37 }
  0xc2   :  { %v314_v0 = vsel %vm290_vm15, %v310_v60, %v286_v44  ;;  %v319_v1 = vadd.f32 3.5, %v315_v61  ;;  %v320_v2 = vadd.f32 3.5, %v316_v62  ;;  %v321_v4 = vadd.f32 3.5, %v317_v53 }
  0xc3   :  { %v322_v5 = vadd.f32 3.5, %v318_v56  ;;  %v327_v3 = vmul.f32 -0.5, %v311_v42  ;;  %v328_v6 = vmul.f32 -0.5, %v312_v43  ;;  %v329_v7 = vmul.f32 -0.5, %v313_v63 }
  0xc4   :  { %v330_v8 = vmul.f32 -0.5, %v314_v0  ;;  %v323_v9 = vmul.f32 %v319_v1, %v303_v50  ;;  %v324_v10 = vmul.f32 %v320_v2, %v304_v51  ;;  %v325_v13 = vmul.f32 %v321_v4, %v305_v54 }
  0xc5   :  { %v331_v11 = vadd.f32 %v327_v3, %v3757_v19  ;;  %v332_v12 = vadd.f32 %v328_v6, %v3759_v20  ;;  %v326_v14 = vmul.f32 %v322_v5, %v306_v55  ;;  %v333_v15 = vadd.f32 %v329_v7, %v3763_v38 }
  0xc6   :  { %v334_v16 = vadd.f32 %v330_v8, %v3765_v39  ;;  %v339_v21 = vmul.f32 0.99, %v311_v42  ;;  %v340_v22 = vmul.f32 0.99, %v312_v43  ;;  %v341_v25 = vmul.f32 0.99, %v313_v63 }
  0xc7   :  { %v335_v17 = vadd.f32 %v331_v11, %v323_v9  ;;  %v336_v18 = vadd.f32 %v332_v12, %v324_v10  ;;  %v337_v23 = vadd.f32 %v333_v15, %v325_v13  ;;  %v342_v26 = vmul.f32 0.99, %v314_v0 }
  0xc8   :  { %v338_v24 = vadd.f32 %v334_v16, %v326_v14 }
  0xc9   :  { %v343_v27 = vmul.f32 0.002, %v335_v17  ;;  %v344_v28 = vmul.f32 0.002, %v336_v18  ;;  %vm351_vm0 = vcmp.gt.f32.partialorder %v335_v17, 30.0  ;;  %vm352_vm1 = vcmp.gt.f32.partialorder %v336_v18, 30.0 }
  0xca   :  { %v345_v29 = vmul.f32 0.002, %v337_v23  ;;  %v346_v30 = vmul.f32 0.002, %v338_v24  ;;  %vm353_vm2 = vcmp.gt.f32.partialorder %v337_v23, 30.0  ;;  %vm354_vm3 = vcmp.gt.f32.partialorder %v338_v24, 30.0 }
  0xcb   :  { %v347_v31 = vadd.f32 %v343_v27, %v339_v21  ;;  %v348_v32 = vadd.f32 %v344_v28, %v340_v22  ;;  %v3357_v33 = vsel %vm351_vm0, 1.0, %v3703_v52  ;;  %v3358_v34 = vsel %vm352_vm1, 1.0, %v3703_v52 }
  0xcc   :  { %v349_v35 = vadd.f32 %v345_v29, %v341_v25  ;;  %v350_v36 = vadd.f32 %v346_v30, %v342_v26  ;;  %v3359_v37 = vsel %vm353_vm2, 1.0, %v3703_v52  ;;  %v3360_v40 = vsel %vm354_vm3, 1.0, %v3703_v52 }
  0xcd   :  { %v363_v41 = vadd.f32 %v3357_v33, %v299_v46  ;;  %v364_v44 = vadd.f32 %v3358_v34, %v300_v47  ;;  %v365_v45 = vadd.f32 %v3359_v37, %v301_v48  ;;  %v366_v50 = vadd.f32 %v3360_v40, %v302_v49 }
  0xce   :  { %v367_v51 = vsel %vm351_vm0, -65.0, %v335_v17  ;;  %v368_v54 = vsel %vm352_vm1, -65.0, %v336_v18  ;;  %v369_v55 = vsel %vm353_vm2, -65.0, %v337_v23  ;;  %v370_v57 = vsel %vm354_vm3, -65.0, %v338_v24 }
  0xcf   :  { %v371_v58 = vadd.f32 8.0, %v347_v31  ;;  %v372_v59 = vadd.f32 8.0, %v348_v32  ;;  %v373_v60 = vadd.f32 8.0, %v349_v35  ;;  %v374_v61 = vadd.f32 8.0, %v350_v36 }
  0xd0   :  { %v379_v62 = vmul.f32 0.02, %v367_v51  ;;  %v380_v42 = vmul.f32 0.02, %v368_v54  ;;  %v381_v43 = vmul.f32 0.02, %v369_v55 }
  0xd1   :  { %v375_v46 = vsel %vm351_vm0, %v371_v58, %v347_v31  ;;  %v376_v47 = vsel %vm352_vm1, %v372_v59, %v348_v32  ;;  %v377_v48 = vsel %vm353_vm2, %v373_v60, %v349_v35  ;;  %v378_v49 = vsel %vm354_vm3, %v374_v61, %v350_v36 }
  0xd2   :  { %v382_v53 = vmul.f32 0.02, %v370_v57  ;;  %v383_v56 = vadd.f32 3.5, %v379_v62  ;;  %v384_v63 = vadd.f32 3.5, %v380_v42  ;;  %v385_v0 = vadd.f32 3.5, %v381_v43 }
  0xd3   :  { %v391_v1 = vmul.f32 -0.5, %v375_v46  ;;  %v392_v2 = vmul.f32 -0.5, %v376_v47  ;;  %v393_v4 = vmul.f32 -0.5, %v377_v48  ;;  %v394_v5 = vmul.f32 -0.5, %v378_v49 }
  0xd4   :  { %v386_v3 = vadd.f32 3.5, %v382_v53  ;;  %v387_v6 = vmul.f32 %v383_v56, %v367_v51  ;;  %v388_v7 = vmul.f32 %v384_v63, %v368_v54  ;;  %v389_v8 = vmul.f32 %v385_v0, %v369_v55 }
  0xd5   :  { %v395_v9 = vadd.f32 %v391_v1, %v3757_v19  ;;  %v396_v10 = vadd.f32 %v392_v2, %v3759_v20  ;;  %v397_v11 = vadd.f32 %v393_v4, %v3763_v38  ;;  %v398_v12 = vadd.f32 %v394_v5, %v3765_v39 }
  0xd6   :  { %v390_v13 = vmul.f32 %v386_v3, %v370_v57  ;;  %v403_v17 = vmul.f32 0.99, %v375_v46  ;;  %v404_v21 = vmul.f32 0.99, %v376_v47  ;;  %v405_v22 = vmul.f32 0.99, %v377_v48 }
  0xd7   :  { %v399_v14 = vadd.f32 %v395_v9, %v387_v6  ;;  %v400_v15 = vadd.f32 %v396_v10, %v388_v7  ;;  %v401_v16 = vadd.f32 %v397_v11, %v389_v8  ;;  %v406_v23 = vmul.f32 0.99, %v378_v49 }
  0xd8   :  { %v402_v18 = vadd.f32 %v398_v12, %v390_v13 }
  0xd9   :  { %v407_v24 = vmul.f32 0.002, %v399_v14  ;;  %v408_v25 = vmul.f32 0.002, %v400_v15  ;;  %v409_v26 = vmul.f32 0.002, %v401_v16 }
  0xda   :  { %v410_v27 = vmul.f32 0.002, %v402_v18  ;;  %vm415_vm4 = vcmp.gt.f32.partialorder %v399_v14, 30.0  ;;  %vm416_vm5 = vcmp.gt.f32.partialorder %v400_v15, 30.0  ;;  %vm417_vm6 = vcmp.gt.f32.partialorder %v401_v16, 30.0 }
  0xdb   :  { %v411_v28 = vadd.f32 %v407_v24, %v403_v17  ;;  %v412_v29 = vadd.f32 %v408_v25, %v404_v21  ;;  %v413_v30 = vadd.f32 %v409_v26, %v405_v22  ;;  %vm418_vm7 = vcmp.gt.f32.partialorder %v402_v18, 30.0 }
  0xdc   :  { %v414_v31 = vadd.f32 %v410_v27, %v406_v23  ;;  %v3361_v32 = vsel %vm415_vm4, 1.0, %v3703_v52  ;;  %v3362_v33 = vsel %vm416_vm5, 1.0, %v3703_v52  ;;  %v3363_v34 = vsel %vm417_vm6, 1.0, %v3703_v52 }
  0xdd   :  { %v3364_v35 = vsel %vm418_vm7, 1.0, %v3703_v52  ;;  %v427_v36 = vadd.f32 %v3361_v32, %v363_v41  ;;  %v428_v37 = vadd.f32 %v3362_v33, %v364_v44  ;;  %v429_v40 = vadd.f32 %v3363_v34, %v365_v45 }
  0xde   :  { %v430_v51 = vadd.f32 %v3364_v35, %v366_v50  ;;  %v431_v54 = vsel %vm415_vm4, -65.0, %v399_v14  ;;  %v432_v55 = vsel %vm416_vm5, -65.0, %v400_v15  ;;  %v433_v57 = vsel %vm417_vm6, -65.0, %v401_v16 }
  0xdf   :  { %v434_v58 = vsel %vm418_vm7, -65.0, %v402_v18  ;;  %v435_v59 = vadd.f32 8.0, %v411_v28  ;;  %v436_v60 = vadd.f32 8.0, %v412_v29  ;;  %v437_v61 = vadd.f32 8.0, %v413_v30 }
  0xe0   :  { %v438_v62 = vadd.f32 8.0, %v414_v31  ;;  %v443_v42 = vmul.f32 0.02, %v431_v54  ;;  %v444_v43 = vmul.f32 0.02, %v432_v55 }
  0xe1   :  { %v439_v46 = vsel %vm415_vm4, %v435_v59, %v411_v28  ;;  %v440_v41 = vsel %vm416_vm5, %v436_v60, %v412_v29  ;;  %v441_v44 = vsel %vm417_vm6, %v437_v61, %v413_v30  ;;  %v445_v45 = vmul.f32 0.02, %v433_v57 }
  0xe2   :  { %v442_v50 = vsel %vm418_vm7, %v438_v62, %v414_v31  ;;  %v446_v47 = vmul.f32 0.02, %v434_v58  ;;  %v447_v48 = vadd.f32 3.5, %v443_v42  ;;  %v448_v49 = vadd.f32 3.5, %v444_v43 }
  0xe3   :  { %v449_v53 = vadd.f32 3.5, %v445_v45  ;;  %v455_v56 = vmul.f32 -0.5, %v439_v46  ;;  %v456_v63 = vmul.f32 -0.5, %v440_v41  ;;  %v457_v0 = vmul.f32 -0.5, %v441_v44 }
  0xe4   :  { %v450_v1 = vadd.f32 3.5, %v446_v47  ;;  %v451_v2 = vmul.f32 %v447_v48, %v431_v54  ;;  %v452_v4 = vmul.f32 %v448_v49, %v432_v55  ;;  %v458_v5 = vmul.f32 -0.5, %v442_v50 }
  0xe5   :  { %v453_v3 = vmul.f32 %v449_v53, %v433_v57  ;;  %v459_v6 = vadd.f32 %v455_v56, %v3757_v19  ;;  %v460_v7 = vadd.f32 %v456_v63, %v3759_v20  ;;  %v461_v8 = vadd.f32 %v457_v0, %v3763_v38 }
  0xe6   :  { %v454_v9 = vmul.f32 %v450_v1, %v434_v58  ;;  %v462_v10 = vadd.f32 %v458_v5, %v3765_v39  ;;  %v467_v14 = vmul.f32 0.99, %v439_v46  ;;  %v468_v16 = vmul.f32 0.99, %v440_v41 }
  0xe7   :  { %v463_v11 = vadd.f32 %v459_v6, %v451_v2  ;;  %v464_v12 = vadd.f32 %v460_v7, %v452_v4  ;;  %v465_v13 = vadd.f32 %v461_v8, %v453_v3  ;;  %v469_v17 = vmul.f32 0.99, %v441_v44 }
  0xe8   :  { %v466_v15 = vadd.f32 %v462_v10, %v454_v9  ;;  %v470_v18 = vmul.f32 0.99, %v442_v50 }
  0xe9   :  { %v471_v21 = vmul.f32 0.002, %v463_v11  ;;  %v472_v22 = vmul.f32 0.002, %v464_v12  ;;  %v473_v23 = vmul.f32 0.002, %v465_v13 }
  0xea   :  { %v474_v24 = vmul.f32 0.002, %v466_v15  ;;  %vm479_vm8 = vcmp.gt.f32.partialorder %v463_v11, 30.0  ;;  %vm480_vm9 = vcmp.gt.f32.partialorder %v464_v12, 30.0  ;;  %vm481_vm10 = vcmp.gt.f32.partialorder %v465_v13, 30.0 }
  0xeb   :  { %v475_v25 = vadd.f32 %v471_v21, %v467_v14  ;;  %v476_v26 = vadd.f32 %v472_v22, %v468_v16  ;;  %v477_v27 = vadd.f32 %v473_v23, %v469_v17  ;;  %vm482_vm11 = vcmp.gt.f32.partialorder %v466_v15, 30.0 }
  0xec   :  { %v478_v28 = vadd.f32 %v474_v24, %v470_v18  ;;  %v3365_v29 = vsel %vm479_vm8, 1.0, %v3703_v52  ;;  %v3366_v30 = vsel %vm480_vm9, 1.0, %v3703_v52  ;;  %v3367_v31 = vsel %vm481_vm10, 1.0, %v3703_v52 }
  0xed   :  { %v3368_v32 = vsel %vm482_vm11, 1.0, %v3703_v52  ;;  %v491_v33 = vadd.f32 %v3365_v29, %v427_v36  ;;  %v492_v34 = vadd.f32 %v3366_v30, %v428_v37  ;;  %v493_v35 = vadd.f32 %v3367_v31, %v429_v40 }
  0xee   :  { %v494_v54 = vadd.f32 %v3368_v32, %v430_v51  ;;  %v495_v55 = vsel %vm479_vm8, -65.0, %v463_v11  ;;  %v496_v57 = vsel %vm480_vm9, -65.0, %v464_v12  ;;  %v497_v58 = vsel %vm481_vm10, -65.0, %v465_v13 }
  0xef   :  { %v498_v59 = vsel %vm482_vm11, -65.0, %v466_v15  ;;  %v499_v60 = vadd.f32 8.0, %v475_v25  ;;  %v500_v61 = vadd.f32 8.0, %v476_v26  ;;  %v501_v62 = vadd.f32 8.0, %v477_v27 }
  0xf0   :  { %v502_v42 = vadd.f32 8.0, %v478_v28  ;;  %v507_v43 = vmul.f32 0.02, %v495_v55  ;;  %v508_v46 = vmul.f32 0.02, %v496_v57 }
  0xf1   :  { %v503_v41 = vsel %vm479_vm8, %v499_v60, %v475_v25  ;;  %v504_v36 = vsel %vm480_vm9, %v500_v61, %v476_v26  ;;  %v505_v37 = vsel %vm481_vm10, %v501_v62, %v477_v27  ;;  %v509_v40 = vmul.f32 0.02, %v497_v58 }
  0xf2   :  { %v506_v51 = vsel %vm482_vm11, %v502_v42, %v478_v28  ;;  %v510_v44 = vmul.f32 0.02, %v498_v59  ;;  %v511_v45 = vadd.f32 3.5, %v507_v43  ;;  %v512_v50 = vadd.f32 3.5, %v508_v46 }
  0xf3   :  { %v513_v47 = vadd.f32 3.5, %v509_v40  ;;  %v519_v48 = vmul.f32 -0.5, %v503_v41  ;;  %v520_v49 = vmul.f32 -0.5, %v504_v36  ;;  %v521_v53 = vmul.f32 -0.5, %v505_v37 }
  0xf4   :  { %v514_v56 = vadd.f32 3.5, %v510_v44  ;;  %v515_v63 = vmul.f32 %v511_v45, %v495_v55  ;;  %v516_v0 = vmul.f32 %v512_v50, %v496_v57  ;;  %v522_v1 = vmul.f32 -0.5, %v506_v51 }
  0xf5   :  { %v517_v2 = vmul.f32 %v513_v47, %v497_v58  ;;  %v523_v4 = vadd.f32 %v519_v48, %v3757_v19  ;;  %v524_v5 = vadd.f32 %v520_v49, %v3759_v20  ;;  %v525_v3 = vadd.f32 %v521_v53, %v3763_v38 }
  0xf6   :  { %v518_v6 = vmul.f32 %v514_v56, %v498_v59  ;;  %v526_v7 = vadd.f32 %v522_v1, %v3765_v39  ;;  %v531_v11 = vmul.f32 0.99, %v503_v41  ;;  %v532_v13 = vmul.f32 0.99, %v504_v36 }
  0xf7   :  { %v527_v8 = vadd.f32 %v523_v4, %v515_v63  ;;  %v528_v9 = vadd.f32 %v524_v5, %v516_v0  ;;  %v529_v10 = vadd.f32 %v525_v3, %v517_v2  ;;  %v533_v14 = vmul.f32 0.99, %v505_v37 }
  0xf8   :  { %v530_v12 = vadd.f32 %v526_v7, %v518_v6  ;;  %v534_v15 = vmul.f32 0.99, %v506_v51 }
  0xf9   :  { %v535_v16 = vmul.f32 0.002, %v527_v8  ;;  %v536_v17 = vmul.f32 0.002, %v528_v9  ;;  %v537_v18 = vmul.f32 0.002, %v529_v10 }
  0xfa   :  { %v538_v21 = vmul.f32 0.002, %v530_v12  ;;  %vm543_vm12 = vcmp.gt.f32.partialorder %v527_v8, 30.0  ;;  %vm544_vm13 = vcmp.gt.f32.partialorder %v528_v9, 30.0  ;;  %vm545_vm14 = vcmp.gt.f32.partialorder %v529_v10, 30.0 }
  0xfb   :  { %v539_v22 = vadd.f32 %v535_v16, %v531_v11  ;;  %v540_v23 = vadd.f32 %v536_v17, %v532_v13  ;;  %v541_v24 = vadd.f32 %v537_v18, %v533_v14  ;;  %vm546_vm15 = vcmp.gt.f32.partialorder %v530_v12, 30.0 }
  0xfc   :  { %v542_v25 = vadd.f32 %v538_v21, %v534_v15  ;;  %v3369_v26 = vsel %vm543_vm12, 1.0, %v3703_v52  ;;  %v3370_v27 = vsel %vm544_vm13, 1.0, %v3703_v52  ;;  %v3371_v28 = vsel %vm545_vm14, 1.0, %v3703_v52 }
  0xfd   :  { %v3372_v29 = vsel %vm546_vm15, 1.0, %v3703_v52  ;;  %v555_v30 = vadd.f32 %v3369_v26, %v491_v33  ;;  %v556_v31 = vadd.f32 %v3370_v27, %v492_v34  ;;  %v557_v32 = vadd.f32 %v3371_v28, %v493_v35 }
  0xfe   :  { %v558_v55 = vadd.f32 %v3372_v29, %v494_v54  ;;  %v559_v57 = vsel %vm543_vm12, -65.0, %v527_v8  ;;  %v560_v58 = vsel %vm544_vm13, -65.0, %v528_v9  ;;  %v561_v59 = vsel %vm545_vm14, -65.0, %v529_v10 }
  0xff   :  { %v562_v60 = vsel %vm546_vm15, -65.0, %v530_v12  ;;  %v563_v61 = vadd.f32 8.0, %v539_v22  ;;  %v564_v62 = vadd.f32 8.0, %v540_v23  ;;  %v565_v42 = vadd.f32 8.0, %v541_v24 }
 0x100   :  { %v566_v43 = vadd.f32 8.0, %v542_v25  ;;  %v571_v46 = vmul.f32 0.02, %v559_v57  ;;  %v572_v41 = vmul.f32 0.02, %v560_v58 }
 0x101   :  { %v567_v36 = vsel %vm543_vm12, %v563_v61, %v539_v22  ;;  %v568_v33 = vsel %vm544_vm13, %v564_v62, %v540_v23  ;;  %v569_v34 = vsel %vm545_vm14, %v565_v42, %v541_v24  ;;  %v573_v35 = vmul.f32 0.02, %v561_v59 }
 0x102   :  { %v570_v54 = vsel %vm546_vm15, %v566_v43, %v542_v25  ;;  %v574_v37 = vmul.f32 0.02, %v562_v60  ;;  %v575_v40 = vadd.f32 3.5, %v571_v46  ;;  %v576_v51 = vadd.f32 3.5, %v572_v41 }
 0x103   :  { %v577_v44 = vadd.f32 3.5, %v573_v35  ;;  %v583_v45 = vmul.f32 -0.5, %v567_v36  ;;  %v584_v50 = vmul.f32 -0.5, %v568_v33  ;;  %v585_v47 = vmul.f32 -0.5, %v569_v34 }
 0x104   :  { %v578_v48 = vadd.f32 3.5, %v574_v37  ;;  %v579_v49 = vmul.f32 %v575_v40, %v559_v57  ;;  %v580_v53 = vmul.f32 %v576_v51, %v560_v58  ;;  %v586_v56 = vmul.f32 -0.5, %v570_v54 }
 0x105   :  { %v581_v63 = vmul.f32 %v577_v44, %v561_v59  ;;  %v587_v0 = vadd.f32 %v583_v45, %v3757_v19  ;;  %v588_v1 = vadd.f32 %v584_v50, %v3759_v20  ;;  %v589_v2 = vadd.f32 %v585_v47, %v3763_v38 }
 0x106   :  { %v582_v4 = vmul.f32 %v578_v48, %v562_v60  ;;  %v590_v5 = vadd.f32 %v586_v56, %v3765_v39  ;;  %v595_v8 = vmul.f32 0.99, %v567_v36  ;;  %v596_v10 = vmul.f32 0.99, %v568_v33 }
 0x107   :  { %v591_v3 = vadd.f32 %v587_v0, %v579_v49  ;;  %v592_v6 = vadd.f32 %v588_v1, %v580_v53  ;;  %v593_v7 = vadd.f32 %v589_v2, %v581_v63  ;;  %v597_v11 = vmul.f32 0.99, %v569_v34 }
 0x108   :  { %v594_v9 = vadd.f32 %v590_v5, %v582_v4  ;;  %v598_v12 = vmul.f32 0.99, %v570_v54 }
 0x109   :  { %v599_v13 = vmul.f32 0.002, %v591_v3  ;;  %v600_v14 = vmul.f32 0.002, %v592_v6  ;;  %v601_v15 = vmul.f32 0.002, %v593_v7 }
 0x10a   :  { %v602_v16 = vmul.f32 0.002, %v594_v9  ;;  %vm607_vm0 = vcmp.gt.f32.partialorder %v591_v3, 30.0  ;;  %vm608_vm1 = vcmp.gt.f32.partialorder %v592_v6, 30.0  ;;  %vm609_vm2 = vcmp.gt.f32.partialorder %v593_v7, 30.0 }
 0x10b   :  { %v603_v17 = vadd.f32 %v599_v13, %v595_v8  ;;  %v604_v18 = vadd.f32 %v600_v14, %v596_v10  ;;  %v605_v21 = vadd.f32 %v601_v15, %v597_v11  ;;  %vm610_vm3 = vcmp.gt.f32.partialorder %v594_v9, 30.0 }
 0x10c   :  { %v606_v22 = vadd.f32 %v602_v16, %v598_v12  ;;  %v3373_v23 = vsel %vm607_vm0, 1.0, %v3703_v52  ;;  %v3374_v24 = vsel %vm608_vm1, 1.0, %v3703_v52  ;;  %v3375_v25 = vsel %vm609_vm2, 1.0, %v3703_v52 }
 0x10d   :  { %v3376_v26 = vsel %vm610_vm3, 1.0, %v3703_v52  ;;  %v619_v27 = vadd.f32 %v3373_v23, %v555_v30  ;;  %v620_v28 = vadd.f32 %v3374_v24, %v556_v31  ;;  %v621_v29 = vadd.f32 %v3375_v25, %v557_v32 }
 0x10e   :  { %v622_v57 = vadd.f32 %v3376_v26, %v558_v55  ;;  %v623_v58 = vsel %vm607_vm0, -65.0, %v591_v3  ;;  %v624_v59 = vsel %vm608_vm1, -65.0, %v592_v6  ;;  %v625_v60 = vsel %vm609_vm2, -65.0, %v593_v7 }
 0x10f   :  { %v626_v61 = vsel %vm610_vm3, -65.0, %v594_v9  ;;  %v627_v62 = vadd.f32 8.0, %v603_v17  ;;  %v628_v42 = vadd.f32 8.0, %v604_v18  ;;  %v629_v43 = vadd.f32 8.0, %v605_v21 }
 0x110   :  { %v630_v46 = vadd.f32 8.0, %v606_v22  ;;  %v635_v41 = vmul.f32 0.02, %v623_v58  ;;  %v636_v36 = vmul.f32 0.02, %v624_v59 }
 0x111   :  { %v631_v33 = vsel %vm607_vm0, %v627_v62, %v603_v17  ;;  %v632_v30 = vsel %vm608_vm1, %v628_v42, %v604_v18  ;;  %v633_v31 = vsel %vm609_vm2, %v629_v43, %v605_v21  ;;  %v637_v32 = vmul.f32 0.02, %v625_v60 }
 0x112   :  { %v634_v55 = vsel %vm610_vm3, %v630_v46, %v606_v22  ;;  %v638_v34 = vmul.f32 0.02, %v626_v61  ;;  %v639_v35 = vadd.f32 3.5, %v635_v41  ;;  %v640_v54 = vadd.f32 3.5, %v636_v36 }
 0x113   :  { %v641_v37 = vadd.f32 3.5, %v637_v32  ;;  %v647_v40 = vmul.f32 -0.5, %v631_v33  ;;  %v648_v51 = vmul.f32 -0.5, %v632_v30  ;;  %v649_v44 = vmul.f32 -0.5, %v633_v31 }
 0x114   :  { %v642_v45 = vadd.f32 3.5, %v638_v34  ;;  %v643_v50 = vmul.f32 %v639_v35, %v623_v58  ;;  %v644_v47 = vmul.f32 %v640_v54, %v624_v59  ;;  %v650_v48 = vmul.f32 -0.5, %v634_v55 }
 0x115   :  { %v645_v49 = vmul.f32 %v641_v37, %v625_v60  ;;  %v651_v53 = vadd.f32 %v647_v40, %v3757_v19  ;;  %v652_v56 = vadd.f32 %v648_v51, %v3759_v20  ;;  %v653_v63 = vadd.f32 %v649_v44, %v3763_v38 }
 0x116   :  { %v646_v0 = vmul.f32 %v642_v45, %v626_v61  ;;  %v654_v1 = vadd.f32 %v650_v48, %v3765_v39  ;;  %v659_v3 = vmul.f32 0.99, %v631_v33  ;;  %v660_v7 = vmul.f32 0.99, %v632_v30 }
 0x117   :  { %v655_v2 = vadd.f32 %v651_v53, %v643_v50  ;;  %v656_v4 = vadd.f32 %v652_v56, %v644_v47  ;;  %v657_v5 = vadd.f32 %v653_v63, %v645_v49  ;;  %v661_v8 = vmul.f32 0.99, %v633_v31 }
 0x118   :  { %v658_v6 = vadd.f32 %v654_v1, %v646_v0  ;;  %v662_v9 = vmul.f32 0.99, %v634_v55 }
 0x119   :  { %v663_v10 = vmul.f32 0.002, %v655_v2  ;;  %v664_v11 = vmul.f32 0.002, %v656_v4  ;;  %v665_v12 = vmul.f32 0.002, %v657_v5 }
 0x11a   :  { %v666_v13 = vmul.f32 0.002, %v658_v6  ;;  %vm671_vm4 = vcmp.gt.f32.partialorder %v655_v2, 30.0  ;;  %vm672_vm5 = vcmp.gt.f32.partialorder %v656_v4, 30.0  ;;  %vm673_vm6 = vcmp.gt.f32.partialorder %v657_v5, 30.0 }
 0x11b   :  { %v667_v14 = vadd.f32 %v663_v10, %v659_v3  ;;  %v668_v15 = vadd.f32 %v664_v11, %v660_v7  ;;  %v669_v16 = vadd.f32 %v665_v12, %v661_v8  ;;  %vm674_vm7 = vcmp.gt.f32.partialorder %v658_v6, 30.0 }
 0x11c   :  { %v670_v17 = vadd.f32 %v666_v13, %v662_v9  ;;  %v3377_v18 = vsel %vm671_vm4, 1.0, %v3703_v52  ;;  %v3378_v21 = vsel %vm672_vm5, 1.0, %v3703_v52  ;;  %v3379_v22 = vsel %vm673_vm6, 1.0, %v3703_v52 }
 0x11d   :  { %v3380_v23 = vsel %vm674_vm7, 1.0, %v3703_v52  ;;  %v683_v24 = vadd.f32 %v3377_v18, %v619_v27  ;;  %v684_v25 = vadd.f32 %v3378_v21, %v620_v28  ;;  %v685_v26 = vadd.f32 %v3379_v22, %v621_v29 }
 0x11e   :  { %v686_v58 = vadd.f32 %v3380_v23, %v622_v57  ;;  %v687_v59 = vsel %vm671_vm4, -65.0, %v655_v2  ;;  %v688_v60 = vsel %vm672_vm5, -65.0, %v656_v4  ;;  %v689_v61 = vsel %vm673_vm6, -65.0, %v657_v5 }
 0x11f   :  { %v690_v62 = vsel %vm674_vm7, -65.0, %v658_v6  ;;  %v691_v42 = vadd.f32 8.0, %v667_v14  ;;  %v692_v43 = vadd.f32 8.0, %v668_v15  ;;  %v693_v46 = vadd.f32 8.0, %v669_v16 }
 0x120   :  { %v694_v41 = vadd.f32 8.0, %v670_v17  ;;  %v699_v36 = vmul.f32 0.02, %v687_v59  ;;  %v700_v33 = vmul.f32 0.02, %v688_v60 }
 0x121   :  { %v695_v30 = vsel %vm671_vm4, %v691_v42, %v667_v14  ;;  %v696_v27 = vsel %vm672_vm5, %v692_v43, %v668_v15  ;;  %v697_v28 = vsel %vm673_vm6, %v693_v46, %v669_v16  ;;  %v701_v29 = vmul.f32 0.02, %v689_v61 }
 0x122   :  { %v698_v57 = vsel %vm674_vm7, %v694_v41, %v670_v17  ;;  %v702_v31 = vmul.f32 0.02, %v690_v62  ;;  %v703_v32 = vadd.f32 3.5, %v699_v36  ;;  %v704_v55 = vadd.f32 3.5, %v700_v33 }
 0x123   :  { %v705_v34 = vadd.f32 3.5, %v701_v29  ;;  %v711_v35 = vmul.f32 -0.5, %v695_v30  ;;  %v712_v54 = vmul.f32 -0.5, %v696_v27  ;;  %v713_v37 = vmul.f32 -0.5, %v697_v28 }
 0x124   :  { %v706_v40 = vadd.f32 3.5, %v702_v31  ;;  %v707_v51 = vmul.f32 %v703_v32, %v687_v59  ;;  %v708_v44 = vmul.f32 %v704_v55, %v688_v60  ;;  %v714_v45 = vmul.f32 -0.5, %v698_v57 }
 0x125   :  { %v709_v50 = vmul.f32 %v705_v34, %v689_v61  ;;  %v715_v47 = vadd.f32 %v711_v35, %v3757_v19  ;;  %v716_v48 = vadd.f32 %v712_v54, %v3759_v20  ;;  %v717_v49 = vadd.f32 %v713_v37, %v3763_v38 }
 0x126   :  { %v710_v53 = vmul.f32 %v706_v40, %v690_v62  ;;  %v718_v56 = vadd.f32 %v714_v45, %v3765_v39  ;;  %v723_v2 = vmul.f32 0.99, %v695_v30  ;;  %v724_v5 = vmul.f32 0.99, %v696_v27 }
 0x127   :  { %v719_v63 = vadd.f32 %v715_v47, %v707_v51  ;;  %v720_v0 = vadd.f32 %v716_v48, %v708_v44  ;;  %v721_v1 = vadd.f32 %v717_v49, %v709_v50  ;;  %v725_v3 = vmul.f32 0.99, %v697_v28 }
 0x128   :  { %v722_v4 = vadd.f32 %v718_v56, %v710_v53  ;;  %v726_v6 = vmul.f32 0.99, %v698_v57 }
 0x129   :  { %v727_v7 = vmul.f32 0.002, %v719_v63  ;;  %v728_v8 = vmul.f32 0.002, %v720_v0  ;;  %v729_v9 = vmul.f32 0.002, %v721_v1 }
 0x12a   :  { %v730_v10 = vmul.f32 0.002, %v722_v4  ;;  %vm735_vm8 = vcmp.gt.f32.partialorder %v719_v63, 30.0  ;;  %vm736_vm9 = vcmp.gt.f32.partialorder %v720_v0, 30.0  ;;  %vm737_vm10 = vcmp.gt.f32.partialorder %v721_v1, 30.0 }
 0x12b   :  { %v731_v11 = vadd.f32 %v727_v7, %v723_v2  ;;  %v732_v12 = vadd.f32 %v728_v8, %v724_v5  ;;  %v733_v13 = vadd.f32 %v729_v9, %v725_v3  ;;  %vm738_vm11 = vcmp.gt.f32.partialorder %v722_v4, 30.0 }
 0x12c   :  { %v734_v14 = vadd.f32 %v730_v10, %v726_v6  ;;  %v3381_v15 = vsel %vm735_vm8, 1.0, %v3703_v52  ;;  %v3382_v16 = vsel %vm736_vm9, 1.0, %v3703_v52  ;;  %v3383_v17 = vsel %vm737_vm10, 1.0, %v3703_v52 }
 0x12d   :  { %v3384_v18 = vsel %vm738_vm11, 1.0, %v3703_v52  ;;  %v747_v21 = vadd.f32 %v3381_v15, %v683_v24  ;;  %v748_v22 = vadd.f32 %v3382_v16, %v684_v25  ;;  %v749_v23 = vadd.f32 %v3383_v17, %v685_v26 }
 0x12e   :  { %v750_v59 = vadd.f32 %v3384_v18, %v686_v58  ;;  %v751_v60 = vsel %vm735_vm8, -65.0, %v719_v63  ;;  %v752_v61 = vsel %vm736_vm9, -65.0, %v720_v0  ;;  %v753_v62 = vsel %vm737_vm10, -65.0, %v721_v1 }
 0x12f   :  { %v754_v42 = vsel %vm738_vm11, -65.0, %v722_v4  ;;  %v755_v43 = vadd.f32 8.0, %v731_v11  ;;  %v756_v46 = vadd.f32 8.0, %v732_v12  ;;  %v757_v41 = vadd.f32 8.0, %v733_v13 }
 0x130   :  { %v758_v36 = vadd.f32 8.0, %v734_v14  ;;  %v763_v33 = vmul.f32 0.02, %v751_v60  ;;  %v764_v30 = vmul.f32 0.02, %v752_v61 }
 0x131   :  { %v759_v27 = vsel %vm735_vm8, %v755_v43, %v731_v11  ;;  %v760_v24 = vsel %vm736_vm9, %v756_v46, %v732_v12  ;;  %v761_v25 = vsel %vm737_vm10, %v757_v41, %v733_v13  ;;  %v765_v26 = vmul.f32 0.02, %v753_v62 }
 0x132   :  { %v762_v58 = vsel %vm738_vm11, %v758_v36, %v734_v14  ;;  %v766_v28 = vmul.f32 0.02, %v754_v42  ;;  %v767_v29 = vadd.f32 3.5, %v763_v33  ;;  %v768_v57 = vadd.f32 3.5, %v764_v30 }
 0x133   :  { %v769_v31 = vadd.f32 3.5, %v765_v26  ;;  %v775_v32 = vmul.f32 -0.5, %v759_v27  ;;  %v776_v55 = vmul.f32 -0.5, %v760_v24  ;;  %v777_v34 = vmul.f32 -0.5, %v761_v25 }
 0x134   :  { %v770_v35 = vadd.f32 3.5, %v766_v28  ;;  %v771_v54 = vmul.f32 %v767_v29, %v751_v60  ;;  %v772_v37 = vmul.f32 %v768_v57, %v752_v61  ;;  %v778_v40 = vmul.f32 -0.5, %v762_v58 }
 0x135   :  { %v773_v51 = vmul.f32 %v769_v31, %v753_v62  ;;  %v779_v44 = vadd.f32 %v775_v32, %v3757_v19  ;;  %v780_v45 = vadd.f32 %v776_v55, %v3759_v20  ;;  %v781_v50 = vadd.f32 %v777_v34, %v3763_v38 }
 0x136   :  { %v774_v47 = vmul.f32 %v770_v35, %v754_v42  ;;  %v782_v48 = vadd.f32 %v778_v40, %v3765_v39  ;;  %v787_v63 = vmul.f32 0.99, %v759_v27  ;;  %v788_v1 = vmul.f32 0.99, %v760_v24 }
 0x137   :  { %v783_v49 = vadd.f32 %v779_v44, %v771_v54  ;;  %v784_v53 = vadd.f32 %v780_v45, %v772_v37  ;;  %v785_v56 = vadd.f32 %v781_v50, %v773_v51  ;;  %v789_v2 = vmul.f32 0.99, %v761_v25 }
 0x138   :  { %v786_v0 = vadd.f32 %v782_v48, %v774_v47  ;;  %v790_v4 = vmul.f32 0.99, %v762_v58 }
 0x139   :  { %v791_v5 = vmul.f32 0.002, %v783_v49  ;;  %v792_v3 = vmul.f32 0.002, %v784_v53  ;;  %v793_v6 = vmul.f32 0.002, %v785_v56 }
 0x13a   :  { %v794_v7 = vmul.f32 0.002, %v786_v0  ;;  %vm799_vm12 = vcmp.gt.f32.partialorder %v783_v49, 30.0  ;;  %vm800_vm13 = vcmp.gt.f32.partialorder %v784_v53, 30.0  ;;  %vm801_vm14 = vcmp.gt.f32.partialorder %v785_v56, 30.0 }
 0x13b   :  { %v795_v8 = vadd.f32 %v791_v5, %v787_v63  ;;  %v796_v9 = vadd.f32 %v792_v3, %v788_v1  ;;  %v797_v10 = vadd.f32 %v793_v6, %v789_v2  ;;  %vm802_vm15 = vcmp.gt.f32.partialorder %v786_v0, 30.0 }
 0x13c   :  { %v798_v11 = vadd.f32 %v794_v7, %v790_v4  ;;  %v3385_v12 = vsel %vm799_vm12, 1.0, %v3703_v52  ;;  %v3386_v13 = vsel %vm800_vm13, 1.0, %v3703_v52  ;;  %v3387_v14 = vsel %vm801_vm14, 1.0, %v3703_v52 }
 0x13d   :  { %v3388_v15 = vsel %vm802_vm15, 1.0, %v3703_v52  ;;  %v811_v16 = vadd.f32 %v3385_v12, %v747_v21  ;;  %v812_v17 = vadd.f32 %v3386_v13, %v748_v22  ;;  %v813_v18 = vadd.f32 %v3387_v14, %v749_v23 }
 0x13e   :  { %v814_v60 = vadd.f32 %v3388_v15, %v750_v59  ;;  %v815_v61 = vsel %vm799_vm12, -65.0, %v783_v49  ;;  %v816_v62 = vsel %vm800_vm13, -65.0, %v784_v53  ;;  %v817_v42 = vsel %vm801_vm14, -65.0, %v785_v56 }
 0x13f   :  { %v818_v43 = vsel %vm802_vm15, -65.0, %v786_v0  ;;  %v819_v46 = vadd.f32 8.0, %v795_v8  ;;  %v820_v41 = vadd.f32 8.0, %v796_v9  ;;  %v821_v36 = vadd.f32 8.0, %v797_v10 }
 0x140   :  { %v822_v33 = vadd.f32 8.0, %v798_v11  ;;  %v827_v30 = vmul.f32 0.02, %v815_v61  ;;  %v828_v27 = vmul.f32 0.02, %v816_v62 }
 0x141   :  { %v823_v24 = vsel %vm799_vm12, %v819_v46, %v795_v8  ;;  %v824_v21 = vsel %vm800_vm13, %v820_v41, %v796_v9  ;;  %v825_v22 = vsel %vm801_vm14, %v821_v36, %v797_v10  ;;  %v829_v23 = vmul.f32 0.02, %v817_v42 }
 0x142   :  { %v826_v59 = vsel %vm802_vm15, %v822_v33, %v798_v11  ;;  %v830_v25 = vmul.f32 0.02, %v818_v43  ;;  %v831_v26 = vadd.f32 3.5, %v827_v30  ;;  %v832_v58 = vadd.f32 3.5, %v828_v27 }
 0x143   :  { %v833_v28 = vadd.f32 3.5, %v829_v23  ;;  %v839_v29 = vmul.f32 -0.5, %v823_v24  ;;  %v840_v57 = vmul.f32 -0.5, %v824_v21  ;;  %v841_v31 = vmul.f32 -0.5, %v825_v22 }
 0x144   :  { %v834_v32 = vadd.f32 3.5, %v830_v25  ;;  %v835_v55 = vmul.f32 %v831_v26, %v815_v61  ;;  %v836_v34 = vmul.f32 %v832_v58, %v816_v62  ;;  %v842_v35 = vmul.f32 -0.5, %v826_v59 }
 0x145   :  { %v837_v54 = vmul.f32 %v833_v28, %v817_v42  ;;  %v843_v37 = vadd.f32 %v839_v29, %v3757_v19  ;;  %v844_v40 = vadd.f32 %v840_v57, %v3759_v20  ;;  %v845_v51 = vadd.f32 %v841_v31, %v3763_v38 }
 0x146   :  { %v838_v44 = vmul.f32 %v834_v32, %v818_v43  ;;  %v846_v45 = vadd.f32 %v842_v35, %v3765_v39  ;;  %v851_v49 = vmul.f32 0.99, %v823_v24  ;;  %v852_v56 = vmul.f32 0.99, %v824_v21 }
 0x147   :  { %v847_v50 = vadd.f32 %v843_v37, %v835_v55  ;;  %v848_v47 = vadd.f32 %v844_v40, %v836_v34  ;;  %v849_v48 = vadd.f32 %v845_v51, %v837_v54  ;;  %v853_v63 = vmul.f32 0.99, %v825_v22 }
 0x148   :  { %v850_v53 = vadd.f32 %v846_v45, %v838_v44  ;;  %v854_v0 = vmul.f32 0.99, %v826_v59 }
 0x149   :  { %v855_v1 = vmul.f32 0.002, %v847_v50  ;;  %v856_v2 = vmul.f32 0.002, %v848_v47  ;;  %v857_v4 = vmul.f32 0.002, %v849_v48 }
 0x14a   :  { %v858_v5 = vmul.f32 0.002, %v850_v53  ;;  %vm863_vm0 = vcmp.gt.f32.partialorder %v847_v50, 30.0  ;;  %vm864_vm1 = vcmp.gt.f32.partialorder %v848_v47, 30.0  ;;  %vm865_vm2 = vcmp.gt.f32.partialorder %v849_v48, 30.0 }
 0x14b   :  { %v859_v3 = vadd.f32 %v855_v1, %v851_v49  ;;  %v860_v6 = vadd.f32 %v856_v2, %v852_v56  ;;  %v861_v7 = vadd.f32 %v857_v4, %v853_v63  ;;  %vm866_vm3 = vcmp.gt.f32.partialorder %v850_v53, 30.0 }
 0x14c   :  { %v862_v8 = vadd.f32 %v858_v5, %v854_v0  ;;  %v3389_v9 = vsel %vm863_vm0, 1.0, %v3703_v52  ;;  %v3390_v10 = vsel %vm864_vm1, 1.0, %v3703_v52  ;;  %v3391_v11 = vsel %vm865_vm2, 1.0, %v3703_v52 }
 0x14d   :  { %v3392_v12 = vsel %vm866_vm3, 1.0, %v3703_v52  ;;  %v875_v13 = vadd.f32 %v3389_v9, %v811_v16  ;;  %v876_v14 = vadd.f32 %v3390_v10, %v812_v17  ;;  %v877_v15 = vadd.f32 %v3391_v11, %v813_v18 }
 0x14e   :  { %v878_v61 = vadd.f32 %v3392_v12, %v814_v60  ;;  %v879_v62 = vsel %vm863_vm0, -65.0, %v847_v50  ;;  %v880_v42 = vsel %vm864_vm1, -65.0, %v848_v47  ;;  %v881_v43 = vsel %vm865_vm2, -65.0, %v849_v48 }
 0x14f   :  { %v882_v46 = vsel %vm866_vm3, -65.0, %v850_v53  ;;  %v883_v41 = vadd.f32 8.0, %v859_v3  ;;  %v884_v36 = vadd.f32 8.0, %v860_v6  ;;  %v885_v33 = vadd.f32 8.0, %v861_v7 }
 0x150   :  { %v886_v30 = vadd.f32 8.0, %v862_v8  ;;  %v891_v27 = vmul.f32 0.02, %v879_v62  ;;  %v892_v24 = vmul.f32 0.02, %v880_v42 }
 0x151   :  { %v887_v21 = vsel %vm863_vm0, %v883_v41, %v859_v3  ;;  %v888_v16 = vsel %vm864_vm1, %v884_v36, %v860_v6  ;;  %v889_v17 = vsel %vm865_vm2, %v885_v33, %v861_v7  ;;  %v893_v18 = vmul.f32 0.02, %v881_v43 }
 0x152   :  { %v890_v60 = vsel %vm866_vm3, %v886_v30, %v862_v8  ;;  %v894_v22 = vmul.f32 0.02, %v882_v46  ;;  %v895_v23 = vadd.f32 3.5, %v891_v27  ;;  %v896_v59 = vadd.f32 3.5, %v892_v24 }
 0x153   :  { %v897_v25 = vadd.f32 3.5, %v893_v18  ;;  %v903_v26 = vmul.f32 -0.5, %v887_v21  ;;  %v904_v58 = vmul.f32 -0.5, %v888_v16  ;;  %v905_v28 = vmul.f32 -0.5, %v889_v17 }
 0x154   :  { %v898_v29 = vadd.f32 3.5, %v894_v22  ;;  %v899_v57 = vmul.f32 %v895_v23, %v879_v62  ;;  %v900_v31 = vmul.f32 %v896_v59, %v880_v42  ;;  %v906_v32 = vmul.f32 -0.5, %v890_v60 }
 0x155   :  { %v901_v55 = vmul.f32 %v897_v25, %v881_v43  ;;  %v907_v34 = vadd.f32 %v903_v26, %v3757_v19  ;;  %v908_v35 = vadd.f32 %v904_v58, %v3759_v20  ;;  %v909_v54 = vadd.f32 %v905_v28, %v3763_v38 }
 0x156   :  { %v902_v37 = vmul.f32 %v898_v29, %v882_v46  ;;  %v910_v40 = vadd.f32 %v906_v32, %v3765_v39  ;;  %v915_v50 = vmul.f32 0.99, %v887_v21  ;;  %v916_v48 = vmul.f32 0.99, %v888_v16 }
 0x157   :  { %v911_v51 = vadd.f32 %v907_v34, %v899_v57  ;;  %v912_v44 = vadd.f32 %v908_v35, %v900_v31  ;;  %v913_v45 = vadd.f32 %v909_v54, %v901_v55  ;;  %v917_v49 = vmul.f32 0.99, %v889_v17 }
 0x158   :  { %v914_v47 = vadd.f32 %v910_v40, %v902_v37  ;;  %v918_v53 = vmul.f32 0.99, %v890_v60 }
 0x159   :  { %v919_v56 = vmul.f32 0.002, %v911_v51  ;;  %v920_v63 = vmul.f32 0.002, %v912_v44  ;;  %v921_v0 = vmul.f32 0.002, %v913_v45 }
 0x15a   :  { %v922_v1 = vmul.f32 0.002, %v914_v47  ;;  %vm927_vm4 = vcmp.gt.f32.partialorder %v911_v51, 30.0  ;;  %vm928_vm5 = vcmp.gt.f32.partialorder %v912_v44, 30.0  ;;  %vm929_vm6 = vcmp.gt.f32.partialorder %v913_v45, 30.0 }
 0x15b   :  { %v923_v2 = vadd.f32 %v919_v56, %v915_v50  ;;  %v924_v4 = vadd.f32 %v920_v63, %v916_v48  ;;  %v925_v5 = vadd.f32 %v921_v0, %v917_v49  ;;  %vm930_vm7 = vcmp.gt.f32.partialorder %v914_v47, 30.0 }
 0x15c   :  { %v926_v3 = vadd.f32 %v922_v1, %v918_v53  ;;  %v3393_v6 = vsel %vm927_vm4, 1.0, %v3703_v52  ;;  %v3394_v7 = vsel %vm928_vm5, 1.0, %v3703_v52  ;;  %v3395_v8 = vsel %vm929_vm6, 1.0, %v3703_v52 }
 0x15d   :  { %v3396_v9 = vsel %vm930_vm7, 1.0, %v3703_v52  ;;  %v939_v10 = vadd.f32 %v3393_v6, %v875_v13  ;;  %v940_v11 = vadd.f32 %v3394_v7, %v876_v14  ;;  %v941_v12 = vadd.f32 %v3395_v8, %v877_v15 }
 0x15e   :  { %v942_v62 = vadd.f32 %v3396_v9, %v878_v61  ;;  %v943_v42 = vsel %vm927_vm4, -65.0, %v911_v51  ;;  %v944_v43 = vsel %vm928_vm5, -65.0, %v912_v44  ;;  %v945_v46 = vsel %vm929_vm6, -65.0, %v913_v45 }
 0x15f   :  { %v946_v41 = vsel %vm930_vm7, -65.0, %v914_v47  ;;  %v947_v36 = vadd.f32 8.0, %v923_v2  ;;  %v948_v33 = vadd.f32 8.0, %v924_v4  ;;  %v949_v30 = vadd.f32 8.0, %v925_v5 }
 0x160   :  { %v950_v27 = vadd.f32 8.0, %v926_v3  ;;  %v955_v24 = vmul.f32 0.02, %v943_v42  ;;  %v956_v21 = vmul.f32 0.02, %v944_v43 }
 0x161   :  { %v951_v16 = vsel %vm927_vm4, %v947_v36, %v923_v2  ;;  %v952_v13 = vsel %vm928_vm5, %v948_v33, %v924_v4  ;;  %v953_v14 = vsel %vm929_vm6, %v949_v30, %v925_v5  ;;  %v957_v15 = vmul.f32 0.02, %v945_v46 }
 0x162   :  { %v954_v61 = vsel %vm930_vm7, %v950_v27, %v926_v3  ;;  %v958_v17 = vmul.f32 0.02, %v946_v41  ;;  %v959_v18 = vadd.f32 3.5, %v955_v24  ;;  %v960_v60 = vadd.f32 3.5, %v956_v21 }
 0x163   :  { %v961_v22 = vadd.f32 3.5, %v957_v15  ;;  %v967_v23 = vmul.f32 -0.5, %v951_v16  ;;  %v968_v59 = vmul.f32 -0.5, %v952_v13  ;;  %v969_v25 = vmul.f32 -0.5, %v953_v14 }
 0x164   :  { %v962_v26 = vadd.f32 3.5, %v958_v17  ;;  %v963_v58 = vmul.f32 %v959_v18, %v943_v42  ;;  %v964_v28 = vmul.f32 %v960_v60, %v944_v43  ;;  %v970_v29 = vmul.f32 -0.5, %v954_v61 }
 0x165   :  { %v965_v57 = vmul.f32 %v961_v22, %v945_v46  ;;  %v971_v31 = vadd.f32 %v967_v23, %v3757_v19  ;;  %v972_v32 = vadd.f32 %v968_v59, %v3759_v20  ;;  %v973_v55 = vadd.f32 %v969_v25, %v3763_v38 }
 0x166   :  { %v966_v34 = vmul.f32 %v962_v26, %v946_v41  ;;  %v974_v35 = vadd.f32 %v970_v29, %v3765_v39  ;;  %v979_v51 = vmul.f32 0.99, %v951_v16  ;;  %v980_v45 = vmul.f32 0.99, %v952_v13 }
 0x167   :  { %v975_v54 = vadd.f32 %v971_v31, %v963_v58  ;;  %v976_v37 = vadd.f32 %v972_v32, %v964_v28  ;;  %v977_v40 = vadd.f32 %v973_v55, %v965_v57  ;;  %v981_v50 = vmul.f32 0.99, %v953_v14 }
 0x168   :  { %v978_v44 = vadd.f32 %v974_v35, %v966_v34  ;;  %v982_v47 = vmul.f32 0.99, %v954_v61 }
 0x169   :  { %v983_v48 = vmul.f32 0.002, %v975_v54  ;;  %v984_v49 = vmul.f32 0.002, %v976_v37  ;;  %v985_v53 = vmul.f32 0.002, %v977_v40 }
 0x16a   :  { %v986_v56 = vmul.f32 0.002, %v978_v44  ;;  %vm991_vm8 = vcmp.gt.f32.partialorder %v975_v54, 30.0  ;;  %vm992_vm9 = vcmp.gt.f32.partialorder %v976_v37, 30.0  ;;  %vm993_vm10 = vcmp.gt.f32.partialorder %v977_v40, 30.0 }
 0x16b   :  { %v987_v63 = vadd.f32 %v983_v48, %v979_v51  ;;  %v988_v0 = vadd.f32 %v984_v49, %v980_v45  ;;  %v989_v1 = vadd.f32 %v985_v53, %v981_v50  ;;  %vm994_vm11 = vcmp.gt.f32.partialorder %v978_v44, 30.0 }
 0x16c   :  { %v990_v2 = vadd.f32 %v986_v56, %v982_v47  ;;  %v3397_v4 = vsel %vm991_vm8, 1.0, %v3703_v52  ;;  %v3398_v5 = vsel %vm992_vm9, 1.0, %v3703_v52  ;;  %v3399_v3 = vsel %vm993_vm10, 1.0, %v3703_v52 }
 0x16d   :  { %v3400_v6 = vsel %vm994_vm11, 1.0, %v3703_v52  ;;  %v1003_v7 = vadd.f32 %v3397_v4, %v939_v10  ;;  %v1004_v8 = vadd.f32 %v3398_v5, %v940_v11  ;;  %v1005_v9 = vadd.f32 %v3399_v3, %v941_v12 }
 0x16e   :  { %v1006_v42 = vadd.f32 %v3400_v6, %v942_v62  ;;  %v1007_v43 = vsel %vm991_vm8, -65.0, %v975_v54  ;;  %v1008_v46 = vsel %vm992_vm9, -65.0, %v976_v37  ;;  %v1009_v41 = vsel %vm993_vm10, -65.0, %v977_v40 }
 0x16f   :  { %v1010_v36 = vsel %vm994_vm11, -65.0, %v978_v44  ;;  %v1011_v33 = vadd.f32 8.0, %v987_v63  ;;  %v1012_v30 = vadd.f32 8.0, %v988_v0  ;;  %v1013_v27 = vadd.f32 8.0, %v989_v1 }
 0x170   :  { %v1014_v24 = vadd.f32 8.0, %v990_v2  ;;  %v1019_v21 = vmul.f32 0.02, %v1007_v43  ;;  %v1020_v16 = vmul.f32 0.02, %v1008_v46 }
 0x171   :  { %v1015_v13 = vsel %vm991_vm8, %v1011_v33, %v987_v63  ;;  %v1016_v10 = vsel %vm992_vm9, %v1012_v30, %v988_v0  ;;  %v1017_v11 = vsel %vm993_vm10, %v1013_v27, %v989_v1  ;;  %v1021_v12 = vmul.f32 0.02, %v1009_v41 }
 0x172   :  { %v1018_v62 = vsel %vm994_vm11, %v1014_v24, %v990_v2  ;;  %v1022_v14 = vmul.f32 0.02, %v1010_v36  ;;  %v1023_v15 = vadd.f32 3.5, %v1019_v21  ;;  %v1024_v61 = vadd.f32 3.5, %v1020_v16 }
 0x173   :  { %v1025_v17 = vadd.f32 3.5, %v1021_v12  ;;  %v1031_v18 = vmul.f32 -0.5, %v1015_v13  ;;  %v1032_v60 = vmul.f32 -0.5, %v1016_v10  ;;  %v1033_v22 = vmul.f32 -0.5, %v1017_v11 }
 0x174   :  { %v1026_v23 = vadd.f32 3.5, %v1022_v14  ;;  %v1027_v59 = vmul.f32 %v1023_v15, %v1007_v43  ;;  %v1028_v25 = vmul.f32 %v1024_v61, %v1008_v46  ;;  %v1034_v26 = vmul.f32 -0.5, %v1018_v62 }
 0x175   :  { %v1029_v58 = vmul.f32 %v1025_v17, %v1009_v41  ;;  %v1035_v28 = vadd.f32 %v1031_v18, %v3757_v19  ;;  %v1036_v29 = vadd.f32 %v1032_v60, %v3759_v20  ;;  %v1037_v57 = vadd.f32 %v1033_v22, %v3763_v38 }
 0x176   :  { %v1030_v31 = vmul.f32 %v1026_v23, %v1010_v36  ;;  %v1038_v32 = vadd.f32 %v1034_v26, %v3765_v39  ;;  %v1043_v54 = vmul.f32 0.99, %v1015_v13  ;;  %v1044_v40 = vmul.f32 0.99, %v1016_v10 }
 0x177   :  { %v1039_v55 = vadd.f32 %v1035_v28, %v1027_v59  ;;  %v1040_v34 = vadd.f32 %v1036_v29, %v1028_v25  ;;  %v1041_v35 = vadd.f32 %v1037_v57, %v1029_v58  ;;  %v1045_v51 = vmul.f32 0.99, %v1017_v11 }
 0x178   :  { %v1042_v37 = vadd.f32 %v1038_v32, %v1030_v31  ;;  %v1046_v44 = vmul.f32 0.99, %v1018_v62 }
 0x179   :  { %v1047_v45 = vmul.f32 0.002, %v1039_v55  ;;  %v1048_v50 = vmul.f32 0.002, %v1040_v34  ;;  %v1049_v47 = vmul.f32 0.002, %v1041_v35 }
 0x17a   :  { %v1050_v48 = vmul.f32 0.002, %v1042_v37  ;;  %vm1055_vm12 = vcmp.gt.f32.partialorder %v1039_v55, 30.0  ;;  %vm1056_vm13 = vcmp.gt.f32.partialorder %v1040_v34, 30.0  ;;  %vm1057_vm14 = vcmp.gt.f32.partialorder %v1041_v35, 30.0 }
 0x17b   :  { %v1051_v49 = vadd.f32 %v1047_v45, %v1043_v54  ;;  %v1052_v53 = vadd.f32 %v1048_v50, %v1044_v40  ;;  %v1053_v56 = vadd.f32 %v1049_v47, %v1045_v51  ;;  %vm1058_vm15 = vcmp.gt.f32.partialorder %v1042_v37, 30.0 }
 0x17c   :  { %v1054_v63 = vadd.f32 %v1050_v48, %v1046_v44  ;;  %v3401_v0 = vsel %vm1055_vm12, 1.0, %v3703_v52  ;;  %v3402_v1 = vsel %vm1056_vm13, 1.0, %v3703_v52  ;;  %v3403_v2 = vsel %vm1057_vm14, 1.0, %v3703_v52 }
 0x17d   :  { %v3404_v4 = vsel %vm1058_vm15, 1.0, %v3703_v52  ;;  %v1067_v5 = vadd.f32 %v3401_v0, %v1003_v7  ;;  %v1068_v3 = vadd.f32 %v3402_v1, %v1004_v8  ;;  %v1069_v6 = vadd.f32 %v3403_v2, %v1005_v9 }
 0x17e   :  { %v1070_v43 = vadd.f32 %v3404_v4, %v1006_v42  ;;  %v1071_v46 = vsel %vm1055_vm12, -65.0, %v1039_v55  ;;  %v1072_v41 = vsel %vm1056_vm13, -65.0, %v1040_v34  ;;  %v1073_v36 = vsel %vm1057_vm14, -65.0, %v1041_v35 }
 0x17f   :  { %v1074_v33 = vsel %vm1058_vm15, -65.0, %v1042_v37  ;;  %v1075_v30 = vadd.f32 8.0, %v1051_v49  ;;  %v1076_v27 = vadd.f32 8.0, %v1052_v53  ;;  %v1077_v24 = vadd.f32 8.0, %v1053_v56 }
 0x180   :  { %v1078_v21 = vadd.f32 8.0, %v1054_v63  ;;  %v1083_v16 = vmul.f32 0.02, %v1071_v46  ;;  %v1084_v13 = vmul.f32 0.02, %v1072_v41 }
 0x181   :  { %v1079_v10 = vsel %vm1055_vm12, %v1075_v30, %v1051_v49  ;;  %v1080_v7 = vsel %vm1056_vm13, %v1076_v27, %v1052_v53  ;;  %v1081_v8 = vsel %vm1057_vm14, %v1077_v24, %v1053_v56  ;;  %v1085_v9 = vmul.f32 0.02, %v1073_v36 }
 0x182   :  { %v1082_v42 = vsel %vm1058_vm15, %v1078_v21, %v1054_v63  ;;  %v1086_v11 = vmul.f32 0.02, %v1074_v33  ;;  %v1087_v12 = vadd.f32 3.5, %v1083_v16  ;;  %v1088_v62 = vadd.f32 3.5, %v1084_v13 }
 0x183   :  { %v1089_v14 = vadd.f32 3.5, %v1085_v9  ;;  %v1095_v15 = vmul.f32 -0.5, %v1079_v10  ;;  %v1096_v61 = vmul.f32 -0.5, %v1080_v7  ;;  %v1097_v17 = vmul.f32 -0.5, %v1081_v8 }
 0x184   :  { %v1090_v18 = vadd.f32 3.5, %v1086_v11  ;;  %v1091_v60 = vmul.f32 %v1087_v12, %v1071_v46  ;;  %v1092_v22 = vmul.f32 %v1088_v62, %v1072_v41  ;;  %v1098_v23 = vmul.f32 -0.5, %v1082_v42 }
 0x185   :  { %v1093_v59 = vmul.f32 %v1089_v14, %v1073_v36  ;;  %v1099_v25 = vadd.f32 %v1095_v15, %v3757_v19  ;;  %v1100_v26 = vadd.f32 %v1096_v61, %v3759_v20  ;;  %v1101_v58 = vadd.f32 %v1097_v17, %v3763_v38 }
 0x186   :  { %v1094_v28 = vmul.f32 %v1090_v18, %v1074_v33  ;;  %v1102_v29 = vadd.f32 %v1098_v23, %v3765_v39  ;;  %v1107_v55 = vmul.f32 0.99, %v1079_v10  ;;  %v1108_v35 = vmul.f32 0.99, %v1080_v7 }
 0x187   :  { %v1103_v57 = vadd.f32 %v1099_v25, %v1091_v60  ;;  %v1104_v31 = vadd.f32 %v1100_v26, %v1092_v22  ;;  %v1105_v32 = vadd.f32 %v1101_v58, %v1093_v59  ;;  %v1109_v54 = vmul.f32 0.99, %v1081_v8 }
 0x188   :  { %v1106_v34 = vadd.f32 %v1102_v29, %v1094_v28  ;;  %v1110_v37 = vmul.f32 0.99, %v1082_v42 }
 0x189   :  { %v1111_v40 = vmul.f32 0.002, %v1103_v57  ;;  %v1112_v51 = vmul.f32 0.002, %v1104_v31  ;;  %v1113_v44 = vmul.f32 0.002, %v1105_v32 }
 0x18a   :  { %v1114_v45 = vmul.f32 0.002, %v1106_v34  ;;  %vm1119_vm0 = vcmp.gt.f32.partialorder %v1103_v57, 30.0  ;;  %vm1120_vm1 = vcmp.gt.f32.partialorder %v1104_v31, 30.0  ;;  %vm1121_vm2 = vcmp.gt.f32.partialorder %v1105_v32, 30.0 }
 0x18b   :  { %v1115_v50 = vadd.f32 %v1111_v40, %v1107_v55  ;;  %v1116_v47 = vadd.f32 %v1112_v51, %v1108_v35  ;;  %v1117_v48 = vadd.f32 %v1113_v44, %v1109_v54  ;;  %vm1122_vm3 = vcmp.gt.f32.partialorder %v1106_v34, 30.0 }
 0x18c   :  { %v1118_v49 = vadd.f32 %v1114_v45, %v1110_v37  ;;  %v3405_v53 = vsel %vm1119_vm0, 1.0, %v3703_v52  ;;  %v3406_v56 = vsel %vm1120_vm1, 1.0, %v3703_v52  ;;  %v3407_v63 = vsel %vm1121_vm2, 1.0, %v3703_v52 }
 0x18d   :  { %v3408_v0 = vsel %vm1122_vm3, 1.0, %v3703_v52  ;;  %v1131_v1 = vadd.f32 %v3405_v53, %v1067_v5  ;;  %v1132_v2 = vadd.f32 %v3406_v56, %v1068_v3  ;;  %v1133_v4 = vadd.f32 %v3407_v63, %v1069_v6 }
 0x18e   :  { %v1134_v46 = vadd.f32 %v3408_v0, %v1070_v43  ;;  %v1135_v41 = vsel %vm1119_vm0, -65.0, %v1103_v57  ;;  %v1136_v36 = vsel %vm1120_vm1, -65.0, %v1104_v31  ;;  %v1137_v33 = vsel %vm1121_vm2, -65.0, %v1105_v32 }
 0x18f   :  { %v1138_v30 = vsel %vm1122_vm3, -65.0, %v1106_v34  ;;  %v1139_v27 = vadd.f32 8.0, %v1115_v50  ;;  %v1140_v24 = vadd.f32 8.0, %v1116_v47  ;;  %v1141_v21 = vadd.f32 8.0, %v1117_v48 }
 0x190   :  { %v1142_v16 = vadd.f32 8.0, %v1118_v49  ;;  %v1147_v13 = vmul.f32 0.02, %v1135_v41  ;;  %v1148_v10 = vmul.f32 0.02, %v1136_v36 }
 0x191   :  { %v1143_v7 = vsel %vm1119_vm0, %v1139_v27, %v1115_v50  ;;  %v1144_v5 = vsel %vm1120_vm1, %v1140_v24, %v1116_v47  ;;  %v1145_v3 = vsel %vm1121_vm2, %v1141_v21, %v1117_v48  ;;  %v1149_v6 = vmul.f32 0.02, %v1137_v33 }
 0x192   :  { %v1146_v43 = vsel %vm1122_vm3, %v1142_v16, %v1118_v49  ;;  %v1150_v8 = vmul.f32 0.02, %v1138_v30  ;;  %v1151_v9 = vadd.f32 3.5, %v1147_v13  ;;  %v1152_v42 = vadd.f32 3.5, %v1148_v10 }
 0x193   :  { %v1153_v11 = vadd.f32 3.5, %v1149_v6  ;;  %v1159_v12 = vmul.f32 -0.5, %v1143_v7  ;;  %v1160_v62 = vmul.f32 -0.5, %v1144_v5  ;;  %v1161_v14 = vmul.f32 -0.5, %v1145_v3 }
 0x194   :  { %v1154_v15 = vadd.f32 3.5, %v1150_v8  ;;  %v1155_v61 = vmul.f32 %v1151_v9, %v1135_v41  ;;  %v1156_v17 = vmul.f32 %v1152_v42, %v1136_v36  ;;  %v1162_v18 = vmul.f32 -0.5, %v1146_v43 }
 0x195   :  { %v1157_v60 = vmul.f32 %v1153_v11, %v1137_v33  ;;  %v1163_v22 = vadd.f32 %v1159_v12, %v3757_v19  ;;  %v1164_v23 = vadd.f32 %v1160_v62, %v3759_v20  ;;  %v1165_v59 = vadd.f32 %v1161_v14, %v3763_v38 }
 0x196   :  { %v1158_v25 = vmul.f32 %v1154_v15, %v1138_v30  ;;  %v1166_v26 = vadd.f32 %v1162_v18, %v3765_v39  ;;  %v1171_v57 = vmul.f32 0.99, %v1143_v7  ;;  %v1172_v32 = vmul.f32 0.99, %v1144_v5 }
 0x197   :  { %v1167_v58 = vadd.f32 %v1163_v22, %v1155_v61  ;;  %v1168_v28 = vadd.f32 %v1164_v23, %v1156_v17  ;;  %v1169_v29 = vadd.f32 %v1165_v59, %v1157_v60  ;;  %v1173_v55 = vmul.f32 0.99, %v1145_v3 }
 0x198   :  { %v1170_v31 = vadd.f32 %v1166_v26, %v1158_v25  ;;  %v1174_v34 = vmul.f32 0.99, %v1146_v43 }
 0x199   :  { %v1175_v35 = vmul.f32 0.002, %v1167_v58  ;;  %v1176_v54 = vmul.f32 0.002, %v1168_v28  ;;  %v1177_v37 = vmul.f32 0.002, %v1169_v29 }
 0x19a   :  { %v1178_v40 = vmul.f32 0.002, %v1170_v31  ;;  %vm1183_vm4 = vcmp.gt.f32.partialorder %v1167_v58, 30.0  ;;  %vm1184_vm5 = vcmp.gt.f32.partialorder %v1168_v28, 30.0  ;;  %vm1185_vm6 = vcmp.gt.f32.partialorder %v1169_v29, 30.0 }
 0x19b   :  { %v1179_v51 = vadd.f32 %v1175_v35, %v1171_v57  ;;  %v1180_v44 = vadd.f32 %v1176_v54, %v1172_v32  ;;  %v1181_v45 = vadd.f32 %v1177_v37, %v1173_v55  ;;  %vm1186_vm7 = vcmp.gt.f32.partialorder %v1170_v31, 30.0 }
 0x19c   :  { %v1182_v50 = vadd.f32 %v1178_v40, %v1174_v34  ;;  %v3409_v47 = vsel %vm1183_vm4, 1.0, %v3703_v52  ;;  %v3410_v48 = vsel %vm1184_vm5, 1.0, %v3703_v52  ;;  %v3411_v49 = vsel %vm1185_vm6, 1.0, %v3703_v52 }
 0x19d   :  { %v3412_v53 = vsel %vm1186_vm7, 1.0, %v3703_v52  ;;  %v1195_v56 = vadd.f32 %v3409_v47, %v1131_v1  ;;  %v1196_v63 = vadd.f32 %v3410_v48, %v1132_v2  ;;  %v1197_v0 = vadd.f32 %v3411_v49, %v1133_v4 }
 0x19e   :  { %v1198_v41 = vadd.f32 %v3412_v53, %v1134_v46  ;;  %v1199_v36 = vsel %vm1183_vm4, -65.0, %v1167_v58  ;;  %v1200_v33 = vsel %vm1184_vm5, -65.0, %v1168_v28  ;;  %v1201_v30 = vsel %vm1185_vm6, -65.0, %v1169_v29 }
 0x19f   :  { %v1202_v27 = vsel %vm1186_vm7, -65.0, %v1170_v31  ;;  %v1203_v24 = vadd.f32 8.0, %v1179_v51  ;;  %v1204_v21 = vadd.f32 8.0, %v1180_v44  ;;  %v1205_v16 = vadd.f32 8.0, %v1181_v45 }
 0x1a0   :  { %v1206_v13 = vadd.f32 8.0, %v1182_v50  ;;  %v1211_v10 = vmul.f32 0.02, %v1199_v36  ;;  %v1212_v7 = vmul.f32 0.02, %v1200_v33 }
 0x1a1   :  { %v1207_v5 = vsel %vm1183_vm4, %v1203_v24, %v1179_v51  ;;  %v1208_v1 = vsel %vm1184_vm5, %v1204_v21, %v1180_v44  ;;  %v1209_v2 = vsel %vm1185_vm6, %v1205_v16, %v1181_v45  ;;  %v1213_v4 = vmul.f32 0.02, %v1201_v30 }
 0x1a2   :  { %v1210_v46 = vsel %vm1186_vm7, %v1206_v13, %v1182_v50  ;;  %v1214_v3 = vmul.f32 0.02, %v1202_v27  ;;  %v1215_v6 = vadd.f32 3.5, %v1211_v10  ;;  %v1216_v43 = vadd.f32 3.5, %v1212_v7 }
 0x1a3   :  { %v1217_v8 = vadd.f32 3.5, %v1213_v4  ;;  %v1223_v9 = vmul.f32 -0.5, %v1207_v5  ;;  %v1224_v42 = vmul.f32 -0.5, %v1208_v1  ;;  %v1225_v11 = vmul.f32 -0.5, %v1209_v2 }
 0x1a4   :  { %v1218_v12 = vadd.f32 3.5, %v1214_v3  ;;  %v1219_v62 = vmul.f32 %v1215_v6, %v1199_v36  ;;  %v1220_v14 = vmul.f32 %v1216_v43, %v1200_v33  ;;  %v1226_v15 = vmul.f32 -0.5, %v1210_v46 }
 0x1a5   :  { %v1221_v61 = vmul.f32 %v1217_v8, %v1201_v30  ;;  %v1227_v17 = vadd.f32 %v1223_v9, %v3757_v19  ;;  %v1228_v18 = vadd.f32 %v1224_v42, %v3759_v20  ;;  %v1229_v60 = vadd.f32 %v1225_v11, %v3763_v38 }
 0x1a6   :  { %v1222_v22 = vmul.f32 %v1218_v12, %v1202_v27  ;;  %v1230_v23 = vadd.f32 %v1226_v15, %v3765_v39  ;;  %v1235_v58 = vmul.f32 0.99, %v1207_v5  ;;  %v1236_v29 = vmul.f32 0.99, %v1208_v1 }
 0x1a7   :  { %v1231_v59 = vadd.f32 %v1227_v17, %v1219_v62  ;;  %v1232_v25 = vadd.f32 %v1228_v18, %v1220_v14  ;;  %v1233_v26 = vadd.f32 %v1229_v60, %v1221_v61  ;;  %v1237_v57 = vmul.f32 0.99, %v1209_v2 }
 0x1a8   :  { %v1234_v28 = vadd.f32 %v1230_v23, %v1222_v22  ;;  %v1238_v31 = vmul.f32 0.99, %v1210_v46 }
 0x1a9   :  { %v1239_v32 = vmul.f32 0.002, %v1231_v59  ;;  %v1240_v55 = vmul.f32 0.002, %v1232_v25  ;;  %v1241_v34 = vmul.f32 0.002, %v1233_v26 }
 0x1aa   :  { %v1242_v35 = vmul.f32 0.002, %v1234_v28  ;;  %vm1247_vm8 = vcmp.gt.f32.partialorder %v1231_v59, 30.0  ;;  %vm1248_vm9 = vcmp.gt.f32.partialorder %v1232_v25, 30.0  ;;  %vm1249_vm10 = vcmp.gt.f32.partialorder %v1233_v26, 30.0 }
 0x1ab   :  { %v1243_v54 = vadd.f32 %v1239_v32, %v1235_v58  ;;  %v1244_v37 = vadd.f32 %v1240_v55, %v1236_v29  ;;  %v1245_v40 = vadd.f32 %v1241_v34, %v1237_v57  ;;  %vm1250_vm11 = vcmp.gt.f32.partialorder %v1234_v28, 30.0 }
 0x1ac   :  { %v1246_v51 = vadd.f32 %v1242_v35, %v1238_v31  ;;  %v3413_v44 = vsel %vm1247_vm8, 1.0, %v3703_v52  ;;  %v3414_v45 = vsel %vm1248_vm9, 1.0, %v3703_v52  ;;  %v3415_v50 = vsel %vm1249_vm10, 1.0, %v3703_v52 }
 0x1ad   :  { %v3416_v47 = vsel %vm1250_vm11, 1.0, %v3703_v52  ;;  %v1259_v48 = vadd.f32 %v3413_v44, %v1195_v56  ;;  %v1260_v49 = vadd.f32 %v3414_v45, %v1196_v63  ;;  %v1261_v53 = vadd.f32 %v3415_v50, %v1197_v0 }
 0x1ae   :  { %v1262_v36 = vadd.f32 %v3416_v47, %v1198_v41  ;;  %v1263_v33 = vsel %vm1247_vm8, -65.0, %v1231_v59  ;;  %v1264_v30 = vsel %vm1248_vm9, -65.0, %v1232_v25  ;;  %v1265_v27 = vsel %vm1249_vm10, -65.0, %v1233_v26 }
 0x1af   :  { %v1266_v24 = vsel %vm1250_vm11, -65.0, %v1234_v28  ;;  %v1267_v21 = vadd.f32 8.0, %v1243_v54  ;;  %v1268_v16 = vadd.f32 8.0, %v1244_v37  ;;  %v1269_v13 = vadd.f32 8.0, %v1245_v40 }
 0x1b0   :  { %v1270_v10 = vadd.f32 8.0, %v1246_v51  ;;  %v1275_v7 = vmul.f32 0.02, %v1263_v33  ;;  %v1276_v5 = vmul.f32 0.02, %v1264_v30 }
 0x1b1   :  { %v1271_v1 = vsel %vm1247_vm8, %v1267_v21, %v1243_v54  ;;  %v1272_v56 = vsel %vm1248_vm9, %v1268_v16, %v1244_v37  ;;  %v1273_v63 = vsel %vm1249_vm10, %v1269_v13, %v1245_v40  ;;  %v1277_v0 = vmul.f32 0.02, %v1265_v27 }
 0x1b2   :  { %v1274_v41 = vsel %vm1250_vm11, %v1270_v10, %v1246_v51  ;;  %v1278_v2 = vmul.f32 0.02, %v1266_v24  ;;  %v1279_v4 = vadd.f32 3.5, %v1275_v7  ;;  %v1280_v46 = vadd.f32 3.5, %v1276_v5 }
 0x1b3   :  { %v1281_v3 = vadd.f32 3.5, %v1277_v0  ;;  %v1287_v6 = vmul.f32 -0.5, %v1271_v1  ;;  %v1288_v43 = vmul.f32 -0.5, %v1272_v56  ;;  %v1289_v8 = vmul.f32 -0.5, %v1273_v63 }
 0x1b4   :  { %v1282_v9 = vadd.f32 3.5, %v1278_v2  ;;  %v1283_v42 = vmul.f32 %v1279_v4, %v1263_v33  ;;  %v1284_v11 = vmul.f32 %v1280_v46, %v1264_v30  ;;  %v1290_v12 = vmul.f32 -0.5, %v1274_v41 }
 0x1b5   :  { %v1285_v62 = vmul.f32 %v1281_v3, %v1265_v27  ;;  %v1291_v14 = vadd.f32 %v1287_v6, %v3757_v19  ;;  %v1292_v15 = vadd.f32 %v1288_v43, %v3759_v20  ;;  %v1293_v61 = vadd.f32 %v1289_v8, %v3763_v38 }
 0x1b6   :  { %v1286_v17 = vmul.f32 %v1282_v9, %v1266_v24  ;;  %v1294_v18 = vadd.f32 %v1290_v12, %v3765_v39  ;;  %v1299_v59 = vmul.f32 0.99, %v1271_v1  ;;  %v1300_v26 = vmul.f32 0.99, %v1272_v56 }
 0x1b7   :  { %v1295_v60 = vadd.f32 %v1291_v14, %v1283_v42  ;;  %v1296_v22 = vadd.f32 %v1292_v15, %v1284_v11  ;;  %v1297_v23 = vadd.f32 %v1293_v61, %v1285_v62  ;;  %v1301_v58 = vmul.f32 0.99, %v1273_v63 }
 0x1b8   :  { %v1298_v25 = vadd.f32 %v1294_v18, %v1286_v17  ;;  %v1302_v28 = vmul.f32 0.99, %v1274_v41 }
 0x1b9   :  { %v1303_v29 = vmul.f32 0.002, %v1295_v60  ;;  %v1304_v57 = vmul.f32 0.002, %v1296_v22  ;;  %v1305_v31 = vmul.f32 0.002, %v1297_v23 }
 0x1ba   :  { %v1306_v32 = vmul.f32 0.002, %v1298_v25  ;;  %vm1311_vm12 = vcmp.gt.f32.partialorder %v1295_v60, 30.0  ;;  %vm1312_vm13 = vcmp.gt.f32.partialorder %v1296_v22, 30.0  ;;  %vm1313_vm14 = vcmp.gt.f32.partialorder %v1297_v23, 30.0 }
 0x1bb   :  { %v1307_v55 = vadd.f32 %v1303_v29, %v1299_v59  ;;  %v1308_v34 = vadd.f32 %v1304_v57, %v1300_v26  ;;  %v1309_v35 = vadd.f32 %v1305_v31, %v1301_v58  ;;  %vm1314_vm15 = vcmp.gt.f32.partialorder %v1298_v25, 30.0 }
 0x1bc   :  { %v1310_v54 = vadd.f32 %v1306_v32, %v1302_v28  ;;  %v3417_v37 = vsel %vm1311_vm12, 1.0, %v3703_v52  ;;  %v3418_v40 = vsel %vm1312_vm13, 1.0, %v3703_v52  ;;  %v3419_v51 = vsel %vm1313_vm14, 1.0, %v3703_v52 }
 0x1bd   :  { %v3420_v44 = vsel %vm1314_vm15, 1.0, %v3703_v52  ;;  %v1323_v45 = vadd.f32 %v3417_v37, %v1259_v48  ;;  %v1324_v50 = vadd.f32 %v3418_v40, %v1260_v49  ;;  %v1325_v47 = vadd.f32 %v3419_v51, %v1261_v53 }
 0x1be   :  { %v1326_v33 = vadd.f32 %v3420_v44, %v1262_v36  ;;  %v1327_v30 = vsel %vm1311_vm12, -65.0, %v1295_v60  ;;  %v1328_v27 = vsel %vm1312_vm13, -65.0, %v1296_v22  ;;  %v1329_v24 = vsel %vm1313_vm14, -65.0, %v1297_v23 }
 0x1bf   :  { %v1330_v21 = vsel %vm1314_vm15, -65.0, %v1298_v25  ;;  %v1331_v16 = vadd.f32 8.0, %v1307_v55  ;;  %v1332_v13 = vadd.f32 8.0, %v1308_v34  ;;  %v1333_v10 = vadd.f32 8.0, %v1309_v35 }
 0x1c0   :  { %v1334_v7 = vadd.f32 8.0, %v1310_v54  ;;  %v1339_v5 = vmul.f32 0.02, %v1327_v30  ;;  %v1340_v1 = vmul.f32 0.02, %v1328_v27 }
 0x1c1   :  { %v1335_v56 = vsel %vm1311_vm12, %v1331_v16, %v1307_v55  ;;  %v1336_v48 = vsel %vm1312_vm13, %v1332_v13, %v1308_v34  ;;  %v1337_v49 = vsel %vm1313_vm14, %v1333_v10, %v1309_v35  ;;  %v1341_v53 = vmul.f32 0.02, %v1329_v24 }
 0x1c2   :  { %v1338_v36 = vsel %vm1314_vm15, %v1334_v7, %v1310_v54  ;;  %v1342_v63 = vmul.f32 0.02, %v1330_v21  ;;  %v1343_v0 = vadd.f32 3.5, %v1339_v5  ;;  %v1344_v41 = vadd.f32 3.5, %v1340_v1 }
 0x1c3   :  { %v1345_v2 = vadd.f32 3.5, %v1341_v53  ;;  %v1351_v4 = vmul.f32 -0.5, %v1335_v56  ;;  %v1352_v46 = vmul.f32 -0.5, %v1336_v48  ;;  %v1353_v3 = vmul.f32 -0.5, %v1337_v49 }
 0x1c4   :  { %v1346_v6 = vadd.f32 3.5, %v1342_v63  ;;  %v1347_v43 = vmul.f32 %v1343_v0, %v1327_v30  ;;  %v1348_v8 = vmul.f32 %v1344_v41, %v1328_v27  ;;  %v1354_v9 = vmul.f32 -0.5, %v1338_v36 }
 0x1c5   :  { %v1349_v42 = vmul.f32 %v1345_v2, %v1329_v24  ;;  %v1355_v11 = vadd.f32 %v1351_v4, %v3757_v19  ;;  %v1356_v12 = vadd.f32 %v1352_v46, %v3759_v20  ;;  %v1357_v62 = vadd.f32 %v1353_v3, %v3763_v38 }
 0x1c6   :  { %v1350_v14 = vmul.f32 %v1346_v6, %v1330_v21  ;;  %v1358_v15 = vadd.f32 %v1354_v9, %v3765_v39  ;;  %v1363_v60 = vmul.f32 0.99, %v1335_v56  ;;  %v1364_v23 = vmul.f32 0.99, %v1336_v48 }
 0x1c7   :  { %v1359_v61 = vadd.f32 %v1355_v11, %v1347_v43  ;;  %v1360_v17 = vadd.f32 %v1356_v12, %v1348_v8  ;;  %v1361_v18 = vadd.f32 %v1357_v62, %v1349_v42  ;;  %v1365_v59 = vmul.f32 0.99, %v1337_v49 }
 0x1c8   :  { %v1362_v22 = vadd.f32 %v1358_v15, %v1350_v14  ;;  %v1366_v25 = vmul.f32 0.99, %v1338_v36 }
 0x1c9   :  { %v1367_v26 = vmul.f32 0.002, %v1359_v61  ;;  %v1368_v58 = vmul.f32 0.002, %v1360_v17  ;;  %v1369_v28 = vmul.f32 0.002, %v1361_v18 }
 0x1ca   :  { %v1370_v29 = vmul.f32 0.002, %v1362_v22  ;;  %vm1375_vm0 = vcmp.gt.f32.partialorder %v1359_v61, 30.0  ;;  %vm1376_vm1 = vcmp.gt.f32.partialorder %v1360_v17, 30.0  ;;  %vm1377_vm2 = vcmp.gt.f32.partialorder %v1361_v18, 30.0 }
 0x1cb   :  { %v1371_v57 = vadd.f32 %v1367_v26, %v1363_v60  ;;  %v1372_v31 = vadd.f32 %v1368_v58, %v1364_v23  ;;  %v1373_v32 = vadd.f32 %v1369_v28, %v1365_v59  ;;  %vm1378_vm3 = vcmp.gt.f32.partialorder %v1362_v22, 30.0 }
 0x1cc   :  { %v1374_v55 = vadd.f32 %v1370_v29, %v1366_v25  ;;  %v3421_v34 = vsel %vm1375_vm0, 1.0, %v3703_v52  ;;  %v3422_v35 = vsel %vm1376_vm1, 1.0, %v3703_v52  ;;  %v3423_v54 = vsel %vm1377_vm2, 1.0, %v3703_v52 }
 0x1cd   :  { %v3424_v37 = vsel %vm1378_vm3, 1.0, %v3703_v52  ;;  %v1387_v40 = vadd.f32 %v3421_v34, %v1323_v45  ;;  %v1388_v51 = vadd.f32 %v3422_v35, %v1324_v50  ;;  %v1389_v44 = vadd.f32 %v3423_v54, %v1325_v47 }
 0x1ce   :  { %v1390_v30 = vadd.f32 %v3424_v37, %v1326_v33  ;;  %v1391_v27 = vsel %vm1375_vm0, -65.0, %v1359_v61  ;;  %v1392_v24 = vsel %vm1376_vm1, -65.0, %v1360_v17  ;;  %v1393_v21 = vsel %vm1377_vm2, -65.0, %v1361_v18 }
 0x1cf   :  { %v1394_v16 = vsel %vm1378_vm3, -65.0, %v1362_v22  ;;  %v1395_v13 = vadd.f32 8.0, %v1371_v57  ;;  %v1396_v10 = vadd.f32 8.0, %v1372_v31  ;;  %v1397_v7 = vadd.f32 8.0, %v1373_v32 }
 0x1d0   :  { %v1398_v5 = vadd.f32 8.0, %v1374_v55  ;;  %v1403_v1 = vmul.f32 0.02, %v1391_v27  ;;  %v1404_v56 = vmul.f32 0.02, %v1392_v24 }
 0x1d1   :  { %v1399_v48 = vsel %vm1375_vm0, %v1395_v13, %v1371_v57  ;;  %v1400_v45 = vsel %vm1376_vm1, %v1396_v10, %v1372_v31  ;;  %v1401_v50 = vsel %vm1377_vm2, %v1397_v7, %v1373_v32  ;;  %v1405_v47 = vmul.f32 0.02, %v1393_v21 }
 0x1d2   :  { %v1402_v33 = vsel %vm1378_vm3, %v1398_v5, %v1374_v55  ;;  %v1406_v49 = vmul.f32 0.02, %v1394_v16  ;;  %v1407_v53 = vadd.f32 3.5, %v1403_v1  ;;  %v1408_v36 = vadd.f32 3.5, %v1404_v56 }
 0x1d3   :  { %v1409_v63 = vadd.f32 3.5, %v1405_v47  ;;  %v1415_v0 = vmul.f32 -0.5, %v1399_v48  ;;  %v1416_v41 = vmul.f32 -0.5, %v1400_v45  ;;  %v1417_v2 = vmul.f32 -0.5, %v1401_v50 }
 0x1d4   :  { %v1410_v4 = vadd.f32 3.5, %v1406_v49  ;;  %v1411_v46 = vmul.f32 %v1407_v53, %v1391_v27  ;;  %v1412_v3 = vmul.f32 %v1408_v36, %v1392_v24  ;;  %v1418_v6 = vmul.f32 -0.5, %v1402_v33 }
 0x1d5   :  { %v1413_v43 = vmul.f32 %v1409_v63, %v1393_v21  ;;  %v1419_v8 = vadd.f32 %v1415_v0, %v3757_v19  ;;  %v1420_v9 = vadd.f32 %v1416_v41, %v3759_v20  ;;  %v1421_v42 = vadd.f32 %v1417_v2, %v3763_v38 }
 0x1d6   :  { %v1414_v11 = vmul.f32 %v1410_v4, %v1394_v16  ;;  %v1422_v12 = vadd.f32 %v1418_v6, %v3765_v39  ;;  %v1427_v61 = vmul.f32 0.99, %v1399_v48  ;;  %v1428_v18 = vmul.f32 0.99, %v1400_v45 }
 0x1d7   :  { %v1423_v62 = vadd.f32 %v1419_v8, %v1411_v46  ;;  %v1424_v14 = vadd.f32 %v1420_v9, %v1412_v3  ;;  %v1425_v15 = vadd.f32 %v1421_v42, %v1413_v43  ;;  %v1429_v60 = vmul.f32 0.99, %v1401_v50 }
 0x1d8   :  { %v1426_v17 = vadd.f32 %v1422_v12, %v1414_v11  ;;  %v1430_v22 = vmul.f32 0.99, %v1402_v33 }
 0x1d9   :  { %v1431_v23 = vmul.f32 0.002, %v1423_v62  ;;  %v1432_v59 = vmul.f32 0.002, %v1424_v14  ;;  %v1433_v25 = vmul.f32 0.002, %v1425_v15 }
 0x1da   :  { %v1434_v26 = vmul.f32 0.002, %v1426_v17  ;;  %vm1439_vm4 = vcmp.gt.f32.partialorder %v1423_v62, 30.0  ;;  %vm1440_vm5 = vcmp.gt.f32.partialorder %v1424_v14, 30.0  ;;  %vm1441_vm6 = vcmp.gt.f32.partialorder %v1425_v15, 30.0 }
 0x1db   :  { %v1435_v58 = vadd.f32 %v1431_v23, %v1427_v61  ;;  %v1436_v28 = vadd.f32 %v1432_v59, %v1428_v18  ;;  %v1437_v29 = vadd.f32 %v1433_v25, %v1429_v60  ;;  %vm1442_vm7 = vcmp.gt.f32.partialorder %v1426_v17, 30.0 }
 0x1dc   :  { %v1438_v57 = vadd.f32 %v1434_v26, %v1430_v22  ;;  %v3425_v31 = vsel %vm1439_vm4, 1.0, %v3703_v52  ;;  %v3426_v32 = vsel %vm1440_vm5, 1.0, %v3703_v52  ;;  %v3427_v55 = vsel %vm1441_vm6, 1.0, %v3703_v52 }
 0x1dd   :  { %v3428_v34 = vsel %vm1442_vm7, 1.0, %v3703_v52  ;;  %v1451_v35 = vadd.f32 %v3425_v31, %v1387_v40  ;;  %v1452_v54 = vadd.f32 %v3426_v32, %v1388_v51  ;;  %v1453_v37 = vadd.f32 %v3427_v55, %v1389_v44 }
 0x1de   :  { %v1454_v27 = vadd.f32 %v3428_v34, %v1390_v30  ;;  %v1455_v24 = vsel %vm1439_vm4, -65.0, %v1423_v62  ;;  %v1456_v21 = vsel %vm1440_vm5, -65.0, %v1424_v14  ;;  %v1457_v16 = vsel %vm1441_vm6, -65.0, %v1425_v15 }
 0x1df   :  { %v1458_v13 = vsel %vm1442_vm7, -65.0, %v1426_v17  ;;  %v1459_v10 = vadd.f32 8.0, %v1435_v58  ;;  %v1460_v7 = vadd.f32 8.0, %v1436_v28  ;;  %v1461_v5 = vadd.f32 8.0, %v1437_v29 }
 0x1e0   :  { %v1462_v1 = vadd.f32 8.0, %v1438_v57  ;;  %v1467_v56 = vmul.f32 0.02, %v1455_v24  ;;  %v1468_v48 = vmul.f32 0.02, %v1456_v21 }
 0x1e1   :  { %v1463_v45 = vsel %vm1439_vm4, %v1459_v10, %v1435_v58  ;;  %v1464_v40 = vsel %vm1440_vm5, %v1460_v7, %v1436_v28  ;;  %v1465_v51 = vsel %vm1441_vm6, %v1461_v5, %v1437_v29  ;;  %v1469_v44 = vmul.f32 0.02, %v1457_v16 }
 0x1e2   :  { %v1466_v30 = vsel %vm1442_vm7, %v1462_v1, %v1438_v57  ;;  %v1470_v50 = vmul.f32 0.02, %v1458_v13  ;;  %v1471_v47 = vadd.f32 3.5, %v1467_v56  ;;  %v1472_v33 = vadd.f32 3.5, %v1468_v48 }
 0x1e3   :  { %v1473_v49 = vadd.f32 3.5, %v1469_v44  ;;  %v1479_v53 = vmul.f32 -0.5, %v1463_v45  ;;  %v1480_v36 = vmul.f32 -0.5, %v1464_v40  ;;  %v1481_v63 = vmul.f32 -0.5, %v1465_v51 }
 0x1e4   :  { %v1474_v0 = vadd.f32 3.5, %v1470_v50  ;;  %v1475_v41 = vmul.f32 %v1471_v47, %v1455_v24  ;;  %v1476_v2 = vmul.f32 %v1472_v33, %v1456_v21  ;;  %v1482_v4 = vmul.f32 -0.5, %v1466_v30 }
 0x1e5   :  { %v1477_v46 = vmul.f32 %v1473_v49, %v1457_v16  ;;  %v1483_v3 = vadd.f32 %v1479_v53, %v3757_v19  ;;  %v1484_v6 = vadd.f32 %v1480_v36, %v3759_v20  ;;  %v1485_v43 = vadd.f32 %v1481_v63, %v3763_v38 }
 0x1e6   :  { %v1478_v8 = vmul.f32 %v1474_v0, %v1458_v13  ;;  %v1486_v9 = vadd.f32 %v1482_v4, %v3765_v39  ;;  %v1491_v62 = vmul.f32 0.99, %v1463_v45  ;;  %v1492_v15 = vmul.f32 0.99, %v1464_v40 }
 0x1e7   :  { %v1487_v42 = vadd.f32 %v1483_v3, %v1475_v41  ;;  %v1488_v11 = vadd.f32 %v1484_v6, %v1476_v2  ;;  %v1489_v12 = vadd.f32 %v1485_v43, %v1477_v46  ;;  %v1493_v61 = vmul.f32 0.99, %v1465_v51 }
 0x1e8   :  { %v1490_v14 = vadd.f32 %v1486_v9, %v1478_v8  ;;  %v1494_v17 = vmul.f32 0.99, %v1466_v30 }
 0x1e9   :  { %v1495_v18 = vmul.f32 0.002, %v1487_v42  ;;  %v1496_v60 = vmul.f32 0.002, %v1488_v11  ;;  %v1497_v22 = vmul.f32 0.002, %v1489_v12 }
 0x1ea   :  { %v1498_v23 = vmul.f32 0.002, %v1490_v14  ;;  %vm1503_vm8 = vcmp.gt.f32.partialorder %v1487_v42, 30.0  ;;  %vm1504_vm9 = vcmp.gt.f32.partialorder %v1488_v11, 30.0  ;;  %vm1505_vm10 = vcmp.gt.f32.partialorder %v1489_v12, 30.0 }
 0x1eb   :  { %v1499_v59 = vadd.f32 %v1495_v18, %v1491_v62  ;;  %v1500_v25 = vadd.f32 %v1496_v60, %v1492_v15  ;;  %v1501_v26 = vadd.f32 %v1497_v22, %v1493_v61  ;;  %vm1506_vm11 = vcmp.gt.f32.partialorder %v1490_v14, 30.0 }
 0x1ec   :  { %v1502_v58 = vadd.f32 %v1498_v23, %v1494_v17  ;;  %v3429_v28 = vsel %vm1503_vm8, 1.0, %v3703_v52  ;;  %v3430_v29 = vsel %vm1504_vm9, 1.0, %v3703_v52  ;;  %v3431_v57 = vsel %vm1505_vm10, 1.0, %v3703_v52 }
 0x1ed   :  { %v3432_v31 = vsel %vm1506_vm11, 1.0, %v3703_v52  ;;  %v1515_v32 = vadd.f32 %v3429_v28, %v1451_v35  ;;  %v1516_v55 = vadd.f32 %v3430_v29, %v1452_v54  ;;  %v1517_v34 = vadd.f32 %v3431_v57, %v1453_v37 }
 0x1ee   :  { %v1518_v24 = vadd.f32 %v3432_v31, %v1454_v27  ;;  %v1519_v21 = vsel %vm1503_vm8, -65.0, %v1487_v42  ;;  %v1520_v16 = vsel %vm1504_vm9, -65.0, %v1488_v11  ;;  %v1521_v13 = vsel %vm1505_vm10, -65.0, %v1489_v12 }
 0x1ef   :  { %v1522_v10 = vsel %vm1506_vm11, -65.0, %v1490_v14  ;;  %v1523_v7 = vadd.f32 8.0, %v1499_v59  ;;  %v1524_v5 = vadd.f32 8.0, %v1500_v25  ;;  %v1525_v1 = vadd.f32 8.0, %v1501_v26 }
 0x1f0   :  { %v1526_v56 = vadd.f32 8.0, %v1502_v58  ;;  %v1531_v48 = vmul.f32 0.02, %v1519_v21  ;;  %v1532_v45 = vmul.f32 0.02, %v1520_v16 }
 0x1f1   :  { %v1527_v40 = vsel %vm1503_vm8, %v1523_v7, %v1499_v59  ;;  %v1528_v35 = vsel %vm1504_vm9, %v1524_v5, %v1500_v25  ;;  %v1529_v54 = vsel %vm1505_vm10, %v1525_v1, %v1501_v26  ;;  %v1533_v37 = vmul.f32 0.02, %v1521_v13 }
 0x1f2   :  { %v1530_v27 = vsel %vm1506_vm11, %v1526_v56, %v1502_v58  ;;  %v1534_v51 = vmul.f32 0.02, %v1522_v10  ;;  %v1535_v44 = vadd.f32 3.5, %v1531_v48  ;;  %v1536_v30 = vadd.f32 3.5, %v1532_v45 }
 0x1f3   :  { %v1537_v50 = vadd.f32 3.5, %v1533_v37  ;;  %v1543_v47 = vmul.f32 -0.5, %v1527_v40  ;;  %v1544_v33 = vmul.f32 -0.5, %v1528_v35  ;;  %v1545_v49 = vmul.f32 -0.5, %v1529_v54 }
 0x1f4   :  { %v1538_v53 = vadd.f32 3.5, %v1534_v51  ;;  %v1539_v36 = vmul.f32 %v1535_v44, %v1519_v21  ;;  %v1540_v63 = vmul.f32 %v1536_v30, %v1520_v16  ;;  %v1546_v0 = vmul.f32 -0.5, %v1530_v27 }
 0x1f5   :  { %v1541_v41 = vmul.f32 %v1537_v50, %v1521_v13  ;;  %v1547_v2 = vadd.f32 %v1543_v47, %v3757_v19  ;;  %v1548_v4 = vadd.f32 %v1544_v33, %v3759_v20  ;;  %v1549_v46 = vadd.f32 %v1545_v49, %v3763_v38 }
 0x1f6   :  { %v1542_v3 = vmul.f32 %v1538_v53, %v1522_v10  ;;  %v1550_v6 = vadd.f32 %v1546_v0, %v3765_v39  ;;  %v1555_v42 = vmul.f32 0.99, %v1527_v40  ;;  %v1556_v12 = vmul.f32 0.99, %v1528_v35 }
 0x1f7   :  { %v1551_v43 = vadd.f32 %v1547_v2, %v1539_v36  ;;  %v1552_v8 = vadd.f32 %v1548_v4, %v1540_v63  ;;  %v1553_v9 = vadd.f32 %v1549_v46, %v1541_v41  ;;  %v1557_v62 = vmul.f32 0.99, %v1529_v54 }
 0x1f8   :  { %v1554_v11 = vadd.f32 %v1550_v6, %v1542_v3  ;;  %v1558_v14 = vmul.f32 0.99, %v1530_v27 }
 0x1f9   :  { %v1559_v15 = vmul.f32 0.002, %v1551_v43  ;;  %v1560_v61 = vmul.f32 0.002, %v1552_v8  ;;  %v1561_v17 = vmul.f32 0.002, %v1553_v9 }
 0x1fa   :  { %v1562_v18 = vmul.f32 0.002, %v1554_v11  ;;  %vm1567_vm12 = vcmp.gt.f32.partialorder %v1551_v43, 30.0  ;;  %vm1568_vm13 = vcmp.gt.f32.partialorder %v1552_v8, 30.0  ;;  %vm1569_vm14 = vcmp.gt.f32.partialorder %v1553_v9, 30.0 }
 0x1fb   :  { %v1563_v60 = vadd.f32 %v1559_v15, %v1555_v42  ;;  %v1564_v22 = vadd.f32 %v1560_v61, %v1556_v12  ;;  %v1565_v23 = vadd.f32 %v1561_v17, %v1557_v62  ;;  %vm1570_vm15 = vcmp.gt.f32.partialorder %v1554_v11, 30.0 }
 0x1fc   :  { %v1566_v59 = vadd.f32 %v1562_v18, %v1558_v14  ;;  %v3433_v25 = vsel %vm1567_vm12, 1.0, %v3703_v52  ;;  %v3434_v26 = vsel %vm1568_vm13, 1.0, %v3703_v52  ;;  %v3435_v58 = vsel %vm1569_vm14, 1.0, %v3703_v52 }
 0x1fd   :  { %v3436_v28 = vsel %vm1570_vm15, 1.0, %v3703_v52  ;;  %v1579_v29 = vadd.f32 %v3433_v25, %v1515_v32  ;;  %v1580_v57 = vadd.f32 %v3434_v26, %v1516_v55  ;;  %v1581_v31 = vadd.f32 %v3435_v58, %v1517_v34 }
 0x1fe   :  { %v1582_v21 = vadd.f32 %v3436_v28, %v1518_v24  ;;  %v1583_v16 = vsel %vm1567_vm12, -65.0, %v1551_v43  ;;  %v1584_v13 = vsel %vm1568_vm13, -65.0, %v1552_v8  ;;  %v1585_v10 = vsel %vm1569_vm14, -65.0, %v1553_v9 }
 0x1ff   :  { %v1586_v7 = vsel %vm1570_vm15, -65.0, %v1554_v11  ;;  %v1587_v5 = vadd.f32 8.0, %v1563_v60  ;;  %v1588_v1 = vadd.f32 8.0, %v1564_v22  ;;  %v1589_v56 = vadd.f32 8.0, %v1565_v23 }
 0x200   :  { %v1590_v48 = vadd.f32 8.0, %v1566_v59  ;;  %v1595_v45 = vmul.f32 0.02, %v1583_v16  ;;  %v1596_v40 = vmul.f32 0.02, %v1584_v13 }
 0x201   :  { %v1591_v35 = vsel %vm1567_vm12, %v1587_v5, %v1563_v60  ;;  %v1592_v32 = vsel %vm1568_vm13, %v1588_v1, %v1564_v22  ;;  %v1593_v55 = vsel %vm1569_vm14, %v1589_v56, %v1565_v23  ;;  %v1597_v34 = vmul.f32 0.02, %v1585_v10 }
 0x202   :  { %v1594_v24 = vsel %vm1570_vm15, %v1590_v48, %v1566_v59  ;;  %v1598_v54 = vmul.f32 0.02, %v1586_v7  ;;  %v1599_v37 = vadd.f32 3.5, %v1595_v45  ;;  %v1600_v27 = vadd.f32 3.5, %v1596_v40 }
 0x203   :  { %v1601_v51 = vadd.f32 3.5, %v1597_v34  ;;  %v1607_v44 = vmul.f32 -0.5, %v1591_v35  ;;  %v1608_v30 = vmul.f32 -0.5, %v1592_v32  ;;  %v1609_v50 = vmul.f32 -0.5, %v1593_v55 }
 0x204   :  { %v1602_v47 = vadd.f32 3.5, %v1598_v54  ;;  %v1603_v33 = vmul.f32 %v1599_v37, %v1583_v16  ;;  %v1604_v49 = vmul.f32 %v1600_v27, %v1584_v13  ;;  %v1610_v53 = vmul.f32 -0.5, %v1594_v24 }
 0x205   :  { %v1605_v36 = vmul.f32 %v1601_v51, %v1585_v10  ;;  %v1611_v63 = vadd.f32 %v1607_v44, %v3757_v19  ;;  %v1612_v0 = vadd.f32 %v1608_v30, %v3759_v20  ;;  %v1613_v41 = vadd.f32 %v1609_v50, %v3763_v38 }
 0x206   :  { %v1606_v2 = vmul.f32 %v1602_v47, %v1586_v7  ;;  %v1614_v4 = vadd.f32 %v1610_v53, %v3765_v39  ;;  %v1619_v43 = vmul.f32 0.99, %v1591_v35  ;;  %v1620_v9 = vmul.f32 0.99, %v1592_v32 }
 0x207   :  { %v1615_v46 = vadd.f32 %v1611_v63, %v1603_v33  ;;  %v1616_v3 = vadd.f32 %v1612_v0, %v1604_v49  ;;  %v1617_v6 = vadd.f32 %v1613_v41, %v1605_v36  ;;  %v1621_v42 = vmul.f32 0.99, %v1593_v55 }
 0x208   :  { %v1618_v8 = vadd.f32 %v1614_v4, %v1606_v2  ;;  %v1622_v11 = vmul.f32 0.99, %v1594_v24 }
 0x209   :  { %v1623_v12 = vmul.f32 0.002, %v1615_v46  ;;  %v1624_v62 = vmul.f32 0.002, %v1616_v3  ;;  %v1625_v14 = vmul.f32 0.002, %v1617_v6 }
 0x20a   :  { %v1626_v15 = vmul.f32 0.002, %v1618_v8  ;;  %vm1631_vm0 = vcmp.gt.f32.partialorder %v1615_v46, 30.0  ;;  %vm1632_vm1 = vcmp.gt.f32.partialorder %v1616_v3, 30.0  ;;  %vm1633_vm2 = vcmp.gt.f32.partialorder %v1617_v6, 30.0 }
 0x20b   :  { %v1627_v61 = vadd.f32 %v1623_v12, %v1619_v43  ;;  %v1628_v17 = vadd.f32 %v1624_v62, %v1620_v9  ;;  %v1629_v18 = vadd.f32 %v1625_v14, %v1621_v42  ;;  %vm1634_vm3 = vcmp.gt.f32.partialorder %v1618_v8, 30.0 }
 0x20c   :  { %v1630_v60 = vadd.f32 %v1626_v15, %v1622_v11  ;;  %v3437_v22 = vsel %vm1631_vm0, 1.0, %v3703_v52  ;;  %v3438_v23 = vsel %vm1632_vm1, 1.0, %v3703_v52  ;;  %v3439_v59 = vsel %vm1633_vm2, 1.0, %v3703_v52 }
 0x20d   :  { %v3440_v25 = vsel %vm1634_vm3, 1.0, %v3703_v52  ;;  %v1643_v26 = vadd.f32 %v3437_v22, %v1579_v29  ;;  %v1644_v58 = vadd.f32 %v3438_v23, %v1580_v57  ;;  %v1645_v28 = vadd.f32 %v3439_v59, %v1581_v31 }
 0x20e   :  { %v1646_v16 = vadd.f32 %v3440_v25, %v1582_v21  ;;  %v1647_v13 = vsel %vm1631_vm0, -65.0, %v1615_v46  ;;  %v1648_v10 = vsel %vm1632_vm1, -65.0, %v1616_v3  ;;  %v1649_v7 = vsel %vm1633_vm2, -65.0, %v1617_v6 }
 0x20f   :  { %v1650_v5 = vsel %vm1634_vm3, -65.0, %v1618_v8  ;;  %v1651_v1 = vadd.f32 8.0, %v1627_v61  ;;  %v1652_v56 = vadd.f32 8.0, %v1628_v17  ;;  %v1653_v48 = vadd.f32 8.0, %v1629_v18 }
 0x210   :  { %v1654_v45 = vadd.f32 8.0, %v1630_v60  ;;  %v1659_v40 = vmul.f32 0.02, %v1647_v13  ;;  %v1660_v35 = vmul.f32 0.02, %v1648_v10 }
 0x211   :  { %v1655_v32 = vsel %vm1631_vm0, %v1651_v1, %v1627_v61  ;;  %v1656_v29 = vsel %vm1632_vm1, %v1652_v56, %v1628_v17  ;;  %v1657_v57 = vsel %vm1633_vm2, %v1653_v48, %v1629_v18  ;;  %v1661_v31 = vmul.f32 0.02, %v1649_v7 }
 0x212   :  { %v1658_v21 = vsel %vm1634_vm3, %v1654_v45, %v1630_v60  ;;  %v1662_v55 = vmul.f32 0.02, %v1650_v5  ;;  %v1663_v34 = vadd.f32 3.5, %v1659_v40  ;;  %v1664_v24 = vadd.f32 3.5, %v1660_v35 }
 0x213   :  { %v1665_v54 = vadd.f32 3.5, %v1661_v31  ;;  %v1671_v37 = vmul.f32 -0.5, %v1655_v32  ;;  %v1672_v27 = vmul.f32 -0.5, %v1656_v29  ;;  %v1673_v51 = vmul.f32 -0.5, %v1657_v57 }
 0x214   :  { %v1666_v44 = vadd.f32 3.5, %v1662_v55  ;;  %v1667_v30 = vmul.f32 %v1663_v34, %v1647_v13  ;;  %v1668_v50 = vmul.f32 %v1664_v24, %v1648_v10  ;;  %v1674_v47 = vmul.f32 -0.5, %v1658_v21 }
 0x215   :  { %v1669_v33 = vmul.f32 %v1665_v54, %v1649_v7  ;;  %v1675_v49 = vadd.f32 %v1671_v37, %v3757_v19  ;;  %v1676_v53 = vadd.f32 %v1672_v27, %v3759_v20  ;;  %v1677_v36 = vadd.f32 %v1673_v51, %v3763_v38 }
 0x216   :  { %v1670_v63 = vmul.f32 %v1666_v44, %v1650_v5  ;;  %v1678_v0 = vadd.f32 %v1674_v47, %v3765_v39  ;;  %v1683_v46 = vmul.f32 0.99, %v1655_v32  ;;  %v1684_v6 = vmul.f32 0.99, %v1656_v29 }
 0x217   :  { %v1679_v41 = vadd.f32 %v1675_v49, %v1667_v30  ;;  %v1680_v2 = vadd.f32 %v1676_v53, %v1668_v50  ;;  %v1681_v4 = vadd.f32 %v1677_v36, %v1669_v33  ;;  %v1685_v43 = vmul.f32 0.99, %v1657_v57 }
 0x218   :  { %v1682_v3 = vadd.f32 %v1678_v0, %v1670_v63  ;;  %v1686_v8 = vmul.f32 0.99, %v1658_v21 }
 0x219   :  { %v1687_v9 = vmul.f32 0.002, %v1679_v41  ;;  %v1688_v42 = vmul.f32 0.002, %v1680_v2  ;;  %v1689_v11 = vmul.f32 0.002, %v1681_v4 }
 0x21a   :  { %v1690_v12 = vmul.f32 0.002, %v1682_v3  ;;  %vm1695_vm4 = vcmp.gt.f32.partialorder %v1679_v41, 30.0  ;;  %vm1696_vm5 = vcmp.gt.f32.partialorder %v1680_v2, 30.0  ;;  %vm1697_vm6 = vcmp.gt.f32.partialorder %v1681_v4, 30.0 }
 0x21b   :  { %v1691_v62 = vadd.f32 %v1687_v9, %v1683_v46  ;;  %v1692_v14 = vadd.f32 %v1688_v42, %v1684_v6  ;;  %v1693_v15 = vadd.f32 %v1689_v11, %v1685_v43  ;;  %vm1698_vm7 = vcmp.gt.f32.partialorder %v1682_v3, 30.0 }
 0x21c   :  { %v1694_v61 = vadd.f32 %v1690_v12, %v1686_v8  ;;  %v3441_v17 = vsel %vm1695_vm4, 1.0, %v3703_v52  ;;  %v3442_v18 = vsel %vm1696_vm5, 1.0, %v3703_v52  ;;  %v3443_v60 = vsel %vm1697_vm6, 1.0, %v3703_v52 }
 0x21d   :  { %v3444_v22 = vsel %vm1698_vm7, 1.0, %v3703_v52  ;;  %v1707_v23 = vadd.f32 %v3441_v17, %v1643_v26  ;;  %v1708_v59 = vadd.f32 %v3442_v18, %v1644_v58  ;;  %v1709_v25 = vadd.f32 %v3443_v60, %v1645_v28 }
 0x21e   :  { %v1710_v13 = vadd.f32 %v3444_v22, %v1646_v16  ;;  %v1711_v10 = vsel %vm1695_vm4, -65.0, %v1679_v41  ;;  %v1712_v7 = vsel %vm1696_vm5, -65.0, %v1680_v2  ;;  %v1713_v5 = vsel %vm1697_vm6, -65.0, %v1681_v4 }
 0x21f   :  { %v1714_v1 = vsel %vm1698_vm7, -65.0, %v1682_v3  ;;  %v1715_v56 = vadd.f32 8.0, %v1691_v62  ;;  %v1716_v48 = vadd.f32 8.0, %v1692_v14  ;;  %v1717_v45 = vadd.f32 8.0, %v1693_v15 }
 0x220   :  { %v1718_v40 = vadd.f32 8.0, %v1694_v61  ;;  %v1723_v35 = vmul.f32 0.02, %v1711_v10  ;;  %v1724_v32 = vmul.f32 0.02, %v1712_v7 }
 0x221   :  { %v1719_v29 = vsel %vm1695_vm4, %v1715_v56, %v1691_v62  ;;  %v1720_v26 = vsel %vm1696_vm5, %v1716_v48, %v1692_v14  ;;  %v1721_v58 = vsel %vm1697_vm6, %v1717_v45, %v1693_v15  ;;  %v1725_v28 = vmul.f32 0.02, %v1713_v5 }
 0x222   :  { %v1722_v16 = vsel %vm1698_vm7, %v1718_v40, %v1694_v61  ;;  %v1726_v57 = vmul.f32 0.02, %v1714_v1  ;;  %v1727_v31 = vadd.f32 3.5, %v1723_v35  ;;  %v1728_v21 = vadd.f32 3.5, %v1724_v32 }
 0x223   :  { %v1729_v55 = vadd.f32 3.5, %v1725_v28  ;;  %v1735_v34 = vmul.f32 -0.5, %v1719_v29  ;;  %v1736_v24 = vmul.f32 -0.5, %v1720_v26  ;;  %v1737_v54 = vmul.f32 -0.5, %v1721_v58 }
 0x224   :  { %v1730_v37 = vadd.f32 3.5, %v1726_v57  ;;  %v1731_v27 = vmul.f32 %v1727_v31, %v1711_v10  ;;  %v1732_v51 = vmul.f32 %v1728_v21, %v1712_v7  ;;  %v1738_v44 = vmul.f32 -0.5, %v1722_v16 }
 0x225   :  { %v1733_v30 = vmul.f32 %v1729_v55, %v1713_v5  ;;  %v1739_v50 = vadd.f32 %v1735_v34, %v3757_v19  ;;  %v1740_v47 = vadd.f32 %v1736_v24, %v3759_v20  ;;  %v1741_v33 = vadd.f32 %v1737_v54, %v3763_v38 }
 0x226   :  { %v1734_v49 = vmul.f32 %v1730_v37, %v1714_v1  ;;  %v1742_v53 = vadd.f32 %v1738_v44, %v3765_v39  ;;  %v1747_v41 = vmul.f32 0.99, %v1719_v29  ;;  %v1748_v4 = vmul.f32 0.99, %v1720_v26 }
 0x227   :  { %v1743_v36 = vadd.f32 %v1739_v50, %v1731_v27  ;;  %v1744_v63 = vadd.f32 %v1740_v47, %v1732_v51  ;;  %v1745_v0 = vadd.f32 %v1741_v33, %v1733_v30  ;;  %v1749_v46 = vmul.f32 0.99, %v1721_v58 }
 0x228   :  { %v1746_v2 = vadd.f32 %v1742_v53, %v1734_v49  ;;  %v1750_v3 = vmul.f32 0.99, %v1722_v16 }
 0x229   :  { %v1751_v6 = vmul.f32 0.002, %v1743_v36  ;;  %v1752_v43 = vmul.f32 0.002, %v1744_v63  ;;  %v1753_v8 = vmul.f32 0.002, %v1745_v0 }
 0x22a   :  { %v1754_v9 = vmul.f32 0.002, %v1746_v2  ;;  %vm1759_vm8 = vcmp.gt.f32.partialorder %v1743_v36, 30.0  ;;  %vm1760_vm9 = vcmp.gt.f32.partialorder %v1744_v63, 30.0  ;;  %vm1761_vm10 = vcmp.gt.f32.partialorder %v1745_v0, 30.0 }
 0x22b   :  { %v1755_v42 = vadd.f32 %v1751_v6, %v1747_v41  ;;  %v1756_v11 = vadd.f32 %v1752_v43, %v1748_v4  ;;  %v1757_v12 = vadd.f32 %v1753_v8, %v1749_v46  ;;  %vm1762_vm11 = vcmp.gt.f32.partialorder %v1746_v2, 30.0 }
 0x22c   :  { %v1758_v62 = vadd.f32 %v1754_v9, %v1750_v3  ;;  %v3445_v14 = vsel %vm1759_vm8, 1.0, %v3703_v52  ;;  %v3446_v15 = vsel %vm1760_vm9, 1.0, %v3703_v52  ;;  %v3447_v61 = vsel %vm1761_vm10, 1.0, %v3703_v52 }
 0x22d   :  { %v3448_v17 = vsel %vm1762_vm11, 1.0, %v3703_v52  ;;  %v1771_v18 = vadd.f32 %v3445_v14, %v1707_v23  ;;  %v1772_v60 = vadd.f32 %v3446_v15, %v1708_v59  ;;  %v1773_v22 = vadd.f32 %v3447_v61, %v1709_v25 }
 0x22e   :  { %v1774_v10 = vadd.f32 %v3448_v17, %v1710_v13  ;;  %v1775_v7 = vsel %vm1759_vm8, -65.0, %v1743_v36  ;;  %v1776_v5 = vsel %vm1760_vm9, -65.0, %v1744_v63  ;;  %v1777_v1 = vsel %vm1761_vm10, -65.0, %v1745_v0 }
 0x22f   :  { %v1778_v56 = vsel %vm1762_vm11, -65.0, %v1746_v2  ;;  %v1779_v48 = vadd.f32 8.0, %v1755_v42  ;;  %v1780_v45 = vadd.f32 8.0, %v1756_v11  ;;  %v1781_v40 = vadd.f32 8.0, %v1757_v12 }
 0x230   :  { %v1782_v35 = vadd.f32 8.0, %v1758_v62  ;;  %v1787_v32 = vmul.f32 0.02, %v1775_v7  ;;  %v1788_v29 = vmul.f32 0.02, %v1776_v5 }
 0x231   :  { %v1783_v26 = vsel %vm1759_vm8, %v1779_v48, %v1755_v42  ;;  %v1784_v23 = vsel %vm1760_vm9, %v1780_v45, %v1756_v11  ;;  %v1785_v59 = vsel %vm1761_vm10, %v1781_v40, %v1757_v12  ;;  %v1789_v25 = vmul.f32 0.02, %v1777_v1 }
 0x232   :  { %v1786_v13 = vsel %vm1762_vm11, %v1782_v35, %v1758_v62  ;;  %v1790_v58 = vmul.f32 0.02, %v1778_v56  ;;  %v1791_v28 = vadd.f32 3.5, %v1787_v32  ;;  %v1792_v16 = vadd.f32 3.5, %v1788_v29 }
 0x233   :  { %v1793_v57 = vadd.f32 3.5, %v1789_v25  ;;  %v1799_v31 = vmul.f32 -0.5, %v1783_v26  ;;  %v1800_v21 = vmul.f32 -0.5, %v1784_v23  ;;  %v1801_v55 = vmul.f32 -0.5, %v1785_v59 }
 0x234   :  { %v1794_v34 = vadd.f32 3.5, %v1790_v58  ;;  %v1795_v24 = vmul.f32 %v1791_v28, %v1775_v7  ;;  %v1796_v54 = vmul.f32 %v1792_v16, %v1776_v5  ;;  %v1802_v37 = vmul.f32 -0.5, %v1786_v13 }
 0x235   :  { %v1797_v27 = vmul.f32 %v1793_v57, %v1777_v1  ;;  %v1803_v51 = vadd.f32 %v1799_v31, %v3757_v19  ;;  %v1804_v44 = vadd.f32 %v1800_v21, %v3759_v20  ;;  %v1805_v30 = vadd.f32 %v1801_v55, %v3763_v38 }
 0x236   :  { %v1798_v50 = vmul.f32 %v1794_v34, %v1778_v56  ;;  %v1806_v47 = vadd.f32 %v1802_v37, %v3765_v39  ;;  %v1811_v36 = vmul.f32 0.99, %v1783_v26  ;;  %v1812_v0 = vmul.f32 0.99, %v1784_v23 }
 0x237   :  { %v1807_v33 = vadd.f32 %v1803_v51, %v1795_v24  ;;  %v1808_v49 = vadd.f32 %v1804_v44, %v1796_v54  ;;  %v1809_v53 = vadd.f32 %v1805_v30, %v1797_v27  ;;  %v1813_v41 = vmul.f32 0.99, %v1785_v59 }
 0x238   :  { %v1810_v63 = vadd.f32 %v1806_v47, %v1798_v50  ;;  %v1814_v2 = vmul.f32 0.99, %v1786_v13 }
 0x239   :  { %v1815_v4 = vmul.f32 0.002, %v1807_v33  ;;  %v1816_v46 = vmul.f32 0.002, %v1808_v49  ;;  %v1817_v3 = vmul.f32 0.002, %v1809_v53 }
 0x23a   :  { %v1818_v6 = vmul.f32 0.002, %v1810_v63  ;;  %vm1823_vm12 = vcmp.gt.f32.partialorder %v1807_v33, 30.0  ;;  %vm1824_vm13 = vcmp.gt.f32.partialorder %v1808_v49, 30.0  ;;  %vm1825_vm14 = vcmp.gt.f32.partialorder %v1809_v53, 30.0 }
 0x23b   :  { %v1819_v43 = vadd.f32 %v1815_v4, %v1811_v36  ;;  %v1820_v8 = vadd.f32 %v1816_v46, %v1812_v0  ;;  %v1821_v9 = vadd.f32 %v1817_v3, %v1813_v41  ;;  %vm1826_vm15 = vcmp.gt.f32.partialorder %v1810_v63, 30.0 }
 0x23c   :  { %v1822_v42 = vadd.f32 %v1818_v6, %v1814_v2  ;;  %v3449_v11 = vsel %vm1823_vm12, 1.0, %v3703_v52  ;;  %v3450_v12 = vsel %vm1824_vm13, 1.0, %v3703_v52  ;;  %v3451_v62 = vsel %vm1825_vm14, 1.0, %v3703_v52 }
 0x23d   :  { %v3452_v14 = vsel %vm1826_vm15, 1.0, %v3703_v52  ;;  %v1835_v15 = vadd.f32 %v3449_v11, %v1771_v18  ;;  %v1836_v61 = vadd.f32 %v3450_v12, %v1772_v60  ;;  %v1837_v17 = vadd.f32 %v3451_v62, %v1773_v22 }
 0x23e   :  { %v1838_v7 = vadd.f32 %v3452_v14, %v1774_v10  ;;  %v1839_v5 = vsel %vm1823_vm12, -65.0, %v1807_v33  ;;  %v1840_v1 = vsel %vm1824_vm13, -65.0, %v1808_v49  ;;  %v1841_v56 = vsel %vm1825_vm14, -65.0, %v1809_v53 }
 0x23f   :  { %v1842_v48 = vsel %vm1826_vm15, -65.0, %v1810_v63  ;;  %v1843_v45 = vadd.f32 8.0, %v1819_v43  ;;  %v1844_v40 = vadd.f32 8.0, %v1820_v8  ;;  %v1845_v35 = vadd.f32 8.0, %v1821_v9 }
 0x240   :  { %v1846_v32 = vadd.f32 8.0, %v1822_v42  ;;  %v1851_v29 = vmul.f32 0.02, %v1839_v5  ;;  %v1852_v26 = vmul.f32 0.02, %v1840_v1 }
 0x241   :  { %v1847_v23 = vsel %vm1823_vm12, %v1843_v45, %v1819_v43  ;;  %v1848_v18 = vsel %vm1824_vm13, %v1844_v40, %v1820_v8  ;;  %v1849_v60 = vsel %vm1825_vm14, %v1845_v35, %v1821_v9  ;;  %v1853_v22 = vmul.f32 0.02, %v1841_v56 }
 0x242   :  { %v1850_v10 = vsel %vm1826_vm15, %v1846_v32, %v1822_v42  ;;  %v1854_v59 = vmul.f32 0.02, %v1842_v48  ;;  %v1855_v25 = vadd.f32 3.5, %v1851_v29  ;;  %v1856_v13 = vadd.f32 3.5, %v1852_v26 }
 0x243   :  { %v1857_v58 = vadd.f32 3.5, %v1853_v22  ;;  %v1863_v28 = vmul.f32 -0.5, %v1847_v23  ;;  %v1864_v16 = vmul.f32 -0.5, %v1848_v18  ;;  %v1865_v57 = vmul.f32 -0.5, %v1849_v60 }
 0x244   :  { %v1858_v31 = vadd.f32 3.5, %v1854_v59  ;;  %v1859_v21 = vmul.f32 %v1855_v25, %v1839_v5  ;;  %v1860_v55 = vmul.f32 %v1856_v13, %v1840_v1  ;;  %v1866_v34 = vmul.f32 -0.5, %v1850_v10 }
 0x245   :  { %v1861_v24 = vmul.f32 %v1857_v58, %v1841_v56  ;;  %v1867_v54 = vadd.f32 %v1863_v28, %v3757_v19  ;;  %v1868_v37 = vadd.f32 %v1864_v16, %v3759_v20  ;;  %v1869_v27 = vadd.f32 %v1865_v57, %v3763_v38 }
 0x246   :  { %v1862_v51 = vmul.f32 %v1858_v31, %v1842_v48  ;;  %v1870_v44 = vadd.f32 %v1866_v34, %v3765_v39  ;;  %v1875_v33 = vmul.f32 0.99, %v1847_v23  ;;  %v1876_v53 = vmul.f32 0.99, %v1848_v18 }
 0x247   :  { %v1871_v30 = vadd.f32 %v1867_v54, %v1859_v21  ;;  %v1872_v50 = vadd.f32 %v1868_v37, %v1860_v55  ;;  %v1873_v47 = vadd.f32 %v1869_v27, %v1861_v24  ;;  %v1877_v36 = vmul.f32 0.99, %v1849_v60 }
 0x248   :  { %v1874_v49 = vadd.f32 %v1870_v44, %v1862_v51  ;;  %v1878_v63 = vmul.f32 0.99, %v1850_v10 }
 0x249   :  { %v1879_v0 = vmul.f32 0.002, %v1871_v30  ;;  %v1880_v41 = vmul.f32 0.002, %v1872_v50  ;;  %v1881_v2 = vmul.f32 0.002, %v1873_v47 }
 0x24a   :  { %v1882_v4 = vmul.f32 0.002, %v1874_v49  ;;  %vm1887_vm0 = vcmp.gt.f32.partialorder %v1871_v30, 30.0  ;;  %vm1888_vm1 = vcmp.gt.f32.partialorder %v1872_v50, 30.0  ;;  %vm1889_vm2 = vcmp.gt.f32.partialorder %v1873_v47, 30.0 }
 0x24b   :  { %v1883_v46 = vadd.f32 %v1879_v0, %v1875_v33  ;;  %v1884_v3 = vadd.f32 %v1880_v41, %v1876_v53  ;;  %v1885_v6 = vadd.f32 %v1881_v2, %v1877_v36  ;;  %vm1890_vm3 = vcmp.gt.f32.partialorder %v1874_v49, 30.0 }
 0x24c   :  { %v1886_v43 = vadd.f32 %v1882_v4, %v1878_v63  ;;  %v3453_v8 = vsel %vm1887_vm0, 1.0, %v3703_v52  ;;  %v3454_v9 = vsel %vm1888_vm1, 1.0, %v3703_v52  ;;  %v3455_v42 = vsel %vm1889_vm2, 1.0, %v3703_v52 }
 0x24d   :  { %v3456_v11 = vsel %vm1890_vm3, 1.0, %v3703_v52  ;;  %v1899_v12 = vadd.f32 %v3453_v8, %v1835_v15  ;;  %v1900_v62 = vadd.f32 %v3454_v9, %v1836_v61  ;;  %v1901_v14 = vadd.f32 %v3455_v42, %v1837_v17 }
 0x24e   :  { %v1902_v5 = vadd.f32 %v3456_v11, %v1838_v7  ;;  %v1903_v1 = vsel %vm1887_vm0, -65.0, %v1871_v30  ;;  %v1904_v56 = vsel %vm1888_vm1, -65.0, %v1872_v50  ;;  %v1905_v48 = vsel %vm1889_vm2, -65.0, %v1873_v47 }
 0x24f   :  { %v1906_v45 = vsel %vm1890_vm3, -65.0, %v1874_v49  ;;  %v1907_v40 = vadd.f32 8.0, %v1883_v46  ;;  %v1908_v35 = vadd.f32 8.0, %v1884_v3  ;;  %v1909_v32 = vadd.f32 8.0, %v1885_v6 }
 0x250   :  { %v1910_v29 = vadd.f32 8.0, %v1886_v43  ;;  %v1915_v26 = vmul.f32 0.02, %v1903_v1  ;;  %v1916_v23 = vmul.f32 0.02, %v1904_v56 }
 0x251   :  { %v1911_v18 = vsel %vm1887_vm0, %v1907_v40, %v1883_v46  ;;  %v1912_v15 = vsel %vm1888_vm1, %v1908_v35, %v1884_v3  ;;  %v1913_v61 = vsel %vm1889_vm2, %v1909_v32, %v1885_v6  ;;  %v1917_v17 = vmul.f32 0.02, %v1905_v48 }
 0x252   :  { %v1914_v7 = vsel %vm1890_vm3, %v1910_v29, %v1886_v43  ;;  %v1918_v60 = vmul.f32 0.02, %v1906_v45  ;;  %v1919_v22 = vadd.f32 3.5, %v1915_v26  ;;  %v1920_v10 = vadd.f32 3.5, %v1916_v23 }
 0x253   :  { %v1921_v59 = vadd.f32 3.5, %v1917_v17  ;;  %v1927_v25 = vmul.f32 -0.5, %v1911_v18  ;;  %v1928_v13 = vmul.f32 -0.5, %v1912_v15  ;;  %v1929_v58 = vmul.f32 -0.5, %v1913_v61 }
 0x254   :  { %v1922_v28 = vadd.f32 3.5, %v1918_v60  ;;  %v1923_v16 = vmul.f32 %v1919_v22, %v1903_v1  ;;  %v1924_v57 = vmul.f32 %v1920_v10, %v1904_v56  ;;  %v1930_v31 = vmul.f32 -0.5, %v1914_v7 }
 0x255   :  { %v1925_v21 = vmul.f32 %v1921_v59, %v1905_v48  ;;  %v1931_v55 = vadd.f32 %v1927_v25, %v3757_v19  ;;  %v1932_v34 = vadd.f32 %v1928_v13, %v3759_v20  ;;  %v1933_v24 = vadd.f32 %v1929_v58, %v3763_v38 }
 0x256   :  { %v1926_v54 = vmul.f32 %v1922_v28, %v1906_v45  ;;  %v1934_v37 = vadd.f32 %v1930_v31, %v3765_v39  ;;  %v1939_v30 = vmul.f32 0.99, %v1911_v18  ;;  %v1940_v47 = vmul.f32 0.99, %v1912_v15 }
 0x257   :  { %v1935_v27 = vadd.f32 %v1931_v55, %v1923_v16  ;;  %v1936_v51 = vadd.f32 %v1932_v34, %v1924_v57  ;;  %v1937_v44 = vadd.f32 %v1933_v24, %v1925_v21  ;;  %v1941_v33 = vmul.f32 0.99, %v1913_v61 }
 0x258   :  { %v1938_v50 = vadd.f32 %v1934_v37, %v1926_v54  ;;  %v1942_v49 = vmul.f32 0.99, %v1914_v7 }
 0x259   :  { %v1943_v53 = vmul.f32 0.002, %v1935_v27  ;;  %v1944_v36 = vmul.f32 0.002, %v1936_v51  ;;  %v1945_v63 = vmul.f32 0.002, %v1937_v44 }
 0x25a   :  { %v1946_v0 = vmul.f32 0.002, %v1938_v50  ;;  %vm1951_vm4 = vcmp.gt.f32.partialorder %v1935_v27, 30.0  ;;  %vm1952_vm5 = vcmp.gt.f32.partialorder %v1936_v51, 30.0  ;;  %vm1953_vm6 = vcmp.gt.f32.partialorder %v1937_v44, 30.0 }
 0x25b   :  { %v1947_v41 = vadd.f32 %v1943_v53, %v1939_v30  ;;  %v1948_v2 = vadd.f32 %v1944_v36, %v1940_v47  ;;  %v1949_v4 = vadd.f32 %v1945_v63, %v1941_v33  ;;  %vm1954_vm7 = vcmp.gt.f32.partialorder %v1938_v50, 30.0 }
 0x25c   :  { %v1950_v46 = vadd.f32 %v1946_v0, %v1942_v49  ;;  %v3457_v3 = vsel %vm1951_vm4, 1.0, %v3703_v52  ;;  %v3458_v6 = vsel %vm1952_vm5, 1.0, %v3703_v52  ;;  %v3459_v43 = vsel %vm1953_vm6, 1.0, %v3703_v52 }
 0x25d   :  { %v3460_v8 = vsel %vm1954_vm7, 1.0, %v3703_v52  ;;  %v1963_v9 = vadd.f32 %v3457_v3, %v1899_v12  ;;  %v1964_v42 = vadd.f32 %v3458_v6, %v1900_v62  ;;  %v1965_v11 = vadd.f32 %v3459_v43, %v1901_v14 }
 0x25e   :  { %v1966_v1 = vadd.f32 %v3460_v8, %v1902_v5  ;;  %v1967_v56 = vsel %vm1951_vm4, -65.0, %v1935_v27  ;;  %v1968_v48 = vsel %vm1952_vm5, -65.0, %v1936_v51  ;;  %v1969_v45 = vsel %vm1953_vm6, -65.0, %v1937_v44 }
 0x25f   :  { %v1970_v40 = vsel %vm1954_vm7, -65.0, %v1938_v50  ;;  %v1971_v35 = vadd.f32 8.0, %v1947_v41  ;;  %v1972_v32 = vadd.f32 8.0, %v1948_v2  ;;  %v1973_v29 = vadd.f32 8.0, %v1949_v4 }
 0x260   :  { %v1974_v26 = vadd.f32 8.0, %v1950_v46  ;;  %v1979_v23 = vmul.f32 0.02, %v1967_v56  ;;  %v1980_v18 = vmul.f32 0.02, %v1968_v48 }
 0x261   :  { %v1975_v15 = vsel %vm1951_vm4, %v1971_v35, %v1947_v41  ;;  %v1976_v12 = vsel %vm1952_vm5, %v1972_v32, %v1948_v2  ;;  %v1977_v62 = vsel %vm1953_vm6, %v1973_v29, %v1949_v4  ;;  %v1981_v14 = vmul.f32 0.02, %v1969_v45 }
 0x262   :  { %v1978_v5 = vsel %vm1954_vm7, %v1974_v26, %v1950_v46  ;;  %v1982_v61 = vmul.f32 0.02, %v1970_v40  ;;  %v1983_v17 = vadd.f32 3.5, %v1979_v23  ;;  %v1984_v7 = vadd.f32 3.5, %v1980_v18 }
 0x263   :  { %v1985_v60 = vadd.f32 3.5, %v1981_v14  ;;  %v1991_v22 = vmul.f32 -0.5, %v1975_v15  ;;  %v1992_v10 = vmul.f32 -0.5, %v1976_v12  ;;  %v1993_v59 = vmul.f32 -0.5, %v1977_v62 }
 0x264   :  { %v1986_v25 = vadd.f32 3.5, %v1982_v61  ;;  %v1987_v13 = vmul.f32 %v1983_v17, %v1967_v56  ;;  %v1988_v58 = vmul.f32 %v1984_v7, %v1968_v48  ;;  %v1994_v28 = vmul.f32 -0.5, %v1978_v5 }
 0x265   :  { %v1989_v16 = vmul.f32 %v1985_v60, %v1969_v45  ;;  %v1995_v57 = vadd.f32 %v1991_v22, %v3757_v19  ;;  %v1996_v31 = vadd.f32 %v1992_v10, %v3759_v20  ;;  %v1997_v21 = vadd.f32 %v1993_v59, %v3763_v38 }
 0x266   :  { %v1990_v55 = vmul.f32 %v1986_v25, %v1970_v40  ;;  %v1998_v34 = vadd.f32 %v1994_v28, %v3765_v39  ;;  %v2003_v27 = vmul.f32 0.99, %v1975_v15  ;;  %v2004_v44 = vmul.f32 0.99, %v1976_v12 }
 0x267   :  { %v1999_v24 = vadd.f32 %v1995_v57, %v1987_v13  ;;  %v2000_v54 = vadd.f32 %v1996_v31, %v1988_v58  ;;  %v2001_v37 = vadd.f32 %v1997_v21, %v1989_v16  ;;  %v2005_v30 = vmul.f32 0.99, %v1977_v62 }
 0x268   :  { %v2002_v51 = vadd.f32 %v1998_v34, %v1990_v55  ;;  %v2006_v50 = vmul.f32 0.99, %v1978_v5 }
 0x269   :  { %v2007_v47 = vmul.f32 0.002, %v1999_v24  ;;  %v2008_v33 = vmul.f32 0.002, %v2000_v54  ;;  %v2009_v49 = vmul.f32 0.002, %v2001_v37 }
 0x26a   :  { %v2010_v53 = vmul.f32 0.002, %v2002_v51  ;;  %vm2015_vm8 = vcmp.gt.f32.partialorder %v1999_v24, 30.0  ;;  %vm2016_vm9 = vcmp.gt.f32.partialorder %v2000_v54, 30.0  ;;  %vm2017_vm10 = vcmp.gt.f32.partialorder %v2001_v37, 30.0 }
 0x26b   :  { %v2011_v36 = vadd.f32 %v2007_v47, %v2003_v27  ;;  %v2012_v63 = vadd.f32 %v2008_v33, %v2004_v44  ;;  %v2013_v0 = vadd.f32 %v2009_v49, %v2005_v30  ;;  %vm2018_vm11 = vcmp.gt.f32.partialorder %v2002_v51, 30.0 }
 0x26c   :  { %v2014_v41 = vadd.f32 %v2010_v53, %v2006_v50  ;;  %v3461_v2 = vsel %vm2015_vm8, 1.0, %v3703_v52  ;;  %v3462_v4 = vsel %vm2016_vm9, 1.0, %v3703_v52  ;;  %v3463_v46 = vsel %vm2017_vm10, 1.0, %v3703_v52 }
 0x26d   :  { %v3464_v3 = vsel %vm2018_vm11, 1.0, %v3703_v52  ;;  %v2027_v6 = vadd.f32 %v3461_v2, %v1963_v9  ;;  %v2028_v43 = vadd.f32 %v3462_v4, %v1964_v42  ;;  %v2029_v8 = vadd.f32 %v3463_v46, %v1965_v11 }
 0x26e   :  { %v2030_v56 = vadd.f32 %v3464_v3, %v1966_v1  ;;  %v2031_v48 = vsel %vm2015_vm8, -65.0, %v1999_v24  ;;  %v2032_v45 = vsel %vm2016_vm9, -65.0, %v2000_v54  ;;  %v2033_v40 = vsel %vm2017_vm10, -65.0, %v2001_v37 }
 0x26f   :  { %v2034_v35 = vsel %vm2018_vm11, -65.0, %v2002_v51  ;;  %v2035_v32 = vadd.f32 8.0, %v2011_v36  ;;  %v2036_v29 = vadd.f32 8.0, %v2012_v63  ;;  %v2037_v26 = vadd.f32 8.0, %v2013_v0 }
 0x270   :  { %v2038_v23 = vadd.f32 8.0, %v2014_v41  ;;  %v2043_v18 = vmul.f32 0.02, %v2031_v48  ;;  %v2044_v15 = vmul.f32 0.02, %v2032_v45 }
 0x271   :  { %v2039_v12 = vsel %vm2015_vm8, %v2035_v32, %v2011_v36  ;;  %v2040_v9 = vsel %vm2016_vm9, %v2036_v29, %v2012_v63  ;;  %v2041_v42 = vsel %vm2017_vm10, %v2037_v26, %v2013_v0  ;;  %v2045_v11 = vmul.f32 0.02, %v2033_v40 }
 0x272   :  { %v2042_v1 = vsel %vm2018_vm11, %v2038_v23, %v2014_v41  ;;  %v2046_v62 = vmul.f32 0.02, %v2034_v35  ;;  %v2047_v14 = vadd.f32 3.5, %v2043_v18  ;;  %v2048_v5 = vadd.f32 3.5, %v2044_v15 }
 0x273   :  { %v2049_v61 = vadd.f32 3.5, %v2045_v11  ;;  %v2055_v17 = vmul.f32 -0.5, %v2039_v12  ;;  %v2056_v7 = vmul.f32 -0.5, %v2040_v9  ;;  %v2057_v60 = vmul.f32 -0.5, %v2041_v42 }
 0x274   :  { %v2050_v22 = vadd.f32 3.5, %v2046_v62  ;;  %v2051_v10 = vmul.f32 %v2047_v14, %v2031_v48  ;;  %v2052_v59 = vmul.f32 %v2048_v5, %v2032_v45  ;;  %v2058_v25 = vmul.f32 -0.5, %v2042_v1 }
 0x275   :  { %v2053_v13 = vmul.f32 %v2049_v61, %v2033_v40  ;;  %v2059_v58 = vadd.f32 %v2055_v17, %v3757_v19  ;;  %v2060_v28 = vadd.f32 %v2056_v7, %v3759_v20  ;;  %v2061_v16 = vadd.f32 %v2057_v60, %v3763_v38 }
 0x276   :  { %v2054_v57 = vmul.f32 %v2050_v22, %v2034_v35  ;;  %v2062_v31 = vadd.f32 %v2058_v25, %v3765_v39  ;;  %v2067_v24 = vmul.f32 0.99, %v2039_v12  ;;  %v2068_v37 = vmul.f32 0.99, %v2040_v9 }
 0x277   :  { %v2063_v21 = vadd.f32 %v2059_v58, %v2051_v10  ;;  %v2064_v55 = vadd.f32 %v2060_v28, %v2052_v59  ;;  %v2065_v34 = vadd.f32 %v2061_v16, %v2053_v13  ;;  %v2069_v27 = vmul.f32 0.99, %v2041_v42 }
 0x278   :  { %v2066_v54 = vadd.f32 %v2062_v31, %v2054_v57  ;;  %v2070_v51 = vmul.f32 0.99, %v2042_v1 }
 0x279   :  { %v2071_v44 = vmul.f32 0.002, %v2063_v21  ;;  %v2072_v30 = vmul.f32 0.002, %v2064_v55  ;;  %v2073_v50 = vmul.f32 0.002, %v2065_v34 }
 0x27a   :  { %v2074_v47 = vmul.f32 0.002, %v2066_v54  ;;  %vm2079_vm12 = vcmp.gt.f32.partialorder %v2063_v21, 30.0  ;;  %vm2080_vm13 = vcmp.gt.f32.partialorder %v2064_v55, 30.0  ;;  %vm2081_vm14 = vcmp.gt.f32.partialorder %v2065_v34, 30.0 }
 0x27b   :  { %v2075_v33 = vadd.f32 %v2071_v44, %v2067_v24  ;;  %v2076_v49 = vadd.f32 %v2072_v30, %v2068_v37  ;;  %v2077_v53 = vadd.f32 %v2073_v50, %v2069_v27  ;;  %vm2082_vm15 = vcmp.gt.f32.partialorder %v2066_v54, 30.0 }
 0x27c   :  { %v2078_v36 = vadd.f32 %v2074_v47, %v2070_v51  ;;  %v3465_v63 = vsel %vm2079_vm12, 1.0, %v3703_v52  ;;  %v3466_v0 = vsel %vm2080_vm13, 1.0, %v3703_v52  ;;  %v3467_v41 = vsel %vm2081_vm14, 1.0, %v3703_v52 }
 0x27d   :  { %v3468_v2 = vsel %vm2082_vm15, 1.0, %v3703_v52  ;;  %v2091_v4 = vadd.f32 %v3465_v63, %v2027_v6  ;;  %v2092_v46 = vadd.f32 %v3466_v0, %v2028_v43  ;;  %v2093_v3 = vadd.f32 %v3467_v41, %v2029_v8 }
 0x27e   :  { %v2094_v48 = vadd.f32 %v3468_v2, %v2030_v56  ;;  %v2095_v45 = vsel %vm2079_vm12, -65.0, %v2063_v21  ;;  %v2096_v40 = vsel %vm2080_vm13, -65.0, %v2064_v55  ;;  %v2097_v35 = vsel %vm2081_vm14, -65.0, %v2065_v34 }
 0x27f   :  { %v2098_v32 = vsel %vm2082_vm15, -65.0, %v2066_v54  ;;  %v2099_v29 = vadd.f32 8.0, %v2075_v33  ;;  %v2100_v26 = vadd.f32 8.0, %v2076_v49  ;;  %v2101_v23 = vadd.f32 8.0, %v2077_v53 }
 0x280   :  { %v2102_v18 = vadd.f32 8.0, %v2078_v36  ;;  %v2107_v15 = vmul.f32 0.02, %v2095_v45  ;;  %v2108_v12 = vmul.f32 0.02, %v2096_v40 }
 0x281   :  { %v2103_v9 = vsel %vm2079_vm12, %v2099_v29, %v2075_v33  ;;  %v2104_v6 = vsel %vm2080_vm13, %v2100_v26, %v2076_v49  ;;  %v2105_v43 = vsel %vm2081_vm14, %v2101_v23, %v2077_v53  ;;  %v2109_v8 = vmul.f32 0.02, %v2097_v35 }
 0x282   :  { %v2106_v56 = vsel %vm2082_vm15, %v2102_v18, %v2078_v36  ;;  %v2110_v42 = vmul.f32 0.02, %v2098_v32  ;;  %v2111_v11 = vadd.f32 3.5, %v2107_v15  ;;  %v2112_v1 = vadd.f32 3.5, %v2108_v12 }
 0x283   :  { %v2113_v62 = vadd.f32 3.5, %v2109_v8  ;;  %v2119_v14 = vmul.f32 -0.5, %v2103_v9  ;;  %v2120_v5 = vmul.f32 -0.5, %v2104_v6  ;;  %v2121_v61 = vmul.f32 -0.5, %v2105_v43 }
 0x284   :  { %v2114_v17 = vadd.f32 3.5, %v2110_v42  ;;  %v2115_v7 = vmul.f32 %v2111_v11, %v2095_v45  ;;  %v2116_v60 = vmul.f32 %v2112_v1, %v2096_v40  ;;  %v2122_v22 = vmul.f32 -0.5, %v2106_v56 }
 0x285   :  { %v2117_v10 = vmul.f32 %v2113_v62, %v2097_v35  ;;  %v2123_v59 = vadd.f32 %v2119_v14, %v3757_v19  ;;  %v2124_v25 = vadd.f32 %v2120_v5, %v3759_v20  ;;  %v2125_v13 = vadd.f32 %v2121_v61, %v3763_v38 }
 0x286   :  { %v2118_v58 = vmul.f32 %v2114_v17, %v2098_v32  ;;  %v2126_v28 = vadd.f32 %v2122_v22, %v3765_v39  ;;  %v2131_v21 = vmul.f32 0.99, %v2103_v9  ;;  %v2132_v34 = vmul.f32 0.99, %v2104_v6 }
 0x287   :  { %v2127_v16 = vadd.f32 %v2123_v59, %v2115_v7  ;;  %v2128_v57 = vadd.f32 %v2124_v25, %v2116_v60  ;;  %v2129_v31 = vadd.f32 %v2125_v13, %v2117_v10  ;;  %v2133_v24 = vmul.f32 0.99, %v2105_v43 }
 0x288   :  { %v2130_v55 = vadd.f32 %v2126_v28, %v2118_v58  ;;  %v2134_v54 = vmul.f32 0.99, %v2106_v56 }
 0x289   :  { %v2135_v37 = vmul.f32 0.002, %v2127_v16  ;;  %v2136_v27 = vmul.f32 0.002, %v2128_v57  ;;  %v2137_v51 = vmul.f32 0.002, %v2129_v31 }
 0x28a   :  { %v2138_v44 = vmul.f32 0.002, %v2130_v55  ;;  %vm2143_vm0 = vcmp.gt.f32.partialorder %v2127_v16, 30.0  ;;  %vm2144_vm1 = vcmp.gt.f32.partialorder %v2128_v57, 30.0  ;;  %vm2145_vm2 = vcmp.gt.f32.partialorder %v2129_v31, 30.0 }
 0x28b   :  { %v2139_v30 = vadd.f32 %v2135_v37, %v2131_v21  ;;  %v2140_v50 = vadd.f32 %v2136_v27, %v2132_v34  ;;  %v2141_v47 = vadd.f32 %v2137_v51, %v2133_v24  ;;  %vm2146_vm3 = vcmp.gt.f32.partialorder %v2130_v55, 30.0 }
 0x28c   :  { %v2142_v33 = vadd.f32 %v2138_v44, %v2134_v54  ;;  %v3469_v49 = vsel %vm2143_vm0, 1.0, %v3703_v52  ;;  %v3470_v53 = vsel %vm2144_vm1, 1.0, %v3703_v52  ;;  %v3471_v36 = vsel %vm2145_vm2, 1.0, %v3703_v52 }
 0x28d   :  { %v3472_v63 = vsel %vm2146_vm3, 1.0, %v3703_v52  ;;  %v2155_v0 = vadd.f32 %v3469_v49, %v2091_v4  ;;  %v2156_v41 = vadd.f32 %v3470_v53, %v2092_v46  ;;  %v2157_v2 = vadd.f32 %v3471_v36, %v2093_v3 }
 0x28e   :  { %v2158_v45 = vadd.f32 %v3472_v63, %v2094_v48  ;;  %v2159_v40 = vsel %vm2143_vm0, -65.0, %v2127_v16  ;;  %v2160_v35 = vsel %vm2144_vm1, -65.0, %v2128_v57  ;;  %v2161_v32 = vsel %vm2145_vm2, -65.0, %v2129_v31 }
 0x28f   :  { %v2162_v29 = vsel %vm2146_vm3, -65.0, %v2130_v55  ;;  %v2163_v26 = vadd.f32 8.0, %v2139_v30  ;;  %v2164_v23 = vadd.f32 8.0, %v2140_v50  ;;  %v2165_v18 = vadd.f32 8.0, %v2141_v47 }
 0x290   :  { %v2166_v15 = vadd.f32 8.0, %v2142_v33  ;;  %v2171_v12 = vmul.f32 0.02, %v2159_v40  ;;  %v2172_v9 = vmul.f32 0.02, %v2160_v35 }
 0x291   :  { %v2167_v6 = vsel %vm2143_vm0, %v2163_v26, %v2139_v30  ;;  %v2168_v4 = vsel %vm2144_vm1, %v2164_v23, %v2140_v50  ;;  %v2169_v46 = vsel %vm2145_vm2, %v2165_v18, %v2141_v47  ;;  %v2173_v3 = vmul.f32 0.02, %v2161_v32 }
 0x292   :  { %v2170_v48 = vsel %vm2146_vm3, %v2166_v15, %v2142_v33  ;;  %v2174_v43 = vmul.f32 0.02, %v2162_v29  ;;  %v2175_v8 = vadd.f32 3.5, %v2171_v12  ;;  %v2176_v56 = vadd.f32 3.5, %v2172_v9 }
 0x293   :  { %v2177_v42 = vadd.f32 3.5, %v2173_v3  ;;  %v2183_v11 = vmul.f32 -0.5, %v2167_v6  ;;  %v2184_v1 = vmul.f32 -0.5, %v2168_v4  ;;  %v2185_v62 = vmul.f32 -0.5, %v2169_v46 }
 0x294   :  { %v2178_v14 = vadd.f32 3.5, %v2174_v43  ;;  %v2179_v5 = vmul.f32 %v2175_v8, %v2159_v40  ;;  %v2180_v61 = vmul.f32 %v2176_v56, %v2160_v35  ;;  %v2186_v17 = vmul.f32 -0.5, %v2170_v48 }
 0x295   :  { %v2181_v7 = vmul.f32 %v2177_v42, %v2161_v32  ;;  %v2187_v60 = vadd.f32 %v2183_v11, %v3757_v19  ;;  %v2188_v22 = vadd.f32 %v2184_v1, %v3759_v20  ;;  %v2189_v10 = vadd.f32 %v2185_v62, %v3763_v38 }
 0x296   :  { %v2182_v59 = vmul.f32 %v2178_v14, %v2162_v29  ;;  %v2190_v25 = vadd.f32 %v2186_v17, %v3765_v39  ;;  %v2195_v16 = vmul.f32 0.99, %v2167_v6  ;;  %v2196_v31 = vmul.f32 0.99, %v2168_v4 }
 0x297   :  { %v2191_v13 = vadd.f32 %v2187_v60, %v2179_v5  ;;  %v2192_v58 = vadd.f32 %v2188_v22, %v2180_v61  ;;  %v2193_v28 = vadd.f32 %v2189_v10, %v2181_v7  ;;  %v2197_v21 = vmul.f32 0.99, %v2169_v46 }
 0x298   :  { %v2194_v57 = vadd.f32 %v2190_v25, %v2182_v59  ;;  %v2198_v55 = vmul.f32 0.99, %v2170_v48 }
 0x299   :  { %v2199_v34 = vmul.f32 0.002, %v2191_v13  ;;  %v2200_v24 = vmul.f32 0.002, %v2192_v58  ;;  %v2201_v54 = vmul.f32 0.002, %v2193_v28 }
 0x29a   :  { %v2202_v37 = vmul.f32 0.002, %v2194_v57  ;;  %vm2207_vm4 = vcmp.gt.f32.partialorder %v2191_v13, 30.0  ;;  %vm2208_vm5 = vcmp.gt.f32.partialorder %v2192_v58, 30.0  ;;  %vm2209_vm6 = vcmp.gt.f32.partialorder %v2193_v28, 30.0 }
 0x29b   :  { %v2203_v27 = vadd.f32 %v2199_v34, %v2195_v16  ;;  %v2204_v51 = vadd.f32 %v2200_v24, %v2196_v31  ;;  %v2205_v44 = vadd.f32 %v2201_v54, %v2197_v21  ;;  %vm2210_vm7 = vcmp.gt.f32.partialorder %v2194_v57, 30.0 }
 0x29c   :  { %v2206_v30 = vadd.f32 %v2202_v37, %v2198_v55  ;;  %v3473_v50 = vsel %vm2207_vm4, 1.0, %v3703_v52  ;;  %v3474_v47 = vsel %vm2208_vm5, 1.0, %v3703_v52  ;;  %v3475_v33 = vsel %vm2209_vm6, 1.0, %v3703_v52 }
 0x29d   :  { %v3476_v49 = vsel %vm2210_vm7, 1.0, %v3703_v52  ;;  %v2219_v53 = vadd.f32 %v3473_v50, %v2155_v0  ;;  %v2220_v36 = vadd.f32 %v3474_v47, %v2156_v41  ;;  %v2221_v63 = vadd.f32 %v3475_v33, %v2157_v2 }
 0x29e   :  { %v2222_v40 = vadd.f32 %v3476_v49, %v2158_v45  ;;  %v2223_v35 = vsel %vm2207_vm4, -65.0, %v2191_v13  ;;  %v2224_v32 = vsel %vm2208_vm5, -65.0, %v2192_v58  ;;  %v2225_v29 = vsel %vm2209_vm6, -65.0, %v2193_v28 }
 0x29f   :  { %v2226_v26 = vsel %vm2210_vm7, -65.0, %v2194_v57  ;;  %v2227_v23 = vadd.f32 8.0, %v2203_v27  ;;  %v2228_v18 = vadd.f32 8.0, %v2204_v51  ;;  %v2229_v15 = vadd.f32 8.0, %v2205_v44 }
 0x2a0   :  { %v2230_v12 = vadd.f32 8.0, %v2206_v30  ;;  %v2235_v9 = vmul.f32 0.02, %v2223_v35  ;;  %v2236_v6 = vmul.f32 0.02, %v2224_v32 }
 0x2a1   :  { %v2231_v4 = vsel %vm2207_vm4, %v2227_v23, %v2203_v27  ;;  %v2232_v0 = vsel %vm2208_vm5, %v2228_v18, %v2204_v51  ;;  %v2233_v41 = vsel %vm2209_vm6, %v2229_v15, %v2205_v44  ;;  %v2237_v2 = vmul.f32 0.02, %v2225_v29 }
 0x2a2   :  { %v2234_v45 = vsel %vm2210_vm7, %v2230_v12, %v2206_v30  ;;  %v2238_v46 = vmul.f32 0.02, %v2226_v26  ;;  %v2239_v3 = vadd.f32 3.5, %v2235_v9  ;;  %v2240_v48 = vadd.f32 3.5, %v2236_v6 }
 0x2a3   :  { %v2241_v43 = vadd.f32 3.5, %v2237_v2  ;;  %v2247_v8 = vmul.f32 -0.5, %v2231_v4  ;;  %v2248_v56 = vmul.f32 -0.5, %v2232_v0  ;;  %v2249_v42 = vmul.f32 -0.5, %v2233_v41 }
 0x2a4   :  { %v2242_v11 = vadd.f32 3.5, %v2238_v46  ;;  %v2243_v1 = vmul.f32 %v2239_v3, %v2223_v35  ;;  %v2244_v62 = vmul.f32 %v2240_v48, %v2224_v32  ;;  %v2250_v14 = vmul.f32 -0.5, %v2234_v45 }
 0x2a5   :  { %v2245_v5 = vmul.f32 %v2241_v43, %v2225_v29  ;;  %v2251_v61 = vadd.f32 %v2247_v8, %v3757_v19  ;;  %v2252_v17 = vadd.f32 %v2248_v56, %v3759_v20  ;;  %v2253_v7 = vadd.f32 %v2249_v42, %v3763_v38 }
 0x2a6   :  { %v2246_v60 = vmul.f32 %v2242_v11, %v2226_v26  ;;  %v2254_v22 = vadd.f32 %v2250_v14, %v3765_v39  ;;  %v2259_v13 = vmul.f32 0.99, %v2231_v4  ;;  %v2260_v28 = vmul.f32 0.99, %v2232_v0 }
 0x2a7   :  { %v2255_v10 = vadd.f32 %v2251_v61, %v2243_v1  ;;  %v2256_v59 = vadd.f32 %v2252_v17, %v2244_v62  ;;  %v2257_v25 = vadd.f32 %v2253_v7, %v2245_v5  ;;  %v2261_v16 = vmul.f32 0.99, %v2233_v41 }
 0x2a8   :  { %v2258_v58 = vadd.f32 %v2254_v22, %v2246_v60  ;;  %v2262_v57 = vmul.f32 0.99, %v2234_v45 }
 0x2a9   :  { %v2263_v31 = vmul.f32 0.002, %v2255_v10  ;;  %v2264_v21 = vmul.f32 0.002, %v2256_v59  ;;  %v2265_v55 = vmul.f32 0.002, %v2257_v25 }
 0x2aa   :  { %v2266_v34 = vmul.f32 0.002, %v2258_v58  ;;  %vm2271_vm8 = vcmp.gt.f32.partialorder %v2255_v10, 30.0  ;;  %vm2272_vm9 = vcmp.gt.f32.partialorder %v2256_v59, 30.0  ;;  %vm2273_vm10 = vcmp.gt.f32.partialorder %v2257_v25, 30.0 }
 0x2ab   :  { %v2267_v24 = vadd.f32 %v2263_v31, %v2259_v13  ;;  %v2268_v54 = vadd.f32 %v2264_v21, %v2260_v28  ;;  %v2269_v37 = vadd.f32 %v2265_v55, %v2261_v16  ;;  %vm2274_vm11 = vcmp.gt.f32.partialorder %v2258_v58, 30.0 }
 0x2ac   :  { %v2270_v27 = vadd.f32 %v2266_v34, %v2262_v57  ;;  %v3477_v51 = vsel %vm2271_vm8, 1.0, %v3703_v52  ;;  %v3478_v44 = vsel %vm2272_vm9, 1.0, %v3703_v52  ;;  %v3479_v30 = vsel %vm2273_vm10, 1.0, %v3703_v52 }
 0x2ad   :  { %v3480_v50 = vsel %vm2274_vm11, 1.0, %v3703_v52  ;;  %v2283_v47 = vadd.f32 %v3477_v51, %v2219_v53  ;;  %v2284_v33 = vadd.f32 %v3478_v44, %v2220_v36  ;;  %v2285_v49 = vadd.f32 %v3479_v30, %v2221_v63 }
 0x2ae   :  { %v2286_v35 = vadd.f32 %v3480_v50, %v2222_v40  ;;  %v2287_v32 = vsel %vm2271_vm8, -65.0, %v2255_v10  ;;  %v2288_v29 = vsel %vm2272_vm9, -65.0, %v2256_v59  ;;  %v2289_v26 = vsel %vm2273_vm10, -65.0, %v2257_v25 }
 0x2af   :  { %v2290_v23 = vsel %vm2274_vm11, -65.0, %v2258_v58  ;;  %v2291_v18 = vadd.f32 8.0, %v2267_v24  ;;  %v2292_v15 = vadd.f32 8.0, %v2268_v54  ;;  %v2293_v12 = vadd.f32 8.0, %v2269_v37 }
 0x2b0   :  { %v2294_v9 = vadd.f32 8.0, %v2270_v27  ;;  %v2299_v6 = vmul.f32 0.02, %v2287_v32  ;;  %v2300_v4 = vmul.f32 0.02, %v2288_v29 }
 0x2b1   :  { %v2295_v0 = vsel %vm2271_vm8, %v2291_v18, %v2267_v24  ;;  %v2296_v53 = vsel %vm2272_vm9, %v2292_v15, %v2268_v54  ;;  %v2297_v36 = vsel %vm2273_vm10, %v2293_v12, %v2269_v37  ;;  %v2301_v63 = vmul.f32 0.02, %v2289_v26 }
 0x2b2   :  { %v2298_v40 = vsel %vm2274_vm11, %v2294_v9, %v2270_v27  ;;  %v2302_v41 = vmul.f32 0.02, %v2290_v23  ;;  %v2303_v2 = vadd.f32 3.5, %v2299_v6  ;;  %v2304_v45 = vadd.f32 3.5, %v2300_v4 }
 0x2b3   :  { %v2305_v46 = vadd.f32 3.5, %v2301_v63  ;;  %v2311_v3 = vmul.f32 -0.5, %v2295_v0  ;;  %v2312_v48 = vmul.f32 -0.5, %v2296_v53  ;;  %v2313_v43 = vmul.f32 -0.5, %v2297_v36 }
 0x2b4   :  { %v2306_v8 = vadd.f32 3.5, %v2302_v41  ;;  %v2307_v56 = vmul.f32 %v2303_v2, %v2287_v32  ;;  %v2308_v42 = vmul.f32 %v2304_v45, %v2288_v29  ;;  %v2314_v11 = vmul.f32 -0.5, %v2298_v40 }
 0x2b5   :  { %v2309_v1 = vmul.f32 %v2305_v46, %v2289_v26  ;;  %v2315_v62 = vadd.f32 %v2311_v3, %v3757_v19  ;;  %v2316_v14 = vadd.f32 %v2312_v48, %v3759_v20  ;;  %v2317_v5 = vadd.f32 %v2313_v43, %v3763_v38 }
 0x2b6   :  { %v2310_v61 = vmul.f32 %v2306_v8, %v2290_v23  ;;  %v2318_v17 = vadd.f32 %v2314_v11, %v3765_v39  ;;  %v2323_v10 = vmul.f32 0.99, %v2295_v0  ;;  %v2324_v25 = vmul.f32 0.99, %v2296_v53 }
 0x2b7   :  { %v2319_v7 = vadd.f32 %v2315_v62, %v2307_v56  ;;  %v2320_v60 = vadd.f32 %v2316_v14, %v2308_v42  ;;  %v2321_v22 = vadd.f32 %v2317_v5, %v2309_v1  ;;  %v2325_v13 = vmul.f32 0.99, %v2297_v36 }
 0x2b8   :  { %v2322_v59 = vadd.f32 %v2318_v17, %v2310_v61  ;;  %v2326_v58 = vmul.f32 0.99, %v2298_v40 }
 0x2b9   :  { %v2327_v28 = vmul.f32 0.002, %v2319_v7  ;;  %v2328_v16 = vmul.f32 0.002, %v2320_v60  ;;  %v2329_v57 = vmul.f32 0.002, %v2321_v22 }
 0x2ba   :  { %v2330_v31 = vmul.f32 0.002, %v2322_v59  ;;  %vm2335_vm12 = vcmp.gt.f32.partialorder %v2319_v7, 30.0  ;;  %vm2336_vm13 = vcmp.gt.f32.partialorder %v2320_v60, 30.0  ;;  %vm2337_vm14 = vcmp.gt.f32.partialorder %v2321_v22, 30.0 }
 0x2bb   :  { %v2331_v21 = vadd.f32 %v2327_v28, %v2323_v10  ;;  %v2332_v55 = vadd.f32 %v2328_v16, %v2324_v25  ;;  %v2333_v34 = vadd.f32 %v2329_v57, %v2325_v13  ;;  %vm2338_vm15 = vcmp.gt.f32.partialorder %v2322_v59, 30.0 }
 0x2bc   :  { %v2334_v24 = vadd.f32 %v2330_v31, %v2326_v58  ;;  %v3481_v54 = vsel %vm2335_vm12, 1.0, %v3703_v52  ;;  %v3482_v37 = vsel %vm2336_vm13, 1.0, %v3703_v52  ;;  %v3483_v27 = vsel %vm2337_vm14, 1.0, %v3703_v52 }
 0x2bd   :  { %v3484_v51 = vsel %vm2338_vm15, 1.0, %v3703_v52  ;;  %v2347_v44 = vadd.f32 %v3481_v54, %v2283_v47  ;;  %v2348_v30 = vadd.f32 %v3482_v37, %v2284_v33  ;;  %v2349_v50 = vadd.f32 %v3483_v27, %v2285_v49 }
 0x2be   :  { %v2350_v32 = vadd.f32 %v3484_v51, %v2286_v35  ;;  %v2351_v29 = vsel %vm2335_vm12, -65.0, %v2319_v7  ;;  %v2352_v26 = vsel %vm2336_vm13, -65.0, %v2320_v60  ;;  %v2353_v23 = vsel %vm2337_vm14, -65.0, %v2321_v22 }
 0x2bf   :  { %v2354_v18 = vsel %vm2338_vm15, -65.0, %v2322_v59  ;;  %v2355_v15 = vadd.f32 8.0, %v2331_v21  ;;  %v2356_v12 = vadd.f32 8.0, %v2332_v55  ;;  %v2357_v9 = vadd.f32 8.0, %v2333_v34 }
 0x2c0   :  { %v2358_v6 = vadd.f32 8.0, %v2334_v24  ;;  %v2363_v4 = vmul.f32 0.02, %v2351_v29  ;;  %v2364_v0 = vmul.f32 0.02, %v2352_v26 }
 0x2c1   :  { %v2359_v53 = vsel %vm2335_vm12, %v2355_v15, %v2331_v21  ;;  %v2360_v47 = vsel %vm2336_vm13, %v2356_v12, %v2332_v55  ;;  %v2361_v33 = vsel %vm2337_vm14, %v2357_v9, %v2333_v34  ;;  %v2365_v49 = vmul.f32 0.02, %v2353_v23 }
 0x2c2   :  { %v2362_v35 = vsel %vm2338_vm15, %v2358_v6, %v2334_v24  ;;  %v2366_v36 = vmul.f32 0.02, %v2354_v18  ;;  %v2367_v63 = vadd.f32 3.5, %v2363_v4  ;;  %v2368_v40 = vadd.f32 3.5, %v2364_v0 }
 0x2c3   :  { %v2369_v41 = vadd.f32 3.5, %v2365_v49  ;;  %v2375_v2 = vmul.f32 -0.5, %v2359_v53  ;;  %v2376_v45 = vmul.f32 -0.5, %v2360_v47  ;;  %v2377_v46 = vmul.f32 -0.5, %v2361_v33 }
 0x2c4   :  { %v2370_v3 = vadd.f32 3.5, %v2366_v36  ;;  %v2371_v48 = vmul.f32 %v2367_v63, %v2351_v29  ;;  %v2372_v43 = vmul.f32 %v2368_v40, %v2352_v26  ;;  %v2378_v8 = vmul.f32 -0.5, %v2362_v35 }
 0x2c5   :  { %v2373_v56 = vmul.f32 %v2369_v41, %v2353_v23  ;;  %v2379_v42 = vadd.f32 %v2375_v2, %v3757_v19  ;;  %v2380_v11 = vadd.f32 %v2376_v45, %v3759_v20  ;;  %v2381_v1 = vadd.f32 %v2377_v46, %v3763_v38 }
 0x2c6   :  { %v2374_v62 = vmul.f32 %v2370_v3, %v2354_v18  ;;  %v2382_v14 = vadd.f32 %v2378_v8, %v3765_v39  ;;  %v2387_v7 = vmul.f32 0.99, %v2359_v53  ;;  %v2388_v22 = vmul.f32 0.99, %v2360_v47 }
 0x2c7   :  { %v2383_v5 = vadd.f32 %v2379_v42, %v2371_v48  ;;  %v2384_v61 = vadd.f32 %v2380_v11, %v2372_v43  ;;  %v2385_v17 = vadd.f32 %v2381_v1, %v2373_v56  ;;  %v2389_v10 = vmul.f32 0.99, %v2361_v33 }
 0x2c8   :  { %v2386_v60 = vadd.f32 %v2382_v14, %v2374_v62  ;;  %v2390_v59 = vmul.f32 0.99, %v2362_v35 }
 0x2c9   :  { %v2391_v25 = vmul.f32 0.002, %v2383_v5  ;;  %v2392_v13 = vmul.f32 0.002, %v2384_v61  ;;  %v2393_v58 = vmul.f32 0.002, %v2385_v17 }
 0x2ca   :  { %v2394_v28 = vmul.f32 0.002, %v2386_v60  ;;  %vm2399_vm0 = vcmp.gt.f32.partialorder %v2383_v5, 30.0  ;;  %vm2400_vm1 = vcmp.gt.f32.partialorder %v2384_v61, 30.0  ;;  %vm2401_vm2 = vcmp.gt.f32.partialorder %v2385_v17, 30.0 }
 0x2cb   :  { %v2395_v16 = vadd.f32 %v2391_v25, %v2387_v7  ;;  %v2396_v57 = vadd.f32 %v2392_v13, %v2388_v22  ;;  %v2397_v31 = vadd.f32 %v2393_v58, %v2389_v10  ;;  %vm2402_vm3 = vcmp.gt.f32.partialorder %v2386_v60, 30.0 }
 0x2cc   :  { %v2398_v21 = vadd.f32 %v2394_v28, %v2390_v59  ;;  %v3485_v55 = vsel %vm2399_vm0, 1.0, %v3703_v52  ;;  %v3486_v34 = vsel %vm2400_vm1, 1.0, %v3703_v52  ;;  %v3487_v24 = vsel %vm2401_vm2, 1.0, %v3703_v52 }
 0x2cd   :  { %v3488_v54 = vsel %vm2402_vm3, 1.0, %v3703_v52  ;;  %v2411_v37 = vadd.f32 %v3485_v55, %v2347_v44  ;;  %v2412_v27 = vadd.f32 %v3486_v34, %v2348_v30  ;;  %v2413_v51 = vadd.f32 %v3487_v24, %v2349_v50 }
 0x2ce   :  { %v2414_v29 = vadd.f32 %v3488_v54, %v2350_v32  ;;  %v2415_v26 = vsel %vm2399_vm0, -65.0, %v2383_v5  ;;  %v2416_v23 = vsel %vm2400_vm1, -65.0, %v2384_v61  ;;  %v2417_v18 = vsel %vm2401_vm2, -65.0, %v2385_v17 }
 0x2cf   :  { %v2418_v15 = vsel %vm2402_vm3, -65.0, %v2386_v60  ;;  %v2419_v12 = vadd.f32 8.0, %v2395_v16  ;;  %v2420_v9 = vadd.f32 8.0, %v2396_v57  ;;  %v2421_v6 = vadd.f32 8.0, %v2397_v31 }
 0x2d0   :  { %v2422_v4 = vadd.f32 8.0, %v2398_v21  ;;  %v2427_v0 = vmul.f32 0.02, %v2415_v26  ;;  %v2428_v53 = vmul.f32 0.02, %v2416_v23 }
 0x2d1   :  { %v2423_v47 = vsel %vm2399_vm0, %v2419_v12, %v2395_v16  ;;  %v2424_v44 = vsel %vm2400_vm1, %v2420_v9, %v2396_v57  ;;  %v2425_v30 = vsel %vm2401_vm2, %v2421_v6, %v2397_v31  ;;  %v2429_v50 = vmul.f32 0.02, %v2417_v18 }
 0x2d2   :  { %v2426_v32 = vsel %vm2402_vm3, %v2422_v4, %v2398_v21  ;;  %v2430_v33 = vmul.f32 0.02, %v2418_v15  ;;  %v2431_v49 = vadd.f32 3.5, %v2427_v0  ;;  %v2432_v35 = vadd.f32 3.5, %v2428_v53 }
 0x2d3   :  { %v2433_v36 = vadd.f32 3.5, %v2429_v50  ;;  %v2439_v63 = vmul.f32 -0.5, %v2423_v47  ;;  %v2440_v40 = vmul.f32 -0.5, %v2424_v44  ;;  %v2441_v41 = vmul.f32 -0.5, %v2425_v30 }
 0x2d4   :  { %v2434_v2 = vadd.f32 3.5, %v2430_v33  ;;  %v2435_v45 = vmul.f32 %v2431_v49, %v2415_v26  ;;  %v2436_v46 = vmul.f32 %v2432_v35, %v2416_v23  ;;  %v2442_v3 = vmul.f32 -0.5, %v2426_v32 }
 0x2d5   :  { %v2437_v48 = vmul.f32 %v2433_v36, %v2417_v18  ;;  %v2443_v43 = vadd.f32 %v2439_v63, %v3757_v19  ;;  %v2444_v8 = vadd.f32 %v2440_v40, %v3759_v20  ;;  %v2445_v56 = vadd.f32 %v2441_v41, %v3763_v38 }
 0x2d6   :  { %v2438_v42 = vmul.f32 %v2434_v2, %v2418_v15  ;;  %v2446_v11 = vadd.f32 %v2442_v3, %v3765_v39  ;;  %v2451_v5 = vmul.f32 0.99, %v2423_v47  ;;  %v2452_v17 = vmul.f32 0.99, %v2424_v44 }
 0x2d7   :  { %v2447_v1 = vadd.f32 %v2443_v43, %v2435_v45  ;;  %v2448_v62 = vadd.f32 %v2444_v8, %v2436_v46  ;;  %v2449_v14 = vadd.f32 %v2445_v56, %v2437_v48  ;;  %v2453_v7 = vmul.f32 0.99, %v2425_v30 }
 0x2d8   :  { %v2450_v61 = vadd.f32 %v2446_v11, %v2438_v42  ;;  %v2454_v60 = vmul.f32 0.99, %v2426_v32 }
 0x2d9   :  { %v2455_v22 = vmul.f32 0.002, %v2447_v1  ;;  %v2456_v10 = vmul.f32 0.002, %v2448_v62  ;;  %v2457_v59 = vmul.f32 0.002, %v2449_v14 }
 0x2da   :  { %v2458_v25 = vmul.f32 0.002, %v2450_v61  ;;  %vm2463_vm4 = vcmp.gt.f32.partialorder %v2447_v1, 30.0  ;;  %vm2464_vm5 = vcmp.gt.f32.partialorder %v2448_v62, 30.0  ;;  %vm2465_vm6 = vcmp.gt.f32.partialorder %v2449_v14, 30.0 }
 0x2db   :  { %v2459_v13 = vadd.f32 %v2455_v22, %v2451_v5  ;;  %v2460_v58 = vadd.f32 %v2456_v10, %v2452_v17  ;;  %v2461_v28 = vadd.f32 %v2457_v59, %v2453_v7  ;;  %vm2466_vm7 = vcmp.gt.f32.partialorder %v2450_v61, 30.0 }
 0x2dc   :  { %v2462_v16 = vadd.f32 %v2458_v25, %v2454_v60  ;;  %v3489_v57 = vsel %vm2463_vm4, 1.0, %v3703_v52  ;;  %v3490_v31 = vsel %vm2464_vm5, 1.0, %v3703_v52  ;;  %v3491_v21 = vsel %vm2465_vm6, 1.0, %v3703_v52 }
 0x2dd   :  { %v3492_v55 = vsel %vm2466_vm7, 1.0, %v3703_v52  ;;  %v2475_v34 = vadd.f32 %v3489_v57, %v2411_v37  ;;  %v2476_v24 = vadd.f32 %v3490_v31, %v2412_v27  ;;  %v2477_v54 = vadd.f32 %v3491_v21, %v2413_v51 }
 0x2de   :  { %v2478_v26 = vadd.f32 %v3492_v55, %v2414_v29  ;;  %v2479_v23 = vsel %vm2463_vm4, -65.0, %v2447_v1  ;;  %v2480_v18 = vsel %vm2464_vm5, -65.0, %v2448_v62  ;;  %v2481_v15 = vsel %vm2465_vm6, -65.0, %v2449_v14 }
 0x2df   :  { %v2482_v12 = vsel %vm2466_vm7, -65.0, %v2450_v61  ;;  %v2483_v9 = vadd.f32 8.0, %v2459_v13  ;;  %v2484_v6 = vadd.f32 8.0, %v2460_v58  ;;  %v2485_v4 = vadd.f32 8.0, %v2461_v28 }
 0x2e0   :  { %v2486_v0 = vadd.f32 8.0, %v2462_v16  ;;  %v2491_v53 = vmul.f32 0.02, %v2479_v23  ;;  %v2492_v47 = vmul.f32 0.02, %v2480_v18 }
 0x2e1   :  { %v2487_v44 = vsel %vm2463_vm4, %v2483_v9, %v2459_v13  ;;  %v2488_v37 = vsel %vm2464_vm5, %v2484_v6, %v2460_v58  ;;  %v2489_v27 = vsel %vm2465_vm6, %v2485_v4, %v2461_v28  ;;  %v2493_v51 = vmul.f32 0.02, %v2481_v15 }
 0x2e2   :  { %v2490_v29 = vsel %vm2466_vm7, %v2486_v0, %v2462_v16  ;;  %v2494_v30 = vmul.f32 0.02, %v2482_v12  ;;  %v2495_v50 = vadd.f32 3.5, %v2491_v53  ;;  %v2496_v32 = vadd.f32 3.5, %v2492_v47 }
 0x2e3   :  { %v2497_v33 = vadd.f32 3.5, %v2493_v51  ;;  %v2503_v49 = vmul.f32 -0.5, %v2487_v44  ;;  %v2504_v35 = vmul.f32 -0.5, %v2488_v37  ;;  %v2505_v36 = vmul.f32 -0.5, %v2489_v27 }
 0x2e4   :  { %v2498_v63 = vadd.f32 3.5, %v2494_v30  ;;  %v2499_v40 = vmul.f32 %v2495_v50, %v2479_v23  ;;  %v2500_v41 = vmul.f32 %v2496_v32, %v2480_v18  ;;  %v2506_v2 = vmul.f32 -0.5, %v2490_v29 }
 0x2e5   :  { %v2501_v45 = vmul.f32 %v2497_v33, %v2481_v15  ;;  %v2507_v46 = vadd.f32 %v2503_v49, %v3757_v19  ;;  %v2508_v3 = vadd.f32 %v2504_v35, %v3759_v20  ;;  %v2509_v48 = vadd.f32 %v2505_v36, %v3763_v38 }
 0x2e6   :  { %v2502_v43 = vmul.f32 %v2498_v63, %v2482_v12  ;;  %v2510_v8 = vadd.f32 %v2506_v2, %v3765_v39  ;;  %v2515_v1 = vmul.f32 0.99, %v2487_v44  ;;  %v2516_v14 = vmul.f32 0.99, %v2488_v37 }
 0x2e7   :  { %v2511_v56 = vadd.f32 %v2507_v46, %v2499_v40  ;;  %v2512_v42 = vadd.f32 %v2508_v3, %v2500_v41  ;;  %v2513_v11 = vadd.f32 %v2509_v48, %v2501_v45  ;;  %v2517_v5 = vmul.f32 0.99, %v2489_v27 }
 0x2e8   :  { %v2514_v62 = vadd.f32 %v2510_v8, %v2502_v43  ;;  %v2518_v61 = vmul.f32 0.99, %v2490_v29 }
 0x2e9   :  { %v2519_v17 = vmul.f32 0.002, %v2511_v56  ;;  %v2520_v7 = vmul.f32 0.002, %v2512_v42  ;;  %v2521_v60 = vmul.f32 0.002, %v2513_v11 }
 0x2ea   :  { %v2522_v22 = vmul.f32 0.002, %v2514_v62  ;;  %vm2527_vm8 = vcmp.gt.f32.partialorder %v2511_v56, 30.0  ;;  %vm2528_vm9 = vcmp.gt.f32.partialorder %v2512_v42, 30.0  ;;  %vm2529_vm10 = vcmp.gt.f32.partialorder %v2513_v11, 30.0 }
 0x2eb   :  { %v2523_v10 = vadd.f32 %v2519_v17, %v2515_v1  ;;  %v2524_v59 = vadd.f32 %v2520_v7, %v2516_v14  ;;  %v2525_v25 = vadd.f32 %v2521_v60, %v2517_v5  ;;  %vm2530_vm11 = vcmp.gt.f32.partialorder %v2514_v62, 30.0 }
 0x2ec   :  { %v2526_v13 = vadd.f32 %v2522_v22, %v2518_v61  ;;  %v3493_v58 = vsel %vm2527_vm8, 1.0, %v3703_v52  ;;  %v3494_v28 = vsel %vm2528_vm9, 1.0, %v3703_v52  ;;  %v3495_v16 = vsel %vm2529_vm10, 1.0, %v3703_v52 }
 0x2ed   :  { %v3496_v57 = vsel %vm2530_vm11, 1.0, %v3703_v52  ;;  %v2539_v31 = vadd.f32 %v3493_v58, %v2475_v34  ;;  %v2540_v21 = vadd.f32 %v3494_v28, %v2476_v24  ;;  %v2541_v55 = vadd.f32 %v3495_v16, %v2477_v54 }
 0x2ee   :  { %v2542_v23 = vadd.f32 %v3496_v57, %v2478_v26  ;;  %v2543_v18 = vsel %vm2527_vm8, -65.0, %v2511_v56  ;;  %v2544_v15 = vsel %vm2528_vm9, -65.0, %v2512_v42  ;;  %v2545_v12 = vsel %vm2529_vm10, -65.0, %v2513_v11 }
 0x2ef   :  { %v2546_v9 = vsel %vm2530_vm11, -65.0, %v2514_v62  ;;  %v2547_v6 = vadd.f32 8.0, %v2523_v10  ;;  %v2548_v4 = vadd.f32 8.0, %v2524_v59  ;;  %v2549_v0 = vadd.f32 8.0, %v2525_v25 }
 0x2f0   :  { %v2550_v53 = vadd.f32 8.0, %v2526_v13  ;;  %v2555_v47 = vmul.f32 0.02, %v2543_v18  ;;  %v2556_v44 = vmul.f32 0.02, %v2544_v15 }
 0x2f1   :  { %v2551_v37 = vsel %vm2527_vm8, %v2547_v6, %v2523_v10  ;;  %v2552_v34 = vsel %vm2528_vm9, %v2548_v4, %v2524_v59  ;;  %v2553_v24 = vsel %vm2529_vm10, %v2549_v0, %v2525_v25  ;;  %v2557_v54 = vmul.f32 0.02, %v2545_v12 }
 0x2f2   :  { %v2554_v26 = vsel %vm2530_vm11, %v2550_v53, %v2526_v13  ;;  %v2558_v27 = vmul.f32 0.02, %v2546_v9  ;;  %v2559_v51 = vadd.f32 3.5, %v2555_v47  ;;  %v2560_v29 = vadd.f32 3.5, %v2556_v44 }
 0x2f3   :  { %v2561_v30 = vadd.f32 3.5, %v2557_v54  ;;  %v2567_v50 = vmul.f32 -0.5, %v2551_v37  ;;  %v2568_v32 = vmul.f32 -0.5, %v2552_v34  ;;  %v2569_v33 = vmul.f32 -0.5, %v2553_v24 }
 0x2f4   :  { %v2562_v49 = vadd.f32 3.5, %v2558_v27  ;;  %v2563_v35 = vmul.f32 %v2559_v51, %v2543_v18  ;;  %v2564_v36 = vmul.f32 %v2560_v29, %v2544_v15  ;;  %v2570_v63 = vmul.f32 -0.5, %v2554_v26 }
 0x2f5   :  { %v2565_v40 = vmul.f32 %v2561_v30, %v2545_v12  ;;  %v2571_v41 = vadd.f32 %v2567_v50, %v3757_v19  ;;  %v2572_v2 = vadd.f32 %v2568_v32, %v3759_v20  ;;  %v2573_v45 = vadd.f32 %v2569_v33, %v3763_v38 }
 0x2f6   :  { %v2566_v46 = vmul.f32 %v2562_v49, %v2546_v9  ;;  %v2574_v3 = vadd.f32 %v2570_v63, %v3765_v39  ;;  %v2579_v56 = vmul.f32 0.99, %v2551_v37  ;;  %v2580_v11 = vmul.f32 0.99, %v2552_v34 }
 0x2f7   :  { %v2575_v48 = vadd.f32 %v2571_v41, %v2563_v35  ;;  %v2576_v43 = vadd.f32 %v2572_v2, %v2564_v36  ;;  %v2577_v8 = vadd.f32 %v2573_v45, %v2565_v40  ;;  %v2581_v1 = vmul.f32 0.99, %v2553_v24 }
 0x2f8   :  { %v2578_v42 = vadd.f32 %v2574_v3, %v2566_v46  ;;  %v2582_v62 = vmul.f32 0.99, %v2554_v26 }
 0x2f9   :  { %v2583_v14 = vmul.f32 0.002, %v2575_v48  ;;  %v2584_v5 = vmul.f32 0.002, %v2576_v43  ;;  %v2585_v61 = vmul.f32 0.002, %v2577_v8 }
 0x2fa   :  { %v2586_v17 = vmul.f32 0.002, %v2578_v42  ;;  %vm2591_vm12 = vcmp.gt.f32.partialorder %v2575_v48, 30.0  ;;  %vm2592_vm13 = vcmp.gt.f32.partialorder %v2576_v43, 30.0  ;;  %vm2593_vm14 = vcmp.gt.f32.partialorder %v2577_v8, 30.0 }
 0x2fb   :  { %v2587_v7 = vadd.f32 %v2583_v14, %v2579_v56  ;;  %v2588_v60 = vadd.f32 %v2584_v5, %v2580_v11  ;;  %v2589_v22 = vadd.f32 %v2585_v61, %v2581_v1  ;;  %vm2594_vm15 = vcmp.gt.f32.partialorder %v2578_v42, 30.0 }
 0x2fc   :  { %v2590_v10 = vadd.f32 %v2586_v17, %v2582_v62  ;;  %v3497_v59 = vsel %vm2591_vm12, 1.0, %v3703_v52  ;;  %v3498_v25 = vsel %vm2592_vm13, 1.0, %v3703_v52  ;;  %v3499_v13 = vsel %vm2593_vm14, 1.0, %v3703_v52 }
 0x2fd   :  { %v3500_v58 = vsel %vm2594_vm15, 1.0, %v3703_v52  ;;  %v2603_v28 = vadd.f32 %v3497_v59, %v2539_v31  ;;  %v2604_v16 = vadd.f32 %v3498_v25, %v2540_v21  ;;  %v2605_v57 = vadd.f32 %v3499_v13, %v2541_v55 }
 0x2fe   :  { %v2606_v18 = vadd.f32 %v3500_v58, %v2542_v23  ;;  %v2607_v15 = vsel %vm2591_vm12, -65.0, %v2575_v48  ;;  %v2608_v12 = vsel %vm2592_vm13, -65.0, %v2576_v43  ;;  %v2609_v9 = vsel %vm2593_vm14, -65.0, %v2577_v8 }
 0x2ff   :  { %v2610_v6 = vsel %vm2594_vm15, -65.0, %v2578_v42  ;;  %v2611_v4 = vadd.f32 8.0, %v2587_v7  ;;  %v2612_v0 = vadd.f32 8.0, %v2588_v60  ;;  %v2613_v53 = vadd.f32 8.0, %v2589_v22 }
 0x300   :  { %v2614_v47 = vadd.f32 8.0, %v2590_v10  ;;  %v2619_v44 = vmul.f32 0.02, %v2607_v15  ;;  %v2620_v37 = vmul.f32 0.02, %v2608_v12 }
 0x301   :  { %v2615_v34 = vsel %vm2591_vm12, %v2611_v4, %v2587_v7  ;;  %v2616_v31 = vsel %vm2592_vm13, %v2612_v0, %v2588_v60  ;;  %v2617_v21 = vsel %vm2593_vm14, %v2613_v53, %v2589_v22  ;;  %v2621_v55 = vmul.f32 0.02, %v2609_v9 }
 0x302   :  { %v2618_v23 = vsel %vm2594_vm15, %v2614_v47, %v2590_v10  ;;  %v2622_v24 = vmul.f32 0.02, %v2610_v6  ;;  %v2623_v54 = vadd.f32 3.5, %v2619_v44  ;;  %v2624_v26 = vadd.f32 3.5, %v2620_v37 }
 0x303   :  { %v2625_v27 = vadd.f32 3.5, %v2621_v55  ;;  %v2631_v51 = vmul.f32 -0.5, %v2615_v34  ;;  %v2632_v29 = vmul.f32 -0.5, %v2616_v31  ;;  %v2633_v30 = vmul.f32 -0.5, %v2617_v21 }
 0x304   :  { %v2626_v50 = vadd.f32 3.5, %v2622_v24  ;;  %v2627_v32 = vmul.f32 %v2623_v54, %v2607_v15  ;;  %v2628_v33 = vmul.f32 %v2624_v26, %v2608_v12  ;;  %v2634_v49 = vmul.f32 -0.5, %v2618_v23 }
 0x305   :  { %v2629_v35 = vmul.f32 %v2625_v27, %v2609_v9  ;;  %v2635_v36 = vadd.f32 %v2631_v51, %v3757_v19  ;;  %v2636_v63 = vadd.f32 %v2632_v29, %v3759_v20  ;;  %v2637_v40 = vadd.f32 %v2633_v30, %v3763_v38 }
 0x306   :  { %v2630_v41 = vmul.f32 %v2626_v50, %v2610_v6  ;;  %v2638_v2 = vadd.f32 %v2634_v49, %v3765_v39  ;;  %v2643_v48 = vmul.f32 0.99, %v2615_v34  ;;  %v2644_v8 = vmul.f32 0.99, %v2616_v31 }
 0x307   :  { %v2639_v45 = vadd.f32 %v2635_v36, %v2627_v32  ;;  %v2640_v46 = vadd.f32 %v2636_v63, %v2628_v33  ;;  %v2641_v3 = vadd.f32 %v2637_v40, %v2629_v35  ;;  %v2645_v56 = vmul.f32 0.99, %v2617_v21 }
 0x308   :  { %v2642_v43 = vadd.f32 %v2638_v2, %v2630_v41  ;;  %v2646_v42 = vmul.f32 0.99, %v2618_v23 }
 0x309   :  { %v2647_v11 = vmul.f32 0.002, %v2639_v45  ;;  %v2648_v1 = vmul.f32 0.002, %v2640_v46  ;;  %v2649_v62 = vmul.f32 0.002, %v2641_v3 }
 0x30a   :  { %v2650_v14 = vmul.f32 0.002, %v2642_v43  ;;  %vm2655_vm0 = vcmp.gt.f32.partialorder %v2639_v45, 30.0  ;;  %vm2656_vm1 = vcmp.gt.f32.partialorder %v2640_v46, 30.0  ;;  %vm2657_vm2 = vcmp.gt.f32.partialorder %v2641_v3, 30.0 }
 0x30b   :  { %v2651_v5 = vadd.f32 %v2647_v11, %v2643_v48  ;;  %v2652_v61 = vadd.f32 %v2648_v1, %v2644_v8  ;;  %v2653_v17 = vadd.f32 %v2649_v62, %v2645_v56  ;;  %vm2658_vm3 = vcmp.gt.f32.partialorder %v2642_v43, 30.0 }
 0x30c   :  { %v2654_v7 = vadd.f32 %v2650_v14, %v2646_v42  ;;  %v3501_v60 = vsel %vm2655_vm0, 1.0, %v3703_v52  ;;  %v3502_v22 = vsel %vm2656_vm1, 1.0, %v3703_v52  ;;  %v3503_v10 = vsel %vm2657_vm2, 1.0, %v3703_v52 }
 0x30d   :  { %v3504_v59 = vsel %vm2658_vm3, 1.0, %v3703_v52  ;;  %v2667_v25 = vadd.f32 %v3501_v60, %v2603_v28  ;;  %v2668_v13 = vadd.f32 %v3502_v22, %v2604_v16  ;;  %v2669_v58 = vadd.f32 %v3503_v10, %v2605_v57 }
 0x30e   :  { %v2670_v15 = vadd.f32 %v3504_v59, %v2606_v18  ;;  %v2671_v12 = vsel %vm2655_vm0, -65.0, %v2639_v45  ;;  %v2672_v9 = vsel %vm2656_vm1, -65.0, %v2640_v46  ;;  %v2673_v6 = vsel %vm2657_vm2, -65.0, %v2641_v3 }
 0x30f   :  { %v2674_v4 = vsel %vm2658_vm3, -65.0, %v2642_v43  ;;  %v2675_v0 = vadd.f32 8.0, %v2651_v5  ;;  %v2676_v53 = vadd.f32 8.0, %v2652_v61  ;;  %v2677_v47 = vadd.f32 8.0, %v2653_v17 }
 0x310   :  { %v2678_v44 = vadd.f32 8.0, %v2654_v7  ;;  %v2683_v37 = vmul.f32 0.02, %v2671_v12  ;;  %v2684_v34 = vmul.f32 0.02, %v2672_v9 }
 0x311   :  { %v2679_v31 = vsel %vm2655_vm0, %v2675_v0, %v2651_v5  ;;  %v2680_v28 = vsel %vm2656_vm1, %v2676_v53, %v2652_v61  ;;  %v2681_v16 = vsel %vm2657_vm2, %v2677_v47, %v2653_v17  ;;  %v2685_v57 = vmul.f32 0.02, %v2673_v6 }
 0x312   :  { %v2682_v18 = vsel %vm2658_vm3, %v2678_v44, %v2654_v7  ;;  %v2686_v21 = vmul.f32 0.02, %v2674_v4  ;;  %v2687_v55 = vadd.f32 3.5, %v2683_v37  ;;  %v2688_v23 = vadd.f32 3.5, %v2684_v34 }
 0x313   :  { %v2689_v24 = vadd.f32 3.5, %v2685_v57  ;;  %v2695_v54 = vmul.f32 -0.5, %v2679_v31  ;;  %v2696_v26 = vmul.f32 -0.5, %v2680_v28  ;;  %v2697_v27 = vmul.f32 -0.5, %v2681_v16 }
 0x314   :  { %v2690_v51 = vadd.f32 3.5, %v2686_v21  ;;  %v2691_v29 = vmul.f32 %v2687_v55, %v2671_v12  ;;  %v2692_v30 = vmul.f32 %v2688_v23, %v2672_v9  ;;  %v2698_v50 = vmul.f32 -0.5, %v2682_v18 }
 0x315   :  { %v2693_v32 = vmul.f32 %v2689_v24, %v2673_v6  ;;  %v2699_v33 = vadd.f32 %v2695_v54, %v3757_v19  ;;  %v2700_v49 = vadd.f32 %v2696_v26, %v3759_v20  ;;  %v2701_v35 = vadd.f32 %v2697_v27, %v3763_v38 }
 0x316   :  { %v2694_v36 = vmul.f32 %v2690_v51, %v2674_v4  ;;  %v2702_v63 = vadd.f32 %v2698_v50, %v3765_v39  ;;  %v2707_v45 = vmul.f32 0.99, %v2679_v31  ;;  %v2708_v3 = vmul.f32 0.99, %v2680_v28 }
 0x317   :  { %v2703_v40 = vadd.f32 %v2699_v33, %v2691_v29  ;;  %v2704_v41 = vadd.f32 %v2700_v49, %v2692_v30  ;;  %v2705_v2 = vadd.f32 %v2701_v35, %v2693_v32  ;;  %v2709_v48 = vmul.f32 0.99, %v2681_v16 }
 0x318   :  { %v2706_v46 = vadd.f32 %v2702_v63, %v2694_v36  ;;  %v2710_v43 = vmul.f32 0.99, %v2682_v18 }
 0x319   :  { %v2711_v8 = vmul.f32 0.002, %v2703_v40  ;;  %v2712_v56 = vmul.f32 0.002, %v2704_v41  ;;  %v2713_v42 = vmul.f32 0.002, %v2705_v2 }
 0x31a   :  { %v2714_v11 = vmul.f32 0.002, %v2706_v46  ;;  %vm2719_vm4 = vcmp.gt.f32.partialorder %v2703_v40, 30.0  ;;  %vm2720_vm5 = vcmp.gt.f32.partialorder %v2704_v41, 30.0  ;;  %vm2721_vm6 = vcmp.gt.f32.partialorder %v2705_v2, 30.0 }
 0x31b   :  { %v2715_v1 = vadd.f32 %v2711_v8, %v2707_v45  ;;  %v2716_v62 = vadd.f32 %v2712_v56, %v2708_v3  ;;  %v2717_v14 = vadd.f32 %v2713_v42, %v2709_v48  ;;  %vm2722_vm7 = vcmp.gt.f32.partialorder %v2706_v46, 30.0 }
 0x31c   :  { %v2718_v5 = vadd.f32 %v2714_v11, %v2710_v43  ;;  %v3505_v61 = vsel %vm2719_vm4, 1.0, %v3703_v52  ;;  %v3506_v17 = vsel %vm2720_vm5, 1.0, %v3703_v52  ;;  %v3507_v7 = vsel %vm2721_vm6, 1.0, %v3703_v52 }
 0x31d   :  { %v3508_v60 = vsel %vm2722_vm7, 1.0, %v3703_v52  ;;  %v2731_v22 = vadd.f32 %v3505_v61, %v2667_v25  ;;  %v2732_v10 = vadd.f32 %v3506_v17, %v2668_v13  ;;  %v2733_v59 = vadd.f32 %v3507_v7, %v2669_v58 }
 0x31e   :  { %v2734_v12 = vadd.f32 %v3508_v60, %v2670_v15  ;;  %v2735_v9 = vsel %vm2719_vm4, -65.0, %v2703_v40  ;;  %v2736_v6 = vsel %vm2720_vm5, -65.0, %v2704_v41  ;;  %v2737_v4 = vsel %vm2721_vm6, -65.0, %v2705_v2 }
 0x31f   :  { %v2738_v0 = vsel %vm2722_vm7, -65.0, %v2706_v46  ;;  %v2739_v53 = vadd.f32 8.0, %v2715_v1  ;;  %v2740_v47 = vadd.f32 8.0, %v2716_v62  ;;  %v2741_v44 = vadd.f32 8.0, %v2717_v14 }
 0x320   :  { %v2742_v37 = vadd.f32 8.0, %v2718_v5  ;;  %v2747_v34 = vmul.f32 0.02, %v2735_v9  ;;  %v2748_v31 = vmul.f32 0.02, %v2736_v6 }
 0x321   :  { %v2743_v28 = vsel %vm2719_vm4, %v2739_v53, %v2715_v1  ;;  %v2744_v25 = vsel %vm2720_vm5, %v2740_v47, %v2716_v62  ;;  %v2745_v13 = vsel %vm2721_vm6, %v2741_v44, %v2717_v14  ;;  %v2749_v58 = vmul.f32 0.02, %v2737_v4 }
 0x322   :  { %v2746_v15 = vsel %vm2722_vm7, %v2742_v37, %v2718_v5  ;;  %v2750_v16 = vmul.f32 0.02, %v2738_v0  ;;  %v2751_v57 = vadd.f32 3.5, %v2747_v34  ;;  %v2752_v18 = vadd.f32 3.5, %v2748_v31 }
 0x323   :  { %v2753_v21 = vadd.f32 3.5, %v2749_v58  ;;  %v2759_v55 = vmul.f32 -0.5, %v2743_v28  ;;  %v2760_v23 = vmul.f32 -0.5, %v2744_v25  ;;  %v2761_v24 = vmul.f32 -0.5, %v2745_v13 }
 0x324   :  { %v2754_v54 = vadd.f32 3.5, %v2750_v16  ;;  %v2755_v26 = vmul.f32 %v2751_v57, %v2735_v9  ;;  %v2756_v27 = vmul.f32 %v2752_v18, %v2736_v6  ;;  %v2762_v51 = vmul.f32 -0.5, %v2746_v15 }
 0x325   :  { %v2757_v29 = vmul.f32 %v2753_v21, %v2737_v4  ;;  %v2763_v30 = vadd.f32 %v2759_v55, %v3757_v19  ;;  %v2764_v50 = vadd.f32 %v2760_v23, %v3759_v20  ;;  %v2765_v32 = vadd.f32 %v2761_v24, %v3763_v38 }
 0x326   :  { %v2758_v33 = vmul.f32 %v2754_v54, %v2738_v0  ;;  %v2766_v49 = vadd.f32 %v2762_v51, %v3765_v39  ;;  %v2771_v40 = vmul.f32 0.99, %v2743_v28  ;;  %v2772_v2 = vmul.f32 0.99, %v2744_v25 }
 0x327   :  { %v2767_v35 = vadd.f32 %v2763_v30, %v2755_v26  ;;  %v2768_v36 = vadd.f32 %v2764_v50, %v2756_v27  ;;  %v2769_v63 = vadd.f32 %v2765_v32, %v2757_v29  ;;  %v2773_v45 = vmul.f32 0.99, %v2745_v13 }
 0x328   :  { %v2770_v41 = vadd.f32 %v2766_v49, %v2758_v33  ;;  %v2774_v46 = vmul.f32 0.99, %v2746_v15 }
 0x329   :  { %v2775_v3 = vmul.f32 0.002, %v2767_v35  ;;  %v2776_v48 = vmul.f32 0.002, %v2768_v36  ;;  %v2777_v43 = vmul.f32 0.002, %v2769_v63 }
 0x32a   :  { %v2778_v8 = vmul.f32 0.002, %v2770_v41  ;;  %vm2783_vm8 = vcmp.gt.f32.partialorder %v2767_v35, 30.0  ;;  %vm2784_vm9 = vcmp.gt.f32.partialorder %v2768_v36, 30.0  ;;  %vm2785_vm10 = vcmp.gt.f32.partialorder %v2769_v63, 30.0 }
 0x32b   :  { %v2779_v56 = vadd.f32 %v2775_v3, %v2771_v40  ;;  %v2780_v42 = vadd.f32 %v2776_v48, %v2772_v2  ;;  %v2781_v11 = vadd.f32 %v2777_v43, %v2773_v45  ;;  %vm2786_vm11 = vcmp.gt.f32.partialorder %v2770_v41, 30.0 }
 0x32c   :  { %v2782_v1 = vadd.f32 %v2778_v8, %v2774_v46  ;;  %v3509_v62 = vsel %vm2783_vm8, 1.0, %v3703_v52  ;;  %v3510_v14 = vsel %vm2784_vm9, 1.0, %v3703_v52  ;;  %v3511_v5 = vsel %vm2785_vm10, 1.0, %v3703_v52 }
 0x32d   :  { %v3512_v61 = vsel %vm2786_vm11, 1.0, %v3703_v52  ;;  %v4603_v17 = vadd.f32 %v3509_v62, %v2731_v22  ;;  %v4605_v7 = vadd.f32 %v3510_v14, %v2732_v10  ;;  %v4607_v60 = vadd.f32 %v3511_v5, %v2733_v59 }
 0x32e   :  { %v4609_v9 = vadd.f32 %v3512_v61, %v2734_v12  ;;  %v2799_v6 = vsel %vm2783_vm8, -65.0, %v2767_v35  ;;  %v2800_v4 = vsel %vm2784_vm9, -65.0, %v2768_v36  ;;  %v2801_v0 = vsel %vm2785_vm10, -65.0, %v2769_v63 }
 0x32f   :  { %v2802_v53 = vsel %vm2786_vm11, -65.0, %v2770_v41  ;;  %v2803_v47 = vadd.f32 8.0, %v2779_v56  ;;  %v2804_v44 = vadd.f32 8.0, %v2780_v42  ;;  %v2805_v37 = vadd.f32 8.0, %v2781_v11 }
 0x330   :  { %v2806_v34 = vadd.f32 8.0, %v2782_v1  ;;  %v2811_v22 = vmul.f32 0.02, %v2799_v6  ;;  %v2812_v31 = vmul.f32 0.02, %v2800_v4 }
 0x331   :  { %v2807_v10 = vsel %vm2783_vm8, %v2803_v47, %v2779_v56  ;;  %v2808_v59 = vsel %vm2784_vm9, %v2804_v44, %v2780_v42  ;;  %v2809_v12 = vsel %vm2785_vm10, %v2805_v37, %v2781_v11  ;;  %v2813_v28 = vmul.f32 0.02, %v2801_v0 }
 0x332   :  { %v2810_v25 = vsel %vm2786_vm11, %v2806_v34, %v2782_v1  ;;  %v2814_v13 = vmul.f32 0.02, %v2802_v53  ;;  %v2815_v58 = vadd.f32 3.5, %v2811_v22  ;;  %v2816_v15 = vadd.f32 3.5, %v2812_v31 }
 0x333   :  { %v2817_v16 = vadd.f32 3.5, %v2813_v28  ;;  %v2823_v57 = vmul.f32 -0.5, %v2807_v10  ;;  %v2824_v18 = vmul.f32 -0.5, %v2808_v59  ;;  %v2825_v21 = vmul.f32 -0.5, %v2809_v12 }
 0x334   :  { %v2818_v55 = vadd.f32 3.5, %v2814_v13  ;;  %v2819_v23 = vmul.f32 %v2815_v58, %v2799_v6  ;;  %v2820_v24 = vmul.f32 %v2816_v15, %v2800_v4  ;;  %v2826_v54 = vmul.f32 -0.5, %v2810_v25 }
 0x335   :  { %v2821_v26 = vmul.f32 %v2817_v16, %v2801_v0  ;;  %v2827_v27 = vadd.f32 %v2823_v57, %v3757_v19  ;;  %v2828_v51 = vadd.f32 %v2824_v18, %v3759_v20  ;;  %v2829_v29 = vadd.f32 %v2825_v21, %v3763_v38 }
 0x336   :  { %v2822_v30 = vmul.f32 %v2818_v55, %v2802_v53  ;;  %v2830_v50 = vadd.f32 %v2826_v54, %v3765_v39  ;;  %v2835_v35 = vmul.f32 0.99, %v2807_v10  ;;  %v2836_v63 = vmul.f32 0.99, %v2808_v59 }
 0x337   :  { %v2831_v32 = vadd.f32 %v2827_v27, %v2819_v23  ;;  %v2832_v33 = vadd.f32 %v2828_v51, %v2820_v24  ;;  %v2833_v49 = vadd.f32 %v2829_v29, %v2821_v26  ;;  %v2837_v40 = vmul.f32 0.99, %v2809_v12 }
 0x338   :  { %v2834_v36 = vadd.f32 %v2830_v50, %v2822_v30  ;;  %v2838_v41 = vmul.f32 0.99, %v2810_v25 }
 0x339   :  { %v2839_v2 = vmul.f32 0.002, %v2831_v32  ;;  %v2840_v45 = vmul.f32 0.002, %v2832_v33  ;;  %v2841_v46 = vmul.f32 0.002, %v2833_v49 }
 0x33a   :  { %v2842_v3 = vmul.f32 0.002, %v2834_v36  ;;  %vm2847_vm12 = vcmp.gt.f32.partialorder %v2831_v32, 30.0  ;;  %vm2848_vm13 = vcmp.gt.f32.partialorder %v2832_v33, 30.0  ;;  %vm2849_vm14 = vcmp.gt.f32.partialorder %v2833_v49, 30.0 }
 0x33b   :  { %v2843_v48 = vadd.f32 %v2839_v2, %v2835_v35  ;;  %v2844_v43 = vadd.f32 %v2840_v45, %v2836_v63  ;;  %v2845_v8 = vadd.f32 %v2841_v46, %v2837_v40  ;;  %vm2850_vm15 = vcmp.gt.f32.partialorder %v2834_v36, 30.0 }
 0x33c   :  { %v2846_v56 = vadd.f32 %v2842_v3, %v2838_v41  ;;  %v3513_v42 = vsel %vm2847_vm12, 1.0, %v3703_v52  ;;  %v3514_v11 = vsel %vm2848_vm13, 1.0, %v3703_v52  ;;  %v3515_v1 = vsel %vm2849_vm14, 1.0, %v3703_v52 }
 0x33d   :  { %v3516_v62 = vsel %vm2850_vm15, 1.0, %v3703_v52  ;;  %v4638_v14 = vadd.f32 %v3513_v42, %v4603_v17  ;;  %v4641_v5 = vadd.f32 %v3514_v11, %v4605_v7  ;;  %v4644_v61 = vadd.f32 %v3515_v1, %v4607_v60 }
 0x33e   :  { %v4647_v6 = vadd.f32 %v3516_v62, %v4609_v9  ;;  %v2863_v4 = vsel %vm2847_vm12, -65.0, %v2831_v32  ;;  %v2864_v0 = vsel %vm2848_vm13, -65.0, %v2832_v33  ;;  %v2865_v53 = vsel %vm2849_vm14, -65.0, %v2833_v49 }
 0x33f   :  { %v2866_v47 = vsel %vm2850_vm15, -65.0, %v2834_v36  ;;  %v2867_v44 = vadd.f32 8.0, %v2843_v48  ;;  %v2868_v17 = vadd.f32 8.0, %v2844_v43  ;;  %v2869_v37 = vadd.f32 8.0, %v2845_v8 }
 0x340   :  { %v2870_v34 = vadd.f32 8.0, %v2846_v56  ;;  %v2875_v7 = vmul.f32 0.02, %v2863_v4  ;;  %v2876_v22 = vmul.f32 0.02, %v2864_v0 }
 0x341   :  { %v2871_v60 = vsel %vm2847_vm12, %v2867_v44, %v2843_v48  ;;  %v2872_v31 = vsel %vm2848_vm13, %v2868_v17, %v2844_v43  ;;  %v2873_v9 = vsel %vm2849_vm14, %v2869_v37, %v2845_v8  ;;  %v2877_v10 = vmul.f32 0.02, %v2865_v53 }
 0x342   :  { %v2874_v59 = vsel %vm2850_vm15, %v2870_v34, %v2846_v56  ;;  %v2878_v12 = vmul.f32 0.02, %v2866_v47  ;;  %v2879_v28 = vadd.f32 3.5, %v2875_v7  ;;  %v2880_v25 = vadd.f32 3.5, %v2876_v22 }
 0x343   :  { %v2881_v13 = vadd.f32 3.5, %v2877_v10  ;;  %v2887_v58 = vmul.f32 -0.5, %v2871_v60  ;;  %v2888_v15 = vmul.f32 -0.5, %v2872_v31  ;;  %v2889_v16 = vmul.f32 -0.5, %v2873_v9 }
 0x344   :  { %v2882_v57 = vadd.f32 3.5, %v2878_v12  ;;  %v2883_v18 = vmul.f32 %v2879_v28, %v2863_v4  ;;  %v2884_v21 = vmul.f32 %v2880_v25, %v2864_v0  ;;  %v2890_v55 = vmul.f32 -0.5, %v2874_v59 }
 0x345   :  { %v2885_v23 = vmul.f32 %v2881_v13, %v2865_v53  ;;  %v2891_v24 = vadd.f32 %v2887_v58, %v3757_v19  ;;  %v2892_v54 = vadd.f32 %v2888_v15, %v3759_v20  ;;  %v2893_v26 = vadd.f32 %v2889_v16, %v3763_v38 }
 0x346   :  { %v2886_v27 = vmul.f32 %v2882_v57, %v2866_v47  ;;  %v2894_v51 = vadd.f32 %v2890_v55, %v3765_v39  ;;  %v2899_v33 = vmul.f32 0.99, %v2871_v60  ;;  %v2900_v49 = vmul.f32 0.99, %v2872_v31 }
 0x347   :  { %v4661_v29 = vadd.f32 %v2891_v24, %v2883_v18  ;;  %v4663_v30 = vadd.f32 %v2892_v54, %v2884_v21  ;;  %v4665_v50 = vadd.f32 %v2893_v26, %v2885_v23  ;;  %v2901_v35 = vmul.f32 0.99, %v2873_v9 }
 0x348   :  { %v4667_v32 = vadd.f32 %v2894_v51, %v2886_v27  ;;  %v2902_v41 = vmul.f32 0.99, %v2874_v59 }
 0x349   :  { %v2903_v36 = vmul.f32 0.002, %v4661_v29  ;;  %v2904_v63 = vmul.f32 0.002, %v4663_v30  ;;  %v2905_v40 = vmul.f32 0.002, %v4665_v50 }
 0x34a   :  { %v2906_v2 = vmul.f32 0.002, %v4667_v32  ;;  %vm2911_vm0 = vcmp.gt.f32.partialorder %v4661_v29, 30.0  ;;  %vm2912_vm1 = vcmp.gt.f32.partialorder %v4663_v30, 30.0  ;;  %vm2913_vm2 = vcmp.gt.f32.partialorder %v4665_v50, 30.0 }
 0x34b   :  { %v2907_v45 = vadd.f32 %v2903_v36, %v2899_v33  ;;  %v2908_v46 = vadd.f32 %v2904_v63, %v2900_v49  ;;  %v2909_v3 = vadd.f32 %v2905_v40, %v2901_v35  ;;  %vm2914_vm3 = vcmp.gt.f32.partialorder %v4667_v32, 30.0 }
 0x34c   :  { %v2910_v48 = vadd.f32 %v2906_v2, %v2902_v41  ;;  %v2927_v43 = vsel %vm2911_vm0, -65.0, %v4661_v29  ;;  %v2928_v8 = vsel %vm2912_vm1, -65.0, %v4663_v30  ;;  %v2929_v56 = vsel %vm2913_vm2, -65.0, %v4665_v50 }
 0x34d   :  { %v2930_v42 = vsel %vm2914_vm3, -65.0, %v4667_v32  ;;  %v2931_v11 = vadd.f32 8.0, %v2907_v45  ;;  %v2932_v1 = vadd.f32 8.0, %v2908_v46  ;;  %v2933_v62 = vadd.f32 8.0, %v2909_v3 }
 0x34e   :  { %v2934_v4 = vadd.f32 8.0, %v2910_v48  ;;  %v2939_v0 = vmul.f32 0.02, %v2927_v43  ;;  %v2940_v53 = vmul.f32 0.02, %v2928_v8 }
 0x34f   :  { %v2935_v47 = vsel %vm2911_vm0, %v2931_v11, %v2907_v45  ;;  %v2936_v44 = vsel %vm2912_vm1, %v2932_v1, %v2908_v46  ;;  %v2937_v17 = vsel %vm2913_vm2, %v2933_v62, %v2909_v3  ;;  %v2941_v37 = vmul.f32 0.02, %v2929_v56 }
 0x350   :  { %v2938_v34 = vsel %vm2914_vm3, %v2934_v4, %v2910_v48  ;;  %v2942_v7 = vmul.f32 0.02, %v2930_v42  ;;  %v2943_v22 = vadd.f32 3.5, %v2939_v0  ;;  %v2944_v60 = vadd.f32 3.5, %v2940_v53 }
 0x351   :  { %v2945_v31 = vadd.f32 3.5, %v2941_v37  ;;  %v2951_v9 = vmul.f32 -0.5, %v2935_v47  ;;  %v2952_v10 = vmul.f32 -0.5, %v2936_v44  ;;  %v2953_v59 = vmul.f32 -0.5, %v2937_v17 }
 0x352   :  { %v2946_v12 = vadd.f32 3.5, %v2942_v7  ;;  %v2947_v28 = vmul.f32 %v2943_v22, %v2927_v43  ;;  %v2948_v25 = vmul.f32 %v2944_v60, %v2928_v8  ;;  %v2954_v13 = vmul.f32 -0.5, %v2938_v34 }
 0x353   :  { %v2949_v58 = vmul.f32 %v2945_v31, %v2929_v56  ;;  %v2955_v15 = vadd.f32 %v2951_v9, %v3757_v19  ;;  %v2956_v16 = vadd.f32 %v2952_v10, %v3759_v20  ;;  %v2957_v57 = vadd.f32 %v2953_v59, %v3763_v38 }
 0x354   :  { %v2950_v18 = vmul.f32 %v2946_v12, %v2930_v42  ;;  %v2958_v21 = vadd.f32 %v2954_v13, %v3765_v39  ;;  %v2963_v26 = vmul.f32 0.99, %v2935_v47  ;;  %v2964_v27 = vmul.f32 0.99, %v2936_v44 }
 0x355   :  { %v4701_v55 = vadd.f32 %v2955_v15, %v2947_v28  ;;  %v4703_v23 = vadd.f32 %v2956_v16, %v2948_v25  ;;  %v4705_v24 = vadd.f32 %v2957_v57, %v2949_v58  ;;  %v2965_v51 = vmul.f32 0.99, %v2937_v17 }
 0x356   :  { %v4707_v54 = vadd.f32 %v2958_v21, %v2950_v18  ;;  %v2966_v36 = vmul.f32 0.99, %v2938_v34  ;;  %v3517_v15 = vsel %vm2911_vm0, 1.0, %v3703_v52  ;;  %v3518_v18 = vsel %vm2912_vm1, 1.0, %v3703_v52 }
 0x357   :  { %v2967_v33 = vmul.f32 0.002, %v4701_v55  ;;  %v2968_v49 = vmul.f32 0.002, %v4703_v23  ;;  %v2969_v35 = vmul.f32 0.002, %v4705_v24 }
 0x358   :  { %v2970_v63 = vmul.f32 0.002, %v4707_v54  ;;  %vm2975_vm4 = vcmp.gt.f32.partialorder %v4701_v55, 30.0  ;;  %vm2976_vm5 = vcmp.gt.f32.partialorder %v4703_v23, 30.0  ;;  %vm2977_vm6 = vcmp.gt.f32.partialorder %v4705_v24, 30.0 }
 0x359   :  { %v2971_v40 = vadd.f32 %v2967_v33, %v2963_v26  ;;  %v2972_v41 = vadd.f32 %v2968_v49, %v2964_v27  ;;  %v2973_v2 = vadd.f32 %v2969_v35, %v2965_v51  ;;  %vm2978_vm7 = vcmp.gt.f32.partialorder %v4707_v54, 30.0 }
 0x35a   :  { %v2974_v45 = vadd.f32 %v2970_v63, %v2966_v36  ;;  %v2991_v46 = vsel %vm2975_vm4, -65.0, %v4701_v55  ;;  %v2992_v3 = vsel %vm2976_vm5, -65.0, %v4703_v23  ;;  %v2993_v48 = vsel %vm2977_vm6, -65.0, %v4705_v24 }
 0x35b   :  { %v2994_v43 = vsel %vm2978_vm7, -65.0, %v4707_v54  ;;  %v2995_v8 = vadd.f32 8.0, %v2971_v40  ;;  %v2996_v56 = vadd.f32 8.0, %v2972_v41  ;;  %v2997_v42 = vadd.f32 8.0, %v2973_v2 }
 0x35c   :  { %v2998_v11 = vadd.f32 8.0, %v2974_v45  ;;  %v3003_v1 = vmul.f32 0.02, %v2991_v46  ;;  %v3004_v62 = vmul.f32 0.02, %v2992_v3 }
 0x35d   :  { %v2999_v4 = vsel %vm2975_vm4, %v2995_v8, %v2971_v40  ;;  %v3000_v0 = vsel %vm2976_vm5, %v2996_v56, %v2972_v41  ;;  %v3001_v53 = vsel %vm2977_vm6, %v2997_v42, %v2973_v2  ;;  %v3005_v47 = vmul.f32 0.02, %v2993_v48 }
 0x35e   :  { %v3002_v44 = vsel %vm2978_vm7, %v2998_v11, %v2974_v45  ;;  %v3006_v17 = vmul.f32 0.02, %v2994_v43  ;;  %v3007_v37 = vadd.f32 3.5, %v3003_v1  ;;  %v3008_v34 = vadd.f32 3.5, %v3004_v62 }
 0x35f   :  { %v3009_v7 = vadd.f32 3.5, %v3005_v47  ;;  %v3015_v22 = vmul.f32 -0.5, %v2999_v4  ;;  %v3016_v60 = vmul.f32 -0.5, %v3000_v0  ;;  %v3017_v31 = vmul.f32 -0.5, %v3001_v53 }
 0x360   :  { %v3010_v9 = vadd.f32 3.5, %v3006_v17  ;;  %v3011_v10 = vmul.f32 %v3007_v37, %v2991_v46  ;;  %v3012_v59 = vmul.f32 %v3008_v34, %v2992_v3  ;;  %v3018_v12 = vmul.f32 -0.5, %v3002_v44 }
 0x361   :  { %v3013_v28 = vmul.f32 %v3009_v7, %v2993_v48  ;;  %v3019_v25 = vadd.f32 %v3015_v22, %v3757_v19  ;;  %v3020_v13 = vadd.f32 %v3016_v60, %v3759_v20  ;;  %v3021_v58 = vadd.f32 %v3017_v31, %v3763_v38 }
 0x362   :  { %v3014_v16 = vmul.f32 %v3010_v9, %v2994_v43  ;;  %v3022_v57 = vadd.f32 %v3018_v12, %v3765_v39  ;;  %v3027_v33 = vmul.f32 0.99, %v2999_v4  ;;  %v3028_v49 = vmul.f32 0.99, %v3000_v0 }
 0x363   :  { %v4747_v21 = vadd.f32 %v3019_v25, %v3011_v10  ;;  %v4749_v26 = vadd.f32 %v3020_v13, %v3012_v59  ;;  %v4751_v27 = vadd.f32 %v3021_v58, %v3013_v28  ;;  %v3029_v35 = vmul.f32 0.99, %v3001_v53 }
 0x364   :  { %v4753_v51 = vadd.f32 %v3022_v57, %v3014_v16  ;;  %v3030_v40 = vmul.f32 0.99, %v3002_v44  ;;  %v3519_v3 = vsel %vm2913_vm2, 1.0, %v3703_v52  ;;  %v3520_v48 = vsel %vm2914_vm3, 1.0, %v3703_v52 }
 0x365   :  { %v3031_v29 = vmul.f32 0.002, %v4747_v21  ;;  %v3032_v36 = vmul.f32 0.002, %v4749_v26  ;;  %v3033_v63 = vmul.f32 0.002, %v4751_v27  ;;  %v2923_v43 = vadd.f32 %v3517_v15, %v4638_v14 }
 0x366   :  { %v3034_v30 = vmul.f32 0.002, %v4753_v51  ;;  %vm3039_vm8 = vcmp.gt.f32.partialorder %v4747_v21, 30.0  ;;  %vm3040_vm9 = vcmp.gt.f32.partialorder %v4749_v26, 30.0  ;;  %vm3041_vm10 = vcmp.gt.f32.partialorder %v4751_v27, 30.0 }
 0x367   :  { %v3035_v41 = vadd.f32 %v3031_v29, %v3027_v33  ;;  %v3036_v2 = vadd.f32 %v3032_v36, %v3028_v49  ;;  %v3037_v45 = vadd.f32 %v3033_v63, %v3029_v35  ;;  %vm3042_vm11 = vcmp.gt.f32.partialorder %v4753_v51, 30.0 }
 0x368   :  { %v3038_v46 = vadd.f32 %v3034_v30, %v3030_v40  ;;  %v2924_v8 = vadd.f32 %v3518_v18, %v4641_v5  ;;  %v3055_v56 = vsel %vm3039_vm8, -65.0, %v4747_v21  ;;  %v3056_v42 = vsel %vm3040_vm9, -65.0, %v4749_v26 }
 0x369   :  { %v3057_v50 = vsel %vm3041_vm10, -65.0, %v4751_v27  ;;  %v3058_v32 = vsel %vm3042_vm11, -65.0, %v4753_v51  ;;  %v3059_v11 = vadd.f32 8.0, %v3035_v41  ;;  %v3060_v14 = vadd.f32 8.0, %v3036_v2 }
 0x36a   :  { %v3061_v1 = vadd.f32 8.0, %v3037_v45  ;;  %v3521_v5 = vsel %vm2975_vm4, 1.0, %v3703_v52  ;;  %v3062_v62 = vadd.f32 8.0, %v3038_v46  ;;  %v3067_v4 = vmul.f32 0.02, %v3055_v56 }
 0x36b   :  { %v3068_v0 = vmul.f32 0.02, %v3056_v42  ;;  %v3063_v53 = vsel %vm3039_vm8, %v3059_v11, %v3035_v41  ;;  %v3064_v47 = vsel %vm3040_vm9, %v3060_v14, %v3036_v2  ;;  %v3069_v17 = vmul.f32 0.02, %v3057_v50 }
 0x36c   :  { %v3065_v44 = vsel %vm3041_vm10, %v3061_v1, %v3037_v45  ;;  %v3066_v37 = vsel %vm3042_vm11, %v3062_v62, %v3038_v46  ;;  %v3070_v34 = vmul.f32 0.02, %v3058_v32  ;;  %v3071_v7 = vadd.f32 3.5, %v3067_v4 }
 0x36d   :  { %v3072_v55 = vadd.f32 3.5, %v3068_v0  ;;  %v3073_v22 = vadd.f32 3.5, %v3069_v17  ;;  %v3079_v60 = vmul.f32 -0.5, %v3063_v53  ;;  %v3080_v31 = vmul.f32 -0.5, %v3064_v47 }
 0x36e   :  { %v3081_v9 = vmul.f32 -0.5, %v3065_v44  ;;  %v3074_v10 = vadd.f32 3.5, %v3070_v34  ;;  %v3075_v59 = vmul.f32 %v3071_v7, %v3055_v56  ;;  %v3082_v28 = vmul.f32 -0.5, %v3066_v37 }
 0x36f   :  { %v3076_v12 = vmul.f32 %v3072_v55, %v3056_v42  ;;  %v3077_v25 = vmul.f32 %v3073_v22, %v3057_v50  ;;  %v3083_v13 = vadd.f32 %v3079_v60, %v3757_v19  ;;  %v3084_v58 = vadd.f32 %v3080_v31, %v3759_v20 }
 0x370   :  { %v3085_v15 = vadd.f32 %v3081_v9, %v3763_v38  ;;  %v3522_v16 = vsel %vm2976_vm5, 1.0, %v3703_v52  ;;  %v3523_v57 = vsel %vm2977_vm6, 1.0, %v3703_v52  ;;  %v3078_v18 = vmul.f32 %v3074_v10, %v3058_v32 }
 0x371   :  { %v3086_v33 = vadd.f32 %v3082_v28, %v3765_v39  ;;  %v3524_v49 = vsel %vm2978_vm7, 1.0, %v3703_v52  ;;  %v4807_v35 = vadd.f32 %v3083_v13, %v3075_v59  ;;  %v4809_v29 = vadd.f32 %v3084_v58, %v3076_v12 }
 0x372   :  { %v4811_v36 = vadd.f32 %v3085_v15, %v3077_v25  ;;  %v3091_v23 = vmul.f32 0.99, %v3063_v53  ;;  %v3092_v40 = vmul.f32 0.99, %v3064_v47  ;;  %v3093_v30 = vmul.f32 0.99, %v3065_v44 }
 0x373   :  { %v4813_v63 = vadd.f32 %v3086_v33, %v3078_v18  ;;  %v2925_v24 = vadd.f32 %v3519_v3, %v4644_v61  ;;  %v3095_v41 = vmul.f32 0.002, %v4807_v35  ;;  %v3096_v2 = vmul.f32 0.002, %v4809_v29 }
 0x374   :  { %v3097_v54 = vmul.f32 0.002, %v4811_v36  ;;  %v3094_v45 = vmul.f32 0.99, %v3066_v37  ;;  %vm3103_vm12 = vcmp.gt.f32.partialorder %v4807_v35, 30.0  ;;  %vm3104_vm13 = vcmp.gt.f32.partialorder %v4809_v29, 30.0 }
 0x375   :  { %v3098_v46 = vmul.f32 0.002, %v4813_v63  ;;  %v3099_v56 = vadd.f32 %v3095_v41, %v3091_v23  ;;  %v3100_v42 = vadd.f32 %v3096_v2, %v3092_v40  ;;  %vm3105_vm14 = vcmp.gt.f32.partialorder %v4811_v36, 30.0 }
 0x376   :  { %v3101_v50 = vadd.f32 %v3097_v54, %v3093_v30  ;;  %v2926_v61 = vadd.f32 %v3520_v48, %v4647_v6  ;;  %vm3106_vm15 = vcmp.gt.f32.partialorder %v4813_v63, 30.0  ;;  %v2987_v32 = vadd.f32 %v3521_v5, %v2923_v43 }
 0x377   :  { %v3102_v3 = vadd.f32 %v3098_v46, %v3094_v45  ;;  %v2988_v11 = vadd.f32 %v3522_v16, %v2924_v8  ;;  %v2989_v14 = vadd.f32 %v3523_v57, %v2925_v24  ;;  %v3119_v62 = vsel %vm3103_vm12, -65.0, %v4807_v35 }
 0x378   :  { %v2990_v1 = vadd.f32 %v3524_v49, %v2926_v61  ;;  %v3120_v4 = vsel %vm3104_vm13, -65.0, %v4809_v29  ;;  %v3121_v0 = vsel %vm3105_vm14, -65.0, %v4811_v36  ;;  %v3122_v6 = vsel %vm3106_vm15, -65.0, %v4813_v63 }
 0x379   :  { %v3123_v48 = vadd.f32 8.0, %v3099_v56  ;;  %v3124_v43 = vadd.f32 8.0, %v3100_v42  ;;  %v3125_v8 = vadd.f32 8.0, %v3101_v50  ;;  %v3525_v5 = vsel %vm3039_vm8, 1.0, %v3703_v52 }
 0x37a   :  { %v3126_v53 = vadd.f32 8.0, %v3102_v3  ;;  %v3131_v47 = vmul.f32 0.02, %v3119_v62  ;;  %v3132_v44 = vmul.f32 0.02, %v3120_v4  ;;  %v3526_v18 = vsel %vm3040_vm9, 1.0, %v3703_v52 }
 0x37b   :  { %v3127_v17 = vsel %vm3103_vm12, %v3123_v48, %v3099_v56  ;;  %v3128_v37 = vsel %vm3104_vm13, %v3124_v43, %v3100_v42  ;;  %v3129_v34 = vsel %vm3105_vm14, %v3125_v8, %v3101_v50  ;;  %v3133_v7 = vmul.f32 0.02, %v3121_v0 }
 0x37c   :  { %v3130_v55 = vsel %vm3106_vm15, %v3126_v53, %v3102_v3  ;;  %v3134_v22 = vmul.f32 0.02, %v3122_v6  ;;  %v3135_v60 = vadd.f32 3.5, %v3131_v47  ;;  %v3136_v21 = vadd.f32 3.5, %v3132_v44 }
 0x37d   :  { %v3137_v31 = vadd.f32 3.5, %v3133_v7  ;;  %v3143_v9 = vmul.f32 -0.5, %v3127_v17  ;;  %v3144_v10 = vmul.f32 -0.5, %v3128_v37  ;;  %v3145_v59 = vmul.f32 -0.5, %v3129_v34 }
 0x37e   :  { %v3138_v12 = vadd.f32 3.5, %v3134_v22  ;;  %v3139_v28 = vmul.f32 %v3135_v60, %v3119_v62  ;;  %v3140_v25 = vmul.f32 %v3136_v21, %v3120_v4  ;;  %v3146_v13 = vmul.f32 -0.5, %v3130_v55 }
 0x37f   :  { %v3141_v58 = vmul.f32 %v3137_v31, %v3121_v0  ;;  %v3147_v15 = vadd.f32 %v3143_v9, %v3757_v19  ;;  %v3148_v16 = vadd.f32 %v3144_v10, %v3759_v20  ;;  %v3149_v57 = vadd.f32 %v3145_v59, %v3763_v38 }
 0x380   :  { %v3527_v33 = vsel %vm3041_vm10, 1.0, %v3703_v52  ;;  %v3142_v49 = vmul.f32 %v3138_v12, %v3122_v6  ;;  %v3150_v23 = vadd.f32 %v3146_v13, %v3765_v39  ;;  %v3528_v40 = vsel %vm3042_vm11, 1.0, %v3703_v52 }
 0x381   :  { %v3151_v30 = vadd.f32 %v3147_v15, %v3139_v28  ;;  %v4861_v24 = vadd.f32 %v3148_v16, %v3140_v25  ;;  %v4863_v41 = vadd.f32 %v3149_v57, %v3141_v58  ;;  %v3155_v26 = vmul.f32 0.99, %v3127_v17 }
 0x382   :  { %v4865_v2 = vadd.f32 %v3150_v23, %v3142_v49  ;;  %v3156_v54 = vmul.f32 0.99, %v3128_v37  ;;  %v3157_v45 = vmul.f32 0.99, %v3129_v34  ;;  %v3051_v46 = vadd.f32 %v3525_v5, %v2987_v32 }
 0x383   :  { %v3159_v27 = vmul.f32 0.002, %v3151_v30  ;;  %v3160_v56 = vmul.f32 0.002, %v4861_v24  ;;  %v3161_v42 = vmul.f32 0.002, %v4863_v41  ;;  %v3052_v4 = vadd.f32 %v3526_v18, %v2988_v11 }
 0x384   :  { %v3158_v50 = vmul.f32 0.99, %v3130_v55  ;;  %v3162_v51 = vmul.f32 0.002, %v4865_v2  ;;  %vm3167_vm0 = vcmp.gt.f32.partialorder %v3151_v30, 30.0  ;;  %vm3168_vm1 = vcmp.gt.f32.partialorder %v4861_v24, 30.0 }
 0x385   :  { %v3163_v61 = vadd.f32 %v3159_v27, %v3155_v26  ;;  %v3164_v3 = vadd.f32 %v3160_v56, %v3156_v54  ;;  %v3165_v62 = vadd.f32 %v3161_v42, %v3157_v45  ;;  %vm3169_vm2 = vcmp.gt.f32.partialorder %v4863_v41, 30.0 }
 0x386   :  { %v3053_v0 = vadd.f32 %v3527_v33, %v2989_v14  ;;  %v3166_v6 = vadd.f32 %v3162_v51, %v3158_v50  ;;  %vm3170_vm3 = vcmp.gt.f32.partialorder %v4865_v2, 30.0  ;;  %v3054_v32 = vadd.f32 %v3528_v40, %v2990_v1 }
 0x387   :  { %v3529_v48 = vsel %vm3103_vm12, 1.0, %v3703_v52  ;;  %v3530_v43 = vsel %vm3104_vm13, 1.0, %v3703_v52  ;;  %v3531_v8 = vsel %vm3105_vm14, 1.0, %v3703_v52  ;;  %v3532_v11 = vsel %vm3106_vm15, 1.0, %v3703_v52 }
 0x388   :  { %v3183_v14 = vsel %vm3167_vm0, -65.0, %v3151_v30  ;;  %v3184_v1 = vsel %vm3168_vm1, -65.0, %v4861_v24  ;;  %v3185_v35 = vsel %vm3169_vm2, -65.0, %v4863_v41  ;;  %v3186_v29 = vsel %vm3170_vm3, -65.0, %v4865_v2 }
 0x389   :  { %v3187_v36 = vadd.f32 8.0, %v3163_v61  ;;  %v3188_v5 = vadd.f32 8.0, %v3164_v3  ;;  %v3189_v53 = vadd.f32 8.0, %v3165_v62  ;;  %v3115_v47 = vadd.f32 %v3529_v48, %v3051_v46 }
 0x38a   :  { %v3190_v63 = vadd.f32 8.0, %v3166_v6  ;;  %v3195_v44 = vmul.f32 0.02, %v3183_v14  ;;  %v3196_v17 = vmul.f32 0.02, %v3184_v1  ;;  %v3116_v33 = vadd.f32 %v3530_v43, %v3052_v4 }
 0x38b   :  { %v3191_v37 = vsel %vm3167_vm0, %v3187_v36, %v3163_v61  ;;  %v3192_v34 = vsel %vm3168_vm1, %v3188_v5, %v3164_v3  ;;  %v3193_v7 = vsel %vm3169_vm2, %v3189_v53, %v3165_v62  ;;  %v3197_v55 = vmul.f32 0.02, %v3185_v35 }
 0x38c   :  { %v3194_v22 = vsel %vm3170_vm3, %v3190_v63, %v3166_v6  ;;  %v3198_v60 = vmul.f32 0.02, %v3186_v29  ;;  %v3199_v21 = vadd.f32 3.5, %v3195_v44  ;;  %v3200_v31 = vadd.f32 3.5, %v3196_v17 }
 0x38d   :  { %v3201_v9 = vadd.f32 3.5, %v3197_v55  ;;  %v3207_v10 = vmul.f32 -0.5, %v3191_v37  ;;  %v3208_v59 = vmul.f32 -0.5, %v3192_v34  ;;  %v3209_v12 = vmul.f32 -0.5, %v3193_v7 }
 0x38e   :  { %v3202_v28 = vadd.f32 3.5, %v3198_v60  ;;  %v3203_v25 = vmul.f32 %v3199_v21, %v3183_v14  ;;  %v3204_v13 = vmul.f32 %v3200_v31, %v3184_v1  ;;  %v3210_v58 = vmul.f32 -0.5, %v3194_v22 }
 0x38f   :  { %v3205_v15 = vmul.f32 %v3201_v9, %v3185_v35  ;;  %v3211_v16 = vadd.f32 %v3207_v10, %v3757_v19  ;;  %v3212_v57 = vadd.f32 %v3208_v59, %v3759_v20  ;;  %v3213_v18 = vadd.f32 %v3209_v12, %v3763_v38 }
 0x390   :  { %v3533_v49 = vsel %vm3167_vm0, 1.0, %v3703_v52  ;;  %v3206_v23 = vmul.f32 %v3202_v28, %v3186_v29  ;;  %v3214_v40 = vadd.f32 %v3210_v58, %v3765_v39  ;;  %v3534_v26 = vsel %vm3168_vm1, 1.0, %v3703_v52 }
 0x391   :  { %v3215_v54 = vadd.f32 %v3211_v16, %v3203_v25  ;;  %v3216_v45 = vadd.f32 %v3212_v57, %v3204_v13  ;;  %v3217_v46 = vadd.f32 %v3213_v18, %v3205_v15  ;;  %v3219_v56 = vmul.f32 0.99, %v3191_v37 }
 0x392   :  { %v3218_v27 = vadd.f32 %v3214_v40, %v3206_v23  ;;  %v3220_v42 = vmul.f32 0.99, %v3192_v34  ;;  %v3221_v50 = vmul.f32 0.99, %v3193_v7  ;;  %v3117_v51 = vadd.f32 %v3531_v8, %v3053_v0 }
 0x393   :  { %v3223_v61 = vmul.f32 0.002, %v3215_v54  ;;  %v3224_v3 = vmul.f32 0.002, %v3216_v45  ;;  %v3225_v62 = vmul.f32 0.002, %v3217_v46  ;;  %v3118_v24 = vadd.f32 %v3532_v11, %v3054_v32 }
 0x394   :  { %v3222_v30 = vmul.f32 0.99, %v3194_v22  ;;  %v3226_v4 = vmul.f32 0.002, %v3218_v27  ;;  %vm3231_vm4 = vcmp.gt.f32.partialorder %v3215_v54, 30.0  ;;  %vm3232_vm5 = vcmp.gt.f32.partialorder %v3216_v45, 30.0 }
 0x395   :  { %v3227_v6 = vadd.f32 %v3223_v61, %v3219_v56  ;;  %v3228_v48 = vadd.f32 %v3224_v3, %v3220_v42  ;;  %v3229_v43 = vadd.f32 %v3225_v62, %v3221_v50  ;;  %vm3233_vm6 = vcmp.gt.f32.partialorder %v3217_v46, 30.0 }
 0x396   :  { %v3535_v14 = vsel %vm3169_vm2, 1.0, %v3703_v52  ;;  %v3230_v1 = vadd.f32 %v3226_v4, %v3222_v30  ;;  %vm3234_vm7 = vcmp.gt.f32.partialorder %v3218_v27, 30.0  ;;  %v3536_v0 = vsel %vm3170_vm3, 1.0, %v3703_v52 }
 0x397   :  { %v3179_v8 = vadd.f32 %v3533_v49, %v3115_v47  ;;  %v3180_v35 = vadd.f32 %v3534_v26, %v3116_v33  ;;  %v3537_v29 = vsel %vm3231_vm4, 1.0, %v3703_v52  ;;  %v3538_v36 = vsel %vm3232_vm5, 1.0, %v3703_v52 }
 0x398   :  { %v3247_v32 = vsel %vm3231_vm4, -65.0, %v3215_v54  ;;  %v3248_v11 = vsel %vm3232_vm5, -65.0, %v3216_v45  ;;  %v3249_v41 = vsel %vm3233_vm6, -65.0, %v3217_v46  ;;  %v3250_v5 = vsel %vm3234_vm7, -65.0, %v3218_v27 }
 0x399   :  { %v3251_v53 = vadd.f32 8.0, %v3227_v6  ;;  %v3252_v63 = vadd.f32 8.0, %v3228_v48  ;;  %v3253_v2 = vadd.f32 8.0, %v3229_v43  ;;  %v3539_v47 = vsel %vm3233_vm6, 1.0, %v3703_v52 }
 0x39a   :  { %v3254_v44 = vadd.f32 8.0, %v3230_v1  ;;  %v3259_v17 = vmul.f32 0.02, %v3247_v32  ;;  %v3260_v37 = vmul.f32 0.02, %v3248_v11  ;;  %v3181_v49 = vadd.f32 %v3535_v14, %v3117_v51 }
 0x39b   :  { %v3255_v34 = vsel %vm3231_vm4, %v3251_v53, %v3227_v6  ;;  %v3256_v7 = vsel %vm3232_vm5, %v3252_v63, %v3228_v48  ;;  %v3257_v55 = vsel %vm3233_vm6, %v3253_v2, %v3229_v43  ;;  %v3261_v22 = vmul.f32 0.02, %v3249_v41 }
 0x39c   :  { %v3258_v60 = vsel %vm3234_vm7, %v3254_v44, %v3230_v1  ;;  %v3262_v21 = vmul.f32 0.02, %v3250_v5  ;;  %v3263_v31 = vadd.f32 3.5, %v3259_v17  ;;  %v3264_v9 = vadd.f32 3.5, %v3260_v37 }
 0x39d   :  { %v3265_v10 = vadd.f32 3.5, %v3261_v22  ;;  %v3271_v59 = vmul.f32 -0.5, %v3255_v34  ;;  %v3272_v12 = vmul.f32 -0.5, %v3256_v7  ;;  %v3273_v28 = vmul.f32 -0.5, %v3257_v55 }
 0x39e   :  { %v3266_v25 = vadd.f32 3.5, %v3262_v21  ;;  %v3267_v13 = vmul.f32 %v3263_v31, %v3247_v32  ;;  %v3268_v58 = vmul.f32 %v3264_v9, %v3248_v11  ;;  %v3274_v15 = vmul.f32 -0.5, %v3258_v60 }
 0x39f   :  { %v3269_v16 = vmul.f32 %v3265_v10, %v3249_v41  ;;  %v3275_v57 = vadd.f32 %v3271_v59, %v3757_v19  ;;  %v3276_v18 = vadd.f32 %v3272_v12, %v3759_v20  ;;  %v3277_v33 = vadd.f32 %v3273_v28, %v3763_v38 }
 0x3a0   :  { %v3540_v23 = vsel %vm3234_vm7, 1.0, %v3703_v52  ;;  %v3270_v40 = vmul.f32 %v3266_v25, %v3250_v5  ;;  %v3278_v26 = vadd.f32 %v3274_v15, %v3765_v39  ;;  %v3182_v54 = vadd.f32 %v3536_v0, %v3118_v24 }
 0x3a1   :  { %v3279_v45 = vadd.f32 %v3275_v57, %v3267_v13  ;;  %v3280_v46 = vadd.f32 %v3276_v18, %v3268_v58  ;;  %v3281_v56 = vadd.f32 %v3277_v33, %v3269_v16  ;;  %v3243_v42 = vadd.f32 %v3537_v29, %v3179_v8 }
 0x3a2   :  { %v3244_v50 = vadd.f32 %v3538_v36, %v3180_v35  ;;  %v3245_v61 = vadd.f32 %v3539_v47, %v3181_v49  ;;  %v3282_v3 = vadd.f32 %v3278_v26, %v3270_v40  ;;  %v3246_v19 = vadd.f32 %v3540_v23, %v3182_v54 }
 0x3a3   :  { %vm3283_vm8 = vcmp.gt.f32.partialorder %v3279_v45, 30.0  ;;  %vm3284_vm9 = vcmp.gt.f32.partialorder %v3280_v46, 30.0  ;;  %vm3285_vm10 = vcmp.gt.f32.partialorder %v3281_v56, 30.0 }
 0x3a4   :  { %vm3286_vm11 = vcmp.gt.f32.partialorder %v3282_v3, 30.0  ;;  %v3541_v20 = vsel %vm3283_vm8, 1.0, %v3703_v52  ;;  %v3542_v38 = vsel %vm3284_vm9, 1.0, %v3703_v52  ;;  %v3543_v27 = vsel %vm3285_vm10, 1.0, %v3703_v52 }
 0x3a5   :  { %v3544_v39 = vsel %vm3286_vm11, 1.0, %v3703_v52  ;;  %v3295_v51 = vadd.f32 %v3541_v20, %v3243_v42  ;;  %v3296_v62 = vadd.f32 %v3542_v38, %v3244_v50  ;;  %v3297_v30 = vadd.f32 %v3543_v27, %v3245_v61 }
 0x3a6   :  { %v3298_v4 = vadd.f32 %v3544_v39, %v3246_v19 }
 0x3a7   :  { %v3299_v6 = vmul.f32 0.02, %v3295_v51  ;;  %v3300_v48 = vmul.f32 0.02, %v3296_v62  ;;  %v3301_v43 = vmul.f32 0.02, %v3297_v30 }
 0x3a8   :  { %v3302_v24 = vmul.f32 0.02, %v3298_v4 }
 0x3a9   :  { %3303 = vst [vmem:[#allocation7] sm:$0xff] %v3299_v6 }
 0x3aa   :  { %3304 = vst [vmem:[#allocation7 + $0x8] sm:$0xff] %v3300_v48 }
 0x3ab   :  { %3305 = vst [vmem:[#allocation7 + $0x10] sm:$0xff] %v3301_v43 }
 0x3ac   :  { %3306 = vst [vmem:[#allocation7 + $0x18] sm:$0xff] %v3302_v24 }
 0x3ad   :  { %3319 = dma.vmem_to_hbm [thread:$0]  %s3312_s12, 512, %s3314_s15, [#allocation4], %s3699_s26, %s3699_s26, %s3700_s27  }
 0x3ae   :  { %3694 = dma.done.wait [#allocation4], 512  }
 0x3af   :  { %3695 = vsyncadd [#allocation4], 4294966784 }
 0x3b0   :  { %3696 = dma.done.wait [#allocation9], 512  }
 0x3b1   :  { %3697 = vsyncadd [#allocation9], 4294966784 }
 0x3b2   :  { %3341 = vsyncpa [#allocation3], 1 }
 0x3b3   :  { %3342 = vsyncpa [#allocation6], 1 }
 0x3b4   :  { %3343 = vsyncpa [#allocation4], 1 }
 0x3b5   :  { %3344 = vsyncpa [#allocation9], 1 }

</bundles_post_ra>
